<compile_context>
chip_gen: v6e
topology: v6e:2x2x1
jax: 0.10.0
libtpu: 0.0.40
codegen_flags: <defaults>
</compile_context>

<pallas_src>
import numpy as np
import jax
import jax.numpy as jnp
from jax.experimental import pallas as pl
from jax.experimental.pallas import tpu as pltpu

SECTIONS = (2, 3, 4, 5, 6, 7, 8)             # torch.split(core, section, dim=1)
KERNEL_SIZES = (3, 5, 7, 9, 11, 13, 15)      # final_wide = (wide-1)*2 + 1
FULL_K = KERNEL_SIZES[-1]                    # 15
MAX_PAD = FULL_K // 2                        # 7
TOTAL_CORE_CH = sum(SECTIONS)                # 35
_cs = np.cumsum([0] + list(SECTIONS))
SECTION_OFFSETS = tuple(int(v) for v in _cs[:-1])
_rk = np.cumsum([0] + [k * k for k in KERNEL_SIZES])
ROW_OFFSETS = tuple(int(v) for v in _rk[:-1])
TOTAL_TAPS = int(_rk[-1])                    # 679


def _build_tap_table(wide):
    """Static table replicating _list_core radial interpolation + flipcat mirroring.

    For every (fi, fj) of the full K x K kernel (row-major, matching img_stack order),
    returns None (pre-softmax logit == 0, distance > mid) or (idx_low, idx_high,
    w_low, w_high) s.t.  logit = w_low * |core[idx_low]| + w_high * |core[idx_high]|.
    """
    K = 2 * wide - 1
    mid = np.float32(wide - 1)
    taps = []
    for fi in range(K):
        qi = fi if fi < wide else 2 * (wide - 1) - fi      # flipcat mirror, dim 1
        for fj in range(K):
            qj = fj if fj < wide else 2 * (wide - 1) - fj  # flipcat mirror, dim 2
            d = np.sqrt(np.float32((qi - mid) ** 2 + (qj - mid) ** 2)).astype(np.float32)
            low = np.floor(d).astype(np.float32)
            high = np.ceil(d).astype(np.float32)
            if d > mid:
                taps.append(None)
            elif low == high:
                taps.append((int(low), int(low), 1.0, 0.0))
            else:
                taps.append((int(low), int(low) + 1, float(high - d), float(d - low)))
    return tuple(taps)


TAP_TABLES = tuple(_build_tap_table(w) for w in SECTIONS)


def _build_tap_matrix():
    """Block-diagonal (679, 35) matrix so that  logits = T @ |core|  for all sections."""
    T = np.zeros((TOTAL_TAPS, TOTAL_CORE_CH), np.float32)
    for idx, wide in enumerate(SECTIONS):
        row0 = ROW_OFFSETS[idx]
        ch0 = SECTION_OFFSETS[idx]
        for r, tap in enumerate(TAP_TABLES[idx]):
            if tap is None:
                continue                                   # out-of-radius taps: logit 0
            lo, hi, wl, wh = tap
            T[row0 + r, ch0 + lo] += np.float32(wl)
            T[row0 + r, ch0 + hi] += np.float32(wh)
    return T


TAP_MATRIX = _build_tap_matrix()


def _make_kernel(tile_h, W):
    THW = tile_h * W

    def kernel(t_ref, core_ref, col_ref, pred_ref, *weight_refs):
        # t_ref:    (679, 35)          static tap-coefficient matrix (block diagonal)
        # core_ref: (35, TH*W)         lane-dense core channels for this (batch, H-tile)
        # col_ref:  (15, (TH+14)*W)    15 column-shifted, row-flattened frame slabs
        # pred_ref: (1, TH*W)          prediction for this tile
        # weight_refs[i]: (Ki*Ki, TH*W) softmaxed per-pixel kernels (core_out_list)
        core_abs = jnp.abs(core_ref[...])                  # (35, THW)

        # 4 rotating accumulators -> independent add chains (ILP) instead of 1 long chain.
        accs = [jnp.zeros((1, THW), jnp.float32) for _ in range(4)]
        part = 0

        for idx in range(len(SECTIONS)):
            K = KERNEL_SIZES[idx]
            KK = K * K
            row0 = ROW_OFFSETS[idx]
            wref = weight_refs[idx]                        # (KK, THW)

            # ---- radial-interp logits on the MXU, streamed into the output ref ----
            wref[...] = jnp.dot(t_ref[row0:row0 + KK, :], core_abs,
                                preferred_element_type=jnp.float32)

            # ---- softmax over the K*K taps (torch dim=2), in place, reciprocal-based ----
            m = jnp.max(wref[...], axis=0, keepdims=True)
            wref[...] = jnp.exp(wref[...] - m)
            inv = pl.reciprocal(jnp.sum(wref[...], axis=0, keepdims=True), approx=False)
            wref[...] = wref[...] * inv

            # ---- per-pixel weighted sum of the shifted frames (tree reduction) ----
            off = MAX_PAD - K // 2
            for fi in range(K):
                c0 = (off + fi) * W
                s_blk = col_ref[off:off + K, c0:c0 + THW]  # (K, THW): taps (fi, 0..K-1)
                w_blk = wref[fi * K:(fi + 1) * K, :]       # (K, THW)
                accs[part % 4] = accs[part % 4] + jnp.sum(
                    s_blk * w_blk, axis=0, keepdims=True)
                part += 1

        pred_ref[...] = (accs[0] + accs[1]) + (accs[2] + accs[3])

    return kernel


def _pick_tile_h(H, W, max_tile_pixels=2048):
    """Largest H-tile so TH*W is lane-aligned and the per-tile footprint stays small."""
    if H * W <= max_tile_pixels:
        return H
    for th in range(H - 1, 0, -1):
        if H % th == 0 and th * W <= max_tile_pixels and (th * W) % 128 == 0:
            return th
    return H


def kernel_conv(frames, core, tile_h=None):
    """JAX/Pallas equivalent of KernelConv.forward.

    frames: (B, N, H, W) with N == 1 (color=1 as in the torch module)
    core:   (B, 35, H, W)
    returns (pred_img, core_out_list) matching torch semantics for B > 1, N == 1:
      pred_img: (B, 1, H, W); core_out_list[i]: (B, 1, Ki*Ki, 1, H, W)
    """
    B, N, H, W = frames.shape
    assert N == 1, "this implementation covers the N == 1 (single-frame) case"
    assert core.shape == (B, TOTAL_CORE_CH, H, W)

    if tile_h is None:
        tile_h = _pick_tile_h(H, W)
    assert H % tile_h == 0, "tile_h must divide H"
    assert tile_h == H or (tile_h * W) % 128 == 0, "tiles must flatten lane-aligned"
    TH = tile_h
    nT = H // TH
    THW = TH * W
    THp = TH + 2 * MAX_PAD

    frames = frames.astype(jnp.float32)
    core_flat = core.astype(jnp.float32).reshape(B, TOTAL_CORE_CH, H * W)

    # ---- wrapper-side layout plumbing (no compute hoisted) ----
    fpad = jnp.pad(frames[:, 0], ((0, 0), (MAX_PAD, MAX_PAD), (MAX_PAD, MAX_PAD)))
    # halo'd H-tiles of the padded frame, then 15 column-shifted slabs, row-flattened
    tiles = jnp.stack([fpad[:, t * TH:t * TH + THp, :] for t in range(nT)], axis=1)
    col = jnp.stack([tiles[..., fj:fj + W] for fj in range(FULL_K)], axis=2)
    col = col.reshape(B, nT, FULL_K, THp * W)              # (B, nT, 15, (TH+14)*W)

    tap_matrix = jnp.asarray(TAP_MATRIX)                   # (679, 35)

    out_shapes = [jax.ShapeDtypeStruct((B, 1, H * W), jnp.float32)]
    out_specs = [pl.BlockSpec((None, 1, THW), lambda b, t: (b, 0, t))]
    for K in KERNEL_SIZES:
        out_shapes.append(jax.ShapeDtypeStruct((B, K * K, H * W), jnp.float32))
        out_specs.append(pl.BlockSpec((None, K * K, THW), lambda b, t: (b, 0, t)))

    results = pl.pallas_call(
        _make_kernel(TH, W),
        out_shape=tuple(out_shapes),
        grid_spec=pltpu.PrefetchScalarGridSpec(
            num_scalar_prefetch=0,
            grid=(B, nT),
            in_specs=[
                pl.BlockSpec((TOTAL_TAPS, TOTAL_CORE_CH), lambda b, t: (0, 0)),
                pl.BlockSpec((None, TOTAL_CORE_CH, THW), lambda b, t: (b, 0, t)),
                pl.BlockSpec((None, None, FULL_K, THp * W), lambda b, t: (b, t, 0, 0)),
            ],
            out_specs=tuple(out_specs),
        ),
        compiler_params=pltpu.CompilerParams(
            dimension_semantics=("parallel", "parallel")),
    )(tap_matrix, core_flat, col)

    pred_img = results[0].reshape(B, 1, H, W)
    core_out_list = [
        results[1 + i].reshape(B, 1, K * K, 1, H, W)
        for i, K in enumerate(KERNEL_SIZES)
    ]
    return pred_img, core_out_list


def kernel_conv_ref(frames, core):
    """Pure-JAX reference mirroring the torch forward (for verification)."""
    B, N, H, W = frames.shape
    pred_img = 0.0
    core_out_list = []
    for idx, wide in enumerate(SECTIONS):
        K = KERNEL_SIZES[idx]
        ch0 = SECTION_OFFSETS[idx]
        c = jnp.abs(core[:, ch0:ch0 + wide])                 # (B, wide, H, W)
        logits = []
        for tap in TAP_TABLES[idx]:
            if tap is None:
                logits.append(jnp.zeros((B, H, W), jnp.float32))
            else:
                lo, hi, wl, wh = tap
                logits.append(wl * c[:, lo] + wh * c[:, hi])
        logits = jnp.stack(logits, axis=1)                   # (B, K*K, H, W)
        w = jax.nn.softmax(logits, axis=1)
        core_out_list.append(w.reshape(B, 1, K * K, 1, H, W))
        pad = K // 2
        fp = jnp.pad(frames[:, 0], ((0, 0), (pad, pad), (pad, pad)))
        p = jnp.zeros((B, H, W), jnp.float32)
        for fi in range(K):
            for fj in range(K):
                p = p + w[:, fi * K + fj] * fp[:, fi:fi + H, fj:fj + W]
        pred_img = pred_img + p[:, None]
    return pred_img, core_out_list


if __name__ == "__main__":
    key = jax.random.PRNGKey(0)
    k1, k2 = jax.random.split(key)
    B, N, H, W = 2, 1, 16, 16
    frames = jax.random.normal(k1, (B, N, H, W), dtype=jnp.float32)
    core = jax.random.normal(k2, (B, TOTAL_CORE_CH, H, W), dtype=jnp.float32)

    # tile_h=8 -> grid (B=2, nT=2): exercises the halo / spatial-tiling path.
    pred, core_out_list = kernel_conv(frames, core, tile_h=8)
    jax.block_until_ready(pred)

    pred_ref, ref_list = kernel_conv_ref(frames, core)
    np.testing.assert_allclose(np.asarray(pred), np.asarray(pred_ref),
                               rtol=1e-4, atol=1e-5)
    for a, b in zip(core_out_list, ref_list):
        np.testing.assert_allclose(np.asarray(a), np.asarray(b),
                                   rtol=1e-4, atol=1e-5)
    print("KERNEL_OK")
</pallas_src>

<mosaic_0001>
module attributes {stable_mosaic.version = 11 : i64} {
  func.func @kernel(%arg0: i32, %arg1: i32, %arg2: memref<679x35xf32, #tpu.memory_space<vmem>>, %arg3: memref<1x35x128xf32, #tpu.memory_space<vmem>>, %arg4: memref<1x1x15x352xf32, #tpu.memory_space<vmem>>, %arg5: memref<1x1x128xf32, #tpu.memory_space<vmem>>, %arg6: memref<1x9x128xf32, #tpu.memory_space<vmem>>, %arg7: memref<1x25x128xf32, #tpu.memory_space<vmem>>, %arg8: memref<1x49x128xf32, #tpu.memory_space<vmem>>, %arg9: memref<1x81x128xf32, #tpu.memory_space<vmem>>, %arg10: memref<1x121x128xf32, #tpu.memory_space<vmem>>, %arg11: memref<1x169x128xf32, #tpu.memory_space<vmem>>, %arg12: memref<1x225x128xf32, #tpu.memory_space<vmem>>) attributes {dimension_semantics = [#tpu.dimension_semantics<parallel>, #tpu.dimension_semantics<parallel>], iteration_bounds = array<i64: 2, 2>, scalar_prefetch = 0 : i64, scratch_operands = 0 : i64, tpu.core_type = #tpu.core_type<tc>, window_params = [{pipeline_mode = #tpu.pipeline_mode<synchronous>, transform_indices = @transform_0, window_bounds = array<i64: 679, 35>}, {transform_indices = @transform_1, window_bounds = array<i64: 1, 35, 128>}, {transform_indices = @transform_2, window_bounds = array<i64: 1, 1, 15, 352>}, {transform_indices = @transform_3, window_bounds = array<i64: 1, 1, 128>}, {transform_indices = @transform_4, window_bounds = array<i64: 1, 9, 128>}, {transform_indices = @transform_5, window_bounds = array<i64: 1, 25, 128>}, {transform_indices = @transform_6, window_bounds = array<i64: 1, 49, 128>}, {transform_indices = @transform_7, window_bounds = array<i64: 1, 81, 128>}, {transform_indices = @transform_8, window_bounds = array<i64: 1, 121, 128>}, {transform_indices = @transform_9, window_bounds = array<i64: 1, 169, 128>}, {transform_indices = @transform_10, window_bounds = array<i64: 1, 225, 128>}]} {
    %c0 = arith.constant 0 : index
    %c0_0 = arith.constant 0 : index
    %c0_1 = arith.constant 0 : index
    %0 = vector.load %arg3[%c0, %c0_0, %c0_1] : memref<1x35x128xf32, #tpu.memory_space<vmem>>, vector<1x35x128xf32>
    %1 = vector.shape_cast %0 : vector<1x35x128xf32> to vector<35x128xf32>
    %2 = math.absf %1 : vector<35x128xf32>
    %cst = arith.constant 0.000000e+00 : f32
    %3 = vector.broadcast %cst : f32 to vector<1x128xf32>
    %cst_2 = arith.constant 0.000000e+00 : f32
    %4 = vector.broadcast %cst_2 : f32 to vector<1x128xf32>
    %cst_3 = arith.constant 0.000000e+00 : f32
    %5 = vector.broadcast %cst_3 : f32 to vector<1x128xf32>
    %cst_4 = arith.constant 0.000000e+00 : f32
    %6 = vector.broadcast %cst_4 : f32 to vector<1x128xf32>
    %c0_5 = arith.constant 0 : index
    %c0_6 = arith.constant 0 : index
    %7 = vector.load %arg2[%c0_5, %c0_6] : memref<679x35xf32, #tpu.memory_space<vmem>>, vector<9x35xf32>
    %cst_7 = arith.constant dense<0.000000e+00> : vector<9x128xf32>
    %8 = tpu.matmul %7, %2, %cst_7 {dimension_numbers = #tpu.dot_dimension_numbers<[1], [0], [0], [1], [0, 0, 1, 1], [], []>} : vector<9x35xf32>, vector<35x128xf32>, vector<9x128xf32> -> vector<9x128xf32>
    %c0_8 = arith.constant 0 : index
    %c0_9 = arith.constant 0 : index
    %c0_10 = arith.constant 0 : index
    %9 = vector.load %arg6[%c0_8, %c0_9, %c0_10] : memref<1x9x128xf32, #tpu.memory_space<vmem>>, vector<1x9x128xf32>
    %10 = vector.shape_cast %9 : vector<1x9x128xf32> to vector<9x128xf32>
    %11 = vector.shape_cast %8 : vector<9x128xf32> to vector<1x9x128xf32>
    tpu.vector_store %arg6[%c0_8, %c0_9, %c0_10], %11 {strides = array<i32>} : memref<1x9x128xf32, #tpu.memory_space<vmem>>, vector<1x9x128xf32>,
    %c0_11 = arith.constant 0 : index
    %c0_12 = arith.constant 0 : index
    %c0_13 = arith.constant 0 : index
    %12 = vector.load %arg6[%c0_11, %c0_12, %c0_13] : memref<1x9x128xf32, #tpu.memory_space<vmem>>, vector<1x9x128xf32>
    %13 = vector.shape_cast %12 : vector<1x9x128xf32> to vector<9x128xf32>
    %cst_14 = arith.constant dense<0xFF800000> : vector<128xf32>
    %14 = vector.multi_reduction <maximumf>, %13, %cst_14 [0] : vector<9x128xf32> to vector<128xf32>
    %15 = vector.shape_cast %14 : vector<128xf32> to vector<1x128xf32>
    %c0_15 = arith.constant 0 : index
    %c0_16 = arith.constant 0 : index
    %c0_17 = arith.constant 0 : index
    %16 = vector.load %arg6[%c0_15, %c0_16, %c0_17] : memref<1x9x128xf32, #tpu.memory_space<vmem>>, vector<1x9x128xf32>
    %17 = vector.shape_cast %16 : vector<1x9x128xf32> to vector<9x128xf32>
    %18 = vector.broadcast %15 : vector<1x128xf32> to vector<9x128xf32>
    %19 = arith.subf %17, %18 : vector<9x128xf32>
    %20 = math.exp %19 : vector<9x128xf32>
    %c0_18 = arith.constant 0 : index
    %c0_19 = arith.constant 0 : index
    %c0_20 = arith.constant 0 : index
    %21 = vector.load %arg6[%c0_18, %c0_19, %c0_20] : memref<1x9x128xf32, #tpu.memory_space<vmem>>, vector<1x9x128xf32>
    %22 = vector.shape_cast %21 : vector<1x9x128xf32> to vector<9x128xf32>
    %23 = vector.shape_cast %20 : vector<9x128xf32> to vector<1x9x128xf32>
    tpu.vector_store %arg6[%c0_18, %c0_19, %c0_20], %23 {strides = array<i32>} : memref<1x9x128xf32, #tpu.memory_space<vmem>>, vector<1x9x128xf32>,
    %c0_21 = arith.constant 0 : index
    %c0_22 = arith.constant 0 : index
    %c0_23 = arith.constant 0 : index
    %24 = vector.load %arg6[%c0_21, %c0_22, %c0_23] : memref<1x9x128xf32, #tpu.memory_space<vmem>>, vector<1x9x128xf32>
    %25 = vector.shape_cast %24 : vector<1x9x128xf32> to vector<9x128xf32>
    %cst_24 = arith.constant dense<0.000000e+00> : vector<128xf32>
    %26 = vector.multi_reduction <add>, %25, %cst_24 [0] : vector<9x128xf32> to vector<128xf32>
    %27 = vector.shape_cast %26 : vector<128xf32> to vector<1x128xf32>
    %28 = tpu.reciprocal %27 : vector<1x128xf32> -> vector<1x128xf32>
    %c0_25 = arith.constant 0 : index
    %c0_26 = arith.constant 0 : index
    %c0_27 = arith.constant 0 : index
    %29 = vector.load %arg6[%c0_25, %c0_26, %c0_27] : memref<1x9x128xf32, #tpu.memory_space<vmem>>, vector<1x9x128xf32>
    %30 = vector.shape_cast %29 : vector<1x9x128xf32> to vector<9x128xf32>
    %31 = vector.broadcast %28 : vector<1x128xf32> to vector<9x128xf32>
    %32 = arith.mulf %30, %31 : vector<9x128xf32>
    %c0_28 = arith.constant 0 : index
    %c0_29 = arith.constant 0 : index
    %c0_30 = arith.constant 0 : index
    %33 = vector.load %arg6[%c0_28, %c0_29, %c0_30] : memref<1x9x128xf32, #tpu.memory_space<vmem>>, vector<1x9x128xf32>
    %34 = vector.shape_cast %33 : vector<1x9x128xf32> to vector<9x128xf32>
    %35 = vector.shape_cast %32 : vector<9x128xf32> to vector<1x9x128xf32>
    tpu.vector_store %arg6[%c0_28, %c0_29, %c0_30], %35 {strides = array<i32>} : memref<1x9x128xf32, #tpu.memory_space<vmem>>, vector<1x9x128xf32>,
    %c0_31 = arith.constant 0 : index
    %c0_32 = arith.constant 0 : index
    %c6 = arith.constant 6 : index
    %c96 = arith.constant 96 : index
    %36 = vector.load %arg4[%c0_31, %c0_32, %c6, %c96] : memref<1x1x15x352xf32, #tpu.memory_space<vmem>>, vector<1x1x3x128xf32>
    %37 = vector.shape_cast %36 : vector<1x1x3x128xf32> to vector<3x128xf32>
    %c0_33 = arith.constant 0 : index
    %c0_34 = arith.constant 0 : index
    %c0_35 = arith.constant 0 : index
    %38 = vector.load %arg6[%c0_33, %c0_34, %c0_35] : memref<1x9x128xf32, #tpu.memory_space<vmem>>, vector<1x3x128xf32>
    %39 = vector.shape_cast %38 : vector<1x3x128xf32> to vector<3x128xf32>
    %40 = arith.mulf %37, %39 : vector<3x128xf32>
    %cst_36 = arith.constant dense<0.000000e+00> : vector<128xf32>
    %41 = vector.multi_reduction <add>, %40, %cst_36 [0] : vector<3x128xf32> to vector<128xf32>
    %42 = vector.shape_cast %41 : vector<128xf32> to vector<1x128xf32>
    %43 = arith.addf %3, %42 : vector<1x128xf32>
    %c0_37 = arith.constant 0 : index
    %c0_38 = arith.constant 0 : index
    %c6_39 = arith.constant 6 : index
    %c112 = arith.constant 112 : index
    %44 = vector.load %arg4[%c0_37, %c0_38, %c6_39, %c112] : memref<1x1x15x352xf32, #tpu.memory_space<vmem>>, vector<1x1x3x128xf32>
    %45 = vector.shape_cast %44 : vector<1x1x3x128xf32> to vector<3x128xf32>
    %c0_40 = arith.constant 0 : index
    %c3 = arith.constant 3 : index
    %c0_41 = arith.constant 0 : index
    %46 = vector.load %arg6[%c0_40, %c3, %c0_41] : memref<1x9x128xf32, #tpu.memory_space<vmem>>, vector<1x3x128xf32>
    %47 = vector.shape_cast %46 : vector<1x3x128xf32> to vector<3x128xf32>
    %48 = arith.mulf %45, %47 : vector<3x128xf32>
    %cst_42 = arith.constant dense<0.000000e+00> : vector<128xf32>
    %49 = vector.multi_reduction <add>, %48, %cst_42 [0] : vector<3x128xf32> to vector<128xf32>
    %50 = vector.shape_cast %49 : vector<128xf32> to vector<1x128xf32>
    %51 = arith.addf %4, %50 : vector<1x128xf32>
    %c0_43 = arith.constant 0 : index
    %c0_44 = arith.constant 0 : index
    %c6_45 = arith.constant 6 : index
    %c128 = arith.constant 128 : index
    %52 = vector.load %arg4[%c0_43, %c0_44, %c6_45, %c128] : memref<1x1x15x352xf32, #tpu.memory_space<vmem>>, vector<1x1x3x128xf32>
    %53 = vector.shape_cast %52 : vector<1x1x3x128xf32> to vector<3x128xf32>
    %c0_46 = arith.constant 0 : index
    %c6_47 = arith.constant 6 : index
    %c0_48 = arith.constant 0 : index
    %54 = vector.load %arg6[%c0_46, %c6_47, %c0_48] : memref<1x9x128xf32, #tpu.memory_space<vmem>>, vector<1x3x128xf32>
    %55 = vector.shape_cast %54 : vector<1x3x128xf32> to vector<3x128xf32>
    %56 = arith.mulf %53, %55 : vector<3x128xf32>
    %cst_49 = arith.constant dense<0.000000e+00> : vector<128xf32>
    %57 = vector.multi_reduction <add>, %56, %cst_49 [0] : vector<3x128xf32> to vector<128xf32>
    %58 = vector.shape_cast %57 : vector<128xf32> to vector<1x128xf32>
    %59 = arith.addf %5, %58 : vector<1x128xf32>
    %c9 = arith.constant 9 : index
    %c0_50 = arith.constant 0 : index
    %60 = vector.load %arg2[%c9, %c0_50] : memref<679x35xf32, #tpu.memory_space<vmem>>, vector<25x35xf32>
    %cst_51 = arith.constant dense<0.000000e+00> : vector<25x128xf32>
    %61 = tpu.matmul %60, %2, %cst_51 {dimension_numbers = #tpu.dot_dimension_numbers<[1], [0], [0], [1], [0, 0, 1, 1], [], []>} : vector<25x35xf32>, vector<35x128xf32>, vector<25x128xf32> -> vector<25x128xf32>
    %c0_52 = arith.constant 0 : index
    %c0_53 = arith.constant 0 : index
    %c0_54 = arith.constant 0 : index
    %62 = vector.load %arg7[%c0_52, %c0_53, %c0_54] : memref<1x25x128xf32, #tpu.memory_space<vmem>>, vector<1x25x128xf32>
    %63 = vector.shape_cast %62 : vector<1x25x128xf32> to vector<25x128xf32>
    %64 = vector.shape_cast %61 : vector<25x128xf32> to vector<1x25x128xf32>
    tpu.vector_store %arg7[%c0_52, %c0_53, %c0_54], %64 {strides = array<i32>} : memref<1x25x128xf32, #tpu.memory_space<vmem>>, vector<1x25x128xf32>,
    %c0_55 = arith.constant 0 : index
    %c0_56 = arith.constant 0 : index
    %c0_57 = arith.constant 0 : index
    %65 = vector.load %arg7[%c0_55, %c0_56, %c0_57] : memref<1x25x128xf32, #tpu.memory_space<vmem>>, vector<1x25x128xf32>
    %66 = vector.shape_cast %65 : vector<1x25x128xf32> to vector<25x128xf32>
    %cst_58 = arith.constant dense<0xFF800000> : vector<128xf32>
    %67 = vector.multi_reduction <maximumf>, %66, %cst_58 [0] : vector<25x128xf32> to vector<128xf32>
    %68 = vector.shape_cast %67 : vector<128xf32> to vector<1x128xf32>
    %c0_59 = arith.constant 0 : index
    %c0_60 = arith.constant 0 : index
    %c0_61 = arith.constant 0 : index
    %69 = vector.load %arg7[%c0_59, %c0_60, %c0_61] : memref<1x25x128xf32, #tpu.memory_space<vmem>>, vector<1x25x128xf32>
    %70 = vector.shape_cast %69 : vector<1x25x128xf32> to vector<25x128xf32>
    %71 = vector.broadcast %68 : vector<1x128xf32> to vector<25x128xf32>
    %72 = arith.subf %70, %71 : vector<25x128xf32>
    %73 = math.exp %72 : vector<25x128xf32>
    %c0_62 = arith.constant 0 : index
    %c0_63 = arith.constant 0 : index
    %c0_64 = arith.constant 0 : index
    %74 = vector.load %arg7[%c0_62, %c0_63, %c0_64] : memref<1x25x128xf32, #tpu.memory_space<vmem>>, vector<1x25x128xf32>
    %75 = vector.shape_cast %74 : vector<1x25x128xf32> to vector<25x128xf32>
    %76 = vector.shape_cast %73 : vector<25x128xf32> to vector<1x25x128xf32>
    tpu.vector_store %arg7[%c0_62, %c0_63, %c0_64], %76 {strides = array<i32>} : memref<1x25x128xf32, #tpu.memory_space<vmem>>, vector<1x25x128xf32>,
    %c0_65 = arith.constant 0 : index
    %c0_66 = arith.constant 0 : index
    %c0_67 = arith.constant 0 : index
    %77 = vector.load %arg7[%c0_65, %c0_66, %c0_67] : memref<1x25x128xf32, #tpu.memory_space<vmem>>, vector<1x25x128xf32>
    %78 = vector.shape_cast %77 : vector<1x25x128xf32> to vector<25x128xf32>
    %cst_68 = arith.constant dense<0.000000e+00> : vector<128xf32>
    %79 = vector.multi_reduction <add>, %78, %cst_68 [0] : vector<25x128xf32> to vector<128xf32>
    %80 = vector.shape_cast %79 : vector<128xf32> to vector<1x128xf32>
    %81 = tpu.reciprocal %80 : vector<1x128xf32> -> vector<1x128xf32>
    %c0_69 = arith.constant 0 : index
    %c0_70 = arith.constant 0 : index
    %c0_71 = arith.constant 0 : index
    %82 = vector.load %arg7[%c0_69, %c0_70, %c0_71] : memref<1x25x128xf32, #tpu.memory_space<vmem>>, vector<1x25x128xf32>
    %83 = vector.shape_cast %82 : vector<1x25x128xf32> to vector<25x128xf32>
    %84 = vector.broadcast %81 : vector<1x128xf32> to vector<25x128xf32>
    %85 = arith.mulf %83, %84 : vector<25x128xf32>
    %c0_72 = arith.constant 0 : index
    %c0_73 = arith.constant 0 : index
    %c0_74 = arith.constant 0 : index
    %86 = vector.load %arg7[%c0_72, %c0_73, %c0_74] : memref<1x25x128xf32, #tpu.memory_space<vmem>>, vector<1x25x128xf32>
    %87 = vector.shape_cast %86 : vector<1x25x128xf32> to vector<25x128xf32>
    %88 = vector.shape_cast %85 : vector<25x128xf32> to vector<1x25x128xf32>
    tpu.vector_store %arg7[%c0_72, %c0_73, %c0_74], %88 {strides = array<i32>} : memref<1x25x128xf32, #tpu.memory_space<vmem>>, vector<1x25x128xf32>,
    %c0_75 = arith.constant 0 : index
    %c0_76 = arith.constant 0 : index
    %c5 = arith.constant 5 : index
    %c80 = arith.constant 80 : index
    %89 = vector.load %arg4[%c0_75, %c0_76, %c5, %c80] : memref<1x1x15x352xf32, #tpu.memory_space<vmem>>, vector<1x1x5x128xf32>
    %90 = vector.shape_cast %89 : vector<1x1x5x128xf32> to vector<5x128xf32>
    %c0_77 = arith.constant 0 : index
    %c0_78 = arith.constant 0 : index
    %c0_79 = arith.constant 0 : index
    %91 = vector.load %arg7[%c0_77, %c0_78, %c0_79] : memref<1x25x128xf32, #tpu.memory_space<vmem>>, vector<1x5x128xf32>
    %92 = vector.shape_cast %91 : vector<1x5x128xf32> to vector<5x128xf32>
    %93 = arith.mulf %90, %92 : vector<5x128xf32>
    %cst_80 = arith.constant dense<0.000000e+00> : vector<128xf32>
    %94 = vector.multi_reduction <add>, %93, %cst_80 [0] : vector<5x128xf32> to vector<128xf32>
    %95 = vector.shape_cast %94 : vector<128xf32> to vector<1x128xf32>
    %96 = arith.addf %6, %95 : vector<1x128xf32>
    %c0_81 = arith.constant 0 : index
    %c0_82 = arith.constant 0 : index
    %c5_83 = arith.constant 5 : index
    %c96_84 = arith.constant 96 : index
    %97 = vector.load %arg4[%c0_81, %c0_82, %c5_83, %c96_84] : memref<1x1x15x352xf32, #tpu.memory_space<vmem>>, vector<1x1x5x128xf32>
    %98 = vector.shape_cast %97 : vector<1x1x5x128xf32> to vector<5x128xf32>
    %c0_85 = arith.constant 0 : index
    %c5_86 = arith.constant 5 : index
    %c0_87 = arith.constant 0 : index
    %99 = vector.load %arg7[%c0_85, %c5_86, %c0_87] : memref<1x25x128xf32, #tpu.memory_space<vmem>>, vector<1x5x128xf32>
    %100 = vector.shape_cast %99 : vector<1x5x128xf32> to vector<5x128xf32>
    %101 = arith.mulf %98, %100 : vector<5x128xf32>
    %cst_88 = arith.constant dense<0.000000e+00> : vector<128xf32>
    %102 = vector.multi_reduction <add>, %101, %cst_88 [0] : vector<5x128xf32> to vector<128xf32>
    %103 = vector.shape_cast %102 : vector<128xf32> to vector<1x128xf32>
    %104 = arith.addf %43, %103 : vector<1x128xf32>
    %c0_89 = arith.constant 0 : index
    %c0_90 = arith.constant 0 : index
    %c5_91 = arith.constant 5 : index
    %c112_92 = arith.constant 112 : index
    %105 = vector.load %arg4[%c0_89, %c0_90, %c5_91, %c112_92] : memref<1x1x15x352xf32, #tpu.memory_space<vmem>>, vector<1x1x5x128xf32>
    %106 = vector.shape_cast %105 : vector<1x1x5x128xf32> to vector<5x128xf32>
    %c0_93 = arith.constant 0 : index
    %c10 = arith.constant 10 : index
    %c0_94 = arith.constant 0 : index
    %107 = vector.load %arg7[%c0_93, %c10, %c0_94] : memref<1x25x128xf32, #tpu.memory_space<vmem>>, vector<1x5x128xf32>
    %108 = vector.shape_cast %107 : vector<1x5x128xf32> to vector<5x128xf32>
    %109 = arith.mulf %106, %108 : vector<5x128xf32>
    %cst_95 = arith.constant dense<0.000000e+00> : vector<128xf32>
    %110 = vector.multi_reduction <add>, %109, %cst_95 [0] : vector<5x128xf32> to vector<128xf32>
    %111 = vector.shape_cast %110 : vector<128xf32> to vector<1x128xf32>
    %112 = arith.addf %51, %111 : vector<1x128xf32>
    %c0_96 = arith.constant 0 : index
    %c0_97 = arith.constant 0 : index
    %c5_98 = arith.constant 5 : index
    %c128_99 = arith.constant 128 : index
    %113 = vector.load %arg4[%c0_96, %c0_97, %c5_98, %c128_99] : memref<1x1x15x352xf32, #tpu.memory_space<vmem>>, vector<1x1x5x128xf32>
    %114 = vector.shape_cast %113 : vector<1x1x5x128xf32> to vector<5x128xf32>
    %c0_100 = arith.constant 0 : index
    %c15 = arith.constant 15 : index
    %c0_101 = arith.constant 0 : index
    %115 = vector.load %arg7[%c0_100, %c15, %c0_101] : memref<1x25x128xf32, #tpu.memory_space<vmem>>, vector<1x5x128xf32>
    %116 = vector.shape_cast %115 : vector<1x5x128xf32> to vector<5x128xf32>
    %117 = arith.mulf %114, %116 : vector<5x128xf32>
    %cst_102 = arith.constant dense<0.000000e+00> : vector<128xf32>
    %118 = vector.multi_reduction <add>, %117, %cst_102 [0] : vector<5x128xf32> to vector<128xf32>
    %119 = vector.shape_cast %118 : vector<128xf32> to vector<1x128xf32>
    %120 = arith.addf %59, %119 : vector<1x128xf32>
    %c0_103 = arith.constant 0 : index
    %c0_104 = arith.constant 0 : index
    %c5_105 = arith.constant 5 : index
    %c144 = arith.constant 144 : index
    %121 = vector.load %arg4[%c0_103, %c0_104, %c5_105, %c144] : memref<1x1x15x352xf32, #tpu.memory_space<vmem>>, vector<1x1x5x128xf32>
    %122 = vector.shape_cast %121 : vector<1x1x5x128xf32> to vector<5x128xf32>
    %c0_106 = arith.constant 0 : index
    %c20 = arith.constant 20 : index
    %c0_107 = arith.constant 0 : index
    %123 = vector.load %arg7[%c0_106, %c20, %c0_107] : memref<1x25x128xf32, #tpu.memory_space<vmem>>, vector<1x5x128xf32>
    %124 = vector.shape_cast %123 : vector<1x5x128xf32> to vector<5x128xf32>
    %125 = arith.mulf %122, %124 : vector<5x128xf32>
    %cst_108 = arith.constant dense<0.000000e+00> : vector<128xf32>
    %126 = vector.multi_reduction <add>, %125, %cst_108 [0] : vector<5x128xf32> to vector<128xf32>
    %127 = vector.shape_cast %126 : vector<128xf32> to vector<1x128xf32>
    %128 = arith.addf %96, %127 : vector<1x128xf32>
    %c34 = arith.constant 34 : index
    %c0_109 = arith.constant 0 : index
    %129 = vector.load %arg2[%c34, %c0_109] : memref<679x35xf32, #tpu.memory_space<vmem>>, vector<49x35xf32>
    %cst_110 = arith.constant dense<0.000000e+00> : vector<49x128xf32>
    %130 = tpu.matmul %129, %2, %cst_110 {dimension_numbers = #tpu.dot_dimension_numbers<[1], [0], [0], [1], [0, 0, 1, 1], [], []>} : vector<49x35xf32>, vector<35x128xf32>, vector<49x128xf32> -> vector<49x128xf32>
    %c0_111 = arith.constant 0 : index
    %c0_112 = arith.constant 0 : index
    %c0_113 = arith.constant 0 : index
    %131 = vector.load %arg8[%c0_111, %c0_112, %c0_113] : memref<1x49x128xf32, #tpu.memory_space<vmem>>, vector<1x49x128xf32>
    %132 = vector.shape_cast %131 : vector<1x49x128xf32> to vector<49x128xf32>
    %133 = vector.shape_cast %130 : vector<49x128xf32> to vector<1x49x128xf32>
    tpu.vector_store %arg8[%c0_111, %c0_112, %c0_113], %133 {strides = array<i32>} : memref<1x49x128xf32, #tpu.memory_space<vmem>>, vector<1x49x128xf32>,
    %c0_114 = arith.constant 0 : index
    %c0_115 = arith.constant 0 : index
    %c0_116 = arith.constant 0 : index
    %134 = vector.load %arg8[%c0_114, %c0_115, %c0_116] : memref<1x49x128xf32, #tpu.memory_space<vmem>>, vector<1x49x128xf32>
    %135 = vector.shape_cast %134 : vector<1x49x128xf32> to vector<49x128xf32>
    %cst_117 = arith.constant dense<0xFF800000> : vector<128xf32>
    %136 = vector.multi_reduction <maximumf>, %135, %cst_117 [0] : vector<49x128xf32> to vector<128xf32>
    %137 = vector.shape_cast %136 : vector<128xf32> to vector<1x128xf32>
    %c0_118 = arith.constant 0 : index
    %c0_119 = arith.constant 0 : index
    %c0_120 = arith.constant 0 : index
    %138 = vector.load %arg8[%c0_118, %c0_119, %c0_120] : memref<1x49x128xf32, #tpu.memory_space<vmem>>, vector<1x49x128xf32>
    %139 = vector.shape_cast %138 : vector<1x49x128xf32> to vector<49x128xf32>
    %140 = vector.broadcast %137 : vector<1x128xf32> to vector<49x128xf32>
    %141 = arith.subf %139, %140 : vector<49x128xf32>
    %142 = math.exp %141 : vector<49x128xf32>
    %c0_121 = arith.constant 0 : index
    %c0_122 = arith.constant 0 : index
    %c0_123 = arith.constant 0 : index
    %143 = vector.load %arg8[%c0_121, %c0_122, %c0_123] : memref<1x49x128xf32, #tpu.memory_space<vmem>>, vector<1x49x128xf32>
    %144 = vector.shape_cast %143 : vector<1x49x128xf32> to vector<49x128xf32>
    %145 = vector.shape_cast %142 : vector<49x128xf32> to vector<1x49x128xf32>
    tpu.vector_store %arg8[%c0_121, %c0_122, %c0_123], %145 {strides = array<i32>} : memref<1x49x128xf32, #tpu.memory_space<vmem>>, vector<1x49x128xf32>,
    %c0_124 = arith.constant 0 : index
    %c0_125 = arith.constant 0 : index
    %c0_126 = arith.constant 0 : index
    %146 = vector.load %arg8[%c0_124, %c0_125, %c0_126] : memref<1x49x128xf32, #tpu.memory_space<vmem>>, vector<1x49x128xf32>
    %147 = vector.shape_cast %146 : vector<1x49x128xf32> to vector<49x128xf32>
    %cst_127 = arith.constant dense<0.000000e+00> : vector<128xf32>
    %148 = vector.multi_reduction <add>, %147, %cst_127 [0] : vector<49x128xf32> to vector<128xf32>
    %149 = vector.shape_cast %148 : vector<128xf32> to vector<1x128xf32>
    %150 = tpu.reciprocal %149 : vector<1x128xf32> -> vector<1x128xf32>
    %c0_128 = arith.constant 0 : index
    %c0_129 = arith.constant 0 : index
    %c0_130 = arith.constant 0 : index
    %151 = vector.load %arg8[%c0_128, %c0_129, %c0_130] : memref<1x49x128xf32, #tpu.memory_space<vmem>>, vector<1x49x128xf32>
    %152 = vector.shape_cast %151 : vector<1x49x128xf32> to vector<49x128xf32>
    %153 = vector.broadcast %150 : vector<1x128xf32> to vector<49x128xf32>
    %154 = arith.mulf %152, %153 : vector<49x128xf32>
    %c0_131 = arith.constant 0 : index
    %c0_132 = arith.constant 0 : index
    %c0_133 = arith.constant 0 : index
    %155 = vector.load %arg8[%c0_131, %c0_132, %c0_133] : memref<1x49x128xf32, #tpu.memory_space<vmem>>, vector<1x49x128xf32>
    %156 = vector.shape_cast %155 : vector<1x49x128xf32> to vector<49x128xf32>
    %157 = vector.shape_cast %154 : vector<49x128xf32> to vector<1x49x128xf32>
    tpu.vector_store %arg8[%c0_131, %c0_132, %c0_133], %157 {strides = array<i32>} : memref<1x49x128xf32, #tpu.memory_space<vmem>>, vector<1x49x128xf32>,
    %c0_134 = arith.constant 0 : index
    %c0_135 = arith.constant 0 : index
    %c4 = arith.constant 4 : index
    %c64 = arith.constant 64 : index
    %158 = vector.load %arg4[%c0_134, %c0_135, %c4, %c64] : memref<1x1x15x352xf32, #tpu.memory_space<vmem>>, vector<1x1x7x128xf32>
    %159 = vector.shape_cast %158 : vector<1x1x7x128xf32> to vector<7x128xf32>
    %c0_136 = arith.constant 0 : index
    %c0_137 = arith.constant 0 : index
    %c0_138 = arith.constant 0 : index
    %160 = vector.load %arg8[%c0_136, %c0_137, %c0_138] : memref<1x49x128xf32, #tpu.memory_space<vmem>>, vector<1x7x128xf32>
    %161 = vector.shape_cast %160 : vector<1x7x128xf32> to vector<7x128xf32>
    %162 = arith.mulf %159, %161 : vector<7x128xf32>
    %cst_139 = arith.constant dense<0.000000e+00> : vector<128xf32>
    %163 = vector.multi_reduction <add>, %162, %cst_139 [0] : vector<7x128xf32> to vector<128xf32>
    %164 = vector.shape_cast %163 : vector<128xf32> to vector<1x128xf32>
    %165 = arith.addf %104, %164 : vector<1x128xf32>
    %c0_140 = arith.constant 0 : index
    %c0_141 = arith.constant 0 : index
    %c4_142 = arith.constant 4 : index
    %c80_143 = arith.constant 80 : index
    %166 = vector.load %arg4[%c0_140, %c0_141, %c4_142, %c80_143] : memref<1x1x15x352xf32, #tpu.memory_space<vmem>>, vector<1x1x7x128xf32>
    %167 = vector.shape_cast %166 : vector<1x1x7x128xf32> to vector<7x128xf32>
    %c0_144 = arith.constant 0 : index
    %c7 = arith.constant 7 : index
    %c0_145 = arith.constant 0 : index
    %168 = vector.load %arg8[%c0_144, %c7, %c0_145] : memref<1x49x128xf32, #tpu.memory_space<vmem>>, vector<1x7x128xf32>
    %169 = vector.shape_cast %168 : vector<1x7x128xf32> to vector<7x128xf32>
    %170 = arith.mulf %167, %169 : vector<7x128xf32>
    %cst_146 = arith.constant dense<0.000000e+00> : vector<128xf32>
    %171 = vector.multi_reduction <add>, %170, %cst_146 [0] : vector<7x128xf32> to vector<128xf32>
    %172 = vector.shape_cast %171 : vector<128xf32> to vector<1x128xf32>
    %173 = arith.addf %112, %172 : vector<1x128xf32>
    %c0_147 = arith.constant 0 : index
    %c0_148 = arith.constant 0 : index
    %c4_149 = arith.constant 4 : index
    %c96_150 = arith.constant 96 : index
    %174 = vector.load %arg4[%c0_147, %c0_148, %c4_149, %c96_150] : memref<1x1x15x352xf32, #tpu.memory_space<vmem>>, vector<1x1x7x128xf32>
    %175 = vector.shape_cast %174 : vector<1x1x7x128xf32> to vector<7x128xf32>
    %c0_151 = arith.constant 0 : index
    %c14 = arith.constant 14 : index
    %c0_152 = arith.constant 0 : index
    %176 = vector.load %arg8[%c0_151, %c14, %c0_152] : memref<1x49x128xf32, #tpu.memory_space<vmem>>, vector<1x7x128xf32>
    %177 = vector.shape_cast %176 : vector<1x7x128xf32> to vector<7x128xf32>
    %178 = arith.mulf %175, %177 : vector<7x128xf32>
    %cst_153 = arith.constant dense<0.000000e+00> : vector<128xf32>
    %179 = vector.multi_reduction <add>, %178, %cst_153 [0] : vector<7x128xf32> to vector<128xf32>
    %180 = vector.shape_cast %179 : vector<128xf32> to vector<1x128xf32>
    %181 = arith.addf %120, %180 : vector<1x128xf32>
    %c0_154 = arith.constant 0 : index
    %c0_155 = arith.constant 0 : index
    %c4_156 = arith.constant 4 : index
    %c112_157 = arith.constant 112 : index
    %182 = vector.load %arg4[%c0_154, %c0_155, %c4_156, %c112_157] : memref<1x1x15x352xf32, #tpu.memory_space<vmem>>, vector<1x1x7x128xf32>
    %183 = vector.shape_cast %182 : vector<1x1x7x128xf32> to vector<7x128xf32>
    %c0_158 = arith.constant 0 : index
    %c21 = arith.constant 21 : index
    %c0_159 = arith.constant 0 : index
    %184 = vector.load %arg8[%c0_158, %c21, %c0_159] : memref<1x49x128xf32, #tpu.memory_space<vmem>>, vector<1x7x128xf32>
    %185 = vector.shape_cast %184 : vector<1x7x128xf32> to vector<7x128xf32>
    %186 = arith.mulf %183, %185 : vector<7x128xf32>
    %cst_160 = arith.constant dense<0.000000e+00> : vector<128xf32>
    %187 = vector.multi_reduction <add>, %186, %cst_160 [0] : vector<7x128xf32> to vector<128xf32>
    %188 = vector.shape_cast %187 : vector<128xf32> to vector<1x128xf32>
    %189 = arith.addf %128, %188 : vector<1x128xf32>
    %c0_161 = arith.constant 0 : index
    %c0_162 = arith.constant 0 : index
    %c4_163 = arith.constant 4 : index
    %c128_164 = arith.constant 128 : index
    %190 = vector.load %arg4[%c0_161, %c0_162, %c4_163, %c128_164] : memref<1x1x15x352xf32, #tpu.memory_space<vmem>>, vector<1x1x7x128xf32>
    %191 = vector.shape_cast %190 : vector<1x1x7x128xf32> to vector<7x128xf32>
    %c0_165 = arith.constant 0 : index
    %c28 = arith.constant 28 : index
    %c0_166 = arith.constant 0 : index
    %192 = vector.load %arg8[%c0_165, %c28, %c0_166] : memref<1x49x128xf32, #tpu.memory_space<vmem>>, vector<1x7x128xf32>
    %193 = vector.shape_cast %192 : vector<1x7x128xf32> to vector<7x128xf32>
    %194 = arith.mulf %191, %193 : vector<7x128xf32>
    %cst_167 = arith.constant dense<0.000000e+00> : vector<128xf32>
    %195 = vector.multi_reduction <add>, %194, %cst_167 [0] : vector<7x128xf32> to vector<128xf32>
    %196 = vector.shape_cast %195 : vector<128xf32> to vector<1x128xf32>
    %197 = arith.addf %165, %196 : vector<1x128xf32>
    %c0_168 = arith.constant 0 : index
    %c0_169 = arith.constant 0 : index
    %c4_170 = arith.constant 4 : index
    %c144_171 = arith.constant 144 : index
    %198 = vector.load %arg4[%c0_168, %c0_169, %c4_170, %c144_171] : memref<1x1x15x352xf32, #tpu.memory_space<vmem>>, vector<1x1x7x128xf32>
    %199 = vector.shape_cast %198 : vector<1x1x7x128xf32> to vector<7x128xf32>
    %c0_172 = arith.constant 0 : index
    %c35 = arith.constant 35 : index
    %c0_173 = arith.constant 0 : index
    %200 = vector.load %arg8[%c0_172, %c35, %c0_173] : memref<1x49x128xf32, #tpu.memory_space<vmem>>, vector<1x7x128xf32>
    %201 = vector.shape_cast %200 : vector<1x7x128xf32> to vector<7x128xf32>
    %202 = arith.mulf %199, %201 : vector<7x128xf32>
    %cst_174 = arith.constant dense<0.000000e+00> : vector<128xf32>
    %203 = vector.multi_reduction <add>, %202, %cst_174 [0] : vector<7x128xf32> to vector<128xf32>
    %204 = vector.shape_cast %203 : vector<128xf32> to vector<1x128xf32>
    %205 = arith.addf %173, %204 : vector<1x128xf32>
    %c0_175 = arith.constant 0 : index
    %c0_176 = arith.constant 0 : index
    %c4_177 = arith.constant 4 : index
    %c160 = arith.constant 160 : index
    %206 = vector.load %arg4[%c0_175, %c0_176, %c4_177, %c160] : memref<1x1x15x352xf32, #tpu.memory_space<vmem>>, vector<1x1x7x128xf32>
    %207 = vector.shape_cast %206 : vector<1x1x7x128xf32> to vector<7x128xf32>
    %c0_178 = arith.constant 0 : index
    %c42 = arith.constant 42 : index
    %c0_179 = arith.constant 0 : index
    %208 = vector.load %arg8[%c0_178, %c42, %c0_179] : memref<1x49x128xf32, #tpu.memory_space<vmem>>, vector<1x7x128xf32>
    %209 = vector.shape_cast %208 : vector<1x7x128xf32> to vector<7x128xf32>
    %210 = arith.mulf %207, %209 : vector<7x128xf32>
    %cst_180 = arith.constant dense<0.000000e+00> : vector<128xf32>
    %211 = vector.multi_reduction <add>, %210, %cst_180 [0] : vector<7x128xf32> to vector<128xf32>
    %212 = vector.shape_cast %211 : vector<128xf32> to vector<1x128xf32>
    %213 = arith.addf %181, %212 : vector<1x128xf32>
    %c83 = arith.constant 83 : index
    %c0_181 = arith.constant 0 : index
    %214 = vector.load %arg2[%c83, %c0_181] : memref<679x35xf32, #tpu.memory_space<vmem>>, vector<81x35xf32>
    %cst_182 = arith.constant dense<0.000000e+00> : vector<81x128xf32>
    %215 = tpu.matmul %214, %2, %cst_182 {dimension_numbers = #tpu.dot_dimension_numbers<[1], [0], [0], [1], [0, 0, 1, 1], [], []>} : vector<81x35xf32>, vector<35x128xf32>, vector<81x128xf32> -> vector<81x128xf32>
    %c0_183 = arith.constant 0 : index
    %c0_184 = arith.constant 0 : index
    %c0_185 = arith.constant 0 : index
    %216 = vector.load %arg9[%c0_183, %c0_184, %c0_185] : memref<1x81x128xf32, #tpu.memory_space<vmem>>, vector<1x81x128xf32>
    %217 = vector.shape_cast %216 : vector<1x81x128xf32> to vector<81x128xf32>
    %218 = vector.shape_cast %215 : vector<81x128xf32> to vector<1x81x128xf32>
    tpu.vector_store %arg9[%c0_183, %c0_184, %c0_185], %218 {strides = array<i32>} : memref<1x81x128xf32, #tpu.memory_space<vmem>>, vector<1x81x128xf32>,
    %c0_186 = arith.constant 0 : index
    %c0_187 = arith.constant 0 : index
    %c0_188 = arith.constant 0 : index
    %219 = vector.load %arg9[%c0_186, %c0_187, %c0_188] : memref<1x81x128xf32, #tpu.memory_space<vmem>>, vector<1x81x128xf32>
    %220 = vector.shape_cast %219 : vector<1x81x128xf32> to vector<81x128xf32>
    %cst_189 = arith.constant dense<0xFF800000> : vector<128xf32>
    %221 = vector.multi_reduction <maximumf>, %220, %cst_189 [0] : vector<81x128xf32> to vector<128xf32>
    %222 = vector.shape_cast %221 : vector<128xf32> to vector<1x128xf32>
    %c0_190 = arith.constant 0 : index
    %c0_191 = arith.constant 0 : index
    %c0_192 = arith.constant 0 : index
    %223 = vector.load %arg9[%c0_190, %c0_191, %c0_192] : memref<1x81x128xf32, #tpu.memory_space<vmem>>, vector<1x81x128xf32>
    %224 = vector.shape_cast %223 : vector<1x81x128xf32> to vector<81x128xf32>
    %225 = vector.broadcast %222 : vector<1x128xf32> to vector<81x128xf32>
    %226 = arith.subf %224, %225 : vector<81x128xf32>
    %227 = math.exp %226 : vector<81x128xf32>
    %c0_193 = arith.constant 0 : index
    %c0_194 = arith.constant 0 : index
    %c0_195 = arith.constant 0 : index
    %228 = vector.load %arg9[%c0_193, %c0_194, %c0_195] : memref<1x81x128xf32, #tpu.memory_space<vmem>>, vector<1x81x128xf32>
    %229 = vector.shape_cast %228 : vector<1x81x128xf32> to vector<81x128xf32>
    %230 = vector.shape_cast %227 : vector<81x128xf32> to vector<1x81x128xf32>
    tpu.vector_store %arg9[%c0_193, %c0_194, %c0_195], %230 {strides = array<i32>} : memref<1x81x128xf32, #tpu.memory_space<vmem>>, vector<1x81x128xf32>,
    %c0_196 = arith.constant 0 : index
    %c0_197 = arith.constant 0 : index
    %c0_198 = arith.constant 0 : index
    %231 = vector.load %arg9[%c0_196, %c0_197, %c0_198] : memref<1x81x128xf32, #tpu.memory_space<vmem>>, vector<1x81x128xf32>
    %232 = vector.shape_cast %231 : vector<1x81x128xf32> to vector<81x128xf32>
    %cst_199 = arith.constant dense<0.000000e+00> : vector<128xf32>
    %233 = vector.multi_reduction <add>, %232, %cst_199 [0] : vector<81x128xf32> to vector<128xf32>
    %234 = vector.shape_cast %233 : vector<128xf32> to vector<1x128xf32>
    %235 = tpu.reciprocal %234 : vector<1x128xf32> -> vector<1x128xf32>
    %c0_200 = arith.constant 0 : index
    %c0_201 = arith.constant 0 : index
    %c0_202 = arith.constant 0 : index
    %236 = vector.load %arg9[%c0_200, %c0_201, %c0_202] : memref<1x81x128xf32, #tpu.memory_space<vmem>>, vector<1x81x128xf32>
    %237 = vector.shape_cast %236 : vector<1x81x128xf32> to vector<81x128xf32>
    %238 = vector.broadcast %235 : vector<1x128xf32> to vector<81x128xf32>
    %239 = arith.mulf %237, %238 : vector<81x128xf32>
    %c0_203 = arith.constant 0 : index
    %c0_204 = arith.constant 0 : index
    %c0_205 = arith.constant 0 : index
    %240 = vector.load %arg9[%c0_203, %c0_204, %c0_205] : memref<1x81x128xf32, #tpu.memory_space<vmem>>, vector<1x81x128xf32>
    %241 = vector.shape_cast %240 : vector<1x81x128xf32> to vector<81x128xf32>
    %242 = vector.shape_cast %239 : vector<81x128xf32> to vector<1x81x128xf32>
    tpu.vector_store %arg9[%c0_203, %c0_204, %c0_205], %242 {strides = array<i32>} : memref<1x81x128xf32, #tpu.memory_space<vmem>>, vector<1x81x128xf32>,
    %c0_206 = arith.constant 0 : index
    %c0_207 = arith.constant 0 : index
    %c3_208 = arith.constant 3 : index
    %c48 = arith.constant 48 : index
    %243 = vector.load %arg4[%c0_206, %c0_207, %c3_208, %c48] : memref<1x1x15x352xf32, #tpu.memory_space<vmem>>, vector<1x1x9x128xf32>
    %244 = vector.shape_cast %243 : vector<1x1x9x128xf32> to vector<9x128xf32>
    %c0_209 = arith.constant 0 : index
    %c0_210 = arith.constant 0 : index
    %c0_211 = arith.constant 0 : index
    %245 = vector.load %arg9[%c0_209, %c0_210, %c0_211] : memref<1x81x128xf32, #tpu.memory_space<vmem>>, vector<1x9x128xf32>
    %246 = vector.shape_cast %245 : vector<1x9x128xf32> to vector<9x128xf32>
    %247 = arith.mulf %244, %246 : vector<9x128xf32>
    %cst_212 = arith.constant dense<0.000000e+00> : vector<128xf32>
    %248 = vector.multi_reduction <add>, %247, %cst_212 [0] : vector<9x128xf32> to vector<128xf32>
    %249 = vector.shape_cast %248 : vector<128xf32> to vector<1x128xf32>
    %250 = arith.addf %189, %249 : vector<1x128xf32>
    %c0_213 = arith.constant 0 : index
    %c0_214 = arith.constant 0 : index
    %c3_215 = arith.constant 3 : index
    %c64_216 = arith.constant 64 : index
    %251 = vector.load %arg4[%c0_213, %c0_214, %c3_215, %c64_216] : memref<1x1x15x352xf32, #tpu.memory_space<vmem>>, vector<1x1x9x128xf32>
    %252 = vector.shape_cast %251 : vector<1x1x9x128xf32> to vector<9x128xf32>
    %c0_217 = arith.constant 0 : index
    %c9_218 = arith.constant 9 : index
    %c0_219 = arith.constant 0 : index
    %253 = vector.load %arg9[%c0_217, %c9_218, %c0_219] : memref<1x81x128xf32, #tpu.memory_space<vmem>>, vector<1x9x128xf32>
    %254 = vector.shape_cast %253 : vector<1x9x128xf32> to vector<9x128xf32>
    %255 = arith.mulf %252, %254 : vector<9x128xf32>
    %cst_220 = arith.constant dense<0.000000e+00> : vector<128xf32>
    %256 = vector.multi_reduction <add>, %255, %cst_220 [0] : vector<9x128xf32> to vector<128xf32>
    %257 = vector.shape_cast %256 : vector<128xf32> to vector<1x128xf32>
    %258 = arith.addf %197, %257 : vector<1x128xf32>
    %c0_221 = arith.constant 0 : index
    %c0_222 = arith.constant 0 : index
    %c3_223 = arith.constant 3 : index
    %c80_224 = arith.constant 80 : index
    %259 = vector.load %arg4[%c0_221, %c0_222, %c3_223, %c80_224] : memref<1x1x15x352xf32, #tpu.memory_space<vmem>>, vector<1x1x9x128xf32>
    %260 = vector.shape_cast %259 : vector<1x1x9x128xf32> to vector<9x128xf32>
    %c0_225 = arith.constant 0 : index
    %c18 = arith.constant 18 : index
    %c0_226 = arith.constant 0 : index
    %261 = vector.load %arg9[%c0_225, %c18, %c0_226] : memref<1x81x128xf32, #tpu.memory_space<vmem>>, vector<1x9x128xf32>
    %262 = vector.shape_cast %261 : vector<1x9x128xf32> to vector<9x128xf32>
    %263 = arith.mulf %260, %262 : vector<9x128xf32>
    %cst_227 = arith.constant dense<0.000000e+00> : vector<128xf32>
    %264 = vector.multi_reduction <add>, %263, %cst_227 [0] : vector<9x128xf32> to vector<128xf32>
    %265 = vector.shape_cast %264 : vector<128xf32> to vector<1x128xf32>
    %266 = arith.addf %205, %265 : vector<1x128xf32>
    %c0_228 = arith.constant 0 : index
    %c0_229 = arith.constant 0 : index
    %c3_230 = arith.constant 3 : index
    %c96_231 = arith.constant 96 : index
    %267 = vector.load %arg4[%c0_228, %c0_229, %c3_230, %c96_231] : memref<1x1x15x352xf32, #tpu.memory_space<vmem>>, vector<1x1x9x128xf32>
    %268 = vector.shape_cast %267 : vector<1x1x9x128xf32> to vector<9x128xf32>
    %c0_232 = arith.constant 0 : index
    %c27 = arith.constant 27 : index
    %c0_233 = arith.constant 0 : index
    %269 = vector.load %arg9[%c0_232, %c27, %c0_233] : memref<1x81x128xf32, #tpu.memory_space<vmem>>, vector<1x9x128xf32>
    %270 = vector.shape_cast %269 : vector<1x9x128xf32> to vector<9x128xf32>
    %271 = arith.mulf %268, %270 : vector<9x128xf32>
    %cst_234 = arith.constant dense<0.000000e+00> : vector<128xf32>
    %272 = vector.multi_reduction <add>, %271, %cst_234 [0] : vector<9x128xf32> to vector<128xf32>
    %273 = vector.shape_cast %272 : vector<128xf32> to vector<1x128xf32>
    %274 = arith.addf %213, %273 : vector<1x128xf32>
    %c0_235 = arith.constant 0 : index
    %c0_236 = arith.constant 0 : index
    %c3_237 = arith.constant 3 : index
    %c112_238 = arith.constant 112 : index
    %275 = vector.load %arg4[%c0_235, %c0_236, %c3_237, %c112_238] : memref<1x1x15x352xf32, #tpu.memory_space<vmem>>, vector<1x1x9x128xf32>
    %276 = vector.shape_cast %275 : vector<1x1x9x128xf32> to vector<9x128xf32>
    %c0_239 = arith.constant 0 : index
    %c36 = arith.constant 36 : index
    %c0_240 = arith.constant 0 : index
    %277 = vector.load %arg9[%c0_239, %c36, %c0_240] : memref<1x81x128xf32, #tpu.memory_space<vmem>>, vector<1x9x128xf32>
    %278 = vector.shape_cast %277 : vector<1x9x128xf32> to vector<9x128xf32>
    %279 = arith.mulf %276, %278 : vector<9x128xf32>
    %cst_241 = arith.constant dense<0.000000e+00> : vector<128xf32>
    %280 = vector.multi_reduction <add>, %279, %cst_241 [0] : vector<9x128xf32> to vector<128xf32>
    %281 = vector.shape_cast %280 : vector<128xf32> to vector<1x128xf32>
    %282 = arith.addf %250, %281 : vector<1x128xf32>
    %c0_242 = arith.constant 0 : index
    %c0_243 = arith.constant 0 : index
    %c3_244 = arith.constant 3 : index
    %c128_245 = arith.constant 128 : index
    %283 = vector.load %arg4[%c0_242, %c0_243, %c3_244, %c128_245] : memref<1x1x15x352xf32, #tpu.memory_space<vmem>>, vector<1x1x9x128xf32>
    %284 = vector.shape_cast %283 : vector<1x1x9x128xf32> to vector<9x128xf32>
    %c0_246 = arith.constant 0 : index
    %c45 = arith.constant 45 : index
    %c0_247 = arith.constant 0 : index
    %285 = vector.load %arg9[%c0_246, %c45, %c0_247] : memref<1x81x128xf32, #tpu.memory_space<vmem>>, vector<1x9x128xf32>
    %286 = vector.shape_cast %285 : vector<1x9x128xf32> to vector<9x128xf32>
    %287 = arith.mulf %284, %286 : vector<9x128xf32>
    %cst_248 = arith.constant dense<0.000000e+00> : vector<128xf32>
    %288 = vector.multi_reduction <add>, %287, %cst_248 [0] : vector<9x128xf32> to vector<128xf32>
    %289 = vector.shape_cast %288 : vector<128xf32> to vector<1x128xf32>
    %290 = arith.addf %258, %289 : vector<1x128xf32>
    %c0_249 = arith.constant 0 : index
    %c0_250 = arith.constant 0 : index
    %c3_251 = arith.constant 3 : index
    %c144_252 = arith.constant 144 : index
    %291 = vector.load %arg4[%c0_249, %c0_250, %c3_251, %c144_252] : memref<1x1x15x352xf32, #tpu.memory_space<vmem>>, vector<1x1x9x128xf32>
    %292 = vector.shape_cast %291 : vector<1x1x9x128xf32> to vector<9x128xf32>
    %c0_253 = arith.constant 0 : index
    %c54 = arith.constant 54 : index
    %c0_254 = arith.constant 0 : index
    %293 = vector.load %arg9[%c0_253, %c54, %c0_254] : memref<1x81x128xf32, #tpu.memory_space<vmem>>, vector<1x9x128xf32>
    %294 = vector.shape_cast %293 : vector<1x9x128xf32> to vector<9x128xf32>
    %295 = arith.mulf %292, %294 : vector<9x128xf32>
    %cst_255 = arith.constant dense<0.000000e+00> : vector<128xf32>
    %296 = vector.multi_reduction <add>, %295, %cst_255 [0] : vector<9x128xf32> to vector<128xf32>
    %297 = vector.shape_cast %296 : vector<128xf32> to vector<1x128xf32>
    %298 = arith.addf %266, %297 : vector<1x128xf32>
    %c0_256 = arith.constant 0 : index
    %c0_257 = arith.constant 0 : index
    %c3_258 = arith.constant 3 : index
    %c160_259 = arith.constant 160 : index
    %299 = vector.load %arg4[%c0_256, %c0_257, %c3_258, %c160_259] : memref<1x1x15x352xf32, #tpu.memory_space<vmem>>, vector<1x1x9x128xf32>
    %300 = vector.shape_cast %299 : vector<1x1x9x128xf32> to vector<9x128xf32>
    %c0_260 = arith.constant 0 : index
    %c63 = arith.constant 63 : index
    %c0_261 = arith.constant 0 : index
    %301 = vector.load %arg9[%c0_260, %c63, %c0_261] : memref<1x81x128xf32, #tpu.memory_space<vmem>>, vector<1x9x128xf32>
    %302 = vector.shape_cast %301 : vector<1x9x128xf32> to vector<9x128xf32>
    %303 = arith.mulf %300, %302 : vector<9x128xf32>
    %cst_262 = arith.constant dense<0.000000e+00> : vector<128xf32>
    %304 = vector.multi_reduction <add>, %303, %cst_262 [0] : vector<9x128xf32> to vector<128xf32>
    %305 = vector.shape_cast %304 : vector<128xf32> to vector<1x128xf32>
    %306 = arith.addf %274, %305 : vector<1x128xf32>
    %c0_263 = arith.constant 0 : index
    %c0_264 = arith.constant 0 : index
    %c3_265 = arith.constant 3 : index
    %c176 = arith.constant 176 : index
    %307 = vector.load %arg4[%c0_263, %c0_264, %c3_265, %c176] : memref<1x1x15x352xf32, #tpu.memory_space<vmem>>, vector<1x1x9x128xf32>
    %308 = vector.shape_cast %307 : vector<1x1x9x128xf32> to vector<9x128xf32>
    %c0_266 = arith.constant 0 : index
    %c72 = arith.constant 72 : index
    %c0_267 = arith.constant 0 : index
    %309 = vector.load %arg9[%c0_266, %c72, %c0_267] : memref<1x81x128xf32, #tpu.memory_space<vmem>>, vector<1x9x128xf32>
    %310 = vector.shape_cast %309 : vector<1x9x128xf32> to vector<9x128xf32>
    %311 = arith.mulf %308, %310 : vector<9x128xf32>
    %cst_268 = arith.constant dense<0.000000e+00> : vector<128xf32>
    %312 = vector.multi_reduction <add>, %311, %cst_268 [0] : vector<9x128xf32> to vector<128xf32>
    %313 = vector.shape_cast %312 : vector<128xf32> to vector<1x128xf32>
    %314 = arith.addf %282, %313 : vector<1x128xf32>
    %c164 = arith.constant 164 : index
    %c0_269 = arith.constant 0 : index
    %315 = vector.load %arg2[%c164, %c0_269] : memref<679x35xf32, #tpu.memory_space<vmem>>, vector<121x35xf32>
    %cst_270 = arith.constant dense<0.000000e+00> : vector<121x128xf32>
    %316 = tpu.matmul %315, %2, %cst_270 {dimension_numbers = #tpu.dot_dimension_numbers<[1], [0], [0], [1], [0, 0, 1, 1], [], []>} : vector<121x35xf32>, vector<35x128xf32>, vector<121x128xf32> -> vector<121x128xf32>
    %c0_271 = arith.constant 0 : index
    %c0_272 = arith.constant 0 : index
    %c0_273 = arith.constant 0 : index
    %317 = vector.load %arg10[%c0_271, %c0_272, %c0_273] : memref<1x121x128xf32, #tpu.memory_space<vmem>>, vector<1x121x128xf32>
    %318 = vector.shape_cast %317 : vector<1x121x128xf32> to vector<121x128xf32>
    %319 = vector.shape_cast %316 : vector<121x128xf32> to vector<1x121x128xf32>
    tpu.vector_store %arg10[%c0_271, %c0_272, %c0_273], %319 {strides = array<i32>} : memref<1x121x128xf32, #tpu.memory_space<vmem>>, vector<1x121x128xf32>,
    %c0_274 = arith.constant 0 : index
    %c0_275 = arith.constant 0 : index
    %c0_276 = arith.constant 0 : index
    %320 = vector.load %arg10[%c0_274, %c0_275, %c0_276] : memref<1x121x128xf32, #tpu.memory_space<vmem>>, vector<1x121x128xf32>
    %321 = vector.shape_cast %320 : vector<1x121x128xf32> to vector<121x128xf32>
    %cst_277 = arith.constant dense<0xFF800000> : vector<128xf32>
    %322 = vector.multi_reduction <maximumf>, %321, %cst_277 [0] : vector<121x128xf32> to vector<128xf32>
    %323 = vector.shape_cast %322 : vector<128xf32> to vector<1x128xf32>
    %c0_278 = arith.constant 0 : index
    %c0_279 = arith.constant 0 : index
    %c0_280 = arith.constant 0 : index
    %324 = vector.load %arg10[%c0_278, %c0_279, %c0_280] : memref<1x121x128xf32, #tpu.memory_space<vmem>>, vector<1x121x128xf32>
    %325 = vector.shape_cast %324 : vector<1x121x128xf32> to vector<121x128xf32>
    %326 = vector.broadcast %323 : vector<1x128xf32> to vector<121x128xf32>
    %327 = arith.subf %325, %326 : vector<121x128xf32>
    %328 = math.exp %327 : vector<121x128xf32>
    %c0_281 = arith.constant 0 : index
    %c0_282 = arith.constant 0 : index
    %c0_283 = arith.constant 0 : index
    %329 = vector.load %arg10[%c0_281, %c0_282, %c0_283] : memref<1x121x128xf32, #tpu.memory_space<vmem>>, vector<1x121x128xf32>
    %330 = vector.shape_cast %329 : vector<1x121x128xf32> to vector<121x128xf32>
    %331 = vector.shape_cast %328 : vector<121x128xf32> to vector<1x121x128xf32>
    tpu.vector_store %arg10[%c0_281, %c0_282, %c0_283], %331 {strides = array<i32>} : memref<1x121x128xf32, #tpu.memory_space<vmem>>, vector<1x121x128xf32>,
    %c0_284 = arith.constant 0 : index
    %c0_285 = arith.constant 0 : index
    %c0_286 = arith.constant 0 : index
    %332 = vector.load %arg10[%c0_284, %c0_285, %c0_286] : memref<1x121x128xf32, #tpu.memory_space<vmem>>, vector<1x121x128xf32>
    %333 = vector.shape_cast %332 : vector<1x121x128xf32> to vector<121x128xf32>
    %cst_287 = arith.constant dense<0.000000e+00> : vector<128xf32>
    %334 = vector.multi_reduction <add>, %333, %cst_287 [0] : vector<121x128xf32> to vector<128xf32>
    %335 = vector.shape_cast %334 : vector<128xf32> to vector<1x128xf32>
    %336 = tpu.reciprocal %335 : vector<1x128xf32> -> vector<1x128xf32>
    %c0_288 = arith.constant 0 : index
    %c0_289 = arith.constant 0 : index
    %c0_290 = arith.constant 0 : index
    %337 = vector.load %arg10[%c0_288, %c0_289, %c0_290] : memref<1x121x128xf32, #tpu.memory_space<vmem>>, vector<1x121x128xf32>
    %338 = vector.shape_cast %337 : vector<1x121x128xf32> to vector<121x128xf32>
    %339 = vector.broadcast %336 : vector<1x128xf32> to vector<121x128xf32>
    %340 = arith.mulf %338, %339 : vector<121x128xf32>
    %c0_291 = arith.constant 0 : index
    %c0_292 = arith.constant 0 : index
    %c0_293 = arith.constant 0 : index
    %341 = vector.load %arg10[%c0_291, %c0_292, %c0_293] : memref<1x121x128xf32, #tpu.memory_space<vmem>>, vector<1x121x128xf32>
    %342 = vector.shape_cast %341 : vector<1x121x128xf32> to vector<121x128xf32>
    %343 = vector.shape_cast %340 : vector<121x128xf32> to vector<1x121x128xf32>
    tpu.vector_store %arg10[%c0_291, %c0_292, %c0_293], %343 {strides = array<i32>} : memref<1x121x128xf32, #tpu.memory_space<vmem>>, vector<1x121x128xf32>,
    %c0_294 = arith.constant 0 : index
    %c0_295 = arith.constant 0 : index
    %c2 = arith.constant 2 : index
    %c32 = arith.constant 32 : index
    %344 = vector.load %arg4[%c0_294, %c0_295, %c2, %c32] : memref<1x1x15x352xf32, #tpu.memory_space<vmem>>, vector<1x1x11x128xf32>
    %345 = vector.shape_cast %344 : vector<1x1x11x128xf32> to vector<11x128xf32>
    %c0_296 = arith.constant 0 : index
    %c0_297 = arith.constant 0 : index
    %c0_298 = arith.constant 0 : index
    %346 = vector.load %arg10[%c0_296, %c0_297, %c0_298] : memref<1x121x128xf32, #tpu.memory_space<vmem>>, vector<1x11x128xf32>
    %347 = vector.shape_cast %346 : vector<1x11x128xf32> to vector<11x128xf32>
    %348 = arith.mulf %345, %347 : vector<11x128xf32>
    %cst_299 = arith.constant dense<0.000000e+00> : vector<128xf32>
    %349 = vector.multi_reduction <add>, %348, %cst_299 [0] : vector<11x128xf32> to vector<128xf32>
    %350 = vector.shape_cast %349 : vector<128xf32> to vector<1x128xf32>
    %351 = arith.addf %290, %350 : vector<1x128xf32>
    %c0_300 = arith.constant 0 : index
    %c0_301 = arith.constant 0 : index
    %c2_302 = arith.constant 2 : index
    %c48_303 = arith.constant 48 : index
    %352 = vector.load %arg4[%c0_300, %c0_301, %c2_302, %c48_303] : memref<1x1x15x352xf32, #tpu.memory_space<vmem>>, vector<1x1x11x128xf32>
    %353 = vector.shape_cast %352 : vector<1x1x11x128xf32> to vector<11x128xf32>
    %c0_304 = arith.constant 0 : index
    %c11 = arith.constant 11 : index
    %c0_305 = arith.constant 0 : index
    %354 = vector.load %arg10[%c0_304, %c11, %c0_305] : memref<1x121x128xf32, #tpu.memory_space<vmem>>, vector<1x11x128xf32>
    %355 = vector.shape_cast %354 : vector<1x11x128xf32> to vector<11x128xf32>
    %356 = arith.mulf %353, %355 : vector<11x128xf32>
    %cst_306 = arith.constant dense<0.000000e+00> : vector<128xf32>
    %357 = vector.multi_reduction <add>, %356, %cst_306 [0] : vector<11x128xf32> to vector<128xf32>
    %358 = vector.shape_cast %357 : vector<128xf32> to vector<1x128xf32>
    %359 = arith.addf %298, %358 : vector<1x128xf32>
    %c0_307 = arith.constant 0 : index
    %c0_308 = arith.constant 0 : index
    %c2_309 = arith.constant 2 : index
    %c64_310 = arith.constant 64 : index
    %360 = vector.load %arg4[%c0_307, %c0_308, %c2_309, %c64_310] : memref<1x1x15x352xf32, #tpu.memory_space<vmem>>, vector<1x1x11x128xf32>
    %361 = vector.shape_cast %360 : vector<1x1x11x128xf32> to vector<11x128xf32>
    %c0_311 = arith.constant 0 : index
    %c22 = arith.constant 22 : index
    %c0_312 = arith.constant 0 : index
    %362 = vector.load %arg10[%c0_311, %c22, %c0_312] : memref<1x121x128xf32, #tpu.memory_space<vmem>>, vector<1x11x128xf32>
    %363 = vector.shape_cast %362 : vector<1x11x128xf32> to vector<11x128xf32>
    %364 = arith.mulf %361, %363 : vector<11x128xf32>
    %cst_313 = arith.constant dense<0.000000e+00> : vector<128xf32>
    %365 = vector.multi_reduction <add>, %364, %cst_313 [0] : vector<11x128xf32> to vector<128xf32>
    %366 = vector.shape_cast %365 : vector<128xf32> to vector<1x128xf32>
    %367 = arith.addf %306, %366 : vector<1x128xf32>
    %c0_314 = arith.constant 0 : index
    %c0_315 = arith.constant 0 : index
    %c2_316 = arith.constant 2 : index
    %c80_317 = arith.constant 80 : index
    %368 = vector.load %arg4[%c0_314, %c0_315, %c2_316, %c80_317] : memref<1x1x15x352xf32, #tpu.memory_space<vmem>>, vector<1x1x11x128xf32>
    %369 = vector.shape_cast %368 : vector<1x1x11x128xf32> to vector<11x128xf32>
    %c0_318 = arith.constant 0 : index
    %c33 = arith.constant 33 : index
    %c0_319 = arith.constant 0 : index
    %370 = vector.load %arg10[%c0_318, %c33, %c0_319] : memref<1x121x128xf32, #tpu.memory_space<vmem>>, vector<1x11x128xf32>
    %371 = vector.shape_cast %370 : vector<1x11x128xf32> to vector<11x128xf32>
    %372 = arith.mulf %369, %371 : vector<11x128xf32>
    %cst_320 = arith.constant dense<0.000000e+00> : vector<128xf32>
    %373 = vector.multi_reduction <add>, %372, %cst_320 [0] : vector<11x128xf32> to vector<128xf32>
    %374 = vector.shape_cast %373 : vector<128xf32> to vector<1x128xf32>
    %375 = arith.addf %314, %374 : vector<1x128xf32>
    %c0_321 = arith.constant 0 : index
    %c0_322 = arith.constant 0 : index
    %c2_323 = arith.constant 2 : index
    %c96_324 = arith.constant 96 : index
    %376 = vector.load %arg4[%c0_321, %c0_322, %c2_323, %c96_324] : memref<1x1x15x352xf32, #tpu.memory_space<vmem>>, vector<1x1x11x128xf32>
    %377 = vector.shape_cast %376 : vector<1x1x11x128xf32> to vector<11x128xf32>
    %c0_325 = arith.constant 0 : index
    %c44 = arith.constant 44 : index
    %c0_326 = arith.constant 0 : index
    %378 = vector.load %arg10[%c0_325, %c44, %c0_326] : memref<1x121x128xf32, #tpu.memory_space<vmem>>, vector<1x11x128xf32>
    %379 = vector.shape_cast %378 : vector<1x11x128xf32> to vector<11x128xf32>
    %380 = arith.mulf %377, %379 : vector<11x128xf32>
    %cst_327 = arith.constant dense<0.000000e+00> : vector<128xf32>
    %381 = vector.multi_reduction <add>, %380, %cst_327 [0] : vector<11x128xf32> to vector<128xf32>
    %382 = vector.shape_cast %381 : vector<128xf32> to vector<1x128xf32>
    %383 = arith.addf %351, %382 : vector<1x128xf32>
    %c0_328 = arith.constant 0 : index
    %c0_329 = arith.constant 0 : index
    %c2_330 = arith.constant 2 : index
    %c112_331 = arith.constant 112 : index
    %384 = vector.load %arg4[%c0_328, %c0_329, %c2_330, %c112_331] : memref<1x1x15x352xf32, #tpu.memory_space<vmem>>, vector<1x1x11x128xf32>
    %385 = vector.shape_cast %384 : vector<1x1x11x128xf32> to vector<11x128xf32>
    %c0_332 = arith.constant 0 : index
    %c55 = arith.constant 55 : index
    %c0_333 = arith.constant 0 : index
    %386 = vector.load %arg10[%c0_332, %c55, %c0_333] : memref<1x121x128xf32, #tpu.memory_space<vmem>>, vector<1x11x128xf32>
    %387 = vector.shape_cast %386 : vector<1x11x128xf32> to vector<11x128xf32>
    %388 = arith.mulf %385, %387 : vector<11x128xf32>
    %cst_334 = arith.constant dense<0.000000e+00> : vector<128xf32>
    %389 = vector.multi_reduction <add>, %388, %cst_334 [0] : vector<11x128xf32> to vector<128xf32>
    %390 = vector.shape_cast %389 : vector<128xf32> to vector<1x128xf32>
    %391 = arith.addf %359, %390 : vector<1x128xf32>
    %c0_335 = arith.constant 0 : index
    %c0_336 = arith.constant 0 : index
    %c2_337 = arith.constant 2 : index
    %c128_338 = arith.constant 128 : index
    %392 = vector.load %arg4[%c0_335, %c0_336, %c2_337, %c128_338] : memref<1x1x15x352xf32, #tpu.memory_space<vmem>>, vector<1x1x11x128xf32>
    %393 = vector.shape_cast %392 : vector<1x1x11x128xf32> to vector<11x128xf32>
    %c0_339 = arith.constant 0 : index
    %c66 = arith.constant 66 : index
    %c0_340 = arith.constant 0 : index
    %394 = vector.load %arg10[%c0_339, %c66, %c0_340] : memref<1x121x128xf32, #tpu.memory_space<vmem>>, vector<1x11x128xf32>
    %395 = vector.shape_cast %394 : vector<1x11x128xf32> to vector<11x128xf32>
    %396 = arith.mulf %393, %395 : vector<11x128xf32>
    %cst_341 = arith.constant dense<0.000000e+00> : vector<128xf32>
    %397 = vector.multi_reduction <add>, %396, %cst_341 [0] : vector<11x128xf32> to vector<128xf32>
    %398 = vector.shape_cast %397 : vector<128xf32> to vector<1x128xf32>
    %399 = arith.addf %367, %398 : vector<1x128xf32>
    %c0_342 = arith.constant 0 : index
    %c0_343 = arith.constant 0 : index
    %c2_344 = arith.constant 2 : index
    %c144_345 = arith.constant 144 : index
    %400 = vector.load %arg4[%c0_342, %c0_343, %c2_344, %c144_345] : memref<1x1x15x352xf32, #tpu.memory_space<vmem>>, vector<1x1x11x128xf32>
    %401 = vector.shape_cast %400 : vector<1x1x11x128xf32> to vector<11x128xf32>
    %c0_346 = arith.constant 0 : index
    %c77 = arith.constant 77 : index
    %c0_347 = arith.constant 0 : index
    %402 = vector.load %arg10[%c0_346, %c77, %c0_347] : memref<1x121x128xf32, #tpu.memory_space<vmem>>, vector<1x11x128xf32>
    %403 = vector.shape_cast %402 : vector<1x11x128xf32> to vector<11x128xf32>
    %404 = arith.mulf %401, %403 : vector<11x128xf32>
    %cst_348 = arith.constant dense<0.000000e+00> : vector<128xf32>
    %405 = vector.multi_reduction <add>, %404, %cst_348 [0] : vector<11x128xf32> to vector<128xf32>
    %406 = vector.shape_cast %405 : vector<128xf32> to vector<1x128xf32>
    %407 = arith.addf %375, %406 : vector<1x128xf32>
    %c0_349 = arith.constant 0 : index
    %c0_350 = arith.constant 0 : index
    %c2_351 = arith.constant 2 : index
    %c160_352 = arith.constant 160 : index
    %408 = vector.load %arg4[%c0_349, %c0_350, %c2_351, %c160_352] : memref<1x1x15x352xf32, #tpu.memory_space<vmem>>, vector<1x1x11x128xf32>
    %409 = vector.shape_cast %408 : vector<1x1x11x128xf32> to vector<11x128xf32>
    %c0_353 = arith.constant 0 : index
    %c88 = arith.constant 88 : index
    %c0_354 = arith.constant 0 : index
    %410 = vector.load %arg10[%c0_353, %c88, %c0_354] : memref<1x121x128xf32, #tpu.memory_space<vmem>>, vector<1x11x128xf32>
    %411 = vector.shape_cast %410 : vector<1x11x128xf32> to vector<11x128xf32>
    %412 = arith.mulf %409, %411 : vector<11x128xf32>
    %cst_355 = arith.constant dense<0.000000e+00> : vector<128xf32>
    %413 = vector.multi_reduction <add>, %412, %cst_355 [0] : vector<11x128xf32> to vector<128xf32>
    %414 = vector.shape_cast %413 : vector<128xf32> to vector<1x128xf32>
    %415 = arith.addf %383, %414 : vector<1x128xf32>
    %c0_356 = arith.constant 0 : index
    %c0_357 = arith.constant 0 : index
    %c2_358 = arith.constant 2 : index
    %c176_359 = arith.constant 176 : index
    %416 = vector.load %arg4[%c0_356, %c0_357, %c2_358, %c176_359] : memref<1x1x15x352xf32, #tpu.memory_space<vmem>>, vector<1x1x11x128xf32>
    %417 = vector.shape_cast %416 : vector<1x1x11x128xf32> to vector<11x128xf32>
    %c0_360 = arith.constant 0 : index
    %c99 = arith.constant 99 : index
    %c0_361 = arith.constant 0 : index
    %418 = vector.load %arg10[%c0_360, %c99, %c0_361] : memref<1x121x128xf32, #tpu.memory_space<vmem>>, vector<1x11x128xf32>
    %419 = vector.shape_cast %418 : vector<1x11x128xf32> to vector<11x128xf32>
    %420 = arith.mulf %417, %419 : vector<11x128xf32>
    %cst_362 = arith.constant dense<0.000000e+00> : vector<128xf32>
    %421 = vector.multi_reduction <add>, %420, %cst_362 [0] : vector<11x128xf32> to vector<128xf32>
    %422 = vector.shape_cast %421 : vector<128xf32> to vector<1x128xf32>
    %423 = arith.addf %391, %422 : vector<1x128xf32>
    %c0_363 = arith.constant 0 : index
    %c0_364 = arith.constant 0 : index
    %c2_365 = arith.constant 2 : index
    %c192 = arith.constant 192 : index
    %424 = vector.load %arg4[%c0_363, %c0_364, %c2_365, %c192] : memref<1x1x15x352xf32, #tpu.memory_space<vmem>>, vector<1x1x11x128xf32>
    %425 = vector.shape_cast %424 : vector<1x1x11x128xf32> to vector<11x128xf32>
    %c0_366 = arith.constant 0 : index
    %c110 = arith.constant 110 : index
    %c0_367 = arith.constant 0 : index
    %426 = vector.load %arg10[%c0_366, %c110, %c0_367] : memref<1x121x128xf32, #tpu.memory_space<vmem>>, vector<1x11x128xf32>
    %427 = vector.shape_cast %426 : vector<1x11x128xf32> to vector<11x128xf32>
    %428 = arith.mulf %425, %427 : vector<11x128xf32>
    %cst_368 = arith.constant dense<0.000000e+00> : vector<128xf32>
    %429 = vector.multi_reduction <add>, %428, %cst_368 [0] : vector<11x128xf32> to vector<128xf32>
    %430 = vector.shape_cast %429 : vector<128xf32> to vector<1x128xf32>
    %431 = arith.addf %399, %430 : vector<1x128xf32>
    %c285 = arith.constant 285 : index
    %c0_369 = arith.constant 0 : index
    %432 = vector.load %arg2[%c285, %c0_369] : memref<679x35xf32, #tpu.memory_space<vmem>>, vector<169x35xf32>
    %cst_370 = arith.constant dense<0.000000e+00> : vector<169x128xf32>
    %433 = tpu.matmul %432, %2, %cst_370 {dimension_numbers = #tpu.dot_dimension_numbers<[1], [0], [0], [1], [0, 0, 1, 1], [], []>} : vector<169x35xf32>, vector<35x128xf32>, vector<169x128xf32> -> vector<169x128xf32>
    %c0_371 = arith.constant 0 : index
    %c0_372 = arith.constant 0 : index
    %c0_373 = arith.constant 0 : index
    %434 = vector.load %arg11[%c0_371, %c0_372, %c0_373] : memref<1x169x128xf32, #tpu.memory_space<vmem>>, vector<1x169x128xf32>
    %435 = vector.shape_cast %434 : vector<1x169x128xf32> to vector<169x128xf32>
    %436 = vector.shape_cast %433 : vector<169x128xf32> to vector<1x169x128xf32>
    tpu.vector_store %arg11[%c0_371, %c0_372, %c0_373], %436 {strides = array<i32>} : memref<1x169x128xf32, #tpu.memory_space<vmem>>, vector<1x169x128xf32>,
    %c0_374 = arith.constant 0 : index
    %c0_375 = arith.constant 0 : index
    %c0_376 = arith.constant 0 : index
    %437 = vector.load %arg11[%c0_374, %c0_375, %c0_376] : memref<1x169x128xf32, #tpu.memory_space<vmem>>, vector<1x169x128xf32>
    %438 = vector.shape_cast %437 : vector<1x169x128xf32> to vector<169x128xf32>
    %cst_377 = arith.constant dense<0xFF800000> : vector<128xf32>
    %439 = vector.multi_reduction <maximumf>, %438, %cst_377 [0] : vector<169x128xf32> to vector<128xf32>
    %440 = vector.shape_cast %439 : vector<128xf32> to vector<1x128xf32>
    %c0_378 = arith.constant 0 : index
    %c0_379 = arith.constant 0 : index
    %c0_380 = arith.constant 0 : index
    %441 = vector.load %arg11[%c0_378, %c0_379, %c0_380] : memref<1x169x128xf32, #tpu.memory_space<vmem>>, vector<1x169x128xf32>
    %442 = vector.shape_cast %441 : vector<1x169x128xf32> to vector<169x128xf32>
    %443 = vector.broadcast %440 : vector<1x128xf32> to vector<169x128xf32>
    %444 = arith.subf %442, %443 : vector<169x128xf32>
    %445 = math.exp %444 : vector<169x128xf32>
    %c0_381 = arith.constant 0 : index
    %c0_382 = arith.constant 0 : index
    %c0_383 = arith.constant 0 : index
    %446 = vector.load %arg11[%c0_381, %c0_382, %c0_383] : memref<1x169x128xf32, #tpu.memory_space<vmem>>, vector<1x169x128xf32>
    %447 = vector.shape_cast %446 : vector<1x169x128xf32> to vector<169x128xf32>
    %448 = vector.shape_cast %445 : vector<169x128xf32> to vector<1x169x128xf32>
    tpu.vector_store %arg11[%c0_381, %c0_382, %c0_383], %448 {strides = array<i32>} : memref<1x169x128xf32, #tpu.memory_space<vmem>>, vector<1x169x128xf32>,
    %c0_384 = arith.constant 0 : index
    %c0_385 = arith.constant 0 : index
    %c0_386 = arith.constant 0 : index
    %449 = vector.load %arg11[%c0_384, %c0_385, %c0_386] : memref<1x169x128xf32, #tpu.memory_space<vmem>>, vector<1x169x128xf32>
    %450 = vector.shape_cast %449 : vector<1x169x128xf32> to vector<169x128xf32>
    %cst_387 = arith.constant dense<0.000000e+00> : vector<128xf32>
    %451 = vector.multi_reduction <add>, %450, %cst_387 [0] : vector<169x128xf32> to vector<128xf32>
    %452 = vector.shape_cast %451 : vector<128xf32> to vector<1x128xf32>
    %453 = tpu.reciprocal %452 : vector<1x128xf32> -> vector<1x128xf32>
    %c0_388 = arith.constant 0 : index
    %c0_389 = arith.constant 0 : index
    %c0_390 = arith.constant 0 : index
    %454 = vector.load %arg11[%c0_388, %c0_389, %c0_390] : memref<1x169x128xf32, #tpu.memory_space<vmem>>, vector<1x169x128xf32>
    %455 = vector.shape_cast %454 : vector<1x169x128xf32> to vector<169x128xf32>
    %456 = vector.broadcast %453 : vector<1x128xf32> to vector<169x128xf32>
    %457 = arith.mulf %455, %456 : vector<169x128xf32>
    %c0_391 = arith.constant 0 : index
    %c0_392 = arith.constant 0 : index
    %c0_393 = arith.constant 0 : index
    %458 = vector.load %arg11[%c0_391, %c0_392, %c0_393] : memref<1x169x128xf32, #tpu.memory_space<vmem>>, vector<1x169x128xf32>
    %459 = vector.shape_cast %458 : vector<1x169x128xf32> to vector<169x128xf32>
    %460 = vector.shape_cast %457 : vector<169x128xf32> to vector<1x169x128xf32>
    tpu.vector_store %arg11[%c0_391, %c0_392, %c0_393], %460 {strides = array<i32>} : memref<1x169x128xf32, #tpu.memory_space<vmem>>, vector<1x169x128xf32>,
    %c0_394 = arith.constant 0 : index
    %c0_395 = arith.constant 0 : index
    %c1 = arith.constant 1 : index
    %c16 = arith.constant 16 : index
    %461 = vector.load %arg4[%c0_394, %c0_395, %c1, %c16] : memref<1x1x15x352xf32, #tpu.memory_space<vmem>>, vector<1x1x13x128xf32>
    %462 = vector.shape_cast %461 : vector<1x1x13x128xf32> to vector<13x128xf32>
    %c0_396 = arith.constant 0 : index
    %c0_397 = arith.constant 0 : index
    %c0_398 = arith.constant 0 : index
    %463 = vector.load %arg11[%c0_396, %c0_397, %c0_398] : memref<1x169x128xf32, #tpu.memory_space<vmem>>, vector<1x13x128xf32>
    %464 = vector.shape_cast %463 : vector<1x13x128xf32> to vector<13x128xf32>
    %465 = arith.mulf %462, %464 : vector<13x128xf32>
    %cst_399 = arith.constant dense<0.000000e+00> : vector<128xf32>
    %466 = vector.multi_reduction <add>, %465, %cst_399 [0] : vector<13x128xf32> to vector<128xf32>
    %467 = vector.shape_cast %466 : vector<128xf32> to vector<1x128xf32>
    %468 = arith.addf %407, %467 : vector<1x128xf32>
    %c0_400 = arith.constant 0 : index
    %c0_401 = arith.constant 0 : index
    %c1_402 = arith.constant 1 : index
    %c32_403 = arith.constant 32 : index
    %469 = vector.load %arg4[%c0_400, %c0_401, %c1_402, %c32_403] : memref<1x1x15x352xf32, #tpu.memory_space<vmem>>, vector<1x1x13x128xf32>
    %470 = vector.shape_cast %469 : vector<1x1x13x128xf32> to vector<13x128xf32>
    %c0_404 = arith.constant 0 : index
    %c13 = arith.constant 13 : index
    %c0_405 = arith.constant 0 : index
    %471 = vector.load %arg11[%c0_404, %c13, %c0_405] : memref<1x169x128xf32, #tpu.memory_space<vmem>>, vector<1x13x128xf32>
    %472 = vector.shape_cast %471 : vector<1x13x128xf32> to vector<13x128xf32>
    %473 = arith.mulf %470, %472 : vector<13x128xf32>
    %cst_406 = arith.constant dense<0.000000e+00> : vector<128xf32>
    %474 = vector.multi_reduction <add>, %473, %cst_406 [0] : vector<13x128xf32> to vector<128xf32>
    %475 = vector.shape_cast %474 : vector<128xf32> to vector<1x128xf32>
    %476 = arith.addf %415, %475 : vector<1x128xf32>
    %c0_407 = arith.constant 0 : index
    %c0_408 = arith.constant 0 : index
    %c1_409 = arith.constant 1 : index
    %c48_410 = arith.constant 48 : index
    %477 = vector.load %arg4[%c0_407, %c0_408, %c1_409, %c48_410] : memref<1x1x15x352xf32, #tpu.memory_space<vmem>>, vector<1x1x13x128xf32>
    %478 = vector.shape_cast %477 : vector<1x1x13x128xf32> to vector<13x128xf32>
    %c0_411 = arith.constant 0 : index
    %c26 = arith.constant 26 : index
    %c0_412 = arith.constant 0 : index
    %479 = vector.load %arg11[%c0_411, %c26, %c0_412] : memref<1x169x128xf32, #tpu.memory_space<vmem>>, vector<1x13x128xf32>
    %480 = vector.shape_cast %479 : vector<1x13x128xf32> to vector<13x128xf32>
    %481 = arith.mulf %478, %480 : vector<13x128xf32>
    %cst_413 = arith.constant dense<0.000000e+00> : vector<128xf32>
    %482 = vector.multi_reduction <add>, %481, %cst_413 [0] : vector<13x128xf32> to vector<128xf32>
    %483 = vector.shape_cast %482 : vector<128xf32> to vector<1x128xf32>
    %484 = arith.addf %423, %483 : vector<1x128xf32>
    %c0_414 = arith.constant 0 : index
    %c0_415 = arith.constant 0 : index
    %c1_416 = arith.constant 1 : index
    %c64_417 = arith.constant 64 : index
    %485 = vector.load %arg4[%c0_414, %c0_415, %c1_416, %c64_417] : memref<1x1x15x352xf32, #tpu.memory_space<vmem>>, vector<1x1x13x128xf32>
    %486 = vector.shape_cast %485 : vector<1x1x13x128xf32> to vector<13x128xf32>
    %c0_418 = arith.constant 0 : index
    %c39 = arith.constant 39 : index
    %c0_419 = arith.constant 0 : index
    %487 = vector.load %arg11[%c0_418, %c39, %c0_419] : memref<1x169x128xf32, #tpu.memory_space<vmem>>, vector<1x13x128xf32>
    %488 = vector.shape_cast %487 : vector<1x13x128xf32> to vector<13x128xf32>
    %489 = arith.mulf %486, %488 : vector<13x128xf32>
    %cst_420 = arith.constant dense<0.000000e+00> : vector<128xf32>
    %490 = vector.multi_reduction <add>, %489, %cst_420 [0] : vector<13x128xf32> to vector<128xf32>
    %491 = vector.shape_cast %490 : vector<128xf32> to vector<1x128xf32>
    %492 = arith.addf %431, %491 : vector<1x128xf32>
    %c0_421 = arith.constant 0 : index
    %c0_422 = arith.constant 0 : index
    %c1_423 = arith.constant 1 : index
    %c80_424 = arith.constant 80 : index
    %493 = vector.load %arg4[%c0_421, %c0_422, %c1_423, %c80_424] : memref<1x1x15x352xf32, #tpu.memory_space<vmem>>, vector<1x1x13x128xf32>
    %494 = vector.shape_cast %493 : vector<1x1x13x128xf32> to vector<13x128xf32>
    %c0_425 = arith.constant 0 : index
    %c52 = arith.constant 52 : index
    %c0_426 = arith.constant 0 : index
    %495 = vector.load %arg11[%c0_425, %c52, %c0_426] : memref<1x169x128xf32, #tpu.memory_space<vmem>>, vector<1x13x128xf32>
    %496 = vector.shape_cast %495 : vector<1x13x128xf32> to vector<13x128xf32>
    %497 = arith.mulf %494, %496 : vector<13x128xf32>
    %cst_427 = arith.constant dense<0.000000e+00> : vector<128xf32>
    %498 = vector.multi_reduction <add>, %497, %cst_427 [0] : vector<13x128xf32> to vector<128xf32>
    %499 = vector.shape_cast %498 : vector<128xf32> to vector<1x128xf32>
    %500 = arith.addf %468, %499 : vector<1x128xf32>
    %c0_428 = arith.constant 0 : index
    %c0_429 = arith.constant 0 : index
    %c1_430 = arith.constant 1 : index
    %c96_431 = arith.constant 96 : index
    %501 = vector.load %arg4[%c0_428, %c0_429, %c1_430, %c96_431] : memref<1x1x15x352xf32, #tpu.memory_space<vmem>>, vector<1x1x13x128xf32>
    %502 = vector.shape_cast %501 : vector<1x1x13x128xf32> to vector<13x128xf32>
    %c0_432 = arith.constant 0 : index
    %c65 = arith.constant 65 : index
    %c0_433 = arith.constant 0 : index
    %503 = vector.load %arg11[%c0_432, %c65, %c0_433] : memref<1x169x128xf32, #tpu.memory_space<vmem>>, vector<1x13x128xf32>
    %504 = vector.shape_cast %503 : vector<1x13x128xf32> to vector<13x128xf32>
    %505 = arith.mulf %502, %504 : vector<13x128xf32>
    %cst_434 = arith.constant dense<0.000000e+00> : vector<128xf32>
    %506 = vector.multi_reduction <add>, %505, %cst_434 [0] : vector<13x128xf32> to vector<128xf32>
    %507 = vector.shape_cast %506 : vector<128xf32> to vector<1x128xf32>
    %508 = arith.addf %476, %507 : vector<1x128xf32>
    %c0_435 = arith.constant 0 : index
    %c0_436 = arith.constant 0 : index
    %c1_437 = arith.constant 1 : index
    %c112_438 = arith.constant 112 : index
    %509 = vector.load %arg4[%c0_435, %c0_436, %c1_437, %c112_438] : memref<1x1x15x352xf32, #tpu.memory_space<vmem>>, vector<1x1x13x128xf32>
    %510 = vector.shape_cast %509 : vector<1x1x13x128xf32> to vector<13x128xf32>
    %c0_439 = arith.constant 0 : index
    %c78 = arith.constant 78 : index
    %c0_440 = arith.constant 0 : index
    %511 = vector.load %arg11[%c0_439, %c78, %c0_440] : memref<1x169x128xf32, #tpu.memory_space<vmem>>, vector<1x13x128xf32>
    %512 = vector.shape_cast %511 : vector<1x13x128xf32> to vector<13x128xf32>
    %513 = arith.mulf %510, %512 : vector<13x128xf32>
    %cst_441 = arith.constant dense<0.000000e+00> : vector<128xf32>
    %514 = vector.multi_reduction <add>, %513, %cst_441 [0] : vector<13x128xf32> to vector<128xf32>
    %515 = vector.shape_cast %514 : vector<128xf32> to vector<1x128xf32>
    %516 = arith.addf %484, %515 : vector<1x128xf32>
    %c0_442 = arith.constant 0 : index
    %c0_443 = arith.constant 0 : index
    %c1_444 = arith.constant 1 : index
    %c128_445 = arith.constant 128 : index
    %517 = vector.load %arg4[%c0_442, %c0_443, %c1_444, %c128_445] : memref<1x1x15x352xf32, #tpu.memory_space<vmem>>, vector<1x1x13x128xf32>
    %518 = vector.shape_cast %517 : vector<1x1x13x128xf32> to vector<13x128xf32>
    %c0_446 = arith.constant 0 : index
    %c91 = arith.constant 91 : index
    %c0_447 = arith.constant 0 : index
    %519 = vector.load %arg11[%c0_446, %c91, %c0_447] : memref<1x169x128xf32, #tpu.memory_space<vmem>>, vector<1x13x128xf32>
    %520 = vector.shape_cast %519 : vector<1x13x128xf32> to vector<13x128xf32>
    %521 = arith.mulf %518, %520 : vector<13x128xf32>
    %cst_448 = arith.constant dense<0.000000e+00> : vector<128xf32>
    %522 = vector.multi_reduction <add>, %521, %cst_448 [0] : vector<13x128xf32> to vector<128xf32>
    %523 = vector.shape_cast %522 : vector<128xf32> to vector<1x128xf32>
    %524 = arith.addf %492, %523 : vector<1x128xf32>
    %c0_449 = arith.constant 0 : index
    %c0_450 = arith.constant 0 : index
    %c1_451 = arith.constant 1 : index
    %c144_452 = arith.constant 144 : index
    %525 = vector.load %arg4[%c0_449, %c0_450, %c1_451, %c144_452] : memref<1x1x15x352xf32, #tpu.memory_space<vmem>>, vector<1x1x13x128xf32>
    %526 = vector.shape_cast %525 : vector<1x1x13x128xf32> to vector<13x128xf32>
    %c0_453 = arith.constant 0 : index
    %c104 = arith.constant 104 : index
    %c0_454 = arith.constant 0 : index
    %527 = vector.load %arg11[%c0_453, %c104, %c0_454] : memref<1x169x128xf32, #tpu.memory_space<vmem>>, vector<1x13x128xf32>
    %528 = vector.shape_cast %527 : vector<1x13x128xf32> to vector<13x128xf32>
    %529 = arith.mulf %526, %528 : vector<13x128xf32>
    %cst_455 = arith.constant dense<0.000000e+00> : vector<128xf32>
    %530 = vector.multi_reduction <add>, %529, %cst_455 [0] : vector<13x128xf32> to vector<128xf32>
    %531 = vector.shape_cast %530 : vector<128xf32> to vector<1x128xf32>
    %532 = arith.addf %500, %531 : vector<1x128xf32>
    %c0_456 = arith.constant 0 : index
    %c0_457 = arith.constant 0 : index
    %c1_458 = arith.constant 1 : index
    %c160_459 = arith.constant 160 : index
    %533 = vector.load %arg4[%c0_456, %c0_457, %c1_458, %c160_459] : memref<1x1x15x352xf32, #tpu.memory_space<vmem>>, vector<1x1x13x128xf32>
    %534 = vector.shape_cast %533 : vector<1x1x13x128xf32> to vector<13x128xf32>
    %c0_460 = arith.constant 0 : index
    %c117 = arith.constant 117 : index
    %c0_461 = arith.constant 0 : index
    %535 = vector.load %arg11[%c0_460, %c117, %c0_461] : memref<1x169x128xf32, #tpu.memory_space<vmem>>, vector<1x13x128xf32>
    %536 = vector.shape_cast %535 : vector<1x13x128xf32> to vector<13x128xf32>
    %537 = arith.mulf %534, %536 : vector<13x128xf32>
    %cst_462 = arith.constant dense<0.000000e+00> : vector<128xf32>
    %538 = vector.multi_reduction <add>, %537, %cst_462 [0] : vector<13x128xf32> to vector<128xf32>
    %539 = vector.shape_cast %538 : vector<128xf32> to vector<1x128xf32>
    %540 = arith.addf %508, %539 : vector<1x128xf32>
    %c0_463 = arith.constant 0 : index
    %c0_464 = arith.constant 0 : index
    %c1_465 = arith.constant 1 : index
    %c176_466 = arith.constant 176 : index
    %541 = vector.load %arg4[%c0_463, %c0_464, %c1_465, %c176_466] : memref<1x1x15x352xf32, #tpu.memory_space<vmem>>, vector<1x1x13x128xf32>
    %542 = vector.shape_cast %541 : vector<1x1x13x128xf32> to vector<13x128xf32>
    %c0_467 = arith.constant 0 : index
    %c130 = arith.constant 130 : index
    %c0_468 = arith.constant 0 : index
    %543 = vector.load %arg11[%c0_467, %c130, %c0_468] : memref<1x169x128xf32, #tpu.memory_space<vmem>>, vector<1x13x128xf32>
    %544 = vector.shape_cast %543 : vector<1x13x128xf32> to vector<13x128xf32>
    %545 = arith.mulf %542, %544 : vector<13x128xf32>
    %cst_469 = arith.constant dense<0.000000e+00> : vector<128xf32>
    %546 = vector.multi_reduction <add>, %545, %cst_469 [0] : vector<13x128xf32> to vector<128xf32>
    %547 = vector.shape_cast %546 : vector<128xf32> to vector<1x128xf32>
    %548 = arith.addf %516, %547 : vector<1x128xf32>
    %c0_470 = arith.constant 0 : index
    %c0_471 = arith.constant 0 : index
    %c1_472 = arith.constant 1 : index
    %c192_473 = arith.constant 192 : index
    %549 = vector.load %arg4[%c0_470, %c0_471, %c1_472, %c192_473] : memref<1x1x15x352xf32, #tpu.memory_space<vmem>>, vector<1x1x13x128xf32>
    %550 = vector.shape_cast %549 : vector<1x1x13x128xf32> to vector<13x128xf32>
    %c0_474 = arith.constant 0 : index
    %c143 = arith.constant 143 : index
    %c0_475 = arith.constant 0 : index
    %551 = vector.load %arg11[%c0_474, %c143, %c0_475] : memref<1x169x128xf32, #tpu.memory_space<vmem>>, vector<1x13x128xf32>
    %552 = vector.shape_cast %551 : vector<1x13x128xf32> to vector<13x128xf32>
    %553 = arith.mulf %550, %552 : vector<13x128xf32>
    %cst_476 = arith.constant dense<0.000000e+00> : vector<128xf32>
    %554 = vector.multi_reduction <add>, %553, %cst_476 [0] : vector<13x128xf32> to vector<128xf32>
    %555 = vector.shape_cast %554 : vector<128xf32> to vector<1x128xf32>
    %556 = arith.addf %524, %555 : vector<1x128xf32>
    %c0_477 = arith.constant 0 : index
    %c0_478 = arith.constant 0 : index
    %c1_479 = arith.constant 1 : index
    %c208 = arith.constant 208 : index
    %557 = vector.load %arg4[%c0_477, %c0_478, %c1_479, %c208] : memref<1x1x15x352xf32, #tpu.memory_space<vmem>>, vector<1x1x13x128xf32>
    %558 = vector.shape_cast %557 : vector<1x1x13x128xf32> to vector<13x128xf32>
    %c0_480 = arith.constant 0 : index
    %c156 = arith.constant 156 : index
    %c0_481 = arith.constant 0 : index
    %559 = vector.load %arg11[%c0_480, %c156, %c0_481] : memref<1x169x128xf32, #tpu.memory_space<vmem>>, vector<1x13x128xf32>
    %560 = vector.shape_cast %559 : vector<1x13x128xf32> to vector<13x128xf32>
    %561 = arith.mulf %558, %560 : vector<13x128xf32>
    %cst_482 = arith.constant dense<0.000000e+00> : vector<128xf32>
    %562 = vector.multi_reduction <add>, %561, %cst_482 [0] : vector<13x128xf32> to vector<128xf32>
    %563 = vector.shape_cast %562 : vector<128xf32> to vector<1x128xf32>
    %564 = arith.addf %532, %563 : vector<1x128xf32>
    %c454 = arith.constant 454 : index
    %c0_483 = arith.constant 0 : index
    %565 = vector.load %arg2[%c454, %c0_483] : memref<679x35xf32, #tpu.memory_space<vmem>>, vector<225x35xf32>
    %cst_484 = arith.constant dense<0.000000e+00> : vector<225x128xf32>
    %566 = tpu.matmul %565, %2, %cst_484 {dimension_numbers = #tpu.dot_dimension_numbers<[1], [0], [0], [1], [0, 0, 1, 1], [], []>} : vector<225x35xf32>, vector<35x128xf32>, vector<225x128xf32> -> vector<225x128xf32>
    %c0_485 = arith.constant 0 : index
    %c0_486 = arith.constant 0 : index
    %c0_487 = arith.constant 0 : index
    %567 = vector.load %arg12[%c0_485, %c0_486, %c0_487] : memref<1x225x128xf32, #tpu.memory_space<vmem>>, vector<1x225x128xf32>
    %568 = vector.shape_cast %567 : vector<1x225x128xf32> to vector<225x128xf32>
    %569 = vector.shape_cast %566 : vector<225x128xf32> to vector<1x225x128xf32>
    tpu.vector_store %arg12[%c0_485, %c0_486, %c0_487], %569 {strides = array<i32>} : memref<1x225x128xf32, #tpu.memory_space<vmem>>, vector<1x225x128xf32>,
    %c0_488 = arith.constant 0 : index
    %c0_489 = arith.constant 0 : index
    %c0_490 = arith.constant 0 : index
    %570 = vector.load %arg12[%c0_488, %c0_489, %c0_490] : memref<1x225x128xf32, #tpu.memory_space<vmem>>, vector<1x225x128xf32>
    %571 = vector.shape_cast %570 : vector<1x225x128xf32> to vector<225x128xf32>
    %cst_491 = arith.constant dense<0xFF800000> : vector<128xf32>
    %572 = vector.multi_reduction <maximumf>, %571, %cst_491 [0] : vector<225x128xf32> to vector<128xf32>
    %573 = vector.shape_cast %572 : vector<128xf32> to vector<1x128xf32>
    %c0_492 = arith.constant 0 : index
    %c0_493 = arith.constant 0 : index
    %c0_494 = arith.constant 0 : index
    %574 = vector.load %arg12[%c0_492, %c0_493, %c0_494] : memref<1x225x128xf32, #tpu.memory_space<vmem>>, vector<1x225x128xf32>
    %575 = vector.shape_cast %574 : vector<1x225x128xf32> to vector<225x128xf32>
    %576 = vector.broadcast %573 : vector<1x128xf32> to vector<225x128xf32>
    %577 = arith.subf %575, %576 : vector<225x128xf32>
    %578 = math.exp %577 : vector<225x128xf32>
    %c0_495 = arith.constant 0 : index
    %c0_496 = arith.constant 0 : index
    %c0_497 = arith.constant 0 : index
    %579 = vector.load %arg12[%c0_495, %c0_496, %c0_497] : memref<1x225x128xf32, #tpu.memory_space<vmem>>, vector<1x225x128xf32>
    %580 = vector.shape_cast %579 : vector<1x225x128xf32> to vector<225x128xf32>
    %581 = vector.shape_cast %578 : vector<225x128xf32> to vector<1x225x128xf32>
    tpu.vector_store %arg12[%c0_495, %c0_496, %c0_497], %581 {strides = array<i32>} : memref<1x225x128xf32, #tpu.memory_space<vmem>>, vector<1x225x128xf32>,
    %c0_498 = arith.constant 0 : index
    %c0_499 = arith.constant 0 : index
    %c0_500 = arith.constant 0 : index
    %582 = vector.load %arg12[%c0_498, %c0_499, %c0_500] : memref<1x225x128xf32, #tpu.memory_space<vmem>>, vector<1x225x128xf32>
    %583 = vector.shape_cast %582 : vector<1x225x128xf32> to vector<225x128xf32>
    %cst_501 = arith.constant dense<0.000000e+00> : vector<128xf32>
    %584 = vector.multi_reduction <add>, %583, %cst_501 [0] : vector<225x128xf32> to vector<128xf32>
    %585 = vector.shape_cast %584 : vector<128xf32> to vector<1x128xf32>
    %586 = tpu.reciprocal %585 : vector<1x128xf32> -> vector<1x128xf32>
    %c0_502 = arith.constant 0 : index
    %c0_503 = arith.constant 0 : index
    %c0_504 = arith.constant 0 : index
    %587 = vector.load %arg12[%c0_502, %c0_503, %c0_504] : memref<1x225x128xf32, #tpu.memory_space<vmem>>, vector<1x225x128xf32>
    %588 = vector.shape_cast %587 : vector<1x225x128xf32> to vector<225x128xf32>
    %589 = vector.broadcast %586 : vector<1x128xf32> to vector<225x128xf32>
    %590 = arith.mulf %588, %589 : vector<225x128xf32>
    %c0_505 = arith.constant 0 : index
    %c0_506 = arith.constant 0 : index
    %c0_507 = arith.constant 0 : index
    %591 = vector.load %arg12[%c0_505, %c0_506, %c0_507] : memref<1x225x128xf32, #tpu.memory_space<vmem>>, vector<1x225x128xf32>
    %592 = vector.shape_cast %591 : vector<1x225x128xf32> to vector<225x128xf32>
    %593 = vector.shape_cast %590 : vector<225x128xf32> to vector<1x225x128xf32>
    tpu.vector_store %arg12[%c0_505, %c0_506, %c0_507], %593 {strides = array<i32>} : memref<1x225x128xf32, #tpu.memory_space<vmem>>, vector<1x225x128xf32>,
    %c0_508 = arith.constant 0 : index
    %c0_509 = arith.constant 0 : index
    %c0_510 = arith.constant 0 : index
    %c0_511 = arith.constant 0 : index
    %594 = vector.load %arg4[%c0_508, %c0_509, %c0_510, %c0_511] : memref<1x1x15x352xf32, #tpu.memory_space<vmem>>, vector<1x1x15x128xf32>
    %595 = vector.shape_cast %594 : vector<1x1x15x128xf32> to vector<15x128xf32>
    %c0_512 = arith.constant 0 : index
    %c0_513 = arith.constant 0 : index
    %c0_514 = arith.constant 0 : index
    %596 = vector.load %arg12[%c0_512, %c0_513, %c0_514] : memref<1x225x128xf32, #tpu.memory_space<vmem>>, vector<1x15x128xf32>
    %597 = vector.shape_cast %596 : vector<1x15x128xf32> to vector<15x128xf32>
    %598 = arith.mulf %595, %597 : vector<15x128xf32>
    %cst_515 = arith.constant dense<0.000000e+00> : vector<128xf32>
    %599 = vector.multi_reduction <add>, %598, %cst_515 [0] : vector<15x128xf32> to vector<128xf32>
    %600 = vector.shape_cast %599 : vector<128xf32> to vector<1x128xf32>
    %601 = arith.addf %540, %600 : vector<1x128xf32>
    %c0_516 = arith.constant 0 : index
    %c0_517 = arith.constant 0 : index
    %c0_518 = arith.constant 0 : index
    %c16_519 = arith.constant 16 : index
    %602 = vector.load %arg4[%c0_516, %c0_517, %c0_518, %c16_519] : memref<1x1x15x352xf32, #tpu.memory_space<vmem>>, vector<1x1x15x128xf32>
    %603 = vector.shape_cast %602 : vector<1x1x15x128xf32> to vector<15x128xf32>
    %c0_520 = arith.constant 0 : index
    %c15_521 = arith.constant 15 : index
    %c0_522 = arith.constant 0 : index
    %604 = vector.load %arg12[%c0_520, %c15_521, %c0_522] : memref<1x225x128xf32, #tpu.memory_space<vmem>>, vector<1x15x128xf32>
    %605 = vector.shape_cast %604 : vector<1x15x128xf32> to vector<15x128xf32>
    %606 = arith.mulf %603, %605 : vector<15x128xf32>
    %cst_523 = arith.constant dense<0.000000e+00> : vector<128xf32>
    %607 = vector.multi_reduction <add>, %606, %cst_523 [0] : vector<15x128xf32> to vector<128xf32>
    %608 = vector.shape_cast %607 : vector<128xf32> to vector<1x128xf32>
    %609 = arith.addf %548, %608 : vector<1x128xf32>
    %c0_524 = arith.constant 0 : index
    %c0_525 = arith.constant 0 : index
    %c0_526 = arith.constant 0 : index
    %c32_527 = arith.constant 32 : index
    %610 = vector.load %arg4[%c0_524, %c0_525, %c0_526, %c32_527] : memref<1x1x15x352xf32, #tpu.memory_space<vmem>>, vector<1x1x15x128xf32>
    %611 = vector.shape_cast %610 : vector<1x1x15x128xf32> to vector<15x128xf32>
    %c0_528 = arith.constant 0 : index
    %c30 = arith.constant 30 : index
    %c0_529 = arith.constant 0 : index
    %612 = vector.load %arg12[%c0_528, %c30, %c0_529] : memref<1x225x128xf32, #tpu.memory_space<vmem>>, vector<1x15x128xf32>
    %613 = vector.shape_cast %612 : vector<1x15x128xf32> to vector<15x128xf32>
    %614 = arith.mulf %611, %613 : vector<15x128xf32>
    %cst_530 = arith.constant dense<0.000000e+00> : vector<128xf32>
    %615 = vector.multi_reduction <add>, %614, %cst_530 [0] : vector<15x128xf32> to vector<128xf32>
    %616 = vector.shape_cast %615 : vector<128xf32> to vector<1x128xf32>
    %617 = arith.addf %556, %616 : vector<1x128xf32>
    %c0_531 = arith.constant 0 : index
    %c0_532 = arith.constant 0 : index
    %c0_533 = arith.constant 0 : index
    %c48_534 = arith.constant 48 : index
    %618 = vector.load %arg4[%c0_531, %c0_532, %c0_533, %c48_534] : memref<1x1x15x352xf32, #tpu.memory_space<vmem>>, vector<1x1x15x128xf32>
    %619 = vector.shape_cast %618 : vector<1x1x15x128xf32> to vector<15x128xf32>
    %c0_535 = arith.constant 0 : index
    %c45_536 = arith.constant 45 : index
    %c0_537 = arith.constant 0 : index
    %620 = vector.load %arg12[%c0_535, %c45_536, %c0_537] : memref<1x225x128xf32, #tpu.memory_space<vmem>>, vector<1x15x128xf32>
    %621 = vector.shape_cast %620 : vector<1x15x128xf32> to vector<15x128xf32>
    %622 = arith.mulf %619, %621 : vector<15x128xf32>
    %cst_538 = arith.constant dense<0.000000e+00> : vector<128xf32>
    %623 = vector.multi_reduction <add>, %622, %cst_538 [0] : vector<15x128xf32> to vector<128xf32>
    %624 = vector.shape_cast %623 : vector<128xf32> to vector<1x128xf32>
    %625 = arith.addf %564, %624 : vector<1x128xf32>
    %c0_539 = arith.constant 0 : index
    %c0_540 = arith.constant 0 : index
    %c0_541 = arith.constant 0 : index
    %c64_542 = arith.constant 64 : index
    %626 = vector.load %arg4[%c0_539, %c0_540, %c0_541, %c64_542] : memref<1x1x15x352xf32, #tpu.memory_space<vmem>>, vector<1x1x15x128xf32>
    %627 = vector.shape_cast %626 : vector<1x1x15x128xf32> to vector<15x128xf32>
    %c0_543 = arith.constant 0 : index
    %c60 = arith.constant 60 : index
    %c0_544 = arith.constant 0 : index
    %628 = vector.load %arg12[%c0_543, %c60, %c0_544] : memref<1x225x128xf32, #tpu.memory_space<vmem>>, vector<1x15x128xf32>
    %629 = vector.shape_cast %628 : vector<1x15x128xf32> to vector<15x128xf32>
    %630 = arith.mulf %627, %629 : vector<15x128xf32>
    %cst_545 = arith.constant dense<0.000000e+00> : vector<128xf32>
    %631 = vector.multi_reduction <add>, %630, %cst_545 [0] : vector<15x128xf32> to vector<128xf32>
    %632 = vector.shape_cast %631 : vector<128xf32> to vector<1x128xf32>
    %633 = arith.addf %601, %632 : vector<1x128xf32>
    %c0_546 = arith.constant 0 : index
    %c0_547 = arith.constant 0 : index
    %c0_548 = arith.constant 0 : index
    %c80_549 = arith.constant 80 : index
    %634 = vector.load %arg4[%c0_546, %c0_547, %c0_548, %c80_549] : memref<1x1x15x352xf32, #tpu.memory_space<vmem>>, vector<1x1x15x128xf32>
    %635 = vector.shape_cast %634 : vector<1x1x15x128xf32> to vector<15x128xf32>
    %c0_550 = arith.constant 0 : index
    %c75 = arith.constant 75 : index
    %c0_551 = arith.constant 0 : index
    %636 = vector.load %arg12[%c0_550, %c75, %c0_551] : memref<1x225x128xf32, #tpu.memory_space<vmem>>, vector<1x15x128xf32>
    %637 = vector.shape_cast %636 : vector<1x15x128xf32> to vector<15x128xf32>
    %638 = arith.mulf %635, %637 : vector<15x128xf32>
    %cst_552 = arith.constant dense<0.000000e+00> : vector<128xf32>
    %639 = vector.multi_reduction <add>, %638, %cst_552 [0] : vector<15x128xf32> to vector<128xf32>
    %640 = vector.shape_cast %639 : vector<128xf32> to vector<1x128xf32>
    %641 = arith.addf %609, %640 : vector<1x128xf32>
    %c0_553 = arith.constant 0 : index
    %c0_554 = arith.constant 0 : index
    %c0_555 = arith.constant 0 : index
    %c96_556 = arith.constant 96 : index
    %642 = vector.load %arg4[%c0_553, %c0_554, %c0_555, %c96_556] : memref<1x1x15x352xf32, #tpu.memory_space<vmem>>, vector<1x1x15x128xf32>
    %643 = vector.shape_cast %642 : vector<1x1x15x128xf32> to vector<15x128xf32>
    %c0_557 = arith.constant 0 : index
    %c90 = arith.constant 90 : index
    %c0_558 = arith.constant 0 : index
    %644 = vector.load %arg12[%c0_557, %c90, %c0_558] : memref<1x225x128xf32, #tpu.memory_space<vmem>>, vector<1x15x128xf32>
    %645 = vector.shape_cast %644 : vector<1x15x128xf32> to vector<15x128xf32>
    %646 = arith.mulf %643, %645 : vector<15x128xf32>
    %cst_559 = arith.constant dense<0.000000e+00> : vector<128xf32>
    %647 = vector.multi_reduction <add>, %646, %cst_559 [0] : vector<15x128xf32> to vector<128xf32>
    %648 = vector.shape_cast %647 : vector<128xf32> to vector<1x128xf32>
    %649 = arith.addf %617, %648 : vector<1x128xf32>
    %c0_560 = arith.constant 0 : index
    %c0_561 = arith.constant 0 : index
    %c0_562 = arith.constant 0 : index
    %c112_563 = arith.constant 112 : index
    %650 = vector.load %arg4[%c0_560, %c0_561, %c0_562, %c112_563] : memref<1x1x15x352xf32, #tpu.memory_space<vmem>>, vector<1x1x15x128xf32>
    %651 = vector.shape_cast %650 : vector<1x1x15x128xf32> to vector<15x128xf32>
    %c0_564 = arith.constant 0 : index
    %c105 = arith.constant 105 : index
    %c0_565 = arith.constant 0 : index
    %652 = vector.load %arg12[%c0_564, %c105, %c0_565] : memref<1x225x128xf32, #tpu.memory_space<vmem>>, vector<1x15x128xf32>
    %653 = vector.shape_cast %652 : vector<1x15x128xf32> to vector<15x128xf32>
    %654 = arith.mulf %651, %653 : vector<15x128xf32>
    %cst_566 = arith.constant dense<0.000000e+00> : vector<128xf32>
    %655 = vector.multi_reduction <add>, %654, %cst_566 [0] : vector<15x128xf32> to vector<128xf32>
    %656 = vector.shape_cast %655 : vector<128xf32> to vector<1x128xf32>
    %657 = arith.addf %625, %656 : vector<1x128xf32>
    %c0_567 = arith.constant 0 : index
    %c0_568 = arith.constant 0 : index
    %c0_569 = arith.constant 0 : index
    %c128_570 = arith.constant 128 : index
    %658 = vector.load %arg4[%c0_567, %c0_568, %c0_569, %c128_570] : memref<1x1x15x352xf32, #tpu.memory_space<vmem>>, vector<1x1x15x128xf32>
    %659 = vector.shape_cast %658 : vector<1x1x15x128xf32> to vector<15x128xf32>
    %c0_571 = arith.constant 0 : index
    %c120 = arith.constant 120 : index
    %c0_572 = arith.constant 0 : index
    %660 = vector.load %arg12[%c0_571, %c120, %c0_572] : memref<1x225x128xf32, #tpu.memory_space<vmem>>, vector<1x15x128xf32>
    %661 = vector.shape_cast %660 : vector<1x15x128xf32> to vector<15x128xf32>
    %662 = arith.mulf %659, %661 : vector<15x128xf32>
    %cst_573 = arith.constant dense<0.000000e+00> : vector<128xf32>
    %663 = vector.multi_reduction <add>, %662, %cst_573 [0] : vector<15x128xf32> to vector<128xf32>
    %664 = vector.shape_cast %663 : vector<128xf32> to vector<1x128xf32>
    %665 = arith.addf %633, %664 : vector<1x128xf32>
    %c0_574 = arith.constant 0 : index
    %c0_575 = arith.constant 0 : index
    %c0_576 = arith.constant 0 : index
    %c144_577 = arith.constant 144 : index
    %666 = vector.load %arg4[%c0_574, %c0_575, %c0_576, %c144_577] : memref<1x1x15x352xf32, #tpu.memory_space<vmem>>, vector<1x1x15x128xf32>
    %667 = vector.shape_cast %666 : vector<1x1x15x128xf32> to vector<15x128xf32>
    %c0_578 = arith.constant 0 : index
    %c135 = arith.constant 135 : index
    %c0_579 = arith.constant 0 : index
    %668 = vector.load %arg12[%c0_578, %c135, %c0_579] : memref<1x225x128xf32, #tpu.memory_space<vmem>>, vector<1x15x128xf32>
    %669 = vector.shape_cast %668 : vector<1x15x128xf32> to vector<15x128xf32>
    %670 = arith.mulf %667, %669 : vector<15x128xf32>
    %cst_580 = arith.constant dense<0.000000e+00> : vector<128xf32>
    %671 = vector.multi_reduction <add>, %670, %cst_580 [0] : vector<15x128xf32> to vector<128xf32>
    %672 = vector.shape_cast %671 : vector<128xf32> to vector<1x128xf32>
    %673 = arith.addf %641, %672 : vector<1x128xf32>
    %c0_581 = arith.constant 0 : index
    %c0_582 = arith.constant 0 : index
    %c0_583 = arith.constant 0 : index
    %c160_584 = arith.constant 160 : index
    %674 = vector.load %arg4[%c0_581, %c0_582, %c0_583, %c160_584] : memref<1x1x15x352xf32, #tpu.memory_space<vmem>>, vector<1x1x15x128xf32>
    %675 = vector.shape_cast %674 : vector<1x1x15x128xf32> to vector<15x128xf32>
    %c0_585 = arith.constant 0 : index
    %c150 = arith.constant 150 : index
    %c0_586 = arith.constant 0 : index
    %676 = vector.load %arg12[%c0_585, %c150, %c0_586] : memref<1x225x128xf32, #tpu.memory_space<vmem>>, vector<1x15x128xf32>
    %677 = vector.shape_cast %676 : vector<1x15x128xf32> to vector<15x128xf32>
    %678 = arith.mulf %675, %677 : vector<15x128xf32>
    %cst_587 = arith.constant dense<0.000000e+00> : vector<128xf32>
    %679 = vector.multi_reduction <add>, %678, %cst_587 [0] : vector<15x128xf32> to vector<128xf32>
    %680 = vector.shape_cast %679 : vector<128xf32> to vector<1x128xf32>
    %681 = arith.addf %649, %680 : vector<1x128xf32>
    %c0_588 = arith.constant 0 : index
    %c0_589 = arith.constant 0 : index
    %c0_590 = arith.constant 0 : index
    %c176_591 = arith.constant 176 : index
    %682 = vector.load %arg4[%c0_588, %c0_589, %c0_590, %c176_591] : memref<1x1x15x352xf32, #tpu.memory_space<vmem>>, vector<1x1x15x128xf32>
    %683 = vector.shape_cast %682 : vector<1x1x15x128xf32> to vector<15x128xf32>
    %c0_592 = arith.constant 0 : index
    %c165 = arith.constant 165 : index
    %c0_593 = arith.constant 0 : index
    %684 = vector.load %arg12[%c0_592, %c165, %c0_593] : memref<1x225x128xf32, #tpu.memory_space<vmem>>, vector<1x15x128xf32>
    %685 = vector.shape_cast %684 : vector<1x15x128xf32> to vector<15x128xf32>
    %686 = arith.mulf %683, %685 : vector<15x128xf32>
    %cst_594 = arith.constant dense<0.000000e+00> : vector<128xf32>
    %687 = vector.multi_reduction <add>, %686, %cst_594 [0] : vector<15x128xf32> to vector<128xf32>
    %688 = vector.shape_cast %687 : vector<128xf32> to vector<1x128xf32>
    %689 = arith.addf %657, %688 : vector<1x128xf32>
    %c0_595 = arith.constant 0 : index
    %c0_596 = arith.constant 0 : index
    %c0_597 = arith.constant 0 : index
    %c192_598 = arith.constant 192 : index
    %690 = vector.load %arg4[%c0_595, %c0_596, %c0_597, %c192_598] : memref<1x1x15x352xf32, #tpu.memory_space<vmem>>, vector<1x1x15x128xf32>
    %691 = vector.shape_cast %690 : vector<1x1x15x128xf32> to vector<15x128xf32>
    %c0_599 = arith.constant 0 : index
    %c180 = arith.constant 180 : index
    %c0_600 = arith.constant 0 : index
    %692 = vector.load %arg12[%c0_599, %c180, %c0_600] : memref<1x225x128xf32, #tpu.memory_space<vmem>>, vector<1x15x128xf32>
    %693 = vector.shape_cast %692 : vector<1x15x128xf32> to vector<15x128xf32>
    %694 = arith.mulf %691, %693 : vector<15x128xf32>
    %cst_601 = arith.constant dense<0.000000e+00> : vector<128xf32>
    %695 = vector.multi_reduction <add>, %694, %cst_601 [0] : vector<15x128xf32> to vector<128xf32>
    %696 = vector.shape_cast %695 : vector<128xf32> to vector<1x128xf32>
    %697 = arith.addf %665, %696 : vector<1x128xf32>
    %c0_602 = arith.constant 0 : index
    %c0_603 = arith.constant 0 : index
    %c0_604 = arith.constant 0 : index
    %c208_605 = arith.constant 208 : index
    %698 = vector.load %arg4[%c0_602, %c0_603, %c0_604, %c208_605] : memref<1x1x15x352xf32, #tpu.memory_space<vmem>>, vector<1x1x15x128xf32>
    %699 = vector.shape_cast %698 : vector<1x1x15x128xf32> to vector<15x128xf32>
    %c0_606 = arith.constant 0 : index
    %c195 = arith.constant 195 : index
    %c0_607 = arith.constant 0 : index
    %700 = vector.load %arg12[%c0_606, %c195, %c0_607] : memref<1x225x128xf32, #tpu.memory_space<vmem>>, vector<1x15x128xf32>
    %701 = vector.shape_cast %700 : vector<1x15x128xf32> to vector<15x128xf32>
    %702 = arith.mulf %699, %701 : vector<15x128xf32>
    %cst_608 = arith.constant dense<0.000000e+00> : vector<128xf32>
    %703 = vector.multi_reduction <add>, %702, %cst_608 [0] : vector<15x128xf32> to vector<128xf32>
    %704 = vector.shape_cast %703 : vector<128xf32> to vector<1x128xf32>
    %705 = arith.addf %673, %704 : vector<1x128xf32>
    %c0_609 = arith.constant 0 : index
    %c0_610 = arith.constant 0 : index
    %c0_611 = arith.constant 0 : index
    %c224 = arith.constant 224 : index
    %706 = vector.load %arg4[%c0_609, %c0_610, %c0_611, %c224] : memref<1x1x15x352xf32, #tpu.memory_space<vmem>>, vector<1x1x15x128xf32>
    %707 = vector.shape_cast %706 : vector<1x1x15x128xf32> to vector<15x128xf32>
    %c0_612 = arith.constant 0 : index
    %c210 = arith.constant 210 : index
    %c0_613 = arith.constant 0 : index
    %708 = vector.load %arg12[%c0_612, %c210, %c0_613] : memref<1x225x128xf32, #tpu.memory_space<vmem>>, vector<1x15x128xf32>
    %709 = vector.shape_cast %708 : vector<1x15x128xf32> to vector<15x128xf32>
    %710 = arith.mulf %707, %709 : vector<15x128xf32>
    %cst_614 = arith.constant dense<0.000000e+00> : vector<128xf32>
    %711 = vector.multi_reduction <add>, %710, %cst_614 [0] : vector<15x128xf32> to vector<128xf32>
    %712 = vector.shape_cast %711 : vector<128xf32> to vector<1x128xf32>
    %713 = arith.addf %681, %712 : vector<1x128xf32>
    %714 = arith.addf %697, %705 : vector<1x128xf32>
    %715 = arith.addf %713, %689 : vector<1x128xf32>
    %716 = arith.addf %714, %715 : vector<1x128xf32>
    %c0_615 = arith.constant 0 : index
    %c0_616 = arith.constant 0 : index
    %c0_617 = arith.constant 0 : index
    %717 = vector.load %arg5[%c0_615, %c0_616, %c0_617] : memref<1x1x128xf32, #tpu.memory_space<vmem>>, vector<1x1x128xf32>
    %718 = vector.shape_cast %717 : vector<1x1x128xf32> to vector<1x128xf32>
    %719 = vector.shape_cast %716 : vector<1x128xf32> to vector<1x1x128xf32>
    tpu.vector_store %arg5[%c0_615, %c0_616, %c0_617], %719 {strides = array<i32>} : memref<1x1x128xf32, #tpu.memory_space<vmem>>, vector<1x1x128xf32>,
    return
  }
  func.func @transform_0(%arg0: i32, %arg1: i32) -> (i32, i32) {
    %c0_i32 = arith.constant 0 : i32
    %c0_i32_0 = arith.constant 0 : i32
    %c0_i32_1 = arith.constant 0 : i32
    return %c0_i32, %c0_i32_0 : i32, i32
  }
  func.func @transform_1(%arg0: i32, %arg1: i32) -> (i32, i32, i32) {
    %c0_i32 = arith.constant 0 : i32
    %c0_i32_0 = arith.constant 0 : i32
    return %arg0, %c0_i32, %arg1 : i32, i32, i32
  }
  func.func @transform_2(%arg0: i32, %arg1: i32) -> (i32, i32, i32, i32) {
    %c0_i32 = arith.constant 0 : i32
    %c0_i32_0 = arith.constant 0 : i32
    %c0_i32_1 = arith.constant 0 : i32
    return %arg0, %arg1, %c0_i32, %c0_i32_0 : i32, i32, i32, i32
  }
  func.func @transform_3(%arg0: i32, %arg1: i32) -> (i32, i32, i32) {
    %c0_i32 = arith.constant 0 : i32
    %c0_i32_0 = arith.constant 0 : i32
    return %arg0, %c0_i32, %arg1 : i32, i32, i32
  }
  func.func @transform_4(%arg0: i32, %arg1: i32) -> (i32, i32, i32) {
    %c0_i32 = arith.constant 0 : i32
    %c0_i32_0 = arith.constant 0 : i32
    return %arg0, %c0_i32, %arg1 : i32, i32, i32
  }
  func.func @transform_5(%arg0: i32, %arg1: i32) -> (i32, i32, i32) {
    %c0_i32 = arith.constant 0 : i32
    %c0_i32_0 = arith.constant 0 : i32
    return %arg0, %c0_i32, %arg1 : i32, i32, i32
  }
  func.func @transform_6(%arg0: i32, %arg1: i32) -> (i32, i32, i32) {
    %c0_i32 = arith.constant 0 : i32
    %c0_i32_0 = arith.constant 0 : i32
    return %arg0, %c0_i32, %arg1 : i32, i32, i32
  }
  func.func @transform_7(%arg0: i32, %arg1: i32) -> (i32, i32, i32) {
    %c0_i32 = arith.constant 0 : i32
    %c0_i32_0 = arith.constant 0 : i32
    return %arg0, %c0_i32, %arg1 : i32, i32, i32
  }
  func.func @transform_8(%arg0: i32, %arg1: i32) -> (i32, i32, i32) {
    %c0_i32 = arith.constant 0 : i32
    %c0_i32_0 = arith.constant 0 : i32
    return %arg0, %c0_i32, %arg1 : i32, i32, i32
  }
  func.func @transform_9(%arg0: i32, %arg1: i32) -> (i32, i32, i32) {
    %c0_i32 = arith.constant 0 : i32
    %c0_i32_0 = arith.constant 0 : i32
    return %arg0, %c0_i32, %arg1 : i32, i32, i32
  }
  func.func @transform_10(%arg0: i32, %arg1: i32) -> (i32, i32, i32) {
    %c0_i32 = arith.constant 0 : i32
    %c0_i32_0 = arith.constant 0 : i32
    return %arg0, %c0_i32, %arg1 : i32, i32, i32
  }
}

</mosaic_0001>

<bundles_post_ra>
// kernel: tpu_custom_call.1
= control target key start
LH: loop header
LB: loop body
LE: loop exit
PB: predicated region body
PF: predicated region fallthrough
CT: control target
= control target key end

     0   :  { %s12387_s0 = inlined_call_operand.vmem [shape: f32[679,35], index: 0, kind: input, shape index: {}]   ;;  %s12388_s1 = inlined_call_operand.vmem [shape: f32[2,35,256], index: 1, kind: input, shape index: {}]   ;;  %s12389_s2 = inlined_call_operand.vmem [shape: f32[2,2,15,352], index: 2, kind: input, shape index: {}]   ;;  %s12390_s3 = inlined_call_operand.hbm [shape: f32[2,1,256], index: 3, kind: output, shape index: {0}]   ;;  %s12391_s4 = inlined_call_operand.vmem [shape: f32[2,9,256], index: 4, kind: output, shape index: {1}]   ;;  %s12392_s5 = inlined_call_operand.vmem [shape: f32[2,25,256], index: 5, kind: output, shape index: {2}]   ;;  %s12393_s6 = inlined_call_operand.vmem [shape: f32[2,49,256], index: 6, kind: output, shape index: {3}]   ;;  %s12394_s7 = inlined_call_operand.vmem [shape: f32[2,81,256], index: 7, kind: output, shape index: {4}]   ;;  %s12395_s8 = inlined_call_operand.vmem [shape: f32[2,121,256], index: 8, kind: output, shape index: {5}]   ;;  %s12396_s9 = inlined_call_operand.vmem [shape: f32[2,169,256], index: 9, kind: output, shape index: {6}]   ;;  %s12397_s10 = inlined_call_operand.vmem [shape: f32[2,225,256], index: 10, kind: output, shape index: {7}]  }
   0x1   :  { %12609 = sst [smem:[#allocation73_spill]] %s12387_s0 }
   0x2   :  { %12610 = sst [smem:[#allocation74_spill]] %s12388_s1 }
   0x3   :  { %12611 = sst [smem:[#allocation75_spill]] %s12389_s2 }
   0x4   :  { %16 = vsyncpa [#allocation4], 0 }
   0x5   :  { %18 = vsyncpa [#allocation4 + $0x1], 0  ;;  %s8014_s13 = smov 0   ;;  %s8016_s14 = smov 0  }
   0x6   :  { %s8018_s15 = smov 0   ;;  %s8020_s16 = smov 0  }
   0x7   :  { %s8022_s17 = smov 0   ;;  %s8024_s18 = smov 0  }
   0x8   :  { %s8026_s19 = smov 0   ;;  %s8028_s20 = smov 0  }
   0x9 LB: > { %12612 = sst [smem:[#allocation13_spill]] %s7919_s13  ;;  %s6993_s21 = sadd.s32 4294967295, %s7947_s20   ;;  %s7947_s20 = sphi %s8028_s20, %s24_s20   ;;  %s7943_s19 = sphi %s8026_s19, %s13179_s19   ;;  %s7939_s18 = sphi %s8024_s18, %s13178_s18   ;;  %s7935_s17 = sphi %s8022_s17, %s13177_s17   ;;  %s7931_s16 = sphi %s8020_s16, %s13176_s16   ;;  %s7927_s15 = sphi %s8018_s15, %s13175_s15   ;;  %s7923_s14 = sphi %s8016_s14, %s13174_s14   ;;  %s7919_s13 = sphi %s8014_s13, %s13173_s13  }
   0xa   : > { %12613 = sst [smem:[#allocation14_spill]] %s7923_s14  ;;  %s6994_s22 = sadd.s32 4294967294, %s7947_s20  }
   0xb   : > { %12614 = sst [smem:[#allocation15_spill]] %s7927_s15  ;;  %s33_s23 = sadd.s32 1, %s7939_s18 }
   0xc   : > { %12615 = sst [smem:[#allocation16_spill]] %s7939_s18  ;;  %p34_p0 = scmp.ge.s32.totalorder %s33_s23, 2 }
   0xd   : > { %12616 = sst [smem:[#allocation17_spill]] %s7943_s19  ;;  %s36_s24 = sadd.s32 1, %s7943_s19 }
   0xe   : > { %p73_p1 = scmp.ne.s32.totalorder %s7927_s15, %s7923_s14  ;;  %p74_p2 = scmp.eq.s32.totalorder %s7947_s20, 0 }
   0xf   : > { %s13181_s23 = smov (%p34_p0, %s33_s23), 0  ;;  %s13183_s24 = smov (!%p34_p0, %s36_s24), %s7943_s19 }
  0x10   : > { %12617 = sst [smem:[#allocation18_spill]] %s13181_s23  ;;  %s62_s25 = ssub.s32 %s7939_s18, %s13181_s23 }
  0x11   : > { %p8066_p3 = por %p74_p2, %p73_p1  ;;  %p38_p4 = scmp.ge.s32.totalorder %s13183_s24, 2 }
  0x12   : > { %p133_p5 = scmp.eq.s32.totalorder %s6993_s21, 3  ;;  %p138_p6 = scmp.ne.s32.totalorder %s7923_s14, %s7919_s13 }
  0x13   : > { %p139_p7 = scmp.eq.s32.totalorder %s6994_s22, 3  ;;  %s13185_s24 = smov (%p38_p4, %s13183_s24), 0 }
  0x14   : > { %12619 = sst [smem:[#allocation19_spill]] %s13185_s24  ;;  %p8074_p8 = por %p133_p5, %p73_p1 }
  0x15   : > { %p8078_p9 = por %p139_p7, %p138_p6  ;;  %s61_s29 = ssub.s32 %s7943_s19, %s13185_s24 }
  0x16   : > { %s63_s30 = sor.u32 %s62_s25, %s61_s29  ;;  %s66_s11 = sadd.s32 1, %s7927_s15 }
  0x17   : > { %s12621_s28 = scalar_select %p8078_p9, 1, 0 }
  0x18   : > { %p64_p10 = scmp.eq.s32.totalorder %s63_s30, 0  ;;  %p6996_p11 = scmp.ge.s32.totalorder %s7947_s20, 4 }
  0x19   : > { %12622 = sst [smem:[#allocation20_spill]] %s12621_s28 }
  0x1a   : > { %s8086_s12 = scalar_select %p64_p10, %s7927_s15, %s66_s11  }
  0x1b   : > { %354 = sbr.rel (%p6996_p11) target bundleno = 44 (0x2c), region = 20 }
  0x1c   : > { %12623 = sst [smem:[#allocation21_spill]] %s8086_s12 }
  0x20   : > { %357 = sbr.rel (!%p8066_p3) target bundleno = 44 (0x2c), region = 24  ;;  %s359_s21 = sand.u32 (%p8066_p3), 1, %s7927_s15  }
  0x21   : > { %s7532_s22 = smul.u32 (%p8066_p3), 10, %s7943_s19  ;;  %s12624_s1 = sld [smem:[#allocation74_spill]] (%p8066_p3) }
  0x22   : > { %s7531_s23 = smul.u32 (%p8066_p3), 40, %s359_s21 }
  0x23   : > { %s363_s13 = sadd.s32 (%p8066_p3), %s7939_s18, %s7532_s22 }
  0x24   : > { %s6997_s28 = sshll.u32 (%p8066_p3), %s363_s13, 3  ;;  %s361_s30 = scalar_lea.vmem (%p8066_p3), [#allocation2], %s7531_s23 }
  0x27   : > { %s365_s29 = scalar_lea.vmem %s12624_s1, %s6997_s28 }
  0x28   : > { %v402_v0 = vld [vmem:[%s365_s29] sm:$0xff]  ;;  %v404_v1 = vld [vmem:[%s365_s29 + $0x10] sm:$0xff] }
  0x29   : > { %v406_v2 = vld [vmem:[%s365_s29 + $0x20] sm:$0xff]  ;;  %403 = vst [vmem:[%s361_s30] sm:$0xff] %v402_v0  ;;  %405 = vst [vmem:[%s361_s30 + $0x8] sm:$0xff] %v404_v1  ;;  %v408_v3 = vld [vmem:[%s365_s29 + $0x30] sm:$0xff] }
  0x2a   : > { %407 = vst [vmem:[%s361_s30 + $0x10] sm:$0xff] %v406_v2  ;;  %v410_v4 = vld [vmem:[%s365_s29 + $0x40] sm:$0xff]  ;;  %409 = vst [vmem:[%s361_s30 + $0x18] sm:$0xff] %v408_v3 }
  0x2b   : > { %411 = vst [vmem:[%s361_s30 + $0x20] sm:$0xff] %v410_v4 }
  0x2c PF: > { %p6998_p12 = scmp.ge.s32.totalorder %s7947_s20, 1  ;;  %p428_p13 = scmp.lt.s32.totalorder %s7947_s20, 5 }
  0x2e   : > { %p429_p0 = pnand %p6998_p12, %p428_p13 }
  0x30   : > { %432 = sbr.rel (%p429_p0) target bundleno = 1394 (0x572), region = 66 }
  0x35   : > { %s8100_s13 = sand.u32 1, %s7923_s14   ;;  %s12625_s0 = sld [smem:[#allocation73_spill]]  ;;  %vm529_vm0 = vcmask 285696   ;;  %vm12512_vm1 = vcmask 1042432   ;;  %v7949_v19 = vmov 0.0   ;;  %vm7950_vm2 = vmmov 0  }
  0x36   : > { %s7533_s11 = smul.u32 40, %s8100_s13  ;;  %vm12493_vm3 = vcmask 1040384   ;;  %s7001_s26 = sshll.u32 %s8100_s13, 7  ;;  %vm1347_vm4 = vcmask 1043456   ;;  %vm12535_vm5 = vcmask 1046528   ;;  %vm12516_vm6 = vcmask 1041408  }
  0x37   : > { %s7534_s29 = smul.u32 56, %s8100_s13  ;;  %s8824_s28 = scalar_lea.vmem [#allocation9], %s7001_s26  ;;  %vm12519_vm7 = vcmask 126976   ;;  %vm12525_vm8 = vcmask 1044608   ;;  %vm12495_vm9 = vcmask 1047040   ;;  %vm12500_vm10 = vcmask 653312  }
  0x38   : > { %s437_s21 = scalar_lea.vmem [#allocation2], %s7533_s11  ;;  %s6999_s11 = sshll.u32 %s8100_s13, 4  ;;  %vm12494_vm11 = vcmask 522240   ;;  %vm12497_vm12 = vcmask 1047296   ;;  %vm12501_vm13 = vcmask 1047168   ;;  %vm12496_vm14 = vcmask 784384  }
  0x39   : > { %v521_v7 = vld [vmem:[%s437_s21 + $0x20] sm:$0x7]  ;;  %v520_v8 = vld [vmem:[%s437_s21 + $0x18] sm:$0xff]  ;;  %v519_v9 = vld [vmem:[%s437_s21 + $0x10] sm:$0xff]  ;;  %s8667_s22 = scalar_lea.vmem [#allocation5], %s6999_s11  ;;  %s8710_s30 = scalar_lea.vmem [#allocation7], %s7534_s29 }
  0x3a   : > { %v8111_v10 = vand.u32 2147483647, %v521_v7  ;;  %v8113_v11 = vand.u32 2147483647, %v520_v8  ;;  %v518_v12 = vld [vmem:[%s437_s21 + $0x8] sm:$0xff]  ;;  %v517_v14 = vld [vmem:[%s437_s21] sm:$0xff] }
  0x3b   : > { %v527_v5 = vld [vmem:[%s12625_s0] sm:$0xff]  ;;  %v756_v6 = vld [vmem:[%s12625_s0 + $0x9] sm:$0xff]  ;;  %v8119_v13 = vand.u32 2147483647, %v519_v9  ;;  %v8127_v15 = vand.u32 2147483647, %v518_v12 }
  0x3c   : > { %7254 = vmatprep.mubr.msk.f32.mxu0 %vm529_vm0, %v527_v5  ;;  %7267 = vmatprep.mubr.msk.f32.mxu1 %vm529_vm0, %v756_v6  ;;  %v8133_v16 = vand.u32 2147483647, %v517_v14  ;;  %v528_v17 = vld [vmem:[%s12625_s0 + $0x8] sm:$0x1]  ;;  %v757_v18 = vld [vmem:[%s12625_s0 + $0x11] sm:$0xff]  ;;  %v758_v20 = vld [vmem:[%s12625_s0 + $0x19] sm:$0xff] }
  0x3d   : > { %7244 = vmatprep.subr.msk.mxu0 %vm12512_vm1, %v8111_v10  ;;  %7257 = vmatprep.subr.msk.mxu1 %vm12512_vm1, %v8111_v10  ;;  %v759_v21 = vld [vmem:[%s12625_s0 + $0x21] sm:$0x1]  ;;  %v1111_v22 = vld [vmem:[%s12625_s0 + $0x22] sm:$0xff]  ;;  %v1654_v23 = vld [vmem:[%s12625_s0 + $0x53] sm:$0xff]  ;;  %s7000_s21 = sshll.u32 %s8100_s13, 5  ;;  %s7535_s24 = smul.u32 88, %s8100_s13 }
  0x3e   : > { %7245 = vmatpush3.msk.msra.mxu0 %vm12512_vm1, %v8111_v10  ;;  %7258 = vmatpush3.msk.msra.mxu1 %vm12512_vm1, %v8111_v10  ;;  %v1112_v24 = vld [vmem:[%s12625_s0 + $0x2a] sm:$0xff]  ;;  %v1655_v25 = vld [vmem:[%s12625_s0 + $0x5b] sm:$0xff]  ;;  %v1113_v26 = vld [vmem:[%s12625_s0 + $0x32] sm:$0xff]  ;;  %s8670_s25 = scalar_lea.vmem [#allocation6], %s7000_s21  ;;  %s7536_s11 = smul.u32 176, %s8100_s13  ;;  %vm12507_vm15 = vcmask 915456  }
  0x3f   : > { %7246 = vmatprep.subr.mxu0 %v8113_v11  ;;  %7259 = vmatprep.subr.mxu1 %v8113_v11  ;;  %v1656_v27 = vld [vmem:[%s12625_s0 + $0x63] sm:$0xff]  ;;  %v1114_v28 = vld [vmem:[%s12625_s0 + $0x3a] sm:$0xff]  ;;  %v1657_v29 = vld [vmem:[%s12625_s0 + $0x6b] sm:$0xff]  ;;  %s8759_s23 = scalar_lea.vmem [#allocation8], %s7535_s24  ;;  %s12431_s21 = smov 96  }
  0x40   : > { %7247 = vmatpush3.msra.mxu0 %v8113_v11  ;;  %7260 = vmatpush3.msra.mxu1 %v8113_v11  ;;  %v1115_v30 = vld [vmem:[%s12625_s0 + $0x42] sm:$0xff]  ;;  %v1658_v31 = vld [vmem:[%s12625_s0 + $0x73] sm:$0xff]  ;;  %v1116_v32 = vld [vmem:[%s12625_s0 + $0x4a] sm:$0xff]  ;;  %s8954_s29 = scalar_lea.vmem [#allocation10], %s7536_s11  ;;  %s12435_s24 = smov 112  }
  0x41   : > { %7248 = vmatprep.subr.mxu0 %v8119_v13  ;;  %7261 = vmatprep.subr.mxu1 %v8119_v13  ;;  %v1659_v33 = vld [vmem:[%s12625_s0 + $0x7b] sm:$0xff]  ;;  %v1117_v34 = vld [vmem:[%s12625_s0 + $0x52] sm:$0x1]  ;;  %v1660_v35 = vld [vmem:[%s12625_s0 + $0x83] sm:$0xff]  ;;  %s12439_s26 = smov 80   ;;  %s12425_s11 = smov 16  }
  0x42   : > { %7249 = vmatpush3.msra.mxu0 %v8119_v13  ;;  %7262 = vmatpush3.msra.mxu1 %v8119_v13  ;;  %v2491_v36 = vld [vmem:[%s12625_s0 + $0xa4] sm:$0xff]  ;;  %v2492_v38 = vld [vmem:[%s12625_s0 + $0xac] sm:$0xff]  ;;  %v2493_v39 = vld [vmem:[%s12625_s0 + $0xb4] sm:$0xff]  ;;  %p508_p1 = scmp.lt.s32.totalorder %s7935_s17, 1  ;;  %p510_p2 = scmp.lt.s32.totalorder %s7931_s16, 1 }
  0x43   : > { %7250 = vmatprep.subr.mxu0 %v8127_v15  ;;  %7263 = vmatprep.subr.mxu1 %v8127_v15  ;;  %v1661_v37 = vld [vmem:[%s12625_s0 + $0x8b] sm:$0xff]  ;;  %v1662_v40 = vld [vmem:[%s12625_s0 + $0x93] sm:$0xff]  ;;  %v2494_v41 = vld [vmem:[%s12625_s0 + $0xbc] sm:$0xff]  ;;  %s12687_s2 = sld [smem:[#allocation75_spill]]  ;;  %s7956_s18 = smov 32  }
  0x44   : > { %7251 = vmatpush3.msra.mxu0 %v8127_v15  ;;  %7264 = vmatpush3.msra.mxu1 %v8127_v15  ;;  %v2495_v42 = vld [vmem:[%s12625_s0 + $0xc4] sm:$0xff]  ;;  %v1663_v43 = vld [vmem:[%s12625_s0 + $0x9b] sm:$0xff]  ;;  %v2496_v44 = vld [vmem:[%s12625_s0 + $0xcc] sm:$0xff]  ;;  %s6028_s15 = scalar_lea.sflag [#allocation4], %s8100_s13 }
  0x45   : > { %7252 = vmatprep.subr.mxu0 %v8133_v16  ;;  %7265 = vmatprep.subr.mxu1 %v8133_v16  ;;  %v2497_v45 = vld [vmem:[%s12625_s0 + $0xd4] sm:$0xff]  ;;  %v1664_v46 = vld [vmem:[%s12625_s0 + $0xa3] sm:$0x1]  ;;  %v2499_v48 = vld [vmem:[%s12625_s0 + $0xe4] sm:$0xff] }
  0x46   : > { %7253 = vmatpush3.msra.mxu0 %v8133_v16  ;;  %7266 = vmatpush3.msra.mxu1 %v8133_v16  ;;  %v2498_v47 = vld [vmem:[%s12625_s0 + $0xdc] sm:$0xff]  ;;  %v2500_v50 = vld [vmem:[%s12625_s0 + $0xec] sm:$0xff]  ;;  %v2501_v52 = vld [vmem:[%s12625_s0 + $0xf4] sm:$0xff] }
  0x47   : > { %7255 = vmatmul.mubr.msk.f32.vlgmr.msra.gmra.mxu0 %vm529_vm0, %v528_v17  ;;  %7268 = vmatmul.mubr.msk.f32.vlgmr.msra.gmra.mxu1 %vm529_vm0, %v757_v18  ;;  %v3502_v49 = vld [vmem:[%s12625_s0 + $0x11d] sm:$0xff]  ;;  %v3503_v51 = vld [vmem:[%s12625_s0 + $0x125] sm:$0xff]  ;;  %v3504_v53 = vld [vmem:[%s12625_s0 + $0x12d] sm:$0xff] }
  0x48   : > { %7273 = vmatprep.subr.mxu0 %v7949_v19  ;;  %7304 = vmatprep.subr.mxu1 %v7949_v19  ;;  %v2502_v54 = vld [vmem:[%s12625_s0 + $0xfc] sm:$0xff]  ;;  %v2503_v56 = vld [vmem:[%s12625_s0 + $0x104] sm:$0xff]  ;;  %v2504_v58 = vld [vmem:[%s12625_s0 + $0x10c] sm:$0xff] }
  0x49   : > { %7274 = vmatpush3.msk.msra.mxu0 %vm12512_vm1, %v8111_v10  ;;  %7305 = vmatpush3.msk.msra.mxu1 %vm12512_vm1, %v8111_v10  ;;  %v3505_v55 = vld [vmem:[%s12625_s0 + $0x135] sm:$0xff]  ;;  %v3506_v57 = vld [vmem:[%s12625_s0 + $0x13d] sm:$0xff]  ;;  %v3507_v59 = vld [vmem:[%s12625_s0 + $0x145] sm:$0xff] }
  0x4a   : > { %7275 = vmatprep.subr.mxu0 %v7949_v19  ;;  %7306 = vmatprep.subr.mxu1 %v7949_v19  ;;  %v2505_v60 = vld [vmem:[%s12625_s0 + $0x114] sm:$0xff]  ;;  %v2506_v62 = vld [vmem:[%s12625_s0 + $0x11c] sm:$0x1]  ;;  %v3510_v0 = vld [vmem:[%s12625_s0 + $0x15d] sm:$0xff] }
  0x4b   : > { %7270 = vmatprep.mubr.msk.f32.mxu1 %vm529_vm0, %v758_v20  ;;  %7276 = vmatpush3.msra.mxu0 %v8113_v11  ;;  %v3508_v61 = vld [vmem:[%s12625_s0 + $0x14d] sm:$0xff]  ;;  %v3509_v63 = vld [vmem:[%s12625_s0 + $0x155] sm:$0xff]  ;;  %v3511_v1 = vld [vmem:[%s12625_s0 + $0x165] sm:$0xff] }
  0x4c   : > { %7307 = vmatpush3.msra.mxu1 %v8113_v11  ;;  %7277 = vmatprep.subr.mxu0 %v7949_v19  ;;  %v4739_v2 = vld [vmem:[%s12625_s0 + $0x1c6] sm:$0xff]  ;;  %v3513_v4 = vld [vmem:[%s12625_s0 + $0x175] sm:$0xff]  ;;  %v3514_v6 = vld [vmem:[%s12625_s0 + $0x17d] sm:$0xff] }
  0x4d   : > { %7271 = vmatmul.mubr.msk.f32.gmra.mxu1 %vm529_vm0, %v759_v21  ;;  %7308 = vmatprep.subr.mxu1 %v7949_v19  ;;  %v3512_v3 = vld [vmem:[%s12625_s0 + $0x16d] sm:$0xff]  ;;  %v3515_v7 = vld [vmem:[%s12625_s0 + $0x185] sm:$0xff]  ;;  %v4741_v8 = vld [vmem:[%s12625_s0 + $0x1d6] sm:$0xff] }
  0x4e   : > { %7278 = vmatpush3.msra.mxu0 %v8119_v13  ;;  %7309 = vmatpush3.msra.mxu1 %v8119_v13  ;;  %v4740_v5 = vld [vmem:[%s12625_s0 + $0x1ce] sm:$0xff]  ;;  %v3518_v12 = vld [vmem:[%s12625_s0 + $0x19d] sm:$0xff]  ;;  %v4743_v14 = vld [vmem:[%s12625_s0 + $0x1e6] sm:$0xff] }
  0x4f   : > { %7279 = vmatprep.subr.mxu0 %v7949_v19  ;;  %7310 = vmatprep.subr.mxu1 %v7949_v19  ;;  %v3516_v9 = vld [vmem:[%s12625_s0 + $0x18d] sm:$0xff]  ;;  %v3522_v18 = vld [vmem:[%s12625_s0 + $0x1bd] sm:$0xff]  ;;  %v3523_v20 = vld [vmem:[%s12625_s0 + $0x1c5] sm:$0x1] }
  0x50   : > { %7280 = vmatpush3.msra.mxu0 %v8127_v15  ;;  %7311 = vmatpush3.msra.mxu1 %v8127_v15  ;;  %v4744_v17 = vld [vmem:[%s12625_s0 + $0x1ee] sm:$0xff]  ;;  %v4745_v21 = vld [vmem:[%s12625_s0 + $0x1f6] sm:$0xff] }
  0x51   : > { %7281 = vmatprep.subr.mxu0 %v7949_v19  ;;  %7312 = vmatprep.subr.mxu1 %v7949_v19 }
  0x52   : > { %7282 = vmatpush3.msra.mxu0 %v8133_v16  ;;  %7283 = vmatprep.mubr.msk.f32.mxu0 %vm7950_vm2, %v7949_v19 }
  0x53   : > { %7313 = vmatpush3.msra.mxu1 %v8133_v16  ;;  %7314 = vmatprep.mubr.msk.f32.mxu1 %vm7950_vm2, %v7949_v19 }
  0x54   : > { %7284 = vmatmul.mubr.msk.f32.vlgmr.msra.gmra.mxu0 %vm529_vm0, %v1111_v22  ;;  %7315 = vmatmul.mubr.msk.f32.vlgmr.msra.gmra.mxu1 %vm529_vm0, %v1654_v23  ;;  %v4746_v22 = vld [vmem:[%s12625_s0 + $0x1fe] sm:$0xff]  ;;  %v4757_v23 = vld [vmem:[%s12625_s0 + $0x256] sm:$0xff] }
  0x55   : > { %7381 = vmatprep.subr.msk.mxu1 %vm12512_vm1, %v8111_v10  ;;  %7286 = vmatprep.mubr.msk.f32.mxu0 %vm7950_vm2, %v7949_v19 }
  0x56   : > { %7382 = vmatpush3.msk.msra.mxu1 %vm12512_vm1, %v8111_v10  ;;  %7317 = vmatprep.mubr.msk.f32.mxu1 %vm7950_vm2, %v7949_v19 }
  0x57   : > { %7347 = vmatprep.subr.msk.mxu0 %vm12512_vm1, %v8111_v10  ;;  %7383 = vmatprep.subr.mxu1 %v8113_v11 }
  0x58   : > { %7287 = vmatmul.mubr.msk.f32.gmra.mxu0 %vm529_vm0, %v1112_v24  ;;  %7318 = vmatmul.mubr.msk.f32.gmra.mxu1 %vm529_vm0, %v1655_v25  ;;  %v4747_v24 = vld [vmem:[%s12625_s0 + $0x206] sm:$0xff]  ;;  %v4758_v25 = vld [vmem:[%s12625_s0 + $0x25e] sm:$0xff] }
  0x59   : > { %7348 = vmatpush3.msk.msra.mxu0 %vm12512_vm1, %v8111_v10  ;;  %7289 = vmatprep.mubr.msk.f32.mxu0 %vm7950_vm2, %v7949_v19 }
  0x5a   : > { %7320 = vmatprep.mubr.msk.f32.mxu1 %vm7950_vm2, %v7949_v19  ;;  %7349 = vmatprep.subr.mxu0 %v8113_v11 }
  0x5b   : > { %7384 = vmatpush3.msra.mxu1 %v8113_v11  ;;  %7350 = vmatpush3.msra.mxu0 %v8113_v11 }
  0x5c   : > { %7290 = vmatmul.mubr.msk.f32.gmra.mxu0 %vm529_vm0, %v1113_v26  ;;  %7321 = vmatmul.mubr.msk.f32.gmra.mxu1 %vm529_vm0, %v1656_v27  ;;  %v4748_v26 = vld [vmem:[%s12625_s0 + $0x20e] sm:$0xff]  ;;  %v4759_v27 = vld [vmem:[%s12625_s0 + $0x266] sm:$0xff] }
  0x5d   : > { %7292 = vmatprep.mubr.msk.f32.mxu0 %vm7950_vm2, %v7949_v19  ;;  %7323 = vmatprep.mubr.msk.f32.mxu1 %vm7950_vm2, %v7949_v19 }
  0x5e   : > { %7351 = vmatprep.subr.mxu0 %v8119_v13  ;;  %7385 = vmatprep.subr.mxu1 %v8119_v13 }
  0x5f   : > { %7352 = vmatpush3.msra.mxu0 %v8119_v13  ;;  %7386 = vmatpush3.msra.mxu1 %v8119_v13 }
  0x60   : > { %7293 = vmatmul.mubr.msk.f32.gmra.mxu0 %vm529_vm0, %v1114_v28  ;;  %7324 = vmatmul.mubr.msk.f32.gmra.mxu1 %vm529_vm0, %v1657_v29  ;;  %v4749_v28 = vld [vmem:[%s12625_s0 + $0x216] sm:$0xff]  ;;  %v4760_v29 = vld [vmem:[%s12625_s0 + $0x26e] sm:$0xff] }
  0x61   : > { %7295 = vmatprep.mubr.msk.f32.mxu0 %vm7950_vm2, %v7949_v19  ;;  %7326 = vmatprep.mubr.msk.f32.mxu1 %vm7950_vm2, %v7949_v19 }
  0x62   : > { %7353 = vmatprep.subr.mxu0 %v8127_v15  ;;  %7387 = vmatprep.subr.mxu1 %v8127_v15 }
  0x63   : > { %7354 = vmatpush3.msra.mxu0 %v8127_v15  ;;  %7388 = vmatpush3.msra.mxu1 %v8127_v15 }
  0x64   : > { %7296 = vmatmul.mubr.msk.f32.gmra.mxu0 %vm529_vm0, %v1115_v30  ;;  %7327 = vmatmul.mubr.msk.f32.gmra.mxu1 %vm529_vm0, %v1658_v31  ;;  %v4750_v30 = vld [vmem:[%s12625_s0 + $0x21e] sm:$0xff]  ;;  %v4761_v31 = vld [vmem:[%s12625_s0 + $0x276] sm:$0xff] }
  0x65   : > { %7298 = vmatprep.mubr.msk.f32.mxu0 %vm7950_vm2, %v7949_v19  ;;  %7329 = vmatprep.mubr.msk.f32.mxu1 %vm7950_vm2, %v7949_v19 }
  0x66   : > { %7355 = vmatprep.subr.mxu0 %v8133_v16  ;;  %7389 = vmatprep.subr.mxu1 %v8133_v16 }
  0x67   : > { %7356 = vmatpush3.msra.mxu0 %v8133_v16  ;;  %7390 = vmatpush3.msra.mxu1 %v8133_v16 }
  0x68   : > { %7299 = vmatmul.mubr.msk.f32.gmra.mxu0 %vm529_vm0, %v1116_v32  ;;  %7330 = vmatmul.mubr.msk.f32.gmra.mxu1 %vm529_vm0, %v1659_v33  ;;  %v4751_v32 = vld [vmem:[%s12625_s0 + $0x226] sm:$0xff]  ;;  %v4762_v33 = vld [vmem:[%s12625_s0 + $0x27e] sm:$0xff] }
  0x69   : > { %7301 = vmatprep.mubr.msk.f32.mxu0 %vm7950_vm2, %v7949_v19  ;;  %7332 = vmatprep.mubr.msk.f32.mxu1 %vm7950_vm2, %v7949_v19 }
  0x6a   : > { %7424 = vmatprep.subr.mxu0 %v7949_v19  ;;  %7521 = vmatprep.subr.mxu1 %v7949_v19 }
  0x6c   : > { %7302 = vmatmul.mubr.msk.f32.gmra.mxu0 %vm529_vm0, %v1117_v34  ;;  %7333 = vmatmul.mubr.msk.f32.gmra.mxu1 %vm529_vm0, %v1660_v35  ;;  %v4752_v34 = vld [vmem:[%s12625_s0 + $0x22e] sm:$0xff]  ;;  %v4763_v35 = vld [vmem:[%s12625_s0 + $0x286] sm:$0xff] }
  0x6d   : > { %7335 = vmatprep.mubr.msk.f32.mxu1 %vm7950_vm2, %v7949_v19  ;;  %7357 = vmatprep.mubr.msk.f32.mxu0 %vm529_vm0, %v2491_v36  ;;  %v4753_v36 = vld [vmem:[%s12625_s0 + $0x236] sm:$0xff] }
  0x70   : > { %7336 = vmatmul.mubr.msk.f32.gmra.mxu1 %vm529_vm0, %v1661_v37  ;;  %7358 = vmatmul.mubr.msk.f32.vlgmr.msra.gmra.mxu0 %vm529_vm0, %v2492_v38  ;;  %v4764_v37 = vld [vmem:[%s12625_s0 + $0x28e] sm:$0xff]  ;;  %v4754_v38 = vld [vmem:[%s12625_s0 + $0x23e] sm:$0xff] }
  0x71   : > { %7338 = vmatprep.mubr.msk.f32.mxu1 %vm7950_vm2, %v7949_v19  ;;  %7360 = vmatprep.mubr.msk.f32.mxu0 %vm529_vm0, %v2493_v39  ;;  %v4765_v39 = vld [vmem:[%s12625_s0 + $0x296] sm:$0xff] }
  0x72   : > { %7425 = vmatpush3.msk.msra.mxu0 %vm12512_vm1, %v8111_v10 }
  0x73   : > { %7426 = vmatprep.subr.mxu0 %v7949_v19 }
  0x74   : > { %7339 = vmatmul.mubr.msk.f32.gmra.mxu1 %vm529_vm0, %v1662_v40  ;;  %7361 = vmatmul.mubr.msk.f32.gmra.mxu0 %vm529_vm0, %v2494_v41  ;;  %v4755_v40 = vld [vmem:[%s12625_s0 + $0x246] sm:$0xff]  ;;  %v4766_v41 = vld [vmem:[%s12625_s0 + $0x29e] sm:$0xff] }
  0x75   : > { %7341 = vmatprep.mubr.msk.f32.mxu1 %vm7950_vm2, %v7949_v19  ;;  %7363 = vmatprep.mubr.msk.f32.mxu0 %vm529_vm0, %v2495_v42  ;;  %v4756_v42 = vld [vmem:[%s12625_s0 + $0x24e] sm:$0xff] }
  0x76   : > { %7427 = vmatpush3.msra.mxu0 %v8113_v11 }
  0x77   : > { %7428 = vmatprep.subr.mxu0 %v7949_v19 }
  0x78   : > { %7342 = vmatmul.mubr.msk.f32.gmra.mxu1 %vm529_vm0, %v1663_v43  ;;  %7364 = vmatmul.mubr.msk.f32.gmra.mxu0 %vm529_vm0, %v2496_v44  ;;  %v4767_v43 = vld [vmem:[%s12625_s0 + $0x2a6] sm:$0x1] }
  0x79   : > { %7344 = vmatprep.mubr.msk.f32.mxu1 %vm7950_vm2, %v7949_v19  ;;  %7366 = vmatprep.mubr.msk.f32.mxu0 %vm529_vm0, %v2497_v45 }
  0x7a   : > { %7429 = vmatpush3.msra.mxu0 %v8119_v13 }
  0x7b   : > { %7430 = vmatprep.subr.mxu0 %v7949_v19 }
  0x7c   : > { %7345 = vmatmul.mubr.msk.f32.gmra.mxu1 %vm529_vm0, %v1664_v46  ;;  %7367 = vmatmul.mubr.msk.f32.gmra.mxu0 %vm529_vm0, %v2498_v47 }
  0x7d   : > { %7369 = vmatprep.mubr.msk.f32.mxu0 %vm529_vm0, %v2499_v48  ;;  %7391 = vmatprep.mubr.msk.f32.mxu1 %vm529_vm0, %v3502_v49 }
  0x7e   : > { %7431 = vmatpush3.msra.mxu0 %v8127_v15 }
  0x7f   : > { %7432 = vmatprep.subr.mxu0 %v7949_v19 }
  0x80   : > { %7370 = vmatmul.mubr.msk.f32.gmra.mxu0 %vm529_vm0, %v2500_v50  ;;  %7392 = vmatmul.mubr.msk.f32.vlgmr.msra.gmra.mxu1 %vm529_vm0, %v3503_v51 }
  0x81   : > { %7372 = vmatprep.mubr.msk.f32.mxu0 %vm529_vm0, %v2501_v52  ;;  %7394 = vmatprep.mubr.msk.f32.mxu1 %vm529_vm0, %v3504_v53 }
  0x82   : > { %7433 = vmatpush3.msra.mxu0 %v8133_v16  ;;  %7526 = vmatpush3.msk.msra.mxu1 %vm12512_vm1, %v8111_v10  ;;  %v3517_v10 = vld [vmem:[%s12625_s0 + $0x195] sm:$0xff] }
  0x83   : > { %7522 = vmatprep.subr.mxu1 %v7949_v19 }
  0x84   : > { %7373 = vmatmul.mubr.msk.f32.gmra.mxu0 %vm529_vm0, %v2502_v54  ;;  %7395 = vmatmul.mubr.msk.f32.gmra.mxu1 %vm529_vm0, %v3505_v55 }
  0x85   : > { %7375 = vmatprep.mubr.msk.f32.mxu0 %vm529_vm0, %v2503_v56  ;;  %7397 = vmatprep.mubr.msk.f32.mxu1 %vm529_vm0, %v3506_v57 }
  0x86   : > { %7527 = vmatpush3.msra.mxu1 %v8113_v11  ;;  %v4742_v11 = vld [vmem:[%s12625_s0 + $0x1de] sm:$0xff] }
  0x87   : > { %7523 = vmatprep.subr.mxu1 %v7949_v19 }
  0x88   : > { %7376 = vmatmul.mubr.msk.f32.gmra.mxu0 %vm529_vm0, %v2504_v58  ;;  %7398 = vmatmul.mubr.msk.f32.gmra.mxu1 %vm529_vm0, %v3507_v59 }
  0x89   : > { %7378 = vmatprep.mubr.msk.f32.mxu0 %vm529_vm0, %v2505_v60  ;;  %7400 = vmatprep.mubr.msk.f32.mxu1 %vm529_vm0, %v3508_v61 }
  0x8a   : > { %7528 = vmatpush3.msra.mxu1 %v8119_v13  ;;  %v3519_v13 = vld [vmem:[%s12625_s0 + $0x1a5] sm:$0xff] }
  0x8b   : > { %7524 = vmatprep.subr.mxu1 %v7949_v19 }
  0x8c   : > { %7379 = vmatmul.mubr.msk.f32.gmra.mxu0 %vm529_vm0, %v2506_v62  ;;  %7401 = vmatmul.mubr.msk.f32.gmra.mxu1 %vm529_vm0, %v3509_v63 }
  0x8d   : > { %7403 = vmatprep.mubr.msk.f32.mxu1 %vm529_vm0, %v3510_v0  ;;  %7434 = vmatprep.mubr.msk.f32.mxu0 %vm7950_vm2, %v7949_v19 }
  0x8e   : > { %7529 = vmatpush3.msra.mxu1 %v8127_v15  ;;  %v3520_v15 = vld [vmem:[%s12625_s0 + $0x1ad] sm:$0xff] }
  0x8f   : > { %7525 = vmatprep.subr.mxu1 %v7949_v19 }
  0x90   : > { %7404 = vmatmul.mubr.msk.f32.gmra.mxu1 %vm529_vm0, %v3511_v1  ;;  %7435 = vmatmul.mubr.msk.f32.vlgmr.msra.gmra.mxu0 %vm529_vm0, %v4739_v2 }
  0x91   : > { %7406 = vmatprep.mubr.msk.f32.mxu1 %vm529_vm0, %v3512_v3  ;;  %7437 = vmatprep.mubr.msk.f32.mxu0 %vm7950_vm2, %v7949_v19 }
  0x92   : > { %7530 = vmatpush3.msra.mxu1 %v8133_v16  ;;  %v3521_v16 = vld [vmem:[%s12625_s0 + $0x1b5] sm:$0xff]  ;;  %s12441_s0 = smov 64  }
  0x94   : > { %7407 = vmatmul.mubr.msk.f32.gmra.mxu1 %vm529_vm0, %v3513_v4  ;;  %7438 = vmatmul.mubr.msk.f32.gmra.mxu0 %vm529_vm0, %v4740_v5 }
  0x95   : > { %7409 = vmatprep.mubr.msk.f32.mxu1 %vm529_vm0, %v3514_v6  ;;  %7440 = vmatprep.mubr.msk.f32.mxu0 %vm7950_vm2, %v7949_v19 }
  0x98   : > { %7410 = vmatmul.mubr.msk.f32.gmra.mxu1 %vm529_vm0, %v3515_v7  ;;  %7441 = vmatmul.mubr.msk.f32.gmra.mxu0 %vm529_vm0, %v4741_v8 }
  0x99   : > { %7412 = vmatprep.mubr.msk.f32.mxu1 %vm529_vm0, %v3516_v9  ;;  %7443 = vmatprep.mubr.msk.f32.mxu0 %vm7950_vm2, %v7949_v19 }
  0x9c   : > { %7413 = vmatmul.mubr.msk.f32.gmra.mxu1 %vm529_vm0, %v3517_v10  ;;  %7444 = vmatmul.mubr.msk.f32.gmra.mxu0 %vm529_vm0, %v4742_v11 }
  0x9d   : > { %7415 = vmatprep.mubr.msk.f32.mxu1 %vm529_vm0, %v3518_v12  ;;  %7446 = vmatprep.mubr.msk.f32.mxu0 %vm7950_vm2, %v7949_v19 }
  0xa0   : > { %7416 = vmatmul.mubr.msk.f32.gmra.mxu1 %vm529_vm0, %v3519_v13  ;;  %7447 = vmatmul.mubr.msk.f32.gmra.mxu0 %vm529_vm0, %v4743_v14 }
  0xa1   : > { %7418 = vmatprep.mubr.msk.f32.mxu1 %vm529_vm0, %v3520_v15  ;;  %7449 = vmatprep.mubr.msk.f32.mxu0 %vm7950_vm2, %v7949_v19 }
  0xa4   : > { %7419 = vmatmul.mubr.msk.f32.gmra.mxu1 %vm529_vm0, %v3521_v16  ;;  %7450 = vmatmul.mubr.msk.f32.gmra.mxu0 %vm529_vm0, %v4744_v17 }
  0xa5   : > { %7421 = vmatprep.mubr.msk.f32.mxu1 %vm529_vm0, %v3522_v18  ;;  %7452 = vmatprep.mubr.msk.f32.mxu0 %vm7950_vm2, %v7949_v19 }
  0xa8   : > { %7422 = vmatmul.mubr.msk.f32.gmra.mxu1 %vm529_vm0, %v3523_v20  ;;  %7453 = vmatmul.mubr.msk.f32.gmra.mxu0 %vm529_vm0, %v4745_v21 }
  0xa9   : > { %7455 = vmatprep.mubr.msk.f32.mxu0 %vm7950_vm2, %v7949_v19  ;;  %7488 = vmatprep.mubr.msk.f32.mxu1 %vm7950_vm2, %v7949_v19 }
  0xac   : > { %7456 = vmatmul.mubr.msk.f32.gmra.mxu0 %vm529_vm0, %v4746_v22  ;;  %7489 = vmatmul.mubr.msk.f32.vlgmr.msra.gmra.mxu1 %vm529_vm0, %v4757_v23 }
  0xad   : > { %7458 = vmatprep.mubr.msk.f32.mxu0 %vm7950_vm2, %v7949_v19  ;;  %7491 = vmatprep.mubr.msk.f32.mxu1 %vm7950_vm2, %v7949_v19 }
  0xb0   : > { %7459 = vmatmul.mubr.msk.f32.gmra.mxu0 %vm529_vm0, %v4747_v24  ;;  %7492 = vmatmul.mubr.msk.f32.gmra.mxu1 %vm529_vm0, %v4758_v25 }
  0xb1   : > { %7461 = vmatprep.mubr.msk.f32.mxu0 %vm7950_vm2, %v7949_v19  ;;  %7494 = vmatprep.mubr.msk.f32.mxu1 %vm7950_vm2, %v7949_v19 }
  0xb4   : > { %7462 = vmatmul.mubr.msk.f32.gmra.mxu0 %vm529_vm0, %v4748_v26  ;;  %7495 = vmatmul.mubr.msk.f32.gmra.mxu1 %vm529_vm0, %v4759_v27 }
  0xb5   : > { %7464 = vmatprep.mubr.msk.f32.mxu0 %vm7950_vm2, %v7949_v19  ;;  %7497 = vmatprep.mubr.msk.f32.mxu1 %vm7950_vm2, %v7949_v19 }
  0xb8   : > { %7465 = vmatmul.mubr.msk.f32.gmra.mxu0 %vm529_vm0, %v4749_v28  ;;  %7498 = vmatmul.mubr.msk.f32.gmra.mxu1 %vm529_vm0, %v4760_v29 }
  0xb9   : > { %7467 = vmatprep.mubr.msk.f32.mxu0 %vm7950_vm2, %v7949_v19  ;;  %7500 = vmatprep.mubr.msk.f32.mxu1 %vm7950_vm2, %v7949_v19 }
  0xbc   : > { %7468 = vmatmul.mubr.msk.f32.gmra.mxu0 %vm529_vm0, %v4750_v30  ;;  %7501 = vmatmul.mubr.msk.f32.gmra.mxu1 %vm529_vm0, %v4761_v31 }
  0xbd   : > { %7470 = vmatprep.mubr.msk.f32.mxu0 %vm7950_vm2, %v7949_v19  ;;  %7503 = vmatprep.mubr.msk.f32.mxu1 %vm7950_vm2, %v7949_v19 }
  0xc0   : > { %7471 = vmatmul.mubr.msk.f32.gmra.mxu0 %vm529_vm0, %v4751_v32  ;;  %7504 = vmatmul.mubr.msk.f32.gmra.mxu1 %vm529_vm0, %v4762_v33 }
  0xc1   : > { %7473 = vmatprep.mubr.msk.f32.mxu0 %vm7950_vm2, %v7949_v19  ;;  %7506 = vmatprep.mubr.msk.f32.mxu1 %vm7950_vm2, %v7949_v19 }
  0xc4   : > { %7474 = vmatmul.mubr.msk.f32.gmra.mxu0 %vm529_vm0, %v4752_v34  ;;  %7507 = vmatmul.mubr.msk.f32.gmra.mxu1 %vm529_vm0, %v4763_v35 }
  0xc5   : > { %7476 = vmatprep.mubr.msk.f32.mxu0 %vm7950_vm2, %v7949_v19  ;;  %7509 = vmatprep.mubr.msk.f32.mxu1 %vm7950_vm2, %v7949_v19 }
  0xc8   : > { %7477 = vmatmul.mubr.msk.f32.gmra.mxu0 %vm529_vm0, %v4753_v36  ;;  %7510 = vmatmul.mubr.msk.f32.gmra.mxu1 %vm529_vm0, %v4764_v37 }
  0xc9   : > { %7479 = vmatprep.mubr.msk.f32.mxu0 %vm7950_vm2, %v7949_v19  ;;  %7512 = vmatprep.mubr.msk.f32.mxu1 %vm7950_vm2, %v7949_v19 }
  0xcc   : > { %7480 = vmatmul.mubr.msk.f32.gmra.mxu0 %vm529_vm0, %v4754_v38  ;;  %7513 = vmatmul.mubr.msk.f32.gmra.mxu1 %vm529_vm0, %v4765_v39 }
  0xcd   : > { %7482 = vmatprep.mubr.msk.f32.mxu0 %vm7950_vm2, %v7949_v19  ;;  %7515 = vmatprep.mubr.msk.f32.mxu1 %vm7950_vm2, %v7949_v19 }
  0xd0   : > { %7483 = vmatmul.mubr.msk.f32.gmra.mxu0 %vm529_vm0, %v4755_v40  ;;  %7516 = vmatmul.mubr.msk.f32.gmra.mxu1 %vm529_vm0, %v4766_v41 }
  0xd1   : > { %7485 = vmatprep.mubr.msk.f32.mxu0 %vm7950_vm2, %v7949_v19  ;;  %7518 = vmatprep.mubr.msk.f32.mxu1 %vm7950_vm2, %v7949_v19  ;;  %vm12506_vm2 = vcmask 1047424  }
  0xd4   : > { %7486 = vmatmul.mubr.msk.f32.gmra.mxu0 %vm529_vm0, %v4756_v42  ;;  %7519 = vmatmul.mubr.msk.f32.gmra.mxu1 %vm529_vm0, %v4767_v43  ;;  %vm12504_vm0 = vcmask 129024  }
 0x107   : > { %v7256_v44 = vpop.f32.mrf.mxu0  ;;  %v8664_v45 = vpop.f32.mrf.mxu1 }
 0x108   : > { %616 = vst [vmem:[%s8667_s22 + $0x8] sm:$0x1] %v7256_v44 }
 0x109   : > { %v838_v46 = vpop.f32.mrf.mxu1  ;;  %v606_v48 = vpop.f32.mrf.mxu0 }
 0x10a   : > { %v866_v61 = vmax.f32 %v838_v46, %v8664_v45 }
 0x10d   : > { %v7272_v19 = vpop.f32.mrf.mxu1 }
 0x10e   : > { %860 = vst [vmem:[%s8670_s25 + $0x18] sm:$0x1] %v7272_v19 }
 0x10f   : > { %v618_v47 = vld [vmem:[%s8667_s22 + $0x8] sm:$0x1]  ;;  %v8675_v51 = vpop.f32.mrf.mxu1 }
 0x110   : > { %v620_v49 = vsel %vm12493_vm3, %v618_v47, -inf }
 0x111   : > { %v621_v50 = vmax.f32 %v606_v48, %v620_v49 }
 0x113   : > { %v622_v52 = vrot.slane %v621_v50, 4 }
 0x114   : > { %v8677_v53 = vpop.f32.mrf.mxu0  ;;  %v8679_v54 = vpop.f32.mrf.mxu1 }
 0x115   : > { %v623_v55 = vmax.f32 %v621_v50, %v622_v52  ;;  %v864_v56 = vld [vmem:[%s8670_s25 + $0x18] sm:$0x1] }
 0x116   : > { %v865_v57 = vsel %vm12493_vm3, %v864_v56, -inf  ;;  %v7285_v58 = vpop.f32.mrf.mxu0  ;;  %v7316_v59 = vpop.f32.mrf.mxu1 }
 0x117   : > { %v624_v60 = vrot.slane %v623_v55, 2  ;;  %v867_v62 = vmax.f32 %v8675_v51, %v865_v57 }
 0x118   : > { %v8685_v63 = vpop.f32.mrf.mxu0  ;;  %v8687_v0 = vpop.f32.mrf.mxu1 }
 0x119   : > { %v625_v1 = vmax.f32 %v623_v55, %v624_v60  ;;  %v868_v2 = vmax.f32 %v866_v61, %v867_v62 }
 0x11a   : > { %v7288_v3 = vpop.f32.mrf.mxu0  ;;  %v7319_v4 = vpop.f32.mrf.mxu1 }
 0x11b   : > { %v626_v5 = vrot.slane %v625_v1, 1  ;;  %v869_v6 = vrot.slane %v868_v2, 4 }
 0x11c   : > { %v8689_v7 = vpop.f32.mrf.mxu0  ;;  %v8691_v8 = vpop.f32.mrf.mxu1 }
 0x11d   : > { %v627_v9 = vmax.f32 %v625_v1, %v626_v5  ;;  %v870_v10 = vmax.f32 %v868_v2, %v869_v6 }
 0x11e   : > { %v7291_v11 = vpop.f32.mrf.mxu0  ;;  %v7322_v12 = vpop.f32.mrf.mxu1 }
 0x11f   : > { %v629_v13 = vsub.f32 %v618_v47, %v627_v9  ;;  %v871_v14 = vrot.slane %v870_v10, 2  ;;  %v628_v23 = vsub.f32 %v606_v48, %v627_v9 }
 0x120   : > { %v8693_v15 = vpop.f32.mrf.mxu0  ;;  %v8695_v16 = vpop.f32.mrf.mxu1 }
 0x121   : > { %v632_v17 = vmul.f32 1.442695, %v629_v13  ;;  %v872_v18 = vmax.f32 %v870_v10, %v871_v14  ;;  %v630_v32 = vmul.f32 1.442695, %v628_v23 }
 0x122   : > { %v7294_v20 = vpop.f32.mrf.mxu0  ;;  %v7325_v21 = vpop.f32.mrf.mxu1 }
 0x123   : > { %v873_v22 = vrot.slane %v872_v18, 1  ;;  %7624 = vpow2.f32 %v632_v17 }
 0x124   : > { %v8697_v24 = vpop.f32.mrf.mxu0  ;;  %v8699_v25 = vpop.f32.mrf.mxu1  ;;  %7626 = vpow2.f32 %v630_v32 }
 0x125   : > { %v874_v26 = vmax.f32 %v872_v18, %v873_v22  ;;  %v1253_v57 = vmax.f32 %v8677_v53, %v8697_v24 }
 0x126   : > { %v7297_v27 = vpop.f32.mrf.mxu0  ;;  %v7328_v28 = vpop.f32.mrf.mxu1 }
 0x127   : > { %v875_v29 = vsub.f32 %v838_v46, %v874_v26  ;;  %v876_v30 = vsub.f32 %v8664_v45, %v874_v26  ;;  %v878_v31 = vsub.f32 %v864_v56, %v874_v26  ;;  %v877_v42 = vsub.f32 %v8675_v51, %v874_v26 }
 0x128   : > { %v8703_v33 = vpop.f32.mrf.mxu0  ;;  %v8705_v34 = vpop.f32.mrf.mxu1 }
 0x129   : > { %v879_v35 = vmul.f32 1.442695, %v875_v29  ;;  %v885_v36 = vmul.f32 1.442695, %v878_v31  ;;  %v881_v39 = vmul.f32 1.442695, %v876_v30  ;;  %v1254_v51 = vmax.f32 %v8685_v63, %v8703_v33 }
 0x12a   : > { %v7300_v37 = vpop.f32.mrf.mxu0  ;;  %v7331_v38 = vpop.f32.mrf.mxu1  ;;  %v883_v47 = vmul.f32 1.442695, %v877_v42 }
 0x12b   : > { %7628 = vpow2.f32 %v879_v35  ;;  %v1257_v61 = vmax.f32 %v1253_v57, %v1254_v51 }
 0x12c   : > { %v1235_v40 = vpop.f32.mrf.mxu0  ;;  %v8707_v41 = vpop.f32.mrf.mxu1  ;;  %7630 = vpow2.f32 %v885_v36 }
 0x12d   : > { %1245 = vst [vmem:[%s8710_s30 + $0x30] sm:$0x1] %v1235_v40  ;;  %7632 = vpow2.f32 %v881_v39 }
 0x12e   : > { %v7303_v43 = vpop.f32.mrf.mxu0  ;;  %v7334_v44 = vpop.f32.mrf.mxu1  ;;  %7634 = vpow2.f32 %v883_v47  ;;  %v1841_v47 = vmax.f32 %v8687_v0, %v8705_v34 }
 0x130   : > { %v8713_v45 = vpop.f32.mrf.mxu1  ;;  %v8715_v46 = vpop.f32.mrf.mxu0 }
 0x131   : > { %v7625_v19 = vpop.eup %7624 }
 0x132   : > { %635 = vst [vmem:[%s8667_s22 + $0x8] sm:$0x1] %v7625_v19  ;;  %v7337_v48 = vpop.f32.mrf.mxu1  ;;  %v8718_v49 = vpop.f32.mrf.mxu0 }
 0x133   : > { %v8742_v3 = vpop.eup %7626 }
 0x134   : > { %v8721_v50 = vld [vmem:[%s8710_s30 + $0x30] sm:$0x1]  ;;  %v8725_v52 = vpop.f32.mrf.mxu1  ;;  %v8727_v55 = vpop.f32.mrf.mxu0 }
 0x135   : > { %v1255_v56 = vsel %vm12493_vm3, %v8721_v50, -inf }
 0x136   : > { %v1256_v58 = vmax.f32 %v8689_v7, %v1255_v56  ;;  %v7340_v59 = vpop.f32.mrf.mxu1  ;;  %v8735_v60 = vpop.f32.mrf.mxu0 }
 0x138   : > { %v1258_v62 = vmax.f32 %v1256_v58, %v8693_v15  ;;  %v8738_v1 = vpop.f32.mrf.mxu1  ;;  %v8740_v2 = vpop.f32.mrf.mxu0  ;;  %v1842_v58 = vmax.f32 %v8691_v8, %v8707_v41 }
 0x139   : > { %v8745_v4 = vld [vmem:[%s8667_s22 + $0x8] sm:$0x1]  ;;  %v8747_v5 = vpop.eup %7628 }
 0x13a   : > { %v638_v6 = vsel %vm12493_vm3, %v8745_v4, 0.0  ;;  %v1259_v9 = vmax.f32 %v1257_v61, %v1258_v62  ;;  %v7343_v10 = vpop.f32.mrf.mxu1  ;;  %v8751_v11 = vpop.f32.mrf.mxu0  ;;  %v1840_v62 = vmax.f32 %v8679_v54, %v8699_v25 }
 0x13b   : > { %v7631_v12 = vpop.eup %7630  ;;  %v639_v13 = vadd.f32 %v8742_v3, %v638_v6 }
 0x13c   : > { %v8754_v14 = vpop.eup %7632  ;;  %890 = vst [vmem:[%s8670_s25 + $0x18] sm:$0x1] %v7631_v12  ;;  %v1260_v17 = vrot.slane %v1259_v9, 4  ;;  %v1814_v18 = vpop.f32.mrf.mxu1 }
 0x13d   : > { %v8757_v20 = vpop.f32.mrf.mxu0  ;;  %v640_v21 = vrot.slane %v639_v13, 4  ;;  %1828 = vst [vmem:[%s8759_s23 + $0x50] sm:$0x1] %v1814_v18  ;;  %v895_v28 = vadd.f32 %v8754_v14, %v8747_v5  ;;  %v8770_v35 = vpop.eup %7634 }
 0x13e   : > { %v1261_v22 = vmax.f32 %v1259_v9, %v1260_v17  ;;  %v7346_v23 = vpop.f32.mrf.mxu1 }
 0x13f   : > { %v8762_v26 = vpop.f32.mrf.mxu0  ;;  %v641_v27 = vadd.f32 %v640_v21, %v639_v13  ;;  %v896_v42 = vadd.f32 %v8770_v35, %v895_v28  ;;  %v1845_v13 = vmax.f32 %v1841_v47, %v8738_v1  ;;  %v1843_v23 = vmax.f32 %v8695_v16, %v8713_v45 }
 0x140   : > { %v1262_v29 = vrot.slane %v1261_v22, 2  ;;  %v8768_v31 = vpop.f32.mrf.mxu1 }
 0x141   : > { %v8766_v30 = vpop.f32.mrf.mxu0  ;;  %v642_v32 = vrot.slane %v641_v27, 2 }
 0x142   : > { %v1263_v36 = vmax.f32 %v1261_v22, %v1262_v29  ;;  %v8774_v38 = vpop.f32.mrf.mxu1 }
 0x143   : > { %v8772_v37 = vpop.f32.mrf.mxu0  ;;  %v643_v39 = vadd.f32 %v642_v32, %v641_v27  ;;  %v8777_v40 = vld [vmem:[%s8670_s25 + $0x18] sm:$0x1] }
 0x144   : > { %v897_v43 = vsel %vm12493_vm3, %v8777_v40, 0.0  ;;  %v1264_v44 = vrot.slane %v1263_v36, 1  ;;  %v8783_v19 = vld [vmem:[%s8759_s23 + $0x50] sm:$0x1]  ;;  %v8789_v51 = vpop.f32.mrf.mxu1 }
 0x145   : > { %v8787_v48 = vpop.f32.mrf.mxu0  ;;  %v644_v56 = vrot.slane %v643_v39, 1  ;;  %v898_v57 = vadd.f32 %v897_v43, %v896_v42  ;;  %v1846_v59 = vsel %vm12493_vm3, %v8783_v19, -inf }
 0x146   : > { %v1265_v61 = vmax.f32 %v1263_v36, %v1264_v44  ;;  %v8799_v9 = vpop.f32.mrf.mxu1  ;;  %v1847_v17 = vmax.f32 %v1842_v58, %v1846_v59  ;;  %v1844_v36 = vmax.f32 %v1840_v62, %v8725_v52 }
 0x147   : > { %v8797_v6 = vpop.f32.mrf.mxu0  ;;  %v645_v10 = vadd.f32 %v644_v56, %v643_v39  ;;  %v899_v12 = vrot.slane %v898_v57, 4 }
 0x148   : > { %v1266_v18 = vsub.f32 %v8677_v53, %v1265_v61  ;;  %v1267_v21 = vsub.f32 %v8685_v63, %v1265_v61  ;;  %v1268_v22 = vsub.f32 %v8689_v7, %v1265_v61  ;;  %v8810_v28 = vpop.f32.mrf.mxu1  ;;  %v1269_v32 = vsub.f32 %v8693_v15, %v1265_v61 }
 0x149   : > { %v8808_v27 = vpop.f32.mrf.mxu0  ;;  %7636 = vrcp.f32 %v645_v10  ;;  %v900_v29 = vadd.f32 %v899_v12, %v898_v57  ;;  %v1272_v39 = vsub.f32 %v8721_v50, %v1265_v61  ;;  %v1848_v47 = vmax.f32 %v1844_v36, %v1845_v13 }
 0x14a   : > { %12626 = vst [vmem:[#allocation22_spill] sm:$0xff] %v8808_v27  ;;  %v1273_v53 = vmul.f32 1.442695, %v1266_v18  ;;  %v1275_v63 = vmul.f32 1.442695, %v1267_v21  ;;  %v8817_v7 = vpop.f32.mrf.mxu1  ;;  %v1849_v56 = vmax.f32 %v1847_v17, %v1843_v23  ;;  %v1270_v58 = vsub.f32 %v8697_v24, %v1265_v61 }
 0x14b   : > { %v8815_v42 = vpop.f32.mrf.mxu0  ;;  %v901_v43 = vrot.slane %v900_v29, 2  ;;  %v1277_v44 = vmul.f32 1.442695, %v1268_v22  ;;  %v1279_v50 = vmul.f32 1.442695, %v1269_v32  ;;  %v1271_v10 = vsub.f32 %v8703_v33, %v1265_v61 }
 0x14c   : > { %7638 = vpow2.f32 %v1273_v53  ;;  %v8820_v15 = vpop.f32.mrf.mxu1  ;;  %v1850_v62 = vmax.f32 %v1848_v47, %v1849_v56  ;;  %v1285_v12 = vmul.f32 1.442695, %v1272_v39  ;;  %v1281_v21 = vmul.f32 1.442695, %v1270_v58 }
 0x14d   : > { %v7380_v57 = vpop.f32.mrf.mxu0  ;;  %12627 = vst [vmem:[#allocation23_spill] sm:$0xff] %v8820_v15  ;;  %v902_v59 = vadd.f32 %v901_v43, %v900_v29  ;;  %7640 = vpow2.f32 %v1275_v63  ;;  %v1283_v36 = vmul.f32 1.442695, %v1271_v10  ;;  %v2735_v53 = vmax.f32 %v8727_v55, %v8757_v20 }
 0x14e   : > { %2715 = vst [vmem:[%s8824_s28 + $0x78] sm:$0x1] %v7380_v57  ;;  %v8830_v17 = vpop.f32.mrf.mxu1  ;;  %7642 = vpow2.f32 %v1277_v44  ;;  %v1851_v18 = vrot.slane %v1850_v62, 4  ;;  %v2732_v43 = vmax.f32 %v8718_v49, %v8751_v11  ;;  %v2734_v44 = vmax.f32 %v8735_v60, %v8762_v26 }
 0x14f   : > { %v8828_v13 = vpop.f32.mrf.mxu0  ;;  %v903_v24 = vrot.slane %v902_v59, 1  ;;  %7644 = vpow2.f32 %v1279_v50  ;;  %v2739_v57 = vmax.f32 %v2735_v53, %v8787_v48 }
 0x150   : > { %12628 = vst [vmem:[#allocation24_spill] sm:$0xff] %v8828_v13  ;;  %v8832_v22 = vpop.f32.mrf.mxu1  ;;  %v1852_v32 = vmax.f32 %v1850_v62, %v1851_v18  ;;  %7646 = vpow2.f32 %v1285_v12  ;;  %v2733_v62 = vmax.f32 %v8715_v46, %v8740_v2  ;;  %v2736_v10 = vmax.f32 %v2732_v43, %v8772_v37 }
 0x151   : > { %v8834_v23 = vpop.f32.mrf.mxu0  ;;  %v904_v29 = vadd.f32 %v903_v24, %v902_v59  ;;  %v2738_v12 = vmax.f32 %v2734_v44, %v8797_v6 }
 0x152   : > { %12629 = vst [vmem:[#allocation25_spill] sm:$0xff] %v8834_v23  ;;  %v8836_v33 = vpop.f32.mrf.mxu1  ;;  %v1853_v39 = vrot.slane %v1852_v32, 2  ;;  %v2740_v44 = vmax.f32 %v2736_v10, %v8815_v42 }
 0x153   : > { %v7436_v61 = vpop.f32.mrf.mxu0  ;;  %7648 = vrcp.f32 %v904_v29 }
 0x154   : > { %7650 = vpow2.f32 %v1281_v21  ;;  %v8847_v47 = vpop.f32.mrf.mxu1  ;;  %v1854_v58 = vmax.f32 %v1852_v32, %v1853_v39  ;;  %v2737_v39 = vmax.f32 %v2733_v62, %v8766_v30 }
 0x155   : > { %v8841_v63 = vld [vmem:[%s8824_s28 + $0x78] sm:$0x1]  ;;  %v8849_v56 = vpop.f32.mrf.mxu0  ;;  %7652 = vpow2.f32 %v1283_v36 }
 0x156   : > { %12630 = vst [vmem:[#allocation26_spill] sm:$0xff] %v8849_v56  ;;  %v2743_v59 = vsel %vm12493_vm3, %v8841_v63, -inf  ;;  %v7637_v50 = vpop.eup %7636  ;;  %v8858_v24 = vpop.f32.mrf.mxu1  ;;  %v1855_v32 = vrot.slane %v1854_v58, 1 }
 0x157   : > { %v7439_v18 = vpop.f32.mrf.mxu0  ;;  %v647_v21 = vmul.f32 %v7637_v50, %v8742_v3  ;;  %v648_v29 = vmul.f32 %v7637_v50, %v8745_v4  ;;  %v2744_v61 = vmax.f32 %v2739_v57, %v2743_v59  ;;  %v2742_v3 = vmax.f32 %v2738_v12, %v8828_v13 }
 0x158   : > { %v8863_v53 = vpop.f32.mrf.mxu1  ;;  %v8871_v43 = vmax.f32 %v1854_v58, %v1855_v32  ;;  %v2741_v4 = vmax.f32 %v2737_v39, %v8808_v27 }
 0x159   : > { %v8865_v36 = vpop.f32.mrf.mxu0  ;;  %v8867_v56 = vpop.eup %7638  ;;  %649 = vst [vmem:[%s8667_s22] sm:$0xff] %v647_v21  ;;  %650 = vst [vmem:[%s8667_s22 + $0x8] sm:$0x1] %v648_v29  ;;  %v2746_v21 = vmax.f32 %v2742_v3, %v2744_v61 }
 0x15a   : > { %12631 = vst [vmem:[#allocation27_spill] sm:$0xff] %v8865_v36  ;;  %v8875_v18 = vpop.eup %7640  ;;  %v8878_v57 = vpop.f32.mrf.mxu1  ;;  %v1857_v62 = vsub.f32 %v8679_v54, %v8871_v43  ;;  %v1858_v58 = vsub.f32 %v8687_v0, %v8871_v43  ;;  %v1859_v12 = vsub.f32 %v8691_v8, %v8871_v43  ;;  %v1860_v54 = vsub.f32 %v8695_v16, %v8871_v43 }
 0x15b   : > { %v7442_v59 = vpop.f32.mrf.mxu0  ;;  %v1301_v50 = vadd.f32 %v8875_v18, %v8867_v56  ;;  %v8886_v10 = vpop.eup %7642 }
 0x15c   : > { %v8890_v29 = vpop.f32.mrf.mxu1  ;;  %v2745_v59 = vmax.f32 %v2740_v44, %v2741_v4  ;;  %v8895_v23 = vpop.eup %7644  ;;  %v1868_v0 = vmul.f32 1.442695, %v1857_v62  ;;  %v1870_v61 = vmul.f32 1.442695, %v1858_v58  ;;  %v1861_v44 = vsub.f32 %v8699_v25, %v8871_v43 }
 0x15d   : > { %12632 = vst [vmem:[#allocation28_spill] sm:$0xff] %v8890_v29  ;;  %v8892_v32 = vpop.f32.mrf.mxu0  ;;  %v1302_v39 = vadd.f32 %v8886_v10, %v1301_v50  ;;  %v7647_v13 = vpop.eup %7646  ;;  %v1872_v4 = vmul.f32 1.442695, %v1859_v12 }
 0x15e   : > { %12633 = vst [vmem:[#allocation29_spill] sm:$0xff] %v8892_v32  ;;  %v8899_v3 = vpop.f32.mrf.mxu1  ;;  %v2747_v27 = vmax.f32 %v2745_v59, %v2746_v21  ;;  %1293 = vst [vmem:[%s8710_s30 + $0x30] sm:$0x1] %v7647_v13  ;;  %7654 = vpow2.f32 %v1868_v0  ;;  %v1874_v59 = vmul.f32 1.442695, %v1860_v54 }
 0x15f   : > { %12634 = vst [vmem:[#allocation30_spill] sm:$0xff] %v8899_v3  ;;  %v7445_v36 = vpop.f32.mrf.mxu0  ;;  %v1303_v8 = vadd.f32 %v8895_v23, %v1302_v39  ;;  %v1862_v39 = vsub.f32 %v8705_v34, %v8871_v43  ;;  %7656 = vpow2.f32 %v1870_v61  ;;  %v1863_v34 = vsub.f32 %v8707_v41, %v8871_v43 }
 0x160   : > { %v7649_v32 = vpop.eup %7648  ;;  %v8905_v50 = vpop.f32.mrf.mxu1  ;;  %v655_v21 = vld [vmem:[%s8667_s22] sm:$0x7]  ;;  %7658 = vpow2.f32 %v1872_v4 }
 0x161   : > { %12635 = vst [vmem:[#allocation31_spill] sm:$0xff] %v8905_v50  ;;  %v8907_v16 = vpop.f32.mrf.mxu0  ;;  %v8909_v36 = vpop.eup %7650  ;;  %v906_v62 = vmul.f32 %v7649_v32, %v8747_v5  ;;  %v907_v58 = vmul.f32 %v7649_v32, %v8754_v14  ;;  %v908_v13 = vmul.f32 %v7649_v32, %v8770_v35  ;;  %v909_v25 = vmul.f32 %v7649_v32, %v8777_v40 }
 0x162   : > { %12636 = vst [vmem:[#allocation32_spill] sm:$0xff] %v8907_v16  ;;  %v1304_v12 = vadd.f32 %v8909_v36, %v1303_v8  ;;  %v8920_v0 = vpop.f32.mrf.mxu1  ;;  %v8922_v16 = vpop.eup %7652  ;;  %v1867_v14 = vsub.f32 %v8783_v19, %v8871_v43  ;;  %v2748_v35 = vrot.slane %v2747_v27, 4  ;;  %v657_v40 = vrot.slane %v655_v21, 2  ;;  %v696_v8 = vld [vmem:[%s8667_s22 + $0x3] sm:$0x7] }
 0x163   : > { %12637 = vst [vmem:[#allocation33_spill] sm:$0xff] %v8920_v0  ;;  %v7448_v5 = vpop.f32.mrf.mxu0  ;;  %910 = vst [vmem:[%s8670_s25] sm:$0xff] %v906_v62  ;;  %v1876_v32 = vmul.f32 1.442695, %v1861_v44  ;;  %v1864_v19 = vsub.f32 %v8713_v45, %v8871_v43  ;;  %7660 = vpow2.f32 %v1874_v59  ;;  %v1880_v45 = vmul.f32 1.442695, %v1863_v34 }
 0x164   : > { %911 = vst [vmem:[%s8670_s25 + $0x8] sm:$0xff] %v907_v58  ;;  %912 = vst [vmem:[%s8670_s25 + $0x10] sm:$0xff] %v908_v13  ;;  %v8932_v54 = vpop.f32.mrf.mxu1  ;;  %v1305_v62 = vadd.f32 %v8922_v16, %v1304_v12  ;;  %v2749_v58 = vmax.f32 %v2747_v27, %v2748_v35  ;;  %658 = vrot.lane.b32.xlu0 %v657_v40, %s12431_s21  ;;  %v1878_v13 = vmul.f32 1.442695, %v1862_v39  ;;  %v1888_v21 = vmul.f32 1.442695, %v1867_v14 }
 0x165   : > { %913 = vst [vmem:[%s8670_s25 + $0x18] sm:$0x1] %v909_v25  ;;  %12638 = vst [vmem:[#allocation34_spill] sm:$0xff] %v8932_v54  ;;  %v8934_v61 = vpop.f32.mrf.mxu0  ;;  %v8944_v4 = vld [vmem:[%s8710_s30 + $0x30] sm:$0x1]  ;;  %v1865_v25 = vsub.f32 %v8725_v52, %v8871_v43  ;;  %v698_v27 = vrot.slane %v696_v8, 2  ;;  %7662 = vpow2.f32 %v1876_v32  ;;  %v1866_v52 = vsub.f32 %v8738_v1, %v8871_v43 }
 0x166   : > { %12639 = vst [vmem:[#allocation35_spill] sm:$0xff] %v8934_v61  ;;  %v8941_v41 = vpop.f32.mrf.mxu1  ;;  %12641 = vst [vmem:[#allocation37_spill] sm:$0xff] %v8944_v4  ;;  %v2750_v12 = vrot.slane %v2749_v58, 2  ;;  %v1306_v5 = vsel %vm12493_vm3, %v8944_v4, 0.0  ;;  %7664 = vpow2.f32 %v1878_v13  ;;  %v1882_v14 = vmul.f32 1.442695, %v1864_v19 }
 0x167   : > { %12640 = vst [vmem:[#allocation36_spill] sm:$0xff] %v8941_v41  ;;  %v7451_v44 = vpop.f32.mrf.mxu0  ;;  %v1307_v35 = vadd.f32 %v1306_v5, %v1305_v62  ;;  %7666 = vpow2.f32 %v1888_v21 }
 0x168   : > { %v7423_v59 = vpop.f32.mrf.mxu1  ;;  %v2751_v40 = vmax.f32 %v2749_v58, %v2750_v12  ;;  %699 = vrot.lane.b32.xlu0 %v698_v27, %s12435_s24  ;;  %v1884_v44 = vmul.f32 1.442695, %v1865_v25  ;;  %7668 = vpow2.f32 %v1880_v45 }
 0x169   : > { %v8950_v39 = vpop.f32.mrf.mxu0  ;;  %3786 = vst [vmem:[%s8954_s29 + $0xa8] sm:$0x1] %v7423_v59  ;;  %v1308_v58 = vrot.slane %v1307_v35, 4  ;;  %7670 = vpow2.f32 %v1882_v14 }
 0x16a   : > { %12642 = vst [vmem:[#allocation38_spill] sm:$0xff] %v8950_v39  ;;  %v8960_v32 = vpop.f32.mrf.mxu1  ;;  %v918_v8 = vld [vmem:[%s8670_s25] sm:$0x1f]  ;;  %v2752_v12 = vrot.slane %v2751_v40, 1  ;;  %7672 = vpow2.f32 %v1884_v44  ;;  %v3812_v44 = vmax.f32 %v8789_v51, %v8820_v15 }
 0x16b   : > { %12643 = vst [vmem:[#allocation39_spill] sm:$0xff] %v8960_v32  ;;  %v7454_v34 = vpop.f32.mrf.mxu0  ;;  %v998_v62 = vld [vmem:[%s8670_s25 + $0xa] sm:$0x1f]  ;;  %v920_v27 = vrot.slane %v918_v8, 3  ;;  %v8968_v1 = vpop.eup %7654  ;;  %v1309_v43 = vadd.f32 %v1308_v58, %v1307_v35  ;;  %v958_v13 = vld [vmem:[%s8670_s25 + $0x5] sm:$0x1f]  ;;  %v3809_v8 = vmax.f32 %v8774_v38, %v8817_v7 }
 0x16c   : > { %v8966_v59 = vpop.f32.mrf.mxu1  ;;  %v1000_v61 = vrot.slane %v998_v62, 3  ;;  %12646 = vst [vmem:[#allocation42_spill] sm:$0xff] %v8968_v1  ;;  %v8970_v19 = vmax.f32 %v2751_v40, %v2752_v12  ;;  %v1886_v34 = vmul.f32 1.442695, %v1866_v52  ;;  %v8975_v25 = vpop.eup %7656  ;;  %v960_v52 = vrot.slane %v958_v13, 3 }
 0x16d   : > { %v8964_v5 = vpop.f32.mrf.mxu0  ;;  %12645 = vst [vmem:[#allocation41_spill] sm:$0xff] %v8966_v59  ;;  %921 = vrot.lane.b32.xlu1 %v920_v27, %s12439_s26  ;;  %12647 = vst [vmem:[#allocation43_spill] sm:$0xff] %v8975_v25  ;;  %v1310_v21 = vrot.slane %v1309_v43, 2  ;;  %v1912_v45 = vadd.f32 %v8975_v25, %v8968_v1  ;;  %v8987_v14 = vpop.eup %7658  ;;  %v3810_v62 = vmax.f32 %v8768_v31, %v8810_v28  ;;  %v1061_v58 = vld [vmem:[%s8670_s25 + $0x14] sm:$0x1f]  ;;  %s12675_s26 = smov 80  }
 0x16e   : > { %12644 = vst [vmem:[#allocation40_spill] sm:$0xff] %v8964_v5  ;;  %v7490_v4 = vpop.f32.mrf.mxu1  ;;  %1001 = vrot.lane.b32.xlu0 %v1000_v61, %s12435_s24  ;;  %v2754_v35 = vsub.f32 %v8718_v49, %v8970_v19  ;;  %12649 = vst [vmem:[#allocation45_spill] sm:$0xff] %v8987_v14  ;;  %7674 = vpow2.f32 %v1886_v34  ;;  %v3813_v34 = vmax.f32 %v3809_v8, %v8836_v33  ;;  %s9235_s24 = scalar_select %p510_p2, %s7931_s16, 1 }
 0x16f   : > { %v7457_v39 = vpop.f32.mrf.mxu0  ;;  %v1311_v61 = vadd.f32 %v1310_v21, %v1309_v43  ;;  %v1913_v49 = vadd.f32 %v8987_v14, %v1912_v45  ;;  %v2756_v21 = vsub.f32 %v8735_v60, %v8970_v19  ;;  %v3814_v45 = vmax.f32 %v3810_v62, %v8832_v22 }
 0x170   : > { %v2755_v39 = vsub.f32 %v8715_v46, %v8970_v19  ;;  %v8985_v40 = vpop.f32.mrf.mxu1  ;;  %v3811_v46 = vmax.f32 %v8799_v9, %v8830_v17  ;;  %v9000_v43 = vpop.eup %7660  ;;  %v2770_v14 = vmul.f32 1.442695, %v2754_v35  ;;  %v2757_v60 = vsub.f32 %v8727_v55, %v8970_v19  ;;  %s12679_s1 = smul.u32 6, %s9235_s24  ;;  %s12685_s24 = smov 96  }
 0x171   : > { %v8983_v4 = vpop.f32.mrf.mxu0  ;;  %12648 = vst [vmem:[#allocation44_spill] sm:$0xff] %v8985_v40  ;;  %961 = vrot.lane.b32.xlu1 %v960_v52, %s12431_s21  ;;  %v1312_v13 = vrot.slane %v1311_v61, 1  ;;  %v1914_v40 = vadd.f32 %v9000_v43, %v1913_v49  ;;  %v3816_v62 = vmax.f32 %v3812_v44, %v8847_v47  ;;  %v3817_v35 = vmax.f32 %v3813_v34, %v8878_v57  ;;  %v9026_v44 = vld [vmem:[%s8954_s29 + $0xa8] sm:$0x1] }
 0x172   : > { %v7493_v27 = vpop.f32.mrf.mxu1  ;;  %v2772_v25 = vmul.f32 1.442695, %v2755_v39  ;;  %v9011_v52 = vpop.eup %7662  ;;  %v3815_v8 = vmax.f32 %v3811_v46, %v8858_v24  ;;  %7676 = vpow2.f32 %v2770_v14  ;;  %v3818_v39 = vmax.f32 %v3814_v45, %v8863_v53 }
 0x173   : > { %v7460_v12 = vpop.f32.mrf.mxu0  ;;  %v1063_v27 = vrot.slane %v1061_v58, 3  ;;  %v1313_v15 = vadd.f32 %v1312_v13, %v1311_v61  ;;  %v1915_v49 = vadd.f32 %v9011_v52, %v1914_v40  ;;  %v9021_v61 = vpop.eup %7664  ;;  %v2758_v55 = vsub.f32 %v8751_v11, %v8970_v19 }
 0x174   : > { %v9009_v12 = vpop.f32.mrf.mxu1  ;;  %v2774_v46 = vmul.f32 1.442695, %v2756_v21  ;;  %v3819_v40 = vmax.f32 %v3815_v8, %v8899_v3  ;;  %v7667_v14 = vpop.eup %7666  ;;  %v3820_v34 = vmax.f32 %v3816_v62, %v8890_v29  ;;  %v3821_v45 = vmax.f32 %v3817_v35, %v8920_v0 }
 0x175   : > { %v9007_v1 = vpop.f32.mrf.mxu0  ;;  %12650 = vst [vmem:[#allocation46_spill] sm:$0xff] %v9009_v12  ;;  %1064 = vrot.lane.b32.xlu1 %v1063_v27, %s12425_s11  ;;  %7678 = vrcp.f32 %v1313_v15  ;;  %v1916_v13 = vadd.f32 %v9021_v61, %v1915_v49  ;;  %v9036_v15 = vpop.eup %7668  ;;  %1900 = vst [vmem:[%s8759_s23 + $0x50] sm:$0x1] %v7667_v14  ;;  %v2759_v11 = vsub.f32 %v8740_v2, %v8970_v19  ;;  %v2776_v21 = vmul.f32 1.442695, %v2757_v60  ;;  %s7537_s11 = smul.u32 232, %s8100_s13 }
 0x176   : > { %v7496_v58 = vpop.f32.mrf.mxu1  ;;  %7680 = vpow2.f32 %v2772_v25  ;;  %v3822_v8 = vmax.f32 %v3818_v39, %v8905_v50  ;;  %v3823_v49 = vmax.f32 %v3819_v40, %v8941_v41  ;;  %v3824_v62 = vmax.f32 %v3820_v34, %v8932_v54  ;;  %v9048_v14 = vpop.eup %7670 }
 0x177   : > { %v7463_v12 = vpop.f32.mrf.mxu0  ;;  %v1917_v25 = vadd.f32 %v9036_v15, %v1916_v13  ;;  %v3825_v35 = vmax.f32 %v3821_v45, %v8960_v32  ;;  %v3826_v58 = vsel %vm12493_vm3, %v9026_v44, -inf  ;;  %v2760_v2 = vsub.f32 %v8762_v26, %v8970_v19  ;;  %v9052_v40 = vpop.eup %7672  ;;  %s9176_s21 = scalar_lea.vmem [#allocation11], %s7537_s11 }
 0x178   : > { %v9034_v27 = vpop.f32.mrf.mxu1  ;;  %7682 = vpow2.f32 %v2774_v46  ;;  %v2778_v60 = vmul.f32 1.442695, %v2758_v55  ;;  %v3827_v39 = vmax.f32 %v3822_v8, %v3826_v58  ;;  %v2761_v34 = vsub.f32 %v8757_v20, %v8970_v19  ;;  %s9221_s11 = scalar_select %p508_p1, %s7935_s17, 1 }
 0x179   : > { %v9032_v12 = vpop.f32.mrf.mxu0  ;;  %v1918_v13 = vadd.f32 %v9048_v14, %v1917_v25  ;;  %7684 = vpow2.f32 %v2776_v21  ;;  %v3829_v54 = vmax.f32 %v3823_v49, %v3824_v62  ;;  %v2762_v25 = vsub.f32 %v8772_v37, %v8970_v19 }
 0x17a   : > { %12651 = vst [vmem:[#allocation47_spill] sm:$0xff] %v9032_v12  ;;  %v7499_v29 = vpop.f32.mrf.mxu1  ;;  %v3828_v32 = vmax.f32 %v3825_v35, %v3827_v39  ;;  %7686 = vpow2.f32 %v2778_v60  ;;  %v2782_v58 = vmul.f32 1.442695, %v2760_v2  ;;  %v2769_v21 = vsub.f32 %v8841_v63, %v8970_v19 }
 0x17b   : > { %v7466_v0 = vpop.f32.mrf.mxu0  ;;  %v2780_v29 = vmul.f32 1.442695, %v2759_v11  ;;  %v1919_v26 = vadd.f32 %v9052_v40, %v1918_v13  ;;  %v9062_v8 = vpop.eup %7674  ;;  %v2763_v11 = vsub.f32 %v8766_v30, %v8970_v19  ;;  %v2784_v49 = vmul.f32 1.442695, %v2761_v34 }
 0x17c   : > { %v9059_v0 = vpop.f32.mrf.mxu1  ;;  %v3830_v20 = vmax.f32 %v3828_v32, %v3829_v54  ;;  %v9067_v41 = vld [vmem:[%s8759_s23 + $0x50] sm:$0x1]  ;;  %v2764_v2 = vsub.f32 %v8797_v6, %v8970_v19  ;;  %v2765_v30 = vsub.f32 %v8787_v48, %v8970_v19  ;;  %v2766_v13 = vsub.f32 %v8815_v42, %v8970_v19 }
 0x17d   : > { %v9057_v45 = vpop.f32.mrf.mxu0  ;;  %v1920_v50 = vadd.f32 %v9062_v8, %v1919_v26  ;;  %v1921_v37 = vsel %vm12493_vm3, %v9067_v41, 0.0  ;;  %7688 = vpow2.f32 %v2780_v29  ;;  %v2786_v34 = vmul.f32 1.442695, %v2762_v25 }
 0x17e   : > { %v7502_v46 = vpop.f32.mrf.mxu1  ;;  %v3831_v54 = vrot.slane %v3830_v20, 4  ;;  %7690 = vpow2.f32 %v2782_v58  ;;  %v2800_v6 = vmul.f32 1.442695, %v2769_v21 }
 0x17f   : > { %v7469_v55 = vpop.f32.mrf.mxu0  ;;  %v1922_v32 = vadd.f32 %v1921_v37, %v1920_v50  ;;  %v9084_v63 = vpop.eup %7676  ;;  %7692 = vpow2.f32 %v2784_v49  ;;  %v2788_v50 = vmul.f32 1.442695, %v2763_v11  ;;  %v12652_v49 = vld [vmem:[#allocation37_spill] sm:$0xff] }
 0x180   : > { %v9076_v35 = vpop.f32.mrf.mxu1  ;;  %v3832_v26 = vmax.f32 %v3830_v20, %v3831_v54  ;;  %7694 = vpow2.f32 %v2786_v34 }
 0x181   : > { %v9074_v62 = vpop.f32.mrf.mxu0  ;;  %v1923_v29 = vrot.slane %v1922_v32, 4  ;;  %7696 = vpow2.f32 %v2800_v6  ;;  %v2794_v6 = vmul.f32 1.442695, %v2766_v13 }
 0x182   : > { %v7505_v39 = vpop.f32.mrf.mxu1  ;;  %v7679_v55 = vpop.eup %7678  ;;  %7698 = vpow2.f32 %v2788_v50  ;;  %v12656_v50 = vld [vmem:[#allocation24_spill] sm:$0xff] }
 0x183   : > { %v7472_v60 = vpop.f32.mrf.mxu0  ;;  %v9092_v37 = vpop.eup %7680  ;;  %v1315_v42 = vmul.f32 %v7679_v55, %v8867_v56  ;;  %v1316_v25 = vmul.f32 %v7679_v55, %v8875_v18  ;;  %v1317_v58 = vmul.f32 %v7679_v55, %v8886_v10  ;;  %v1318_v20 = vmul.f32 %v7679_v55, %v8895_v23 }
 0x184   : > { %v9090_v48 = vpop.f32.mrf.mxu1  ;;  %v1319_v11 = vmul.f32 %v7679_v55, %v8909_v36  ;;  %v1320_v21 = vmul.f32 %v7679_v55, %v8922_v16  ;;  %v1321_v54 = vmul.f32 %v7679_v55, %v12652_v49  ;;  %v1924_v60 = vadd.f32 %v1923_v29, %v1922_v32 }
 0x185   : > { %v9088_v46 = vpop.f32.mrf.mxu0  ;;  %1322 = vst [vmem:[%s8710_s30] sm:$0xff] %v1315_v42  ;;  %1323 = vst [vmem:[%s8710_s30 + $0x8] sm:$0xff] %v1316_v25  ;;  %v2790_v56 = vmul.f32 1.442695, %v2764_v2  ;;  %v2834_v23 = vadd.f32 %v9092_v37, %v9084_v63  ;;  %v3833_v18 = vrot.slane %v3832_v26, 2  ;;  %v9107_v10 = vpop.eup %7682  ;;  %v2792_v32 = vmul.f32 1.442695, %v2765_v30 }
 0x186   : > { %v7508_v3 = vpop.f32.mrf.mxu1  ;;  %1324 = vst [vmem:[%s8710_s30 + $0x10] sm:$0xff] %v1317_v58  ;;  %1325 = vst [vmem:[%s8710_s30 + $0x18] sm:$0xff] %v1318_v20  ;;  %v1925_v16 = vrot.slane %v1924_v60, 2  ;;  %v9117_v55 = vpop.eup %7684  ;;  %v12655_v42 = vld [vmem:[#allocation22_spill] sm:$0xff] }
 0x187   : > { %v7475_v39 = vpop.f32.mrf.mxu0  ;;  %1326 = vst [vmem:[%s8710_s30 + $0x20] sm:$0xff] %v1319_v11  ;;  %1327 = vst [vmem:[%s8710_s30 + $0x28] sm:$0xff] %v1320_v21  ;;  %v2835_v34 = vadd.f32 %v9107_v10, %v2834_v23  ;;  %v3834_v2 = vmax.f32 %v3832_v26, %v3833_v18  ;;  %v2767_v25 = vsub.f32 %v12655_v42, %v8970_v19  ;;  %7700 = vpow2.f32 %v2790_v56  ;;  %v9122_v49 = vpop.eup %7686  ;;  %v12658_v42 = vld [vmem:[#allocation38_spill] sm:$0xff] }
 0x188   : > { %1328 = vst [vmem:[%s8710_s30 + $0x30] sm:$0x1] %v1321_v54  ;;  %v9114_v3 = vpop.f32.mrf.mxu1  ;;  %v1926_v29 = vadd.f32 %v1925_v16, %v1924_v60  ;;  %v2768_v26 = vsub.f32 %v12656_v50, %v8970_v19  ;;  %7702 = vpow2.f32 %v2792_v32 }
 0x189   : > { %v9112_v36 = vpop.f32.mrf.mxu0  ;;  %12654 = vst [vmem:[#allocation48_spill] sm:$0xff] %v9114_v3  ;;  %v2836_v11 = vadd.f32 %v9117_v55, %v2835_v34  ;;  %v3835_v21 = vrot.slane %v3834_v2, 1  ;;  %v2796_v18 = vmul.f32 1.442695, %v2767_v25  ;;  %7704 = vpow2.f32 %v2794_v6 }
 0x18a   : > { %12653 = vst [vmem:[#allocation37_spill] sm:$0xff] %v9112_v36  ;;  %v7511_v20 = vpop.f32.mrf.mxu1  ;;  %v1927_v30 = vrot.slane %v1926_v29, 1  ;;  %v9133_v56 = vpop.eup %7688  ;;  %v2798_v32 = vmul.f32 1.442695, %v2768_v26 }
 0x18b   : > { %v7478_v58 = vpop.f32.mrf.mxu0  ;;  %v2837_v39 = vadd.f32 %v9122_v49, %v2836_v11  ;;  %v9131_v23 = vmax.f32 %v3834_v2, %v3835_v21  ;;  %v9139_v50 = vpop.eup %7690 }
 0x18c   : > { %v9128_v60 = vpop.f32.mrf.mxu1  ;;  %v1928_v13 = vadd.f32 %v1927_v30, %v1926_v29  ;;  %v12659_v58 = vld [vmem:[#allocation27_spill] sm:$0xff]  ;;  %12660 = vst [vmem:[#allocation24_spill] sm:$0xff] %v9139_v50  ;;  %v9146_v29 = vpop.eup %7692 }
 0x18d   : > { %v9126_v54 = vpop.f32.mrf.mxu0  ;;  %12657 = vst [vmem:[#allocation22_spill] sm:$0xff] %v9128_v60  ;;  %v5125_v20 = vmax.f32 %v12659_v58, %v12658_v42  ;;  %v2838_v19 = vadd.f32 %v9133_v56, %v2837_v39  ;;  %12663 = vst [vmem:[#allocation50_spill] sm:$0xff] %v9146_v29  ;;  %v3837_v30 = vsub.f32 %v8774_v38, %v9131_v23 }
 0x18e   : > { %v7514_v34 = vpop.f32.mrf.mxu1  ;;  %7706 = vrcp.f32 %v1928_v13  ;;  %v3838_v6 = vsub.f32 %v8768_v31, %v9131_v23  ;;  %v3839_v26 = vsub.f32 %v8799_v9, %v9131_v23  ;;  %v3841_v31 = vsub.f32 %v8817_v7, %v9131_v23 }
 0x18f   : > { %v7481_v16 = vpop.f32.mrf.mxu0  ;;  %v5129_v21 = vmax.f32 %v5125_v20, %v9032_v12  ;;  %v2839_v25 = vadd.f32 %v9139_v50, %v2838_v19  ;;  %7708 = vpow2.f32 %v2796_v18  ;;  %v3840_v20 = vsub.f32 %v8789_v51, %v9131_v23  ;;  %v12664_v19 = vld [vmem:[#allocation32_spill] sm:$0xff]  ;;  %v12665_v12 = vld [vmem:[#allocation25_spill] sm:$0xff]  ;;  %v9161_v18 = vpop.eup %7694 }
 0x190   : > { %v9143_v2 = vpop.f32.mrf.mxu1  ;;  %v5123_v38 = vmax.f32 %v12665_v12, %v12664_v19  ;;  %12666 = vst [vmem:[#allocation25_spill] sm:$0xff] %v9161_v18  ;;  %7710 = vpow2.f32 %v2798_v32  ;;  %v7697_v51 = vpop.eup %7696  ;;  %v3842_v19 = vsub.f32 %v8810_v28, %v9131_v23  ;;  %v3859_v50 = vmul.f32 1.442695, %v3837_v30 }
 0x191   : > { %v9141_v11 = vpop.f32.mrf.mxu0  ;;  %12662 = vst [vmem:[#allocation49_spill] sm:$0xff] %v9143_v2  ;;  %v5133_v16 = vmax.f32 %v5129_v21, %v9112_v36  ;;  %v2840_v34 = vadd.f32 %v9146_v29, %v2839_v25  ;;  %v12668_v21 = vld [vmem:[#allocation26_spill] sm:$0xff]  ;;  %v12669_v25 = vld [vmem:[#allocation29_spill] sm:$0xff]  ;;  %v9180_v32 = vpop.eup %7698  ;;  %2817 = vst [vmem:[%s8824_s28 + $0x78] sm:$0x1] %v7697_v51 }
 0x192   : > { %12661 = vst [vmem:[#allocation27_spill] sm:$0xff] %v9141_v11  ;;  %v7517_v13 = vpop.f32.mrf.mxu1  ;;  %v5126_v42 = vmax.f32 %v12669_v25, %v8964_v5  ;;  %v5127_v7 = vmax.f32 %v5123_v38, %v8983_v4  ;;  %v3863_v5 = vmul.f32 1.442695, %v3839_v26  ;;  %7712 = vpow2.f32 %v3859_v50 }
 0x193   : > { %v7484_v39 = vpop.f32.mrf.mxu0  ;;  %v12667_v13 = vld [vmem:[#allocation35_spill] sm:$0xff]  ;;  %v2841_v29 = vadd.f32 %v9161_v18, %v2840_v34  ;;  %v9187_v28 = vmax.f32 %v5133_v16, %v8966_v59  ;;  %v3843_v50 = vsub.f32 %v8830_v17, %v9131_v23 }
 0x194   : > { %v5061_v39 = vpop.f32.mrf.mxu1  ;;  %v5124_v36 = vmax.f32 %v12668_v21, %v12667_v13  ;;  %v3861_v13 = vmul.f32 1.442695, %v3838_v6  ;;  %v9191_v38 = vmax.f32 %v5126_v42, %v9057_v45  ;;  %v9194_v51 = vpop.eup %7700  ;;  %v3867_v6 = vmul.f32 1.442695, %v3841_v31  ;;  %v12670_v42 = vld [vmem:[#allocation23_spill] sm:$0xff] }
 0x195   : > { %v9165_v9 = vpop.f32.mrf.mxu0  ;;  %5093 = vst [vmem:[%s9176_s21 + $0xe0] sm:$0x1] %v5061_v39  ;;  %v2842_v18 = vadd.f32 %v9180_v32, %v2841_v29  ;;  %v3865_v39 = vmul.f32 1.442695, %v3840_v20  ;;  %v3844_v16 = vsub.f32 %v12670_v42, %v9131_v23  ;;  %v3869_v20 = vmul.f32 1.442695, %v3842_v19  ;;  %v9205_v31 = vpop.eup %7702 }
 0x196   : > { %v9184_v34 = vmax.f32 %v5124_v36, %v9007_v1  ;;  %v7520_v25 = vpop.f32.mrf.mxu1  ;;  %7714 = vpow2.f32 %v3861_v13  ;;  %v5131_v36 = vmax.f32 %v5127_v7, %v9074_v62  ;;  %v3845_v13 = vsub.f32 %v8836_v33, %v9131_v23  ;;  %v9223_v33 = vpop.eup %7704  ;;  %v12672_v19 = vld [vmem:[#allocation43_spill] sm:$0xff] }
 0x197   : > { %v7487_v30 = vpop.f32.mrf.mxu0  ;;  %v2843_v29 = vadd.f32 %v9194_v51, %v2842_v18  ;;  %7716 = vpow2.f32 %v3863_v5  ;;  %v5134_v25 = vmax.f32 %v9191_v38, %v9126_v54  ;;  %v3846_v7 = vsub.f32 %v8832_v22, %v9131_v23  ;;  %v12671_v18 = vld [vmem:[#allocation42_spill] sm:$0xff]  ;;  %v1384_v59 = vld [vmem:[%s8710_s30 + $0x7] sm:$0x7f] }
 0x198   : > { %7718 = vpow2.f32 %v3865_v39  ;;  %v9230_v38 = vmax.f32 %v5131_v36, %v9141_v11  ;;  %v3873_v42 = vmul.f32 1.442695, %v3844_v16  ;;  %v12673_v30 = vld [vmem:[#allocation45_spill] sm:$0xff] }
 0x199   : > { %v2844_v17 = vadd.f32 %v9205_v31, %v2843_v29  ;;  %7720 = vpow2.f32 %v3867_v6  ;;  %v3871_v29 = vmul.f32 1.442695, %v3843_v50 }
 0x19a   : > { %7722 = vpow2.f32 %v3869_v20 }
 0x19b   : > { %v7707_v22 = vpop.eup %7706  ;;  %v2845_v39 = vadd.f32 %v9223_v33, %v2844_v17  ;;  %v1333_v17 = vld [vmem:[%s8710_s30] sm:$0x7f]  ;;  %7724 = vpow2.f32 %v3871_v29 }
 0x19c   : > { %v1930_v5 = vmul.f32 %v7707_v22, %v12671_v18  ;;  %v1931_v6 = vmul.f32 %v7707_v22, %v12672_v19  ;;  %v1932_v36 = vmul.f32 %v7707_v22, %v12673_v30  ;;  %v1933_v26 = vmul.f32 %v7707_v22, %v9000_v43  ;;  %v9243_v11 = vpop.eup %7708 }
 0x19d   : > { %v1934_v50 = vmul.f32 %v7707_v22, %v9011_v52  ;;  %v1935_v16 = vmul.f32 %v7707_v22, %v9021_v61  ;;  %v1936_v20 = vmul.f32 %v7707_v22, %v9036_v15  ;;  %v1937_v18 = vmul.f32 %v7707_v22, %v9048_v14  ;;  %v9259_v52 = vld [vmem:[%s8824_s28 + $0x78] sm:$0x1]  ;;  %v9263_v15 = vpop.eup %7710 }
 0x19e   : > { %v1938_v43 = vmul.f32 %v7707_v22, %v9052_v40  ;;  %v1939_v19 = vmul.f32 %v7707_v22, %v9062_v8  ;;  %v1940_v30 = vmul.f32 %v7707_v22, %v9067_v41  ;;  %1941 = vst [vmem:[%s8759_s23] sm:$0xff] %v1930_v5  ;;  %1942 = vst [vmem:[%s8759_s23 + $0x8] sm:$0xff] %v1931_v6  ;;  %v3875_v40 = vmul.f32 1.442695, %v3845_v13  ;;  %v12676_v13 = vld [vmem:[#allocation44_spill] sm:$0xff] }
 0x19f   : > { %1943 = vst [vmem:[%s8759_s23 + $0x10] sm:$0xff] %v1932_v36  ;;  %1944 = vst [vmem:[%s8759_s23 + $0x18] sm:$0xff] %v1933_v26  ;;  %v2846_v61 = vadd.f32 %v9243_v11, %v2845_v39  ;;  %v3858_v14 = vsub.f32 %v9026_v44, %v9131_v23  ;;  %v1386_v8 = vrot.slane %v1384_v59, 4  ;;  %v9274_v26 = vld [vmem:[%s9176_s21 + $0xe0] sm:$0x1]  ;;  %v1335_v22 = vrot.slane %v1333_v17, 4 }
 0x1a0   : > { %1945 = vst [vmem:[%s8759_s23 + $0x20] sm:$0xff] %v1934_v50  ;;  %1946 = vst [vmem:[%s8759_s23 + $0x28] sm:$0xff] %v1935_v16  ;;  %v12674_v39 = vmax.f32 %v9184_v34, %v9088_v46  ;;  %v1480_v36 = vld [vmem:[%s8710_s30 + $0x15] sm:$0x7f]  ;;  %v2848_v44 = vsel %vm12493_vm3, %v9259_v52, 0.0  ;;  %v5138_v50 = vmax.f32 %v5134_v25, %v12676_v13  ;;  %7726 = vpow2.f32 %v3873_v42 }
 0x1a1   : > { %1947 = vst [vmem:[%s8759_s23 + $0x30] sm:$0xff] %v1936_v20  ;;  %1948 = vst [vmem:[%s8759_s23 + $0x38] sm:$0xff] %v1937_v18  ;;  %v2847_v5 = vadd.f32 %v9263_v15, %v2846_v61  ;;  %v3877_v59 = vmul.f32 1.442695, %v3846_v7  ;;  %1387 = vrot.lane.b32.xlu1 %v1386_v8, %s12675_s26  ;;  %v12677_v16 = vld [vmem:[#allocation46_spill] sm:$0xff]  ;;  %v9291_v20 = vpop.eup %7712  ;;  %1336 = vrot.lane.b32.xlu0 %v1335_v22, %s12441_s0  ;;  %v5147_v7 = vsel %vm12493_vm3, %v9274_v26, -inf  ;;  %7728 = vpow2.f32 %v3875_v40 }
 0x1a2   : > { %1949 = vst [vmem:[%s8759_s23 + $0x40] sm:$0xff] %v1938_v43  ;;  %1950 = vst [vmem:[%s8759_s23 + $0x48] sm:$0xff] %v1939_v19  ;;  %v5136_v6 = vmax.f32 %v12674_v39, %v9165_v9  ;;  %v5139_v29 = vmax.f32 %v9230_v38, %v12677_v16  ;;  %v1433_v17 = vld [vmem:[%s8710_s30 + $0xe] sm:$0x7f]  ;;  %v12678_v25 = vsub.f32 %v8858_v24, %v9131_v23  ;;  %s12680_s0 = smul.u32 12, %s9221_s11  ;;  %s7957_s11 = smov 48  }
 0x1a3   : > { %1951 = vst [vmem:[%s8759_s23 + $0x50] sm:$0x1] %v1940_v30  ;;  %v2849_v18 = vadd.f32 %v2848_v44, %v2847_v5  ;;  %v9298_v43 = vpop.eup %7714  ;;  %v5142_v19 = vmax.f32 %v5138_v50, %v9076_v35  ;;  %v1482_v30 = vrot.slane %v1480_v36, 4  ;;  %v12681_v24 = vmax.f32 %v9187_v28, %v9059_v0  ;;  %v1558_v22 = vld [vmem:[%s8710_s30 + $0x23] sm:$0x7f] }
 0x1a4   : > { %v5140_v34 = vmax.f32 %v5136_v6, %v9034_v27  ;;  %v3879_v38 = vmul.f32 1.442695, %v12678_v25  ;;  %v5143_v42 = vmax.f32 %v5139_v29, %v9090_v48  ;;  %s9309_s19 = sadd.s32 %s12680_s0, %s12679_s1  ;;  %v3947_v8 = vadd.f32 %v9298_v43, %v9291_v20  ;;  %v9318_v39 = vpop.eup %7716  ;;  %s12682_s0 = smov 112   ;;  %v1607_v50 = vld [vmem:[%s8710_s30 + $0x2a] sm:$0x7f] }
 0x1a5   : > { %v2850_v61 = vrot.slane %v2849_v18, 4  ;;  %v5145_v5 = vmax.f32 %v12681_v24, %v9128_v60  ;;  %v5146_v36 = vmax.f32 %v5142_v19, %v9143_v2  ;;  %1483 = vrot.lane.b32.xlu1 %v1482_v30, %s12682_s0  ;;  %v1435_v40 = vrot.slane %v1433_v17, 4  ;;  %v9324_v29 = vpop.eup %7718  ;;  %s7002_s1 = sshll.u32 %s9309_s19, 3  ;;  %v1530_v60 = vld [vmem:[%s8710_s30 + $0x1c] sm:$0x7f]  ;;  %s12686_s19 = smov 16  }
 0x1a6   : > { %v5144_v6 = vmax.f32 %v5140_v34, %v9114_v3  ;;  %v5148_v44 = vmax.f32 %v5143_v42, %v5147_v7  ;;  %7730 = vpow2.f32 %v3877_v59  ;;  %v12683_v28 = vsub.f32 %v8847_v47, %v9131_v23  ;;  %v9333_v34 = vld [vmem:[%s8759_s23 + $0x9] sm:$0xff]  ;;  %v9335_v19 = vpop.eup %7720  ;;  %s9348_s12 = scalar_lea.vmem %s12687_s2, %s7002_s1  ;;  %s12694_s1 = smov 64  }
 0x1a7   : > { %v2851_v25 = vadd.f32 %v2850_v61, %v2849_v18  ;;  %v3948_v41 = vadd.f32 %v9318_v39, %v3947_v8  ;;  %v12684_v7 = vsub.f32 %v8878_v57, %v9131_v23  ;;  %v5150_v30 = vmax.f32 %v5145_v5, %v5146_v36  ;;  %1436 = vrot.lane.b32.xlu0 %v1435_v40, %s12685_s24  ;;  %v9341_v18 = vpop.eup %7722  ;;  %v1332_v36 = vld [vmem:[%s9348_s12 + $0x20] sm:$0x7] }
 0x1a8   : > { %v3881_v24 = vmul.f32 1.442695, %v12683_v28  ;;  %v5149_v42 = vmax.f32 %v5148_v44, %v5144_v6  ;;  %v1560_v59 = vrot.slane %v1558_v22, 4  ;;  %7732 = vpow2.f32 %v3879_v38  ;;  %v1330_v6 = vld [vmem:[%s9348_s12 + $0x8] sm:$0xf0]  ;;  %v12689_v44 = vld [vmem:[#allocation30_spill] sm:$0xff] }
 0x1a9   : > { %v3883_v17 = vmul.f32 1.442695, %v12684_v7  ;;  %v2852_v47 = vrot.slane %v2851_v25, 2  ;;  %v3901_v61 = vmul.f32 1.442695, %v3858_v14  ;;  %v3949_v8 = vadd.f32 %v9324_v29, %v3948_v41 }
 0x1aa   : > { %v5151_v28 = vmax.f32 %v5149_v42, %v5150_v30  ;;  %1561 = vrot.lane.b32.xlu1 %v1560_v59, %s12686_s19  ;;  %v1609_v2 = vrot.slane %v1607_v50, 4  ;;  %v1532_v57 = vrot.slane %v1530_v60, 4  ;;  %v12448_v5 = vrot.slane %v9333_v34, 5  ;;  %v12690_v50 = vld [vmem:[#allocation28_spill] sm:$0xff]  ;;  %v9368_v59 = vpop.eup %7724 }
 0x1ab   : > { %v2853_v22 = vadd.f32 %v2852_v47, %v2851_v25  ;;  %7734 = vpow2.f32 %v3881_v24  ;;  %v12688_v41 = vsub.f32 %v8863_v53, %v9131_v23  ;;  %v3950_v38 = vadd.f32 %v9335_v19, %v3949_v8  ;;  %v12691_v53 = vld [vmem:[#allocation33_spill] sm:$0xff]  ;;  %12693 = vst [vmem:[#allocation23_spill] sm:$0xff] %v9368_v59 }
 0x1ac   : > { %v3851_v40 = vsub.f32 %v12689_v44, %v9131_v23  ;;  %v3852_v60 = vsub.f32 %v12690_v50, %v9131_v23  ;;  %v5152_v7 = vrot.slane %v5151_v28, 4  ;;  %1610 = vrot.lane.b32.xlu0 %v1609_v2, %s7956_s18  ;;  %v3853_v24 = vsub.f32 %v12691_v53, %v9131_v23  ;;  %v9366_v30 = vld [vmem:[%s8759_s23 + $0x12] sm:$0xff]  ;;  %v9374_v2 = vld [vmem:[%s8759_s23] sm:$0xff]  ;;  %v1957_v44 = vld [vmem:[%s8759_s23 + $0x8] sm:$0x1] }
 0x1ad   : > { %v3885_v14 = vmul.f32 1.442695, %v12688_v41  ;;  %v2854_v25 = vrot.slane %v2853_v22, 1  ;;  %7736 = vpow2.f32 %v3883_v17  ;;  %v3951_v42 = vadd.f32 %v9341_v18, %v3950_v38  ;;  %12692 = vst [vmem:[#allocation26_spill] sm:$0xff] %v9366_v30  ;;  %v12695_v17 = vld [vmem:[#allocation31_spill] sm:$0xff]  ;;  %v9380_v3 = vpop.eup %7726 }
 0x1ae   : > { %7738 = vpow2.f32 %v3901_v61  ;;  %v5153_v47 = vmax.f32 %v5151_v28, %v5152_v7  ;;  %v1534_v8 = vmul.f32 %v1532_v57, %v1330_v6  ;;  %v1535_v41 = vmul.f32 %v1532_v57, %v1332_v36  ;;  %2027 = vrot.lane.b32.xlu1 %v12448_v5, %s12694_s1  ;;  %12696 = vst [vmem:[#allocation42_spill] sm:$0xff] %v9380_v3 }
 0x1af   : > { %v2855_v50 = vadd.f32 %v2854_v25, %v2853_v22  ;;  %v3854_v53 = vsub.f32 %v12695_v17, %v9131_v23  ;;  %7740 = vpow2.f32 %v3885_v14  ;;  %v3952_v38 = vadd.f32 %v9368_v59, %v3951_v42  ;;  %v9385_v25 = vpop.eup %7728  ;;  %v12697_v14 = vld [vmem:[#allocation36_spill] sm:$0xff] }
 0x1b0   : > { %v3887_v61 = vmul.f32 1.442695, %v3851_v40  ;;  %v3889_v28 = vmul.f32 1.442695, %v3852_v60  ;;  %v5154_v57 = vrot.slane %v5153_v47, 2  ;;  %v12451_v6 = vrot.slane %v9366_v30, 5 }
 0x1b1   : > { %7742 = vrcp.f32 %v2855_v50  ;;  %v3953_v36 = vadd.f32 %v9380_v3, %v3952_v38  ;;  %v1961_v7 = vrot.slane %v1957_v44, 5  ;;  %v3855_v42 = vsub.f32 %v12697_v14, %v9131_v23  ;;  %v9393_v40 = vld [vmem:[%s8759_s23 + $0x24] sm:$0xff]  ;;  %v2209_v60 = vld [vmem:[%s8759_s23 + $0x2c] sm:$0x1] }
 0x1b2   : > { %v5155_v17 = vmax.f32 %v5153_v47, %v5154_v57  ;;  %v1538_v5 = vrot.slane %v1534_v8, 4  ;;  %v1539_v59 = vrot.slane %v1535_v41, 4  ;;  %2090 = vrot.lane.b32.xlu1 %v12451_v6, %s12675_s26  ;;  %v12698_v50 = vld [vmem:[#allocation34_spill] sm:$0xff]  ;;  %v3891_v44 = vmul.f32 1.442695, %v3853_v24  ;;  %v12699_v47 = vld [vmem:[#allocation39_spill] sm:$0xff] }
 0x1b3   : > { %v3856_v38 = vsub.f32 %v12698_v50, %v9131_v23  ;;  %v3954_v22 = vadd.f32 %v9385_v25, %v3953_v36  ;;  %v9399_v3 = vpop.eup %7730  ;;  %v3857_v8 = vsub.f32 %v12699_v47, %v9131_v23  ;;  %7744 = vpow2.f32 %v3887_v61  ;;  %v9409_v36 = vld [vmem:[%s8759_s23 + $0x48] sm:$0xff] }
 0x1b4   : > { %v3893_v41 = vmul.f32 1.442695, %v3854_v53  ;;  %v12700_v50 = vrot.slane %v9374_v2, 5  ;;  %v2213_v6 = vrot.slane %v2209_v60, 5  ;;  %7746 = vpow2.f32 %v3889_v28 }
 0x1b5   : > { %v3955_v57 = vadd.f32 %v9399_v3, %v3954_v22  ;;  %v9411_v30 = vpop.eup %7732  ;;  %v3895_v23 = vmul.f32 1.442695, %v3855_v42  ;;  %v5156_v61 = vrot.slane %v5155_v17, 1  ;;  %v1540_v53 = vsel %vm1347_vm4, %v1538_v5, %v1539_v59  ;;  %v2432_v22 = vld [vmem:[%s8759_s23 + $0x50] sm:$0x1] }
 0x1b6   : > { %v1962_v24 = vsel %vm12512_vm1, %v12700_v50, %v1961_v7  ;;  %12701 = vst [vmem:[#allocation43_spill] sm:$0xff] %v9411_v30  ;;  %7748 = vpow2.f32 %v3891_v44  ;;  %v3897_v47 = vmul.f32 1.442695, %v3856_v38  ;;  %v9418_v7 = vld [vmem:[%s8759_s23 + $0x1b] sm:$0xff]  ;;  %v2148_v50 = vld [vmem:[%s8759_s23 + $0x23] sm:$0x1] }
 0x1b7   : > { %1965 = vrot.lane.b32.xlu1 %v1962_v24, %s7957_s11  ;;  %v3956_v14 = vadd.f32 %v9411_v30, %v3955_v57  ;;  %7750 = vpow2.f32 %v3893_v41  ;;  %v3899_v28 = vmul.f32 1.442695, %v3857_v8  ;;  %v9426_v59 = vsel %vm12535_vm5, %v1540_v53, 0.0  ;;  %v9438_v41 = vld [vmem:[%s8759_s23 + $0x36] sm:$0xff]  ;;  %v9441_v53 = vld [vmem:[%s8759_s23 + $0x3e] sm:$0x1] }
 0x1b8   : > { %v9421_v60 = vpop.eup %7734  ;;  %v12703_v38 = vrot.slane %v9393_v40, 5  ;;  %v2436_v57 = vrot.slane %v2432_v22, 5  ;;  %7752 = vpow2.f32 %v3895_v23  ;;  %v9433_v30 = vmax.f32 %v5155_v17, %v5156_v61 }
 0x1b9   : > { %12702 = vst [vmem:[#allocation45_spill] sm:$0xff] %v9421_v60  ;;  %v3957_v5 = vadd.f32 %v9421_v60, %v3956_v14  ;;  %v12455_v8 = vrot.slane %v9418_v7, 5  ;;  %v2152_v14 = vrot.slane %v2148_v50, 5  ;;  %7754 = vpow2.f32 %v3897_v47  ;;  %v12706_v50 = vld [vmem:[#allocation50_spill] sm:$0xff] }
 0x1ba   : > { %v2214_v44 = vsel %vm12512_vm1, %v12703_v38, %v2213_v6  ;;  %v9431_v24 = vpop.eup %7736  ;;  %7756 = vpow2.f32 %v3899_v28  ;;  %v1544_v17 = vrot.slane %v9426_v59, 4  ;;  %v12704_v61 = vrot.slane %v9409_v36, 5 }
 0x1bb   : > { %2217 = vrot.lane.b32.xlu1 %v2214_v44, %s12682_s0  ;;  %v7739_v42 = vpop.eup %7738  ;;  %v3958_v60 = vadd.f32 %v9431_v24, %v3957_v5  ;;  %v2311_v38 = vrot.slane %v9441_v53, 5  ;;  %v5158_v47 = vsub.f32 %v12665_v12, %v9433_v30  ;;  %v5159_v28 = vsub.f32 %v12668_v21, %v9433_v30 }
 0x1bc   : > { %v9444_v6 = vpop.eup %7740  ;;  %3924 = vst [vmem:[%s8954_s29 + $0xa8] sm:$0x1] %v7739_v42  ;;  %v2437_v22 = vsel %vm12512_vm1, %v12704_v61, %v2436_v57  ;;  %v5160_v42 = vsub.f32 %v12659_v58, %v9433_v30  ;;  %v12705_v61 = vld [vmem:[#allocation24_spill] sm:$0xff]  ;;  %vm2053_vm5 = vcmask 1040896  }
 0x1bd   : > { %v3959_v23 = vadd.f32 %v9444_v6, %v3958_v60  ;;  %v2153_v60 = vsel %vm12512_vm1, %v12455_v8, %v2152_v14 }
 0x1be   : > { %v7743_v44 = vpop.eup %7742 }
 0x1bf   : > { %2440 = vrot.lane.b32.xlu1 %v2437_v22, %s7957_s11  ;;  %v2857_v5 = vmul.f32 %v7743_v44, %v9084_v63  ;;  %v2858_v12 = vmul.f32 %v7743_v44, %v9092_v37  ;;  %v2859_v21 = vmul.f32 %v7743_v44, %v9107_v10  ;;  %v2860_v58 = vmul.f32 %v7743_v44, %v9117_v55  ;;  %v12707_v63 = vld [vmem:[#allocation25_spill] sm:$0xff] }
 0x1c0   : > { %v2861_v57 = vmul.f32 %v7743_v44, %v9122_v49  ;;  %v2862_v53 = vmul.f32 %v7743_v44, %v9133_v56  ;;  %v2863_v22 = vmul.f32 %v7743_v44, %v12705_v61  ;;  %v2864_v14 = vmul.f32 %v7743_v44, %v12706_v50  ;;  %v9472_v8 = vpop.eup %7744  ;;  %v9483_v56 = vld [vmem:[%s8759_s23 + $0x3f] sm:$0xff]  ;;  %v2371_v50 = vld [vmem:[%s8759_s23 + $0x47] sm:$0x1] }
 0x1c1   : > { %v2865_v37 = vmul.f32 %v7743_v44, %v12707_v63  ;;  %v2866_v10 = vmul.f32 %v7743_v44, %v9180_v32  ;;  %v2867_v55 = vmul.f32 %v7743_v44, %v9194_v51  ;;  %v2868_v49 = vmul.f32 %v7743_v44, %v9205_v31  ;;  %2873 = vst [vmem:[%s8824_s28] sm:$0xff] %v2857_v5  ;;  %v9495_v5 = vpop.eup %7746 }
 0x1c2   : > { %2874 = vst [vmem:[%s8824_s28 + $0x8] sm:$0xff] %v2858_v12  ;;  %2875 = vst [vmem:[%s8824_s28 + $0x10] sm:$0xff] %v2859_v21  ;;  %v2869_v61 = vmul.f32 %v7743_v44, %v9223_v33  ;;  %v2870_v32 = vmul.f32 %v7743_v44, %v9243_v11  ;;  %v2871_v51 = vmul.f32 %v7743_v44, %v9263_v15  ;;  %v12708_v33 = vld [vmem:[#allocation29_spill] sm:$0xff]  ;;  %v5189_v12 = vmul.f32 1.442695, %v5159_v28 }
 0x1c3   : > { %2876 = vst [vmem:[%s8824_s28 + $0x18] sm:$0xff] %v2860_v58  ;;  %v2872_v31 = vmul.f32 %v7743_v44, %v9259_v52  ;;  %2877 = vst [vmem:[%s8824_s28 + $0x20] sm:$0xff] %v2861_v57  ;;  %2156 = vrot.lane.b32.xlu1 %v2153_v60, %s12685_s24  ;;  %v3960_v11 = vadd.f32 %v9472_v8, %v3959_v23  ;;  %v5161_v15 = vsub.f32 %v12708_v33, %v9433_v30  ;;  %v9504_v52 = vpop.eup %7748  ;;  %v12709_v23 = vld [vmem:[#allocation32_spill] sm:$0xff] }
 0x1c4   : > { %2878 = vst [vmem:[%s8824_s28 + $0x28] sm:$0xff] %v2862_v53  ;;  %2879 = vst [vmem:[%s8824_s28 + $0x30] sm:$0xff] %v2863_v22  ;;  %v5187_v44 = vmul.f32 1.442695, %v5158_v47  ;;  %v12460_v60 = vrot.slane %v9483_v56, 5  ;;  %v2375_v21 = vrot.slane %v2371_v50, 5  ;;  %v9511_v58 = vpop.eup %7750  ;;  %v5162_v53 = vsub.f32 %v12709_v23, %v9433_v30 }
 0x1c5   : > { %2880 = vst [vmem:[%s8824_s28 + $0x38] sm:$0xff] %v2864_v14  ;;  %2881 = vst [vmem:[%s8824_s28 + $0x40] sm:$0xff] %v2865_v37  ;;  %v3961_v57 = vadd.f32 %v9495_v5, %v3960_v11  ;;  %v5191_v22 = vmul.f32 1.442695, %v5160_v42  ;;  %v12710_v14 = vrot.slane %v9438_v41, 5  ;;  %v1545_v37 = vadd.f32 %v1544_v17, %v9426_v59  ;;  %v9521_v47 = vpop.eup %7752  ;;  %v12712_v17 = vld [vmem:[#allocation38_spill] sm:$0xff] }
 0x1c6   : > { %2882 = vst [vmem:[%s8824_s28 + $0x48] sm:$0xff] %v2866_v10  ;;  %2883 = vst [vmem:[%s8824_s28 + $0x50] sm:$0xff] %v2867_v55  ;;  %7758 = vpow2.f32 %v5187_v44  ;;  %v12711_v10 = vld [vmem:[#allocation35_spill] sm:$0xff]  ;;  %v9526_v42 = vpop.eup %7754  ;;  %v12713_v11 = vld [vmem:[#allocation40_spill] sm:$0xff] }
 0x1c7   : > { %2884 = vst [vmem:[%s8824_s28 + $0x58] sm:$0xff] %v2868_v49  ;;  %2885 = vst [vmem:[%s8824_s28 + $0x60] sm:$0xff] %v2869_v61  ;;  %v2312_v63 = vsel %vm12512_vm1, %v12710_v14, %v2311_v38  ;;  %v3962_v28 = vadd.f32 %v9504_v52, %v3961_v57  ;;  %v5163_v55 = vsub.f32 %v12711_v10, %v9433_v30  ;;  %7760 = vpow2.f32 %v5189_v12  ;;  %v9531_v50 = vpop.eup %7756  ;;  %v9541_v44 = vld [vmem:[%s8954_s29 + $0xa8] sm:$0x1] }
 0x1c8   : > { %2886 = vst [vmem:[%s8824_s28 + $0x68] sm:$0xff] %v2870_v32  ;;  %2887 = vst [vmem:[%s8824_s28 + $0x70] sm:$0xff] %v2871_v51  ;;  %2315 = vrot.lane.b32.xlu1 %v2312_v63, %s12686_s19  ;;  %v5193_v49 = vmul.f32 1.442695, %v5161_v15  ;;  %v2376_v38 = vsel %vm12512_vm1, %v12460_v60, %v2375_v21  ;;  %v5164_v61 = vsub.f32 %v12712_v17, %v9433_v30  ;;  %7762 = vpow2.f32 %v5191_v22 }
 0x1c9   : > { %2888 = vst [vmem:[%s8824_s28 + $0x78] sm:$0x1] %v2872_v31  ;;  %v3963_v59 = vadd.f32 %v9511_v58, %v3962_v28  ;;  %v5195_v32 = vmul.f32 1.442695, %v5162_v53  ;;  %v1546_v51 = vrot.slane %v1545_v37, 2  ;;  %v5165_v33 = vsub.f32 %v12713_v11, %v9433_v30  ;;  %v9554_v10 = vld [vmem:[%s8824_s28 + $0xb] sm:$0xff] }
 0x1ca   : > { %7764 = vpow2.f32 %v5193_v49  ;;  %v5197_v15 = vmul.f32 1.442695, %v5163_v55  ;;  %v5166_v21 = vsub.f32 %v8983_v4, %v9433_v30  ;;  %v5199_v57 = vmul.f32 1.442695, %v5164_v61  ;;  %v2957_v55 = vld [vmem:[%s8824_s28 + $0x13] sm:$0x7] }
 0x1cb   : > { %v3964_v31 = vadd.f32 %v9521_v47, %v3963_v59  ;;  %7766 = vpow2.f32 %v5195_v32  ;;  %v5167_v22 = vsub.f32 %v9007_v1, %v9433_v30  ;;  %v5201_v63 = vmul.f32 1.442695, %v5165_v33  ;;  %v12714_v49 = vld [vmem:[#allocation47_spill] sm:$0xff] }
 0x1cc   : > { %2379 = vrot.lane.b32.xlu1 %v2376_v38, %s7956_s18  ;;  %7768 = vpow2.f32 %v5197_v15  ;;  %v1547_v28 = vadd.f32 %v1546_v51, %v1545_v37  ;;  %v3967_v4 = vsel %vm12493_vm3, %v9541_v44, 0.0  ;;  %v5168_v38 = vsub.f32 %v12714_v49, %v9433_v30 }
 0x1cd   : > { %v3965_v12 = vadd.f32 %v9526_v42, %v3964_v31  ;;  %v9547_v23 = vld [vmem:[%s8824_s28 + $0x4d] sm:$0xff]  ;;  %v3263_v53 = vld [vmem:[%s8824_s28 + $0x55] sm:$0x7]  ;;  %7770 = vpow2.f32 %v5199_v57  ;;  %v5203_v61 = vmul.f32 1.442695, %v5166_v21  ;;  %v5169_v37 = vsub.f32 %v9057_v45, %v9433_v30 }
 0x1ce   : > { %v12459_v59 = vrot.slane %v9547_v23, 6  ;;  %v3267_v17 = vrot.slane %v3263_v53, 6  ;;  %v1548_v32 = vrot.slane %v1547_v28, 1  ;;  %v12456_v31 = vrot.slane %v9554_v10, 6  ;;  %v9572_v21 = vld [vmem:[%s8824_s28 + $0x16] sm:$0xff] }
 0x1cf   : > { %v3966_v14 = vadd.f32 %v9531_v50, %v3965_v12  ;;  %v2961_v11 = vrot.slane %v2957_v55, 6  ;;  %7772 = vpow2.f32 %v5201_v63  ;;  %v5205_v12 = vmul.f32 1.442695, %v5167_v22  ;;  %v3019_v57 = vld [vmem:[%s8824_s28 + $0x1e] sm:$0x7] }
 0x1d0   : > { %v3268_v51 = vsel %vm12516_vm6, %v12459_v59, %v3267_v17  ;;  %v1549_v53 = vadd.f32 %v1548_v32, %v1547_v28  ;;  %7774 = vpow2.f32 %v5203_v61  ;;  %v5170_v22 = vsub.f32 %v9074_v62, %v9433_v30  ;;  %v9591_v32 = vld [vmem:[%s8824_s28 + $0x21] sm:$0xff] }
 0x1d1   : > { %v3968_v1 = vadd.f32 %v3967_v4, %v3966_v14  ;;  %3271 = vrot.lane.b32.xlu1 %v3268_v51, %s12686_s19  ;;  %v5207_v4 = vmul.f32 1.442695, %v5168_v38  ;;  %v2962_v28 = vsel %vm12516_vm6, %v12456_v31, %v2961_v11  ;;  %v12458_v49 = vrot.slane %v9572_v21, 6  ;;  %v3079_v51 = vld [vmem:[%s8824_s28 + $0x29] sm:$0x7] }
 0x1d2   : > { %1551 = vrot.lane.b32.xlu0 %v1549_v53, %s12685_s24  ;;  %v3023_v17 = vrot.slane %v3019_v57, 6  ;;  %7776 = vpow2.f32 %v5205_v12  ;;  %v5209_v38 = vmul.f32 1.442695, %v5169_v37  ;;  %v12716_v53 = vrot.slane %v9374_v2, 5  ;;  %v9611_v2 = vld [vmem:[%s8824_s28 + $0x63] sm:$0xff] }
 0x1d3   : > { %v9568_v33 = vpop.eup %7758  ;;  %v3969_v15 = vrot.slane %v3968_v1, 4  ;;  %7778 = vpow2.f32 %v5207_v4  ;;  %v5211_v12 = vmul.f32 1.442695, %v5170_v22 }
 0x1d4   : > { %v9575_v14 = vpop.eup %7760  ;;  %v3024_v57 = vsel %vm12516_vm6, %v12458_v49, %v3023_v17  ;;  %7780 = vpow2.f32 %v5209_v38  ;;  %v5171_v17 = vsub.f32 %v9088_v46, %v9433_v30  ;;  %v12719_v38 = vrot.slane %v9393_v40, 5  ;;  %v9635_v40 = vld [vmem:[%s8824_s28 + $0x6e] sm:$0xff]  ;;  %v2021_v49 = vld [vmem:[%s8759_s23 + $0x11] sm:$0x1] }
 0x1d5   : > { %v3970_v45 = vadd.f32 %v3969_v15, %v3968_v1  ;;  %v5303_v55 = vadd.f32 %v9575_v14, %v9568_v33  ;;  %v9580_v63 = vpop.eup %7762  ;;  %2965 = vrot.lane.b32.xlu1 %v2962_v28, %s7957_s11  ;;  %v3083_v28 = vrot.slane %v3079_v51, 6  ;;  %v12718_v51 = vld [vmem:[#allocation37_spill] sm:$0xff]  ;;  %7782 = vpow2.f32 %v5211_v12  ;;  %v3445_v12 = vld [vmem:[%s8824_s28 + $0x76] sm:$0x7] }
 0x1d6   : > { %1963 = vrot.lane.b32.xlu0 %v12716_v53, %s7957_s11  ;;  %v5172_v53 = vsub.f32 %v12718_v51, %v9433_v30  ;;  %v12462_v46 = vrot.slane %v9611_v2, 6 }
 0x1d7   : > { %v3971_v1 = vrot.slane %v3970_v45, 2  ;;  %v5304_v61 = vadd.f32 %v9580_v63, %v5303_v55  ;;  %v9594_v15 = vpop.eup %7764  ;;  %v12457_v55 = vrot.slane %v9591_v32, 6 }
 0x1d8   : > { %12715 = vst [vmem:[#allocation44_spill] sm:$0xff] %v9594_v15  ;;  %v9600_v37 = vpop.eup %7766  ;;  %v5215_v60 = vmul.f32 1.442695, %v5172_v53  ;;  %v2894_v53 = vld [vmem:[%s8824_s28 + $0x8] sm:$0x7] }
 0x1d9   : > { %v3972_v62 = vadd.f32 %v3971_v1, %v3970_v45  ;;  %v5305_v11 = vadd.f32 %v9594_v15, %v5304_v61  ;;  %12717 = vst [vmem:[#allocation46_spill] sm:$0xff] %v9600_v37  ;;  %v5186_v45 = vsub.f32 %v9274_v26, %v9433_v30  ;;  %3027 = vrot.lane.b32.xlu1 %v3024_v57, %s12694_s1  ;;  %v3385_v1 = vld [vmem:[%s8824_s28 + $0x6b] sm:$0x7]  ;;  %v9614_v22 = vpop.eup %7768  ;;  %v3183_v15 = vld [vmem:[%s8824_s28 + $0x3f] sm:$0x7] }
 0x1da   : > { %2215 = vrot.lane.b32.xlu0 %v12719_v38, %s12682_s0  ;;  %v3084_v57 = vsel %vm12516_vm6, %v12457_v55, %v3083_v28  ;;  %v12720_v28 = vld [vmem:[#allocation27_spill] sm:$0xff] }
 0x1db   : > { %v3973_v31 = vrot.slane %v3972_v62, 1  ;;  %v5306_v4 = vadd.f32 %v9600_v37, %v5305_v11  ;;  %v9624_v11 = vpop.eup %7770  ;;  %v5174_v55 = vsub.f32 %v12720_v28, %v9433_v30  ;;  %v3449_v28 = vrot.slane %v3445_v12, 6 }
 0x1dc   : > { %v9638_v38 = vpop.eup %7772 }
 0x1dd   : > { %v3974_v61 = vadd.f32 %v3973_v31, %v3972_v62  ;;  %v5307_v26 = vadd.f32 %v9614_v22, %v5306_v4  ;;  %v3389_v31 = vrot.slane %v3385_v1, 6  ;;  %v5173_v62 = vsub.f32 %v9126_v54, %v9433_v30  ;;  %3087 = vrot.lane.b32.xlu1 %v3084_v57, %s12675_s26  ;;  %v12721_v54 = vld [vmem:[#allocation41_spill] sm:$0xff]  ;;  %v9651_v59 = vpop.eup %7774 }
 0x1de   : > { %v5243_v4 = vmul.f32 1.442695, %v5186_v45  ;;  %v5175_v1 = vsub.f32 %v9165_v9, %v9433_v30  ;;  %v5176_v45 = vsub.f32 %v12721_v54, %v9433_v30  ;;  %v12722_v57 = vrot.slane %v9409_v36, 5 }
 0x1df   : > { %7784 = vrcp.f32 %v3974_v61  ;;  %v5308_v51 = vadd.f32 %v9624_v11, %v5307_v26  ;;  %v5213_v61 = vmul.f32 1.442695, %v5171_v17  ;;  %v3390_v9 = vsel %vm12516_vm6, %v12462_v46, %v3389_v31  ;;  %v9676_v17 = vld [vmem:[%s8824_s28 + $0x37] sm:$0xff] }
 0x1e0   : > { %2438 = vrot.lane.b32.xlu0 %v12722_v57, %s7957_s11  ;;  %v5177_v54 = vsub.f32 %v12676_v13, %v9433_v30  ;;  %v5217_v37 = vmul.f32 1.442695, %v5173_v62  ;;  %7786 = vpow2.f32 %v5243_v4  ;;  %v9665_v57 = vpop.eup %7776  ;;  %v5219_v31 = vmul.f32 1.442695, %v5174_v55 }
 0x1e1   : > { %v5309_v26 = vadd.f32 %v9638_v38, %v5308_v51  ;;  %3393 = vrot.lane.b32.xlu1 %v3390_v9, %s7957_s11  ;;  %v9662_v51 = vld [vmem:[%s8824_s28] sm:$0xff]  ;;  %7788 = vpow2.f32 %v5213_v61  ;;  %v5221_v12 = vmul.f32 1.442695, %v5175_v1  ;;  %v2025_v46 = vrot.slane %v2021_v49, 5  ;;  %v9679_v61 = vpop.eup %7778 }
 0x1e2   : > { %v5178_v13 = vsub.f32 %v12677_v16, %v9433_v30  ;;  %v5179_v62 = vsub.f32 %v9034_v27, %v9433_v30  ;;  %v5223_v4 = vmul.f32 1.442695, %v5176_v45  ;;  %v12723_v9 = vrot.slane %v9418_v7, 5  ;;  %12724 = vst [vmem:[#allocation30_spill] sm:$0xff] %v9679_v61  ;;  %v9682_v49 = vld [vmem:[%s8759_s23 + $0x1a] sm:$0x1] }
 0x1e3   : > { %v5310_v36 = vadd.f32 %v9651_v59, %v5309_v26  ;;  %7790 = vpow2.f32 %v5215_v60  ;;  %v12725_v16 = vrot.slane %v9635_v40, 6  ;;  %v12465_v27 = vrot.slane %v9662_v51, 6  ;;  %v9692_v60 = vpop.eup %7780 }
 0x1e4   : > { %2154 = vrot.lane.b32.xlu0 %v12723_v9, %s12685_s24  ;;  %v2898_v1 = vrot.slane %v2894_v53, 6  ;;  %v5180_v7 = vsub.f32 %v9059_v0, %v9433_v30  ;;  %7792 = vpow2.f32 %v5217_v37  ;;  %v5225_v45 = vmul.f32 1.442695, %v5177_v54  ;;  %12726 = vst [vmem:[#allocation28_spill] sm:$0xff] %v9692_v60 }
 0x1e5   : > { %v5311_v26 = vadd.f32 %v9665_v57, %v5310_v36  ;;  %v3450_v55 = vsel %vm12516_vm6, %v12725_v16, %v3449_v28  ;;  %7794 = vpow2.f32 %v5219_v31  ;;  %v12464_v9 = vrot.slane %v9676_v17, 6  ;;  %v12731_v31 = vld [vmem:[#allocation42_spill] sm:$0xff] }
 0x1e6   : > { %3453 = vrot.lane.b32.xlu1 %v3450_v55, %s12694_s1  ;;  %v3187_v28 = vrot.slane %v3183_v15, 6  ;;  %7796 = vpow2.f32 %v5221_v12  ;;  %v12727_v53 = vrot.slane %v9438_v41, 5  ;;  %v12728_v0 = vrot.slane %v9333_v34, 5  ;;  %v9707_v55 = vld [vmem:[%s8824_s28 + $0x60] sm:$0x7]  ;;  %v9716_v34 = vpop.eup %7782 }
 0x1e7   : > { %v5312_v36 = vadd.f32 %v9679_v61, %v5311_v26  ;;  %v9704_v26 = vld [vmem:[%s8824_s28 + $0x58] sm:$0xff]  ;;  %v5181_v15 = vsub.f32 %v9076_v35, %v9433_v30  ;;  %7798 = vpow2.f32 %v5223_v4  ;;  %v2899_v41 = vsel %vm12516_vm6, %v12465_v27, %v2898_v1 }
 0x1e8   : > { %2313 = vrot.lane.b32.xlu0 %v12727_v53, %s12686_s19  ;;  %v2026_v37 = vsel %vm12512_vm1, %v12728_v0, %v2025_v46  ;;  %7800 = vpow2.f32 %v5225_v45  ;;  %v5227_v46 = vmul.f32 1.442695, %v5178_v13  ;;  %v9718_v12 = vmul.f32 1.442695, %v5179_v62  ;;  %v12730_v27 = vld [vmem:[#allocation23_spill] sm:$0xff] }
 0x1e9   : > { %v5313_v16 = vadd.f32 %v9692_v60, %v5312_v36  ;;  %v9720_v36 = vmul.f32 1.442695, %v5180_v7  ;;  %v3188_v4 = vsel %vm12516_vm6, %v12464_v9, %v3187_v28  ;;  %v12472_v1 = vrot.slane %v9704_v26, 6 }
 0x1ea   : > { %2902 = vrot.lane.b32.xlu1 %v2899_v41, %s7956_s18  ;;  %v3329_v45 = vrot.slane %v9707_v55, 6  ;;  %v12729_v41 = vrot.slane %v9483_v56, 5  ;;  %v12733_v56 = vld [vmem:[#allocation45_spill] sm:$0xff]  ;;  %7802 = vpow2.f32 %v5227_v46  ;;  %v12740_v35 = vsub.f32 %v9090_v48, %v9433_v30 }
 0x1eb   : > { %v5314_v0 = vadd.f32 %v9716_v34, %v5313_v16  ;;  %7804 = vpow2.f32 %v9718_v12  ;;  %v12743_v48 = vld [vmem:[#allocation49_spill] sm:$0xff] }
 0x1ec   : > { %v7785_v53 = vpop.eup %7784  ;;  %2377 = vrot.lane.b32.xlu0 %v12729_v41, %s7956_s18  ;;  %7806 = vpow2.f32 %v9720_v36 }
 0x1ed   : > { %v3976_v13 = vmul.f32 %v7785_v53, %v9291_v20  ;;  %v3977_v62 = vmul.f32 %v7785_v53, %v9298_v43  ;;  %v3978_v7 = vmul.f32 %v7785_v53, %v9318_v39  ;;  %v3979_v16 = vmul.f32 %v7785_v53, %v9324_v29  ;;  %v12732_v29 = vld [vmem:[#allocation43_spill] sm:$0xff] }
 0x1ee   : > { %v3980_v28 = vmul.f32 %v7785_v53, %v9335_v19  ;;  %v3981_v9 = vmul.f32 %v7785_v53, %v9341_v18  ;;  %v3982_v55 = vmul.f32 %v7785_v53, %v12730_v27  ;;  %v3983_v20 = vmul.f32 %v7785_v53, %v12731_v31  ;;  %3191 = vrot.lane.b32.xlu1 %v3188_v4, %s12682_s0  ;;  %v7787_v19 = vpop.eup %7786 }
 0x1ef   : > { %v3984_v43 = vmul.f32 %v7785_v53, %v9385_v25  ;;  %v3985_v39 = vmul.f32 %v7785_v53, %v9399_v3  ;;  %v3986_v54 = vmul.f32 %v7785_v53, %v12732_v29  ;;  %v3987_v41 = vmul.f32 %v7785_v53, %v12733_v56  ;;  %3998 = vst [vmem:[%s8954_s29] sm:$0xff] %v3976_v13  ;;  %v9757_v31 = vpop.eup %7788 }
 0x1f0   : > { %3999 = vst [vmem:[%s8954_s29 + $0x8] sm:$0xff] %v3977_v62  ;;  %4000 = vst [vmem:[%s8954_s29 + $0x10] sm:$0xff] %v3978_v7  ;;  %v3988_v18 = vmul.f32 %v7785_v53, %v9431_v24  ;;  %v3989_v3 = vmul.f32 %v7785_v53, %v9444_v6  ;;  %v3990_v25 = vmul.f32 %v7785_v53, %v9472_v8  ;;  %2029 = vrot.lane.b32.xlu0 %v2026_v37, %s12694_s1  ;;  %v12739_v7 = vld [vmem:[#allocation22_spill] sm:$0xff] }
 0x1f1   : > { %4001 = vst [vmem:[%s8954_s29 + $0x18] sm:$0xff] %v3979_v16  ;;  %v3991_v27 = vmul.f32 %v7785_v53, %v9495_v5  ;;  %4002 = vst [vmem:[%s8954_s29 + $0x20] sm:$0xff] %v3980_v28  ;;  %v3992_v4 = vmul.f32 %v7785_v53, %v9504_v52  ;;  %v3993_v24 = vmul.f32 %v7785_v53, %v9511_v58  ;;  %v9769_v5 = vpop.permute.xlu1 %921 }
 0x1f2   : > { %4003 = vst [vmem:[%s8954_s29 + $0x28] sm:$0xff] %v3981_v9  ;;  %4004 = vst [vmem:[%s8954_s29 + $0x30] sm:$0xff] %v3982_v55  ;;  %v3994_v6 = vmul.f32 %v7785_v53, %v9521_v47  ;;  %v3995_v8 = vmul.f32 %v7785_v53, %v9526_v42  ;;  %v3996_v52 = vmul.f32 %v7785_v53, %v9531_v50  ;;  %v9778_v42 = vpop.eup %7790  ;;  %v12735_v9 = vld [vmem:[#allocation48_spill] sm:$0xff] }
 0x1f3   : > { %4005 = vst [vmem:[%s8954_s29 + $0x38] sm:$0xff] %v3983_v20  ;;  %4006 = vst [vmem:[%s8954_s29 + $0x40] sm:$0xff] %v3984_v43  ;;  %v3997_v58 = vmul.f32 %v7785_v53, %v9541_v44  ;;  %v5315_v47 = vadd.f32 %v9757_v31, %v5314_v0  ;;  %v5183_v50 = vsub.f32 %v12735_v9, %v9433_v30  ;;  %v9789_v37 = vpop.eup %7792  ;;  %v12736_v53 = vrot.slane %v9682_v49, 5  ;;  %v12737_v0 = vld [vmem:[#allocation26_spill] sm:$0xff] }
 0x1f4   : > { %4007 = vst [vmem:[%s8954_s29 + $0x48] sm:$0xff] %v3985_v39  ;;  %4008 = vst [vmem:[%s8954_s29 + $0x50] sm:$0xff] %v3986_v54  ;;  %v3330_v44 = vsel %vm12516_vm6, %v12472_v1, %v3329_v45  ;;  %v5233_v54 = vmul.f32 1.442695, %v5181_v15  ;;  %v12738_v13 = vrot.slane %v12737_v0, 5  ;;  %v9804_v62 = vpop.eup %7794  ;;  %v5184_v16 = vsub.f32 %v12739_v7, %v9433_v30 }
 0x1f5   : > { %4009 = vst [vmem:[%s8954_s29 + $0x58] sm:$0xff] %v3987_v41  ;;  %5273 = vst [vmem:[%s9176_s21 + $0xe0] sm:$0x1] %v7787_v19  ;;  %v5316_v46 = vadd.f32 %v9778_v42, %v5315_v47  ;;  %3333 = vrot.lane.b32.xlu1 %v3330_v44, %s7956_s18  ;;  %v9809_v12 = vpop.eup %7796  ;;  %v5235_v49 = vmul.f32 1.442695, %v12740_v35  ;;  %v9822_v43 = vpop.permute.xlu1 %961  ;;  %v5185_v56 = vsub.f32 %v12743_v48, %v9433_v30  ;;  %v12746_v9 = vrot.slane %v9554_v10, 6 }
 0x1f6   : > { %12734 = vst [vmem:[#allocation33_spill] sm:$0xff] %v9769_v5  ;;  %4010 = vst [vmem:[%s8954_s29 + $0x60] sm:$0xff] %v3988_v18  ;;  %v2089_v45 = vsel %vm12512_vm1, %v12738_v13, %v12736_v53  ;;  %v9817_v28 = vld [vmem:[%s8954_s29] sm:$0xff]  ;;  %v9820_v20 = vpop.eup %7798  ;;  %7808 = vpow2.f32 %v5233_v54  ;;  %v5237_v41 = vmul.f32 1.442695, %v5183_v50  ;;  %v9848_v47 = vpop.permute.xlu0 %658 }
 0x1f7   : > { %4011 = vst [vmem:[%s8954_s29 + $0x68] sm:$0xff] %v3989_v3  ;;  %4012 = vst [vmem:[%s8954_s29 + $0x70] sm:$0xff] %v3990_v25  ;;  %2092 = vrot.lane.b32.xlu0 %v2089_v45, %s12675_s26  ;;  %v5317_v15 = vadd.f32 %v9789_v37, %v5316_v46  ;;  %v4025_v55 = vld [vmem:[%s8954_s29 + $0x8] sm:$0x1f]  ;;  %v12471_v39 = vrot.slane %v9817_v28, 7  ;;  %v9825_v36 = vpop.eup %7800  ;;  %v12744_v3 = vrot.slane %v9547_v23, 6  ;;  %7810 = vpow2.f32 %v5235_v49 }
 0x1f8   : > { %4013 = vst [vmem:[%s8954_s29 + $0x78] sm:$0xff] %v3991_v27  ;;  %4014 = vst [vmem:[%s8954_s29 + $0x80] sm:$0xff] %v3992_v4  ;;  %v4029_v29 = vrot.slane %v4025_v55, 7  ;;  %v5239_v18 = vmul.f32 1.442695, %v5184_v16  ;;  %7812 = vpow2.f32 %v5237_v41  ;;  %v9867_v7 = vpop.eup %7802 }
 0x1f9   : > { %4015 = vst [vmem:[%s8954_s29 + $0x88] sm:$0xff] %v3993_v24  ;;  %4016 = vst [vmem:[%s8954_s29 + $0x90] sm:$0xff] %v3994_v6  ;;  %v5318_v19 = vadd.f32 %v9804_v62, %v5317_v15  ;;  %v4147_v23 = vld [vmem:[%s8954_s29 + $0x22] sm:$0x1f]  ;;  %v9854_v44 = vpop.permute.xlu1 %1064  ;;  %v9864_v45 = vld [vmem:[%s8954_s29 + $0x27] sm:$0xff]  ;;  %v9871_v49 = vpop.eup %7804  ;;  %v12747_v15 = vrot.slane %v9572_v21, 6 }
 0x1fa   : > { %4017 = vst [vmem:[%s8954_s29 + $0x98] sm:$0xff] %v3995_v8  ;;  %4018 = vst [vmem:[%s8954_s29 + $0xa0] sm:$0xff] %v3996_v52  ;;  %v4030_v25 = vsel %vm12493_vm3, %v12471_v39, %v4029_v29  ;;  %v9844_v8 = vld [vmem:[%s8954_s29 + $0x1a] sm:$0xff]  ;;  %v5241_v52 = vmul.f32 1.442695, %v5185_v56  ;;  %v4151_v53 = vrot.slane %v4147_v23, 7  ;;  %7814 = vpow2.f32 %v5239_v18 }
 0x1fb   : > { %4019 = vst [vmem:[%s8954_s29 + $0xa8] sm:$0x1] %v3997_v58  ;;  %12741 = vst [vmem:[#allocation31_spill] sm:$0xff] %v9820_v20  ;;  %3269 = vrot.lane.b32.xlu0 %v12744_v3, %s12686_s19  ;;  %v5319_v30 = vadd.f32 %v9809_v12, %v5318_v19  ;;  %4033 = vrot.lane.b32.xlu1 %v4030_v25, %s12686_s19  ;;  %v1059_v50 = vld [vmem:[%s9348_s12 + $0x10] sm:$0xe0]  ;;  %v12468_v46 = vrot.slane %v9844_v8, 7  ;;  %v9882_v19 = vpop.permute.xlu0 %699  ;;  %v9889_v3 = vpop.eup %7806 }
 0x1fc   : > { %12742 = vst [vmem:[#allocation36_spill] sm:$0xff] %v9822_v43  ;;  %12745 = vst [vmem:[#allocation34_spill] sm:$0xff] %v9848_v47  ;;  %v1060_v13 = vld [vmem:[%s9348_s12 + $0x28] sm:$0x3]  ;;  %v4209_v10 = vld [vmem:[%s8954_s29 + $0x2f] sm:$0x1f]  ;;  %7816 = vpow2.f32 %v5241_v52  ;;  %v1068_v35 = vmul.f32 %v9854_v44, %v1059_v50 }
 0x1fd   : > { %v5320_v58 = vadd.f32 %v9820_v20, %v5319_v30  ;;  %v1070_v55 = vmul.f32 %v9854_v44, %v1060_v13  ;;  %v4152_v29 = vsel %vm12493_vm3, %v12468_v46, %v4151_v53  ;;  %v12467_v48 = vrot.slane %v9864_v45, 7  ;;  %12748 = vst [vmem:[#allocation39_spill] sm:$0xff] %v9882_v19  ;;  %v9886_v18 = vld [vmem:[%s8954_s29 + $0x34] sm:$0xff]  ;;  %v4269_v21 = vld [vmem:[%s8954_s29 + $0x3c] sm:$0x1f] }
 0x1fe   : > { %v9837_v27 = vld [vmem:[%s8954_s29 + $0x68] sm:$0xff]  ;;  %v4451_v4 = vld [vmem:[%s8954_s29 + $0x70] sm:$0x1f]  ;;  %v4213_v56 = vrot.slane %v4209_v10, 7  ;;  %v12757_v39 = vrot.slane %v9662_v51, 6 }
 0x1ff   : > { %v12470_v24 = vrot.slane %v9837_v27, 7  ;;  %v4455_v6 = vrot.slane %v4451_v4, 7  ;;  %2963 = vrot.lane.b32.xlu0 %v12746_v9, %s7957_s11  ;;  %v5321_v0 = vadd.f32 %v9825_v36, %v5320_v58  ;;  %v1078_v4 = vrot.slane %v1068_v35, 5  ;;  %v9910_v13 = vpop.permute.xlu0 %1001  ;;  %v10031_v47 = vld [vmem:[%s9348_s12 + $0x20] sm:$0x7] }
 0x200   : > { %v1079_v23 = vrot.slane %v1070_v55, 5  ;;  %v4214_v52 = vsel %vm12493_vm3, %v12467_v48, %v4213_v56  ;;  %v12466_v58 = vrot.slane %v9886_v18, 7  ;;  %v4273_v9 = vrot.slane %v4269_v21, 7  ;;  %v4571_v53 = vld [vmem:[%s8954_s29 + $0x8a] sm:$0x1f]  ;;  %12750 = vst [vmem:[#allocation24_spill] sm:$0xff] %v9910_v13 }
 0x201   : > { %v4456_v54 = vsel %vm12493_vm3, %v12470_v24, %v4455_v6  ;;  %v5322_v16 = vadd.f32 %v9867_v7, %v5321_v0  ;;  %v12749_v6 = vrot.slane %v9591_v32, 6  ;;  %v4575_v55 = vrot.slane %v4571_v53, 7  ;;  %v9928_v21 = vld [vmem:[%s8954_s29 + $0x8f] sm:$0xff]  ;;  %v9956_v48 = vld [vmem:[%s9348_s12 + $0x8] sm:$0xe0] }
 0x202   : > { %4459 = vrot.lane.b32.xlu1 %v4456_v54, %s12686_s19  ;;  %v9904_v54 = vld [vmem:[%s8954_s29 + $0x82] sm:$0xff]  ;;  %v4274_v35 = vsel %vm12493_vm3, %v12466_v58, %v4273_v9  ;;  %12755 = vst [vmem:[#allocation29_spill] sm:$0xff] %v9956_v48 }
 0x203   : > { %3025 = vrot.lane.b32.xlu0 %v12747_v15, %s12694_s1  ;;  %v5323_v41 = vadd.f32 %v9871_v49, %v5322_v16  ;;  %v9892_v30 = vpop.eup %7808  ;;  %v12751_v16 = vrot.slane %v9611_v2, 6  ;;  %v12469_v15 = vrot.slane %v9904_v54, 7  ;;  %v4631_v2 = vld [vmem:[%s8954_s29 + $0x97] sm:$0x1f]  ;;  %v4689_v46 = vld [vmem:[%s8954_s29 + $0xa4] sm:$0x1f] }
 0x204   : > { %v9907_v32 = vpop.eup %7810  ;;  %v4635_v58 = vrot.slane %v4631_v2, 7  ;;  %v4693_v20 = vrot.slane %v4689_v46, 7  ;;  %v12759_v46 = vrot.slane %v9676_v17, 6  ;;  %v4371_v17 = vld [vmem:[%s8954_s29 + $0x56] sm:$0x1f] }
 0x205   : > { %v5324_v25 = vadd.f32 %v9889_v3, %v5323_v41  ;;  %v9912_v10 = vpop.eup %7812  ;;  %v9924_v41 = vld [vmem:[%s9348_s12] sm:$0xe0] }
 0x206   : > { %4155 = vrot.lane.b32.xlu1 %v4152_v29, %s7957_s11  ;;  %v1080_v29 = vsel %vm12512_vm1, %v1078_v4, %v1079_v23  ;;  %12752 = vst [vmem:[#allocation50_spill] sm:$0xff] %v9924_v41  ;;  %v9939_v4 = vld [vmem:[%s9176_s21 + $0xe0] sm:$0x1] }
 0x207   : > { %3085 = vrot.lane.b32.xlu0 %v12749_v6, %s12675_s26  ;;  %v5325_v50 = vadd.f32 %v9892_v30, %v5324_v25  ;;  %v9931_v25 = vpop.eup %7814  ;;  %v9934_v6 = vld [vmem:[%s9348_s12 + $0x18] sm:$0x3] }
 0x208   : > { %12753 = vst [vmem:[#allocation25_spill] sm:$0xff] %v9934_v6  ;;  %v1006_v9 = vmul.f32 %v9910_v13, %v9934_v6 }
 0x209   : > { %v5326_v0 = vadd.f32 %v9907_v32, %v5325_v50  ;;  %v1092_v50 = vsel %vm12519_vm7, %v1080_v29, 0.0  ;;  %v9945_v53 = vpop.eup %7816  ;;  %v9960_v29 = vld [vmem:[%s8954_s29 + $0x9c] sm:$0xff]  ;;  %vm2339_vm7 = vcmask 1040512  }
 0x20a   : > { %4217 = vrot.lane.b32.xlu1 %v4214_v52, %s12694_s1  ;;  %v1004_v52 = vmul.f32 %v9910_v13, %v9924_v41  ;;  %v1013_v2 = vrot.slane %v1006_v9, 5  ;;  %v10020_v13 = vld [vmem:[%s8954_s29 + $0x75] sm:$0xff] }
 0x20b   : > { %3391 = vrot.lane.b32.xlu0 %v12751_v16, %s7957_s11  ;;  %v5327_v56 = vadd.f32 %v9912_v10, %v5326_v0  ;;  %v12754_v0 = vrot.slane %v9635_v40, 6  ;;  %v4576_v16 = vsel %vm12493_vm3, %v12469_v15, %v4575_v55  ;;  %v5330_v40 = vsel %vm12493_vm3, %v9939_v4, 0.0 }
 0x20c   : > { %v1012_v55 = vrot.slane %v1004_v52, 5  ;;  %v1093_v15 = vrot.slane %v1092_v50, 4  ;;  %v12477_v52 = vrot.slane %v9960_v29, 7 }
 0x20d   : > { %v5328_v23 = vadd.f32 %v9931_v25, %v5327_v56 }
 0x20e   : > { %4277 = vrot.lane.b32.xlu1 %v4274_v35, %s12675_s26  ;;  %v12476_v35 = vrot.slane %v9928_v21, 7 }
 0x20f   : > { %3451 = vrot.lane.b32.xlu0 %v12754_v0, %s12694_s1  ;;  %v5329_v56 = vadd.f32 %v9945_v53, %v5328_v23  ;;  %v9966_v0 = vld [vmem:[%s9348_s12 + $0x20] sm:$0x3]  ;;  %v1067_v23 = vmul.f32 %v9854_v44, %v9956_v48 }
 0x210   : > { %12756 = vst [vmem:[#allocation32_spill] sm:$0xff] %v9966_v0  ;;  %v4636_v1 = vsel %vm12493_vm3, %v12476_v35, %v4635_v58  ;;  %v9987_v58 = vsel %vm12512_vm1, %v1012_v55, %v1013_v2  ;;  %v9993_v35 = vld [vmem:[%s9348_s12] sm:$0xf0] }
 0x211   : > { %v5331_v24 = vadd.f32 %v5330_v40, %v5329_v56  ;;  %v9981_v56 = vld [vmem:[%s8954_s29 + $0xd] sm:$0xff]  ;;  %v1094_v40 = vadd.f32 %v1093_v15, %v1092_v50  ;;  %v1075_v60 = vrot.slane %v1067_v23, 5  ;;  %12758 = vst [vmem:[#allocation35_spill] sm:$0xff] %v9987_v58 }
 0x212   : > { %4579 = vrot.lane.b32.xlu1 %v4576_v16, %s7957_s11  ;;  %v1069_v16 = vmul.f32 %v9854_v44, %v9966_v0  ;;  %v4085_v44 = vld [vmem:[%s8954_s29 + $0x15] sm:$0x1f]  ;;  %v12761_v58 = vrot.slane %v9981_v56, 7 }
 0x213   : > { %2900 = vrot.lane.b32.xlu0 %v12757_v39, %s7956_s18  ;;  %v5332_v9 = vrot.slane %v5331_v24, 4  ;;  %v9984_v43 = vpop.permute.xlu1 %1387  ;;  %v10000_v50 = vld [vmem:[%s8954_s29 + $0x4e] sm:$0xff]  ;;  %v1337_v55 = vpop.permute.xlu0 %1336  ;;  %v1095_v2 = vrot.slane %v1094_v40, 2 }
 0x214   : > { %v1076_v39 = vrot.slane %v1069_v16, 5  ;;  %v10003_v16 = vld [vmem:[%s9348_s12 + $0x18] sm:$0x7]  ;;  %v1339_v15 = vmul.f32 %v1337_v55, %v9993_v35 }
 0x215   : > { %v5333_v51 = vadd.f32 %v5332_v9, %v5331_v24  ;;  %v4089_v24 = vrot.slane %v4085_v44, 7 }
 0x216   : > { %4639 = vrot.lane.b32.xlu1 %v4636_v1, %s12694_s1  ;;  %v4694_v1 = vsel %vm12493_vm3, %v12477_v52, %v4693_v20  ;;  %v1077_v44 = vsel %vm12512_vm1, %v1075_v60, %v1076_v39  ;;  %v12760_v52 = vrot.slane %v9704_v26, 6  ;;  %v4511_v60 = vld [vmem:[%s8954_s29 + $0x7d] sm:$0x1f]  ;;  %v1096_v39 = vadd.f32 %v1095_v2, %v1094_v40 }
 0x217   : > { %3189 = vrot.lane.b32.xlu0 %v12759_v46, %s12682_s0  ;;  %v5334_v23 = vrot.slane %v5333_v51, 2  ;;  %v10007_v46 = vpop.permute.xlu1 %1483  ;;  %v1084_v6 = vsel %vm12525_vm8, %v1077_v44, 0.0  ;;  %v12762_v40 = vrot.slane %v9817_v28, 7  ;;  %v1348_v2 = vrot.slane %v1339_v15, 4 }
 0x218   : > { %v12763_v44 = vrot.slane %v10000_v50, 7  ;;  %v4515_v0 = vrot.slane %v4511_v60, 7  ;;  %v1097_v5 = vrot.slane %v1096_v39, 1  ;;  %v1085_v48 = vrot.slane %v1084_v6, 4 }
 0x219   : > { %v5335_v9 = vadd.f32 %v5334_v23, %v5333_v51  ;;  %v4090_v51 = vsel %vm12493_vm3, %v12761_v58, %v4089_v24  ;;  %v4375_v23 = vrot.slane %v4371_v17, 7  ;;  %v1393_v58 = vmul.f32 %v10031_v47, %v9984_v43 }
 0x21a   : > { %4697 = vrot.lane.b32.xlu1 %v4694_v1, %s12675_s26  ;;  %v1341_v1 = vmul.f32 %v1337_v55, %v10003_v16  ;;  %v12765_v15 = vrot.slane %v9837_v27, 7  ;;  %vm12591_vm8 = vcmask 523264  }
 0x21b   : > { %3331 = vrot.lane.b32.xlu0 %v12760_v52, %s7956_s18  ;;  %v5336_v20 = vrot.slane %v5335_v9, 1  ;;  %v10026_v52 = vld [vmem:[%s9348_s12 + $0x8] sm:$0xf0]  ;;  %v1402_v61 = vrot.slane %v1393_v58, 4  ;;  %v1098_v58 = vadd.f32 %v1097_v5, %v1096_v39  ;;  %v10074_v5 = vmul.f32 %v9984_v43, %v10003_v16 }
 0x21c   : > { %v1391_v41 = vmul.f32 %v10026_v52, %v9984_v43  ;;  %v10035_v24 = vpop.permute.xlu1 %1561 }
 0x21d   : > { %v5337_v26 = vadd.f32 %v5336_v20, %v5335_v9  ;;  %v1349_v9 = vrot.slane %v1341_v1, 4  ;;  %v1437_v20 = vpop.permute.xlu0 %1436  ;;  %v12766_v1 = vrot.slane %v10020_v13, 7 }
 0x21e   : > { %4093 = vrot.lane.b32.xlu1 %v4090_v51, %s7956_s18  ;;  %v4376_v51 = vsel %vm12493_vm3, %v12763_v44, %v4375_v23  ;;  %v1401_v19 = vrot.slane %v1391_v41, 4  ;;  %v1439_v17 = vmul.f32 %v1437_v20, %v9993_v35  ;;  %v1441_v28 = vmul.f32 %v1437_v20, %v10003_v16 }
 0x21f   : > { %4031 = vrot.lane.b32.xlu0 %v12762_v40, %s12686_s19  ;;  %7818 = vrcp.f32 %v5337_v26  ;;  %v4516_v23 = vsel %vm12493_vm3, %v12766_v1, %v4515_v0  ;;  %v1350_v60 = vsel %vm1347_vm4, %v1348_v2, %v1349_v9  ;;  %v1340_v41 = vmul.f32 %v10026_v52, %v1337_v55 }
 0x220   : > { %v10047_v40 = vpop.permute.xlu1 %2027  ;;  %v1342_v26 = vmul.f32 %v10031_v47, %v1337_v55  ;;  %v10059_v44 = vadd.f32 %v1085_v48, %v1084_v6  ;;  %v1448_v27 = vrot.slane %v1441_v28, 4  ;;  %v1403_v0 = vsel %vm1347_vm4, %v1401_v19, %v1402_v61 }
 0x221   : > { %12764 = vst [vmem:[#allocation38_spill] sm:$0xff] %v10047_v40  ;;  %v12767_v2 = vrot.slane %v9844_v8, 7  ;;  %v10070_v9 = vmul.f32 %v9984_v43, %v9993_v35  ;;  %v10078_v6 = vmul.f32 %v10026_v52, %v10007_v46  ;;  %v1415_v61 = vsel %vm12500_vm10, %v1403_v0, 0.0 }
 0x222   : > { %4379 = vrot.lane.b32.xlu1 %v4376_v51, %s12682_s0  ;;  %v1447_v51 = vrot.slane %v1439_v17, 4  ;;  %v1351_v19 = vrot.slane %v1340_v41, 4  ;;  %v1352_v8 = vrot.slane %v1342_v26, 4  ;;  %v1416_v39 = vrot.slane %v1415_v61, 4 }
 0x223   : > { %4457 = vrot.lane.b32.xlu0 %v12765_v15, %s12686_s19  ;;  %v1357_v15 = vsel %vm12495_vm9, %v1350_v60, 0.0  ;;  %v12768_v1 = vrot.slane %v9864_v45, 7  ;;  %v1399_v60 = vrot.slane %v10074_v5, 4  ;;  %v10097_v0 = vmul.f32 %v10026_v52, %v1437_v20 }
 0x224   : > { %v10062_v40 = vpop.permute.xlu1 %2090  ;;  %v1358_v48 = vrot.slane %v1357_v15, 4  ;;  %v1449_v43 = vsel %vm1347_vm4, %v1447_v51, %v1448_v27  ;;  %v1417_v26 = vadd.f32 %v1416_v39, %v1415_v61  ;;  %v10100_v51 = vmul.f32 %v10031_v47, %v1437_v20 }
 0x225   : > { %v1353_v27 = vsel %vm1347_vm4, %v1351_v19, %v1352_v8  ;;  %v1456_v61 = vsel %vm12497_vm12, %v1449_v43, 0.0  ;;  %vm12503_vm3 = vcmask 1046784   ;;  %vm12502_vm9 = vcmask 260096  }
 0x226   : > { %4519 = vrot.lane.b32.xlu1 %v4516_v23, %s7956_s18  ;;  %v1359_v55 = vadd.f32 %v1358_v48, %v1357_v15  ;;  %v1398_v23 = vrot.slane %v10070_v9, 4  ;;  %v1497_v15 = vrot.slane %v10078_v6, 4  ;;  %v1418_v48 = vrot.slane %v1417_v26, 2 }
 0x227   : > { %4153 = vrot.lane.b32.xlu0 %v12767_v2, %s7957_s11  ;;  %v1564_v6 = vmul.f32 %v10026_v52, %v10035_v24  ;;  %vm12526_vm12 = vcmask 651264   ;;  %vm2241_vm10 = vcmask 1041280  }
 0x228   : > { %v1360_v41 = vrot.slane %v1359_v55, 2 }
 0x229   : > { %v10083_v28 = vpop.permute.xlu1 %1965 }
 0x22a   : > { %1103 = vrot.lane.b32.xlu1 %v1098_v58, %s12694_s1  ;;  %v10093_v58 = vmul.f32 %v10031_v47, %v10007_v46  ;;  %v1361_v2 = vadd.f32 %v1360_v41, %v1359_v55  ;;  %v10128_v55 = vld [vmem:[%s9348_s12 + $0x10] sm:$0xf0] }
 0x22b   : > { %4215 = vrot.lane.b32.xlu0 %v12768_v1, %s12694_s1 }
 0x22c   : > { %v10102_v45 = vpop.eup %7818 }
 0x22d   : > { %v5339_v39 = vmul.f32 %v10102_v45, %v9568_v33  ;;  %v5347_v1 = vmul.f32 %v10102_v45, %v9651_v59  ;;  %v5351_v20 = vmul.f32 %v10102_v45, %v9716_v34  ;;  %v5354_v17 = vmul.f32 %v10102_v45, %v9789_v37  ;;  %v10114_v19 = vpop.permute.xlu1 %2217 }
 0x22e   : > { %v5355_v33 = vmul.f32 %v10102_v45, %v9804_v62  ;;  %v5356_v8 = vmul.f32 %v10102_v45, %v9809_v12  ;;  %v5358_v59 = vmul.f32 %v10102_v45, %v9825_v36  ;;  %v5359_v34 = vmul.f32 %v10102_v45, %v9867_v7 }
 0x22f   : > { %v12769_v37 = vrot.slane %v9886_v18, 7  ;;  %v5360_v62 = vmul.f32 %v10102_v45, %v9871_v49  ;;  %v5361_v12 = vmul.f32 %v10102_v45, %v9889_v3  ;;  %v5362_v36 = vmul.f32 %v10102_v45, %v9892_v30  ;;  %5368 = vst [vmem:[%s9176_s21] sm:$0xff] %v5339_v39  ;;  %5376 = vst [vmem:[%s9176_s21 + $0x40] sm:$0xff] %v5347_v1  ;;  %v10143_v18 = vld [vmem:[%s9348_s12 + $0x28] sm:$0x7]  ;;  %v1611_v39 = vpop.permute.xlu0 %1610 }
 0x230   : > { %v5363_v7 = vmul.f32 %v10102_v45, %v9907_v32  ;;  %5380 = vst [vmem:[%s9176_s21 + $0x60] sm:$0xff] %v5351_v20  ;;  %5383 = vst [vmem:[%s9176_s21 + $0x78] sm:$0xff] %v5354_v17  ;;  %v5364_v49 = vmul.f32 %v10102_v45, %v9912_v10  ;;  %v5365_v3 = vmul.f32 %v10102_v45, %v9931_v25  ;;  %v1498_v10 = vrot.slane %v10093_v58, 4 }
 0x231   : > { %4275 = vrot.lane.b32.xlu0 %v12769_v37, %s12675_s26  ;;  %v5366_v30 = vmul.f32 %v10102_v45, %v9945_v53  ;;  %v5367_v32 = vmul.f32 %v10102_v45, %v9939_v4  ;;  %5384 = vst [vmem:[%s9176_s21 + $0x80] sm:$0xff] %v5355_v33  ;;  %5385 = vst [vmem:[%s9176_s21 + $0x88] sm:$0xff] %v5356_v8  ;;  %v1565_v25 = vmul.f32 %v10035_v24, %v10128_v55  ;;  %v10164_v43 = vpop.permute.xlu1 %2440 }
 0x232   : > { %5388 = vst [vmem:[%s9176_s21 + $0xa0] sm:$0xff] %v5359_v34  ;;  %5387 = vst [vmem:[%s9176_s21 + $0x98] sm:$0xff] %v5358_v59  ;;  %v1362_v53 = vrot.slane %v1361_v2, 1  ;;  %v1419_v17 = vadd.f32 %v1418_v48, %v1417_v26  ;;  %v12770_v4 = vrot.slane %v9904_v54, 7  ;;  %v1567_v41 = vmul.f32 %v10035_v24, %v10143_v18 }
 0x233   : > { %5389 = vst [vmem:[%s9176_s21 + $0xa8] sm:$0xff] %v5360_v62  ;;  %5391 = vst [vmem:[%s9176_s21 + $0xb8] sm:$0xff] %v5362_v36  ;;  %v1457_v58 = vrot.slane %v1456_v61, 4  ;;  %v1486_v26 = vmul.f32 %v10007_v46, %v9993_v35  ;;  %v1365_v48 = vsel %vm12494_vm11, %v1353_v27, 0.0  ;;  %v1488_v33 = vmul.f32 %v10007_v46, %v10003_v16 }
 0x234   : > { %5392 = vst [vmem:[%s9176_s21 + $0xc0] sm:$0xff] %v5363_v7  ;;  %5390 = vst [vmem:[%s9176_s21 + $0xb0] sm:$0xff] %v5361_v12  ;;  %v1363_v1 = vadd.f32 %v1362_v53, %v1361_v2  ;;  %v1420_v20 = vrot.slane %v1419_v17, 1  ;;  %v1450_v54 = vrot.slane %v10097_v0, 4  ;;  %v1451_v8 = vrot.slane %v10100_v51, 4 }
 0x235   : > { %5393 = vst [vmem:[%s9176_s21 + $0xc8] sm:$0xff] %v5364_v49  ;;  %5394 = vst [vmem:[%s9176_s21 + $0xd0] sm:$0xff] %v5365_v3  ;;  %4577 = vrot.lane.b32.xlu0 %v12770_v4, %s7957_s11  ;;  %v1458_v59 = vadd.f32 %v1457_v58, %v1456_v61  ;;  %v1575_v34 = vrot.slane %v1565_v25, 4  ;;  %v1613_v37 = vmul.f32 %v10026_v52, %v1611_v39  ;;  %v10192_v46 = vpop.permute.xlu1 %2156  ;;  %v12771_v0 = vrot.slane %v9928_v21, 7 }
 0x236   : > { %5395 = vst [vmem:[%s9176_s21 + $0xd8] sm:$0xff] %v5366_v30  ;;  %5396 = vst [vmem:[%s9176_s21 + $0xe0] sm:$0x1] %v5367_v32  ;;  %1374 = vrot.lane.b32.xlu1 %v1363_v1, %s7956_s18  ;;  %v1400_v35 = vsel %vm1347_vm4, %v1398_v23, %v1399_v60  ;;  %v1499_v16 = vsel %vm1347_vm4, %v1497_v15, %v1498_v10  ;;  %v1576_v51 = vrot.slane %v1567_v41, 4  ;;  %v1366_v2 = vrot.slane %v1365_v48, 4 }
 0x237   : > { %v1615_v27 = vmul.f32 %v10031_v47, %v1611_v39  ;;  %v1459_v61 = vrot.slane %v1458_v59, 2  ;;  %v1494_v5 = vrot.slane %v1486_v26, 4  ;;  %v1421_v62 = vadd.f32 %v1420_v20, %v1419_v17 }
 0x238   : > { %v1511_v9 = vsel %vm12507_vm15, %v1499_v16, 0.0  ;;  %v1495_v23 = vrot.slane %v1488_v33, 4  ;;  %v1407_v60 = vsel %vm12501_vm13, %v1400_v35, 0.0  ;;  %v1566_v21 = vmul.f32 %v10031_v47, %v10035_v24 }
 0x239   : > { %4637 = vrot.lane.b32.xlu0 %v12771_v0, %s12694_s1  ;;  %v1460_v15 = vadd.f32 %v1459_v61, %v1458_v59  ;;  %v1621_v12 = vrot.slane %v1613_v37, 4  ;;  %v1452_v36 = vsel %vm1347_vm4, %v1450_v54, %v1451_v8  ;;  %v1512_v7 = vrot.slane %v1511_v9, 4 }
 0x23a   : > { %1426 = vrot.lane.b32.xlu1 %v1421_v62, %s7956_s18  ;;  %v12772_v49 = vrot.slane %v9960_v29, 7  ;;  %v1622_v3 = vrot.slane %v1615_v27, 4  ;;  %v1367_v30 = vadd.f32 %v1366_v2, %v1365_v48  ;;  %v1577_v52 = vsel %vm1347_vm4, %v1575_v34, %v1576_v51  ;;  %v10210_v10 = vpop.permute.xlu1 %2315 }
 0x23b   : > { %v1461_v32 = vrot.slane %v1460_v15, 1  ;;  %v1408_v25 = vrot.slane %v1407_v60, 4  ;;  %v1513_v47 = vadd.f32 %v1512_v7, %v1511_v9  ;;  %v1572_v24 = vrot.slane %v1564_v6, 4 }
 0x23c   : > { %v1464_v53 = vsel %vm12496_vm14, %v1452_v36, 0.0  ;;  %v1589_v4 = vsel %vm12504_vm0, %v1577_v52, 0.0  ;;  %v1573_v41 = vrot.slane %v1566_v21, 4  ;;  %v1614_v29 = vmul.f32 %v1611_v39, %v10128_v55 }
 0x23d   : > { %4695 = vrot.lane.b32.xlu0 %v12772_v49, %s12675_s26  ;;  %v1462_v17 = vadd.f32 %v1461_v32, %v1460_v15  ;;  %v1514_v58 = vrot.slane %v1513_v47, 2  ;;  %v1590_v26 = vrot.slane %v1589_v4, 4  ;;  %v1616_v48 = vmul.f32 %v1611_v39, %v10143_v18 }
 0x23e   : > { %v12773_v1 = vrot.slane %v9981_v56, 7  ;;  %v1368_v20 = vrot.slane %v1367_v30, 2  ;;  %v1496_v33 = vsel %vm1347_vm4, %v1494_v5, %v1495_v23  ;;  %v1623_v54 = vsel %vm1347_vm4, %v1621_v12, %v1622_v3  ;;  %v10226_v56 = vpop.permute.xlu1 %2379 }
 0x23f   : > { %1473 = vrot.lane.b32.xlu1 %v1462_v17, %s7956_s18  ;;  %v1409_v8 = vadd.f32 %v1408_v25, %v1407_v60  ;;  %v1465_v59 = vrot.slane %v1464_v53, 4  ;;  %v1515_v34 = vadd.f32 %v1514_v58, %v1513_v47  ;;  %v1591_v37 = vadd.f32 %v1590_v26, %v1589_v4 }
 0x240   : > { %v12774_v55 = vrot.slane %v10059_v44, 2  ;;  %vm12505_vm11 = vcmask 1046656   ;;  %v1630_v18 = vsel %vm12503_vm3, %v1623_v54, 0.0  ;;  %v1624_v39 = vrot.slane %v1614_v29, 4 }
 0x241   : > { %4091 = vrot.lane.b32.xlu0 %v12773_v1, %s7956_s18  ;;  %v1503_v16 = vsel %vm12506_vm2, %v1496_v33, 0.0  ;;  %v1516_v0 = vrot.slane %v1515_v34, 1  ;;  %v1592_v51 = vrot.slane %v1591_v37, 2  ;;  %v1625_v27 = vrot.slane %v1616_v48, 4 }
 0x242   : > { %v1088_v35 = vadd.f32 %v12774_v55, %v10059_v44  ;;  %v12775_v2 = vrot.slane %v10000_v50, 7  ;;  %v1369_v61 = vadd.f32 %v1368_v20, %v1367_v30  ;;  %v1574_v5 = vsel %vm1347_vm4, %v1572_v24, %v1573_v41 }
 0x243   : > { %v1631_v62 = vrot.slane %v1630_v18, 4  ;;  %v1410_v44 = vrot.slane %v1409_v8, 2  ;;  %v1466_v9 = vadd.f32 %v1465_v59, %v1464_v53  ;;  %v1517_v23 = vadd.f32 %v1516_v0, %v1515_v34  ;;  %v10243_v52 = vpop.permute.xlu1 %3271 }
 0x244   : > { %v1593_v6 = vadd.f32 %v1592_v51, %v1591_v37  ;;  %v1089_v60 = vrot.slane %v1088_v35, 1  ;;  %v1504_v15 = vrot.slane %v1503_v16, 4  ;;  %v1581_v12 = vsel %vm12505_vm11, %v1574_v5, 0.0 }
 0x245   : > { %4377 = vrot.lane.b32.xlu0 %v12775_v2, %s12682_s0  ;;  %v1632_v21 = vadd.f32 %v1631_v62, %v1630_v18  ;;  %1522 = vrot.lane.b32.xlu1 %v1517_v23, %s12685_s24  ;;  %v5344_v50 = vmul.f32 %v10102_v45, %v9614_v22  ;;  %v5345_v7 = vmul.f32 %v10102_v45, %v9624_v11  ;;  %v12776_v49 = vrot.slane %v10020_v13, 7  ;;  %v10249_v11 = vpop.permute.xlu0 %1551  ;;  %v12778_v18 = vld [vmem:[#allocation44_spill] sm:$0xff] }
 0x246   : > { %v1594_v36 = vrot.slane %v1593_v6, 1  ;;  %v1370_v3 = vrot.slane %v1369_v61, 1  ;;  %v1626_v30 = vsel %vm1347_vm4, %v1624_v39, %v1625_v27  ;;  %v1411_v25 = vadd.f32 %v1410_v44, %v1409_v8  ;;  %12777 = vst [vmem:[#allocation40_spill] sm:$0xff] %v10249_v11 }
 0x247   : > { %v1633_v32 = vrot.slane %v1632_v21, 2  ;;  %v1467_v47 = vrot.slane %v1466_v9, 2  ;;  %5373 = vst [vmem:[%s9176_s21 + $0x28] sm:$0xff] %v5344_v50  ;;  %5374 = vst [vmem:[%s9176_s21 + $0x30] sm:$0xff] %v5345_v7  ;;  %v5346_v22 = vmul.f32 %v10102_v45, %v9638_v38  ;;  %v1090_v13 = vadd.f32 %v1089_v60, %v1088_v35  ;;  %v10259_v26 = vpop.permute.xlu1 %2965  ;;  %v5823_v50 = vld [vmem:[%s9176_s21 + $0xad] sm:$0x7f] }
 0x248   : > { %v1595_v24 = vadd.f32 %v1594_v36, %v1593_v6  ;;  %v1505_v53 = vadd.f32 %v1504_v15, %v1503_v16  ;;  %v1582_v17 = vrot.slane %v1581_v12, 4  ;;  %v1638_v41 = vsel %vm12502_vm9, %v1626_v30, 0.0 }
 0x249   : > { %4517 = vrot.lane.b32.xlu0 %v12776_v49, %s7956_s18  ;;  %v1634_v4 = vadd.f32 %v1633_v32, %v1632_v21  ;;  %5375 = vst [vmem:[%s9176_s21 + $0x38] sm:$0xff] %v5346_v22  ;;  %v5352_v29 = vmul.f32 %v10102_v45, %v9757_v31  ;;  %v5353_v58 = vmul.f32 %v10102_v45, %v9778_v42  ;;  %v1412_v1 = vrot.slane %v1411_v25, 1  ;;  %v10263_v33 = vpop.permute.xlu0 %1963 }
 0x24a   : > { %1600 = vrot.lane.b32.xlu1 %v1595_v24, %s12685_s24  ;;  %v1371_v48 = vadd.f32 %v1370_v3, %v1369_v61  ;;  %v1468_v20 = vadd.f32 %v1467_v47, %v1466_v9  ;;  %v1506_v54 = vrot.slane %v1505_v53, 2  ;;  %v1583_v8 = vadd.f32 %v1582_v17, %v1581_v12  ;;  %v12784_v17 = vld [vmem:[#allocation30_spill] sm:$0xff] }
 0x24b   : > { %v1635_v38 = vrot.slane %v1634_v4, 1  ;;  %5381 = vst [vmem:[%s9176_s21 + $0x68] sm:$0xff] %v5352_v29  ;;  %5382 = vst [vmem:[%s9176_s21 + $0x70] sm:$0xff] %v5353_v58  ;;  %v1639_v31 = vrot.slane %v1638_v41, 4  ;;  %v5340_v42 = vmul.f32 %v10102_v45, %v9575_v14  ;;  %v5341_v34 = vmul.f32 %v10102_v45, %v9580_v63  ;;  %v10271_v37 = vpop.permute.xlu1 %3027  ;;  %v12779_v14 = vld [vmem:[#allocation46_spill] sm:$0xff] }
 0x24c   : > { %v1413_v55 = vadd.f32 %v1412_v1, %v1411_v25  ;;  %v1469_v35 = vrot.slane %v1468_v20, 1  ;;  %v5342_v39 = vmul.f32 %v10102_v45, %v12778_v18  ;;  %v1507_v0 = vadd.f32 %v1506_v54, %v1505_v53  ;;  %v651_v29 = vld [vmem:[%s9348_s12] sm:$0xc0]  ;;  %v653_v58 = vld [vmem:[%s9348_s12 + $0x18] sm:$0x1]  ;;  %v12787_v18 = vld [vmem:[#allocation29_spill] sm:$0xff] }
 0x24d   : > { %1101 = vrot.lane.b32.xlu0 %v1090_v13, %s12694_s1  ;;  %v1636_v59 = vadd.f32 %v1635_v38, %v1634_v4  ;;  %v10275_v16 = vpop.permute.xlu0 %2215  ;;  %v1584_v51 = vrot.slane %v1583_v8, 2  ;;  %v1640_v27 = vadd.f32 %v1639_v31, %v1638_v41  ;;  %5369 = vst [vmem:[%s9176_s21 + $0x8] sm:$0xff] %v5340_v42  ;;  %5370 = vst [vmem:[%s9176_s21 + $0x10] sm:$0xff] %v5341_v34  ;;  %v12785_v38 = vld [vmem:[#allocation39_spill] sm:$0xff]  ;;  %vm12498_vm4 = vcmask 1043328  }
 0x24e   : > { %v5343_v63 = vmul.f32 %v10102_v45, %v12779_v14  ;;  %5371 = vst [vmem:[%s9176_s21 + $0x18] sm:$0xff] %v5342_v39  ;;  %v5348_v5 = vmul.f32 %v10102_v45, %v9665_v57  ;;  %v1470_v44 = vadd.f32 %v1469_v35, %v1468_v20  ;;  %v1508_v9 = vrot.slane %v1507_v0, 1  ;;  %v5503_v41 = vld [vmem:[%s9176_s21 + $0x2d] sm:$0xff] }
 0x24f   : > { %1647 = vrot.lane.b32.xlu1 %v1636_v59, %s12685_s24  ;;  %v10286_v61 = vpop.permute.xlu1 %3087  ;;  %v1585_v23 = vadd.f32 %v1584_v51, %v1583_v8  ;;  %v1641_v6 = vrot.slane %v1640_v27, 2  ;;  %v5349_v4 = vmul.f32 %v10102_v45, %v12784_v17  ;;  %v704_v1 = vmul.f32 %v12785_v38, %v653_v58  ;;  %v652_v31 = vld [vmem:[%s9348_s12 + $0x8] sm:$0xc0]  ;;  %v654_v59 = vld [vmem:[%s9348_s12 + $0x20] sm:$0x1]  ;;  %v12789_v51 = vld [vmem:[#allocation32_spill] sm:$0xff] }
 0x250   : > { %v5504_v2 = vld [vmem:[%s9176_s21 + $0x35] sm:$0x7f]  ;;  %5372 = vst [vmem:[%s9176_s21 + $0x20] sm:$0xff] %v5343_v63  ;;  %5377 = vst [vmem:[%s9176_s21 + $0x48] sm:$0xff] %v5348_v5  ;;  %v1509_v12 = vadd.f32 %v1508_v9, %v1507_v0  ;;  %v703_v42 = vmul.f32 %v12785_v38, %v652_v31  ;;  %v705_v34 = vmul.f32 %v12785_v38, %v654_v59  ;;  %v12788_v39 = vld [vmem:[#allocation33_spill] sm:$0xff]  ;;  %vm12499_vm14 = vcmask 911360  }
 0x251   : > { %1376 = vrot.lane.b32.xlu0 %v1371_v48, %s7956_s18  ;;  %v1586_v57 = vrot.slane %v1585_v23, 1  ;;  %v1642_v36 = vadd.f32 %v1641_v6, %v1640_v27  ;;  %5378 = vst [vmem:[%s9176_s21 + $0x50] sm:$0xff] %v5349_v4  ;;  %v702_v48 = vmul.f32 %v12785_v38, %v651_v29  ;;  %v711_v35 = vrot.slane %v704_v1, 6  ;;  %v5822_v63 = vld [vmem:[%s9176_s21 + $0xa5] sm:$0xff] }
 0x252   : > { %v10290_v62 = vpop.permute.xlu0 %2438  ;;  %v5676_v60 = vld [vmem:[%s9176_s21 + $0x71] sm:$0x7f]  ;;  %v5675_v54 = vld [vmem:[%s9176_s21 + $0x69] sm:$0xff]  ;;  %v925_v0 = vmul.f32 %v12788_v39, %v12787_v18  ;;  %v927_v27 = vmul.f32 %v12788_v39, %v12789_v51  ;;  %v713_v9 = vrot.slane %v703_v42, 6  ;;  %vm2252_vm13 = vcmask 909312  }
 0x253   : > { %5509 = vrot.lane.b32.xlu1 %v5504_v2, %s7957_s11  ;;  %v10296_v15 = vpop.permute.xlu1 %3393  ;;  %v1587_v3 = vadd.f32 %v1586_v57, %v1585_v23  ;;  %v1643_v30 = vrot.slane %v1642_v36, 1  ;;  %v12790_v2 = vld [vmem:[#allocation34_spill] sm:$0xff]  ;;  %v714_v23 = vrot.slane %v705_v34, 6  ;;  %v10392_v31 = vld [vmem:[%s9348_s12 + $0x18] sm:$0xf]  ;;  %vm12545_vm9 = vcmask 1045504  }
 0x254   : > { %12780 = vst [vmem:[#allocation47_spill] sm:$0xff] %v10296_v15  ;;  %v10349_v5 = vmul.f32 %v12790_v2, %v651_v29  ;;  %v5419_v4 = vld [vmem:[%s9176_s21 + $0xf] sm:$0xff]  ;;  %vm12539_vm3 = vcmask 387072   ;;  %vm12567_vm0 = vcmask 1044480   ;;  %vm12544_vm11 = vcmask 392192  }
 0x255   : > { %1424 = vrot.lane.b32.xlu0 %v1413_v55, %s7956_s18  ;;  %v5420_v32 = vld [vmem:[%s9176_s21 + $0x17] sm:$0x7f]  ;;  %v1644_v24 = vadd.f32 %v1643_v30, %v1642_v36  ;;  %v710_v55 = vrot.slane %v702_v48, 6  ;;  %v12797_v30 = vld [vmem:[#allocation25_spill] sm:$0xff]  ;;  %v715_v42 = vsel %vm12516_vm6, %v713_v9, %v714_v23  ;;  %vm2180_vm2 = vcmask 1041152  }
 0x256   : > { %v10298_v21 = vpop.permute.xlu0 %2154  ;;  %12791 = vst [vmem:[#allocation42_spill] sm:$0xff] %v10349_v5  ;;  %v10412_v23 = vld [vmem:[%s9348_s12 + $0x8] sm:$0xf8]  ;;  %vm2190_vm15 = vcmask 778240  }
 0x257   : > { %5681 = vrot.lane.b32.xlu1 %v5676_v60, %s12682_s0  ;;  %v5463_v22 = vld [vmem:[%s9176_s21 + $0x26] sm:$0x7f]  ;;  %v935_v60 = vrot.slane %v925_v0, 5  ;;  %v712_v36 = vsel %vm12516_vm6, %v710_v55, %v711_v35  ;;  %v5462_v0 = vld [vmem:[%s9176_s21 + $0x1e] sm:$0xff]  ;;  %v10438_v55 = vmul.f32 %v10114_v19, %v10392_v31  ;;  %vm12540_vm6 = vcmask 518144  }
 0x258   : > { %v10302_v7 = vpop.permute.xlu1 %3453  ;;  %v719_v1 = vsel %vm12498_vm4, %v712_v36, 0.0  ;;  %v10408_v36 = vld [vmem:[%s9348_s12 + $0x20] sm:$0xf]  ;;  %vm1989_vm4 = vcmask 1040768  }
 0x259   : > { %1475 = vrot.lane.b32.xlu0 %v1470_v44, %s7956_s18  ;;  %12781 = vst [vmem:[#allocation37_spill] sm:$0xff] %v10302_v7  ;;  %v10352_v44 = vmul.f32 %v12790_v2, %v653_v58  ;;  %v720_v9 = vrot.slane %v719_v1, 4  ;;  %v5591_v35 = vld [vmem:[%s9176_s21 + $0x4b] sm:$0xff] }
 0x25a   : > { %v10305_v49 = vpop.permute.xlu0 %2313 }
 0x25b   : > { %5828 = vrot.lane.b32.xlu1 %v5823_v50, %s7957_s11  ;;  %12792 = vst [vmem:[#allocation43_spill] sm:$0xff] %v10352_v44  ;;  %v12795_v50 = vld [vmem:[#allocation50_spill] sm:$0xff] }
 0x25c   : > { %v10309_v25 = vpop.permute.xlu1 %2902 }
 0x25d   : > { %1520 = vrot.lane.b32.xlu0 %v1509_v12, %s12685_s24  ;;  %12782 = vst [vmem:[#allocation27_spill] sm:$0xff] %v10309_v25  ;;  %v936_v12 = vrot.slane %v927_v27, 5  ;;  %v10464_v27 = vmul.f32 %v10062_v40, %v10412_v23 }
 0x25e   : > { %v10312_v47 = vpop.permute.xlu0 %2377 }
 0x25f   : > { %5425 = vrot.lane.b32.xlu1 %v5420_v32, %s12686_s19  ;;  %v10365_v32 = vmul.f32 %v12788_v39, %v12797_v30  ;;  %v937_v34 = vsel %vm12512_vm1, %v935_v60, %v936_v12  ;;  %v10416_v60 = vmul.f32 %v10083_v28, %v10392_v31  ;;  %v10420_v12 = vmul.f32 %v10083_v28, %v10408_v36 }
 0x260   : > { %v10317_v13 = vpop.permute.xlu1 %3191  ;;  %v10442_v28 = vmul.f32 %v10114_v19, %v10408_v36  ;;  %v10459_v19 = vadd.f32 %v720_v9, %v719_v1  ;;  %v10484_v1 = vmul.f32 %v10192_v46, %v10392_v31  ;;  %v12814_v9 = vld [vmem:[#allocation28_spill] sm:$0xff]  ;;  %vm1987_vm1 = vcmask 1047936  }
 0x261   : > { %1598 = vrot.lane.b32.xlu0 %v1587_v3, %s12685_s24  ;;  %12783 = vst [vmem:[#allocation41_spill] sm:$0xff] %v10317_v13  ;;  %v10361_v3 = vmul.f32 %v12788_v39, %v12795_v50  ;;  %12798 = vst [vmem:[#allocation22_spill] sm:$0xff] %v10365_v32  ;;  %v1981_v38 = vrot.slane %v10420_v12, 3  ;;  %v1970_v39 = vmul.f32 %v10263_v33, %v10412_v23  ;;  %v10499_v13 = vld [vmem:[%s9348_s12 + $0x10] sm:$0xfc] }
 0x262   : > { %v10319_v53 = vpop.permute.xlu0 %2029  ;;  %12811 = vst [vmem:[#allocation25_spill] sm:$0xff] %v10459_v19  ;;  %v12817_v32 = vrot.slane %v10442_v28, 3 }
 0x263   : > { %5468 = vrot.lane.b32.xlu1 %v5463_v22, %s7956_s18  ;;  %12796 = vst [vmem:[#allocation26_spill] sm:$0xff] %v10361_v3  ;;  %v12816_v3 = vrot.slane %v10438_v55, 3 }
 0x265   : > { %1649 = vrot.lane.b32.xlu0 %v1644_v24, %s12685_s24  ;;  %v12799_v24 = vld [vmem:[#allocation24_spill] sm:$0xff] }
 0x266   : > { %v10369_v22 = vmul.f32 %v12799_v24, %v12787_v18  ;;  %v10373_v17 = vmul.f32 %v12799_v24, %v12789_v51  ;;  %v12809_v24 = vld [vmem:[#allocation38_spill] sm:$0xff] }
 0x267   : > { %v10333_v8 = vpop.permute.xlu1 %3333  ;;  %v10456_v18 = vld [vmem:[%s9348_s12 + $0x28] sm:$0xf] }
 0x268   : > { %12786 = vst [vmem:[#allocation23_spill] sm:$0xff] %v10333_v8  ;;  %12800 = vst [vmem:[#allocation49_spill] sm:$0xff] %v10369_v22  ;;  %v10479_v12 = vmul.f32 %v10164_v43, %v10456_v18  ;;  %v10520_v8 = vsel %vm2241_vm10, %v12816_v3, 0.0  ;;  %vm2350_vm10 = vcmask 122880   ;;  %v10548_v19 = vmul.f32 %v10210_v10, %v10456_v18 }
 0x269   : > { %5507 = vrot.lane.b32.xlu0 %v5503_v41, %s7957_s11  ;;  %v10330_v20 = vpop.permute.xlu0 %2092  ;;  %12801 = vst [vmem:[#allocation44_spill] sm:$0xff] %v10373_v17  ;;  %v12802_v41 = vld [vmem:[#allocation36_spill] sm:$0xff] }
 0x26a   : > { %v10378_v29 = vmul.f32 %v12802_v41, %v12795_v50  ;;  %v10382_v58 = vmul.f32 %v12802_v41, %v12797_v30  ;;  %v10423_v50 = vsel %vm12499_vm14, %v715_v42, 0.0  ;;  %v10426_v30 = vsel %vm12526_vm12, %v937_v34, 0.0 }
 0x26b   : > { %12807 = vst [vmem:[#allocation33_spill] sm:$0xff] %v10423_v50  ;;  %12808 = vst [vmem:[#allocation32_spill] sm:$0xff] %v10426_v30  ;;  %vm2000_vm14 = vcmask 385024   ;;  %v10448_v34 = vmul.f32 %v10164_v43, %v10408_v36  ;;  %v10496_v43 = vmul.f32 %v10192_v46, %v10408_v36  ;;  %v12815_v30 = vrot.slane %v10416_v60, 3 }
 0x26c   : > { %12803 = vst [vmem:[#allocation46_spill] sm:$0xff] %v10378_v29  ;;  %12804 = vst [vmem:[#allocation30_spill] sm:$0xff] %v10382_v58  ;;  %v10510_v11 = vsel %vm2000_vm14, %v1981_v38, 0.0  ;;  %vm2403_vm12 = vcmask 1040640  }
 0x26d   : > { %5679 = vrot.lane.b32.xlu0 %v5675_v54, %s12682_s0  ;;  %v10344_v14 = vpop.permute.xlu0 %3269  ;;  %v10354_v6 = vpop.permute.xlu1 %4033  ;;  %v10389_v54 = vld [vmem:[%s9348_s12] sm:$0xf8]  ;;  %v12819_v50 = vrot.slane %v10448_v34, 3 }
 0x26e   : > { %12793 = vst [vmem:[#allocation45_spill] sm:$0xff] %v10354_v6  ;;  %v1969_v41 = vmul.f32 %v10263_v33, %v10389_v54 }
 0x26f   : > { %v10533_v33 = vsel %vm1989_vm4, %v12819_v50, 0.0  ;;  %v10544_v50 = vmul.f32 %v10210_v10, %v10408_v36  ;;  %v10561_v10 = vmul.f32 %v10319_v53, %v10408_v36 }
 0x271   : > { %5826 = vrot.lane.b32.xlu0 %v5822_v63, %s7957_s11  ;;  %v10356_v57 = vpop.permute.xlu0 %2963 }
 0x272   : > { %12794 = vst [vmem:[#allocation48_spill] sm:$0xff] %v10356_v57  ;;  %v5782_v57 = vld [vmem:[%s9176_s21 + $0x9e] sm:$0x7f] }
 0x274   : > { %v10403_v51 = vpop.permute.xlu1 %4459 }
 0x275   : > { %5423 = vrot.lane.b32.xlu0 %v5419_v4, %s12686_s19  ;;  %v10394_v59 = vpop.permute.xlu0 %3025  ;;  %12806 = vst [vmem:[#allocation29_spill] sm:$0xff] %v10403_v51  ;;  %v10430_v4 = vmul.f32 %v12809_v24, %v10389_v54  ;;  %v10610_v51 = vld [vmem:[%s9348_s12 + $0x18] sm:$0x1f] }
 0x276   : > { %12805 = vst [vmem:[#allocation39_spill] sm:$0xff] %v10394_v59 }
 0x278   : > { %v10468_v48 = vpop.permute.xlu1 %4155 }
 0x279   : > { %5466 = vrot.lane.b32.xlu0 %v5462_v0, %s7956_s18  ;;  %v10434_v0 = vmul.f32 %v12809_v24, %v10412_v23  ;;  %v10444_v42 = vpop.permute.xlu0 %3085  ;;  %v10453_v24 = vmul.f32 %v10062_v40, %v10389_v54  ;;  %12812 = vst [vmem:[#allocation24_spill] sm:$0xff] %v10468_v48  ;;  %v5350_v40 = vmul.f32 %v10102_v45, %v12814_v9  ;;  %v10507_v9 = vsel %vm1989_vm4, %v12815_v30, 0.0 }
 0x27a   : > { %12810 = vst [vmem:[#allocation50_spill] sm:$0xff] %v10444_v42  ;;  %v10525_v30 = vsel %vm2252_vm13, %v12817_v32, 0.0  ;;  %v1980_v32 = vrot.slane %v1970_v39, 3  ;;  %vm2063_vm13 = vcmask 516096   ;;  %vm2051_vm4 = vcmask 1048064  }
 0x27b   : > { %5379 = vst [vmem:[%s9176_s21 + $0x58] sm:$0xff] %v5350_v40 }
 0x27c   : > { %v10536_v25 = vpop.permute.xlu1 %4217 }
 0x27d   : > { %5595 = vrot.lane.b32.xlu0 %v5591_v35, %s12675_s26  ;;  %v10475_v2 = vpop.permute.xlu0 %3391  ;;  %v10487_v35 = vld [vmem:[%s9348_s12 + $0x28] sm:$0x1f]  ;;  %12820 = vst [vmem:[#allocation51_spill] sm:$0xff] %v10536_v25  ;;  %v1982_v25 = vsel %vm12567_vm0, %v1980_v32, %v1981_v38  ;;  %v12825_v32 = vrot.slane %v10484_v1, 3 }
 0x27e   : > { %12813 = vst [vmem:[#allocation38_spill] sm:$0xff] %v10475_v2  ;;  %v3400_v63 = vmul.f32 %v10296_v15, %v10487_v35  ;;  %v3398_v46 = vmul.f32 %v10475_v2, %v10499_v13  ;;  %v3460_v40 = vmul.f32 %v10302_v7, %v10487_v35  ;;  %v12837_v2 = vrot.slane %v10430_v4, 3 }
 0x280   : > { %v3409_v22 = vrot.slane %v3400_v63, 2  ;;  %v3408_v3 = vrot.slane %v3398_v46, 2  ;;  %v10552_v46 = vmul.f32 %v10226_v56, %v10408_v36  ;;  %v1977_v63 = vrot.slane %v1969_v41, 3  ;;  %v12823_v41 = vld [vmem:[#allocation31_spill] sm:$0xff]  ;;  %v10601_v6 = vpop.permute.xlu1 %4277 }
 0x281   : > { %v10527_v17 = vpop.permute.xlu0 %3451  ;;  %v3469_v58 = vrot.slane %v3460_v40, 2  ;;  %v5357_v38 = vmul.f32 %v10102_v45, %v12823_v41  ;;  %v10586_v45 = vmul.f32 %v10319_v53, %v10392_v31  ;;  %12828 = vst [vmem:[#allocation31_spill] sm:$0xff] %v10601_v6  ;;  %v5738_v6 = vld [vmem:[%s9176_s21 + $0x87] sm:$0xff] }
 0x282   : > { %12818 = vst [vmem:[#allocation28_spill] sm:$0xff] %v10527_v17  ;;  %v3425_v48 = vsel %vm12539_vm3, %v3409_v22, 0.0  ;;  %v3410_v39 = vsel %vm12545_vm9, %v3408_v3, %v3409_v22  ;;  %v3458_v22 = vmul.f32 %v10527_v17, %v10499_v13  ;;  %v12824_v3 = vrot.slane %v10479_v12, 3  ;;  %v5634_v41 = vld [vmem:[%s9176_s21 + $0x5a] sm:$0xff] }
 0x283   : > { %v3424_v29 = vsel %vm12544_vm11, %v3410_v39, 0.0  ;;  %v10577_v39 = vsel %vm2180_vm2, %v12825_v32, 0.0  ;;  %vm3304_vm2 = vcmask 124928   ;;  %5638 = vrot.lane.b32.xlu0 %v5634_v41, %s12685_s24  ;;  %5386 = vst [vmem:[%s9176_s21 + $0x90] sm:$0xff] %v5357_v38  ;;  %vm12568_vm3 = vcmask 1048448  }
 0x284   : > { %v10563_v44 = vadd.f32 %v3425_v48, %v3424_v29  ;;  %v10572_v40 = vsel %vm2000_vm14, %v12824_v3, 0.0  ;;  %v5592_v48 = vld [vmem:[%s9176_s21 + $0x53] sm:$0x7f]  ;;  %v12827_v3 = vrot.slane %v10416_v60, 3  ;;  %vm2413_vm14 = vcmask 253952  }
 0x285   : > { %v10557_v5 = vpop.permute.xlu0 %2900  ;;  %5597 = vrot.lane.b32.xlu1 %v5592_v48, %s12675_s26  ;;  %v3468_v53 = vrot.slane %v3458_v22, 2  ;;  %v1999_v60 = vsel %vm12544_vm11, %v1982_v25, 0.0  ;;  %v3485_v48 = vsel %vm12540_vm6, %v3469_v58, 0.0  ;;  %v2045_v22 = vrot.slane %v10561_v10, 3  ;;  %v5635_v10 = vld [vmem:[%s9176_s21 + $0x62] sm:$0x7f] }
 0x286   : > { %12821 = vst [vmem:[#allocation52_spill] sm:$0xff] %v10557_v5  ;;  %12822 = vst [vmem:[#allocation53_spill] sm:$0xff] %v10563_v44  ;;  %v12826_v5 = vrot.slane %v10496_v43, 3  ;;  %v1979_v44 = vsel %vm12567_vm0, %v1977_v63, %v12827_v3  ;;  %v10606_v63 = vmul.f32 %v10226_v56, %v10456_v18  ;;  %v10622_v25 = vmul.f32 %v10243_v52, %v10487_v35 }
 0x287   : > { %v3470_v56 = vsel %vm12545_vm9, %v3468_v53, %v3469_v58  ;;  %v2221_v18 = vmul.f32 %v10275_v16, %v10389_v54  ;;  %v1988_v3 = vsel %vm1987_vm1, %v1979_v44, 0.0  ;;  %v2042_v32 = vrot.slane %v10586_v45, 3  ;;  %5742 = vrot.lane.b32.xlu0 %v5738_v6, %s12686_s19  ;;  %v10647_v45 = vld [vmem:[%s9348_s12 + $0x10] sm:$0xf8] }
 0x288   : > { %v10582_v29 = vsel %vm2190_vm15, %v12826_v5, 0.0  ;;  %v10596_v5 = vld [vmem:[%s9348_s12 + $0x20] sm:$0x1f]  ;;  %vm3294_vm15 = vcmask 1042560   ;;  %vm2988_vm6 = vcmask 1042816   ;;  %v2002_v17 = vadd.f32 %v10510_v11, %v1999_v60 }
 0x289   : > { %v10613_v41 = vpop.permute.xlu0 %3189  ;;  %v10618_v38 = vmul.f32 %v10243_v52, %v10596_v5  ;;  %vm12558_vm11 = vcmask 916480   ;;  %v12830_v52 = vrot.slane %v10544_v50, 3  ;;  %v10640_v58 = vmul.f32 %v10259_v26, %v10610_v51  ;;  %5640 = vrot.lane.b32.xlu1 %v5635_v10, %s12685_s24 }
 0x28a   : > { %12829 = vst [vmem:[#allocation54_spill] sm:$0xff] %v10613_v41  ;;  %v3484_v41 = vsel %vm12591_vm8, %v3470_v56, 0.0  ;;  %v12832_v11 = vrot.slane %v10548_v19, 3  ;;  %v12833_v56 = vrot.slane %v10552_v46, 3  ;;  %vm2116_vm9 = vcmask 1041024  }
 0x28b   : > { %v10636_v35 = vsel %vm2339_vm7, %v12830_v52, 0.0  ;;  %v10643_v44 = vadd.f32 %v3485_v48, %v3484_v41  ;;  %vm2114_vm7 = vcmask 1048192   ;;  %v2098_v6 = vmul.f32 %v10330_v20, %v10392_v31 }
 0x28c   : > { %v10652_v53 = vsel %vm2350_vm10, %v12832_v11, 0.0  ;;  %v10658_v52 = vsel %vm2403_vm12, %v12833_v56, 0.0  ;;  %v2222_v41 = vmul.f32 %v10275_v16, %v10412_v23  ;;  %v1991_v10 = vadd.f32 %v10507_v9, %v1988_v3  ;;  %v10671_v56 = vpop.permute.xlu1 %4579  ;;  %v5739_v9 = vld [vmem:[%s9176_s21 + $0x8f] sm:$0x7f]  ;;  %v5781_v3 = vld [vmem:[%s9176_s21 + $0x96] sm:$0xff] }
 0x28d   : > { %12831 = vst [vmem:[#allocation55_spill] sm:$0xff] %v10643_v44  ;;  %v10662_v48 = vpop.permute.xlu0 %3331  ;;  %v12835_v11 = vrot.slane %v10434_v0, 3  ;;  %12836 = vst [vmem:[#allocation57_spill] sm:$0xff] %v10671_v56  ;;  %v2229_v7 = vrot.slane %v2221_v18, 3  ;;  %v2043_v31 = vsel %vm12567_vm0, %v12837_v2, %v2042_v32  ;;  %v10679_v16 = vmul.f32 %v10259_v26, %v10596_v5  ;;  %5744 = vrot.lane.b32.xlu1 %v5739_v9, %s12686_s19 }
 0x28e   : > { %12834 = vst [vmem:[#allocation56_spill] sm:$0xff] %v10662_v48  ;;  %v2003_v0 = vrot.slane %v2002_v17, 4  ;;  %v2445_v18 = vmul.f32 %v10290_v62, %v10647_v45  ;;  %5785 = vrot.lane.b32.xlu0 %v5781_v3, %s7956_s18  ;;  %v12838_v26 = vrot.slane %v10438_v55, 3  ;;  %v2064_v44 = vsel %vm2063_vm13, %v2045_v22, 0.0 }
 0x28f   : > { %v2046_v60 = vsel %vm12567_vm0, %v12835_v11, %v2045_v22  ;;  %v2444_v11 = vmul.f32 %v10290_v62, %v10412_v23  ;;  %v2105_v15 = vrot.slane %v2098_v6, 3  ;;  %v2232_v59 = vrot.slane %v2222_v41, 3 }
 0x290   : > { %v2231_v2 = vsel %vm12567_vm0, %v2229_v7, %v12838_v26  ;;  %v2062_v48 = vsel %vm12591_vm8, %v2046_v60, 0.0  ;;  %v1992_v62 = vrot.slane %v1991_v10, 4  ;;  %v2052_v4 = vsel %vm2051_vm4, %v2043_v31, 0.0  ;;  %v5908_v31 = vld [vmem:[%s9176_s21 + $0xc3] sm:$0xff] }
 0x291   : > { %v10695_v42 = vpop.permute.xlu0 %4031  ;;  %v2054_v9 = vsel %vm2053_vm5, %v2042_v32, 0.0  ;;  %v12840_v3 = vrot.slane %v10606_v63, 3  ;;  %v12841_v7 = vrot.slane %v10618_v38, 2  ;;  %v12843_v22 = vrot.slane %v10622_v25, 2  ;;  %5787 = vrot.lane.b32.xlu1 %v5782_v57, %s7956_s18 }
 0x292   : > { %12839 = vst [vmem:[#allocation58_spill] sm:$0xff] %v10695_v42  ;;  %v2004_v32 = vadd.f32 %v2003_v0, %v2002_v17  ;;  %v12844_v26 = vrot.slane %v10442_v28, 3  ;;  %v2065_v56 = vadd.f32 %v2064_v44, %v2062_v48  ;;  %5912 = vrot.lane.b32.xlu0 %v5908_v31, %s12675_s26  ;;  %v2055_v41 = vadd.f32 %v2054_v9, %v2052_v4  ;;  %v5909_v9 = vld [vmem:[%s9176_s21 + $0xcb] sm:$0x7f]  ;;  %v5951_v31 = vld [vmem:[%s9176_s21 + $0xd2] sm:$0xff] }
 0x293   : > { %v10703_v55 = vsel %vm2413_vm14, %v12840_v3, 0.0  ;;  %v10708_v60 = vsel %vm3294_vm15, %v12841_v7, 0.0  ;;  %v10713_v6 = vsel %vm3304_vm2, %v12843_v22, 0.0  ;;  %v2240_v3 = vsel %vm12568_vm3, %v2231_v2, 0.0  ;;  %v10723_v7 = vpop.permute.xlu1 %4639 }
 0x294   : > { %12842 = vst [vmem:[#allocation59_spill] sm:$0xff] %v10708_v60  ;;  %v2234_v42 = vsel %vm12567_vm0, %v2232_v59, %v12844_v26  ;;  %v2452_v22 = vrot.slane %v2444_v11, 3  ;;  %v2455_v60 = vrot.slane %v2445_v18, 3  ;;  %v12845_v17 = vrot.slane %v10453_v24, 3 }
 0x295   : > { %v10728_v0 = vpop.permute.xlu0 %4457  ;;  %v10730_v59 = vadd.f32 %v1992_v62, %v1991_v10  ;;  %v12847_v44 = vrot.slane %v10640_v58, 2  ;;  %v10739_v48 = vmul.f32 %v10271_v37, %v10610_v51  ;;  %v10743_v11 = vmul.f32 %v10271_v37, %v10596_v5  ;;  %5914 = vrot.lane.b32.xlu1 %v5909_v9, %s12675_s26 }
 0x296   : > { %v2106_v28 = vsel %vm12567_vm0, %v12845_v17, %v2105_v15  ;;  %12846 = vst [vmem:[#allocation60_spill] sm:$0xff] %v10728_v0  ;;  %v2243_v24 = vadd.f32 %v10520_v8, %v2240_v3  ;;  %v2251_v18 = vsel %vm12558_vm11, %v2234_v42, 0.0  ;;  %v12848_v10 = vrot.slane %v10448_v34, 3  ;;  %5955 = vrot.lane.b32.xlu0 %v5951_v31, %s12685_s24 }
 0x297   : > { %v10735_v57 = vsel %vm2988_vm6, %v12847_v44, 0.0  ;;  %v12849_v2 = vrot.slane %v10479_v12, 3  ;;  %v2066_v26 = vrot.slane %v2065_v56, 4  ;;  %vm2125_vm5 = vcmask 654336   ;;  %v10780_v44 = vpop.permute.xlu1 %4697 }
 0x298   : > { %v2454_v4 = vsel %vm12567_vm0, %v2452_v22, %v12848_v10  ;;  %vm2127_vm12 = vcmask 647168   ;;  %v10757_v37 = vmul.f32 %v10330_v20, %v10408_v36  ;;  %v2115_v8 = vsel %vm2114_vm7, %v2106_v28, 0.0  ;;  %v5952_v28 = vld [vmem:[%s9176_s21 + $0xda] sm:$0x7f]  ;;  %12854 = vst [vmem:[#allocation63_spill] sm:$0xff] %v10780_v44 }
 0x299   : > { %v2457_v62 = vsel %vm12567_vm0, %v2455_v60, %v12849_v2  ;;  %v2117_v42 = vsel %vm2116_vm9, %v2105_v15, 0.0  ;;  %v2005_v34 = vrot.slane %v2004_v32, 2  ;;  %v2160_v12 = vmul.f32 %v10298_v21, %v10389_v54  ;;  %v10770_v36 = vpop.permute.xlu0 %4153  ;;  %5957 = vrot.lane.b32.xlu1 %v5952_v28, %s12685_s24 }
 0x29a   : > { %vm12559_vm10 = vcmask 1048320   ;;  %v2056_v60 = vrot.slane %v2055_v41, 4  ;;  %v12850_v3 = vrot.slane %v10679_v16, 2  ;;  %vm12851_vm13 = vcmask 387072   ;;  %12853 = vst [vmem:[#allocation62_spill] sm:$0xff] %v10770_v36 }
 0x29b   : > { %v10773_v15 = vadd.f32 %v10525_v30, %v2251_v18  ;;  %v2161_v22 = vmul.f32 %v10298_v21, %v10412_v23  ;;  %vm12561_vm9 = vcmask 785408   ;;  %v2244_v10 = vrot.slane %v2243_v24, 4  ;;  %v5549_v18 = vld [vmem:[%s9176_s21 + $0x44] sm:$0x7f] }
 0x29c   : > { %v10768_v20 = vsel %vm12851_vm13, %v12850_v3, 0.0  ;;  %v2462_v2 = vsel %vm1987_vm1, %v2454_v4, 0.0  ;;  %vm12855_vm14 = vcmask 392192   ;;  %vm2337_vm15 = vcmask 1047680   ;;  %5554 = vrot.lane.b32.xlu0 %v5549_v18, %s12694_s1 }
 0x29d   : > { %12852 = vst [vmem:[#allocation61_spill] sm:$0xff] %v10768_v20  ;;  %v2471_v9 = vsel %vm12855_vm14, %v2457_v62, 0.0  ;;  %vm2348_vm2 = vcmask 130048   ;;  %v2118_v30 = vadd.f32 %v2117_v42, %v2115_v8  ;;  %v1994_v31 = vrot.slane %v10730_v59, 2  ;;  %v10793_v42 = vpop.permute.xlu0 %4215  ;;  %v5548_v20 = vld [vmem:[%s9176_s21 + $0x3c] sm:$0xff] }
 0x29e   : > { %v2319_v21 = vmul.f32 %v10305_v49, %v10412_v23  ;;  %v2067_v3 = vadd.f32 %v2066_v26, %v2065_v56  ;;  %v2108_v54 = vrot.slane %v10757_v37, 3  ;;  %v2168_v4 = vrot.slane %v2160_v12, 3  ;;  %5552 = vrot.lane.b32.xlu1 %v5548_v20, %s12694_s1 }
 0x29f   : > { %v2320_v62 = vmul.f32 %v10305_v49, %v10647_v45  ;;  %v2057_v17 = vadd.f32 %v2056_v60, %v2055_v41  ;;  %v2006_v8 = vadd.f32 %v2005_v34, %v2004_v32  ;;  %v2255_v36 = vrot.slane %v10773_v15, 4 }
 0x2a0   : > { %v2171_v0 = vrot.slane %v2161_v22, 3  ;;  %v2464_v56 = vadd.f32 %v10533_v33, %v2462_v2  ;;  %v10798_v26 = vadd.f32 %v10572_v40, %v2471_v9  ;;  %v2245_v37 = vadd.f32 %v2244_v10, %v2243_v24  ;;  %v10809_v40 = vpop.permute.xlu1 %4093 }
 0x2a1   : > { %v12856_v28 = vrot.slane %v10484_v1, 3  ;;  %v2119_v18 = vrot.slane %v2118_v30, 4  ;;  %v2007_v49 = vrot.slane %v2006_v8, 1  ;;  %v2327_v41 = vrot.slane %v2319_v21, 3  ;;  %12858 = vst [vmem:[#allocation64_spill] sm:$0xff] %v10809_v40 }
 0x2a2   : > { %v2068_v32 = vrot.slane %v2067_v3, 2  ;;  %vm12564_vm13 = vcmask 1047808   ;;  %v12857_v34 = vrot.slane %v10464_v27, 3  ;;  %v1995_v33 = vadd.f32 %v1994_v31, %v10730_v59 }
 0x2a3   : > { %v2170_v12 = vsel %vm12567_vm0, %v2168_v4, %v12856_v28  ;;  %v2330_v24 = vrot.slane %v2320_v62, 3  ;;  %v2383_v1 = vmul.f32 %v10312_v47, %v10412_v23  ;;  %v2058_v22 = vrot.slane %v2057_v17, 2  ;;  %v10813_v2 = vpop.permute.xlu0 %4275 }
 0x2a4   : > { %v2109_v60 = vsel %vm12567_vm0, %v12857_v34, %v2108_v54  ;;  %v2008_v10 = vadd.f32 %v2007_v49, %v2006_v8  ;;  %12859 = vst [vmem:[#allocation65_spill] sm:$0xff] %v10813_v2  ;;  %v2465_v9 = vrot.slane %v2464_v56, 4  ;;  %v12860_v21 = vrot.slane %v10496_v43, 3 }
 0x2a5   : > { %v12861_v4 = vrot.slane %v10544_v50, 3  ;;  %v1996_v59 = vrot.slane %v1995_v33, 1  ;;  %v12862_v31 = vrot.slane %v10548_v19, 3  ;;  %v2120_v28 = vadd.f32 %v2119_v18, %v2118_v30 }
 0x2a6   : > { %v2173_v27 = vsel %vm12567_vm0, %v2171_v0, %v12860_v21  ;;  %v2126_v23 = vsel %vm2125_vm5, %v2109_v60, 0.0  ;;  %v2128_v8 = vsel %vm2127_vm12, %v2108_v54, 0.0  ;;  %2013 = vrot.lane.b32.xlu0 %v2008_v10, %s7956_s18  ;;  %v2246_v49 = vrot.slane %v2245_v37, 2  ;;  %v10836_v10 = vpop.permute.xlu1 %4379 }
 0x2a7   : > { %v2329_v20 = vsel %vm12567_vm0, %v2327_v41, %v12861_v4  ;;  %v2332_v62 = vsel %vm12567_vm0, %v2330_v24, %v12862_v31  ;;  %v2179_v43 = vsel %vm12559_vm10, %v2170_v12, 0.0  ;;  %vm1378_vm14 = vcmask 261120   ;;  %v10831_v18 = vpop.permute.xlu0 %4577  ;;  %12863 = vst [vmem:[#allocation66_spill] sm:$0xff] %v10836_v10 }
 0x2a8   : > { %vm3050_vm11 = vcmask 1042944   ;;  %v1997_v50 = vadd.f32 %v1996_v59, %v1995_v33  ;;  %v2069_v0 = vadd.f32 %v2068_v32, %v2067_v3  ;;  %v2189_v41 = vsel %vm12561_vm9, %v2173_v27, 0.0 }
 0x2a9   : > { %v2384_v19 = vmul.f32 %v10312_v47, %v10647_v45  ;;  %v2391_v34 = vrot.slane %v2383_v1, 3  ;;  %v2059_v30 = vadd.f32 %v2058_v22, %v2057_v17  ;;  %v2338_v54 = vsel %vm2337_vm15, %v2329_v20, 0.0 }
 0x2aa   : > { %v2349_v60 = vsel %vm2348_vm2, %v2332_v62, 0.0  ;;  %v2129_v24 = vadd.f32 %v2128_v8, %v2126_v23  ;;  %2011 = vrot.lane.b32.xlu1 %v1997_v50, %s7956_s18  ;;  %v2070_v12 = vrot.slane %v2069_v0, 1  ;;  %v2256_v3 = vadd.f32 %v2255_v36, %v10773_v15  ;;  %v10863_v50 = vpop.permute.xlu1 %4519 }
 0x2ab   : > { %v2121_v32 = vrot.slane %v2120_v28, 2  ;;  %v10841_v47 = vmul.f32 %v10286_v61, %v10610_v51  ;;  %v2060_v45 = vrot.slane %v2059_v30, 1  ;;  %v2182_v17 = vadd.f32 %v10577_v39, %v2179_v43  ;;  %v10850_v20 = vpop.permute.xlu0 %4637  ;;  %12866 = vst [vmem:[#allocation67_spill] sm:$0xff] %v10863_v50 }
 0x2ac   : > { %v2192_v33 = vadd.f32 %v10582_v29, %v2189_v41  ;;  %v12864_v1 = vrot.slane %v10552_v46, 3  ;;  %v2071_v21 = vadd.f32 %v2070_v12, %v2069_v0  ;;  %v2466_v27 = vadd.f32 %v2465_v9, %v2464_v56 }
 0x2ad   : > { %v2341_v4 = vadd.f32 %v10636_v35, %v2338_v54  ;;  %v2352_v36 = vadd.f32 %v10652_v53, %v2349_v60  ;;  %vm3110_vm12 = vcmask 1043072   ;;  %v2061_v15 = vadd.f32 %v2060_v45, %v2059_v30 }
 0x2ae   : > { %v2393_v22 = vsel %vm12567_vm0, %v2391_v34, %v12864_v1  ;;  %v2474_v59 = vrot.slane %v10798_v26, 4  ;;  %v2394_v31 = vrot.slane %v2384_v19, 3  ;;  %v2130_v39 = vrot.slane %v2129_v24, 4  ;;  %2076 = vrot.lane.b32.xlu0 %v2071_v21, %s7956_s18 }
 0x2af   : > { %v2247_v29 = vadd.f32 %v2246_v49, %v2245_v37  ;;  %v2257_v46 = vrot.slane %v2256_v3, 2  ;;  %v2402_v62 = vsel %vm12564_vm13, %v2393_v22, 0.0  ;;  %v10857_v56 = vmul.f32 %v10286_v61, %v10596_v5  ;;  %2074 = vrot.lane.b32.xlu1 %v2061_v15, %s7956_s18  ;;  %v10865_v19 = vpop.permute.xlu0 %4695 }
 0x2b0   : > { %v2122_v35 = vadd.f32 %v2121_v32, %v2120_v28  ;;  %v2183_v53 = vrot.slane %v2182_v17, 4  ;;  %v2193_v9 = vrot.slane %v2192_v33, 4  ;;  %v12865_v23 = vrot.slane %v10606_v63, 3  ;;  %12867 = vst [vmem:[#allocation68_spill] sm:$0xff] %v10865_v19 }
 0x2b1   : > { %v2248_v43 = vrot.slane %v2247_v29, 1  ;;  %v2467_v37 = vrot.slane %v2466_v27, 2  ;;  %v2342_v49 = vrot.slane %v2341_v4, 4  ;;  %v2353_v0 = vrot.slane %v2352_v36, 4 }
 0x2b2   : > { %v2396_v8 = vsel %vm12567_vm0, %v2394_v31, %v12865_v23  ;;  %v2123_v41 = vrot.slane %v2122_v35, 1  ;;  %v2475_v61 = vadd.f32 %v2474_v59, %v10798_v26  ;;  %v2405_v34 = vadd.f32 %v10658_v52, %v2402_v62  ;;  %v10896_v62 = vld [vmem:[%s9348_s12 + $0x8] sm:$0xfc]  ;;  %v12873_v23 = vld [vmem:[#allocation57_spill] sm:$0xff] }
 0x2b3   : > { %v2131_v28 = vadd.f32 %v2130_v39, %v2129_v24  ;;  %v2249_v30 = vadd.f32 %v2248_v43, %v2247_v29  ;;  %v2412_v54 = vsel %vm1378_vm14, %v2396_v8, 0.0  ;;  %v12868_v63 = vrot.slane %v10739_v48, 2  ;;  %v10892_v31 = vpop.permute.xlu0 %4091 }
 0x2b4   : > { %v12869_v12 = vrot.slane %v10743_v11, 2  ;;  %vm12870_vm10 = vcmask 518144   ;;  %v2124_v45 = vadd.f32 %v2123_v41, %v2122_v35  ;;  %v10880_v1 = vadd.f32 %v2183_v53, %v2182_v17  ;;  %12871 = vst [vmem:[#allocation69_spill] sm:$0xff] %v10892_v31  ;;  %v10898_v35 = vpop.permute.xlu1 %1103 }
 0x2b5   : > { %v10873_v60 = vsel %vm3050_vm11, %v12868_v63, 0.0  ;;  %v10882_v26 = vadd.f32 %v2193_v9, %v2192_v33  ;;  %v12560_v52 = vrot.slane %v10841_v47, 2  ;;  %2263 = vrot.lane.b32.xlu0 %v2249_v30, %s12685_s24  ;;  %v10887_v22 = vadd.f32 %v2342_v49, %v2341_v4  ;;  %12872 = vst [vmem:[#allocation70_spill] sm:$0xff] %v10898_v35 }
 0x2b6   : > { %v10878_v32 = vsel %vm12870_vm10, %v12869_v12, 0.0  ;;  %v10889_v21 = vadd.f32 %v2353_v0, %v2352_v36  ;;  %2138 = vrot.lane.b32.xlu1 %v2124_v45, %s7956_s18  ;;  %v2468_v15 = vadd.f32 %v2467_v37, %v2466_v27  ;;  %v2258_v59 = vadd.f32 %v2257_v46, %v2256_v3  ;;  %v10905_v3 = vld [vmem:[%s9348_s12 + $0x28] sm:$0x3f]  ;;  %v10922_v37 = vld [vmem:[%s9348_s12 + $0x10] sm:$0xfe] }
 0x2b7   : > { %v2476_v17 = vrot.slane %v2475_v61, 2  ;;  %v2406_v33 = vrot.slane %v2405_v34, 4  ;;  %v2415_v39 = vadd.f32 %v10703_v55, %v2412_v54  ;;  %v2132_v29 = vrot.slane %v2131_v28, 2  ;;  %v10924_v41 = vpop.permute.xlu0 %4377 }
 0x2b8   : > { %v3275_v4 = vmul.f32 %v10344_v14, %v10896_v62  ;;  %v3276_v27 = vmul.f32 %v10344_v14, %v10499_v13  ;;  %v2469_v36 = vrot.slane %v2468_v15, 1  ;;  %v2259_v46 = vrot.slane %v2258_v59, 1  ;;  %v10919_v14 = vld [vmem:[%s9348_s12] sm:$0xfc]  ;;  %12874 = vst [vmem:[#allocation57_spill] sm:$0xff] %v10924_v41 }
 0x2b9   : > { %v2185_v53 = vrot.slane %v10880_v1, 2  ;;  %v2195_v55 = vrot.slane %v10882_v26, 2  ;;  %v10912_v9 = vsel %vm3110_vm12, %v12560_v52, 0.0  ;;  %v4586_v8 = vmul.f32 %v12873_v23, %v10905_v3 }
 0x2ba   : > { %v2470_v49 = vadd.f32 %v2469_v36, %v2468_v15  ;;  %v2260_v0 = vadd.f32 %v2259_v46, %v2258_v59  ;;  %v2416_v30 = vrot.slane %v2415_v39, 4  ;;  %v4584_v63 = vmul.f32 %v10831_v18, %v10922_v37  ;;  %v12875_v15 = vld [vmem:[#allocation48_spill] sm:$0xff] }
 0x2bb   : > { %v4595_v54 = vrot.slane %v4586_v8, 1  ;;  %v2133_v12 = vadd.f32 %v2132_v29, %v2131_v28  ;;  %v10928_v45 = vadd.f32 %v2406_v33, %v2405_v34  ;;  %v3283_v24 = vrot.slane %v3275_v4, 2  ;;  %v10934_v8 = vpop.permute.xlu1 %1374  ;;  %v10941_v4 = vpop.permute.xlu0 %4517 }
 0x2bc   : > { %v3286_v52 = vrot.slane %v3276_v27, 2  ;;  %2482 = vrot.lane.b32.xlu0 %v2470_v49, %s7956_s18  ;;  %2265 = vrot.lane.b32.xlu1 %v2260_v0, %s12685_s24  ;;  %v2477_v43 = vadd.f32 %v2476_v17, %v2475_v61  ;;  %v2969_v59 = vmul.f32 %v12875_v15, %v10919_v14  ;;  %vm4188_vm10 = vcmask 389120   ;;  %12876 = vst [vmem:[#allocation48_spill] sm:$0xff] %v10941_v4  ;;  %v12877_v17 = vld [vmem:[#allocation39_spill] sm:$0xff] }
 0x2bd   : > { %v4594_v36 = vrot.slane %v4584_v63, 1  ;;  %v2134_v46 = vrot.slane %v2133_v12, 1  ;;  %v2970_v28 = vmul.f32 %v12875_v15, %v10896_v62  ;;  %v4611_v34 = vsel %vm4188_vm10, %v4595_v54, 0.0 }
 0x2be   : > { %v2478_v33 = vrot.slane %v2477_v43, 1  ;;  %v4646_v29 = vmul.f32 %v10723_v7, %v10905_v3  ;;  %v10943_v61 = vadd.f32 %v2416_v30, %v2415_v39  ;;  %v3031_v27 = vmul.f32 %v12877_v17, %v10919_v14 }
 0x2bf   : > { %vm12878_vm12 = vcmask 1046528   ;;  %v2135_v0 = vadd.f32 %v2134_v46, %v2133_v12  ;;  %vm12879_vm9 = vcmask 392192   ;;  %v12880_v10 = vrot.slane %v10618_v38, 2 }
 0x2c0   : > { %v4596_v49 = vsel %vm12878_vm12, %v4594_v36, %v4595_v54  ;;  %v2479_v13 = vadd.f32 %v2478_v33, %v2477_v43  ;;  %v4655_v41 = vrot.slane %v4646_v29, 1  ;;  %vm12881_vm13 = vcmask 1045504  }
 0x2c1   : > { %v4610_v15 = vsel %vm12879_vm9, %v4596_v49, 0.0  ;;  %v3285_v31 = vsel %vm12881_vm13, %v3283_v24, %v12880_v10  ;;  %v12882_v40 = vrot.slane %v10622_v25, 2  ;;  %vm12883_vm0 = vmmov %vm12881_vm13  ;;  %2140 = vrot.lane.b32.xlu0 %v2135_v0, %s7956_s18  ;;  %v4644_v54 = vmul.f32 %v10850_v20, %v10922_v37  ;;  %v10964_v10 = vpop.permute.xlu0 %1101  ;;  %v10968_v24 = vpop.permute.xlu1 %1426 }
 0x2c2   : > { %v10956_v30 = vadd.f32 %v4611_v34, %v4610_v15  ;;  %v2977_v12 = vrot.slane %v2969_v59, 2  ;;  %v2980_v36 = vrot.slane %v2970_v28, 2  ;;  %2484 = vrot.lane.b32.xlu1 %v2479_v13, %s7956_s18  ;;  %v2196_v43 = vadd.f32 %v2195_v55, %v10882_v26  ;;  %12884 = vst [vmem:[#allocation39_spill] sm:$0xff] %v10964_v10  ;;  %vm12885_vm9 = vmmov %vm12878_vm12 }
 0x2c3   : > { %v3288_v39 = vsel %vm12883_vm0, %v3286_v52, %v12882_v40  ;;  %v2186_v38 = vadd.f32 %v2185_v53, %v10880_v1  ;;  %v3032_v25 = vmul.f32 %v12877_v17, %v10896_v62  ;;  %v3039_v40 = vrot.slane %v3031_v27, 2  ;;  %vm12889_vm12 = vmmov %vm12881_vm13 }
 0x2c4   : > { %vm12569_vm0 = vcmask 520192   ;;  %v4654_v52 = vrot.slane %v4644_v54, 1  ;;  %v2197_v59 = vrot.slane %v2196_v43, 1  ;;  %v4704_v13 = vmul.f32 %v10780_v44, %v10905_v3 }
 0x2c5   : > { %v4671_v46 = vsel %vm12569_vm0, %v4655_v41, 0.0  ;;  %v2187_v28 = vrot.slane %v2186_v38, 1  ;;  %v2418_v26 = vrot.slane %v10943_v61, 2  ;;  %v3293_v1 = vsel %vm2337_vm15, %v3285_v31, 0.0  ;;  %v10978_v27 = vpop.permute.xlu0 %1376 }
 0x2c6   : > { %v3303_v53 = vsel %vm2348_vm2, %v3288_v39, 0.0  ;;  %v4656_v55 = vsel %vm12885_vm9, %v4654_v52, %v4655_v41  ;;  %v2198_v33 = vadd.f32 %v2197_v59, %v2196_v43  ;;  %v4713_v17 = vrot.slane %v4704_v13, 1  ;;  %12886 = vst [vmem:[#allocation71_spill] sm:$0xff] %v10978_v27  ;;  %vm12892_vm9 = vmmov %vm12889_vm12  ;;  %v12895_v52 = vld [vmem:[#allocation50_spill] sm:$0xff] }
 0x2c7   : > { %v4670_v34 = vsel %vm12591_vm8, %v4656_v55, 0.0  ;;  %v2188_v29 = vadd.f32 %v2187_v28, %v2186_v38  ;;  %v12887_v49 = vrot.slane %v10640_v58, 2  ;;  %v12888_v15 = vrot.slane %v10679_v16, 2  ;;  %v11007_v28 = vpop.permute.xlu1 %1473  ;;  %v12897_v13 = vld [vmem:[#allocation38_spill] sm:$0xff] }
 0x2c8   : > { %v10986_v31 = vadd.f32 %v4671_v46, %v4670_v34  ;;  %v4702_v41 = vmul.f32 %v10865_v19, %v10922_v37  ;;  %v12891_v39 = vrot.slane %v10739_v48, 2  ;;  %v3042_v38 = vrot.slane %v3032_v25, 2  ;;  %2203 = vrot.lane.b32.xlu0 %v2198_v33, %s7956_s18  ;;  %v12896_v25 = vld [vmem:[#allocation47_spill] sm:$0xff] }
 0x2c9   : > { %v2979_v0 = vsel %vm12881_vm13, %v2977_v12, %v12887_v49  ;;  %v2982_v54 = vsel %vm12889_vm12, %v2980_v36, %v12888_v15  ;;  %vm3120_vm3 = vcmask 649216   ;;  %2201 = vrot.lane.b32.xlu1 %v2188_v29, %s7956_s18  ;;  %v12893_v58 = vrot.slane %v10889_v21, 2 }
 0x2ca   : > { %12890 = vst [vmem:[#allocation72_spill] sm:$0xff] %v10986_v31  ;;  %v3041_v43 = vsel %vm12892_vm9, %v3039_v40, %v12891_v39  ;;  %v12894_v12 = vrot.slane %v10887_v22, 2  ;;  %v3091_v46 = vmul.f32 %v12895_v52, %v10919_v14  ;;  %v3092_v48 = vmul.f32 %v12895_v52, %v10896_v62 }
 0x2cb   : > { %v2356_v16 = vadd.f32 %v12893_v58, %v10889_v21  ;;  %v3399_v40 = vmul.f32 %v12896_v25, %v10596_v5  ;;  %v4712_v59 = vrot.slane %v4702_v41, 1  ;;  %v3397_v55 = vmul.f32 %v12897_v13, %v10896_v62 }
 0x2cc   : > { %v2345_v36 = vadd.f32 %v12894_v12, %v10887_v22  ;;  %vm12898_vm13 = vcmask 651264   ;;  %v11012_v22 = vpop.permute.xlu0 %1424  ;;  %v3306_v14 = vadd.f32 %v10713_v6, %v3303_v53  ;;  %v2987_v29 = vsel %vm1987_vm1, %v2979_v0, 0.0 }
 0x2cd   : > { %v4729_v21 = vsel %vm12898_vm13, %v4713_v17, 0.0  ;;  %v2357_v34 = vrot.slane %v2356_v16, 1  ;;  %vm12899_vm12 = vcmask 392192   ;;  %vm12900_vm9 = vcmask 1046528  }
 0x2ce   : > { %v2346_v33 = vrot.slane %v2345_v36, 1  ;;  %v2997_v49 = vsel %vm12899_vm12, %v2982_v54, 0.0  ;;  %v4714_v15 = vsel %vm12900_vm9, %v4712_v59, %v4713_v17  ;;  %v12901_v41 = vrot.slane %v10743_v11, 2  ;;  %v11041_v59 = vld [vmem:[%s9348_s12 + $0x18] sm:$0x3f] }
 0x2cf   : > { %vm12902_vm0 = vcmask 1045504   ;;  %v4728_v58 = vsel %vm2125_vm5, %v4714_v15, 0.0  ;;  %v2358_v12 = vadd.f32 %v2357_v34, %v2356_v16  ;;  %v3049_v25 = vsel %vm2051_vm4, %v3041_v43, 0.0  ;;  %v12905_v16 = vld [vmem:[#allocation59_spill] sm:$0xff]  ;;  %v12912_v15 = vld [vmem:[#allocation28_spill] sm:$0xff] }
 0x2d0   : > { %v3044_v39 = vsel %vm12902_vm0, %v3042_v38, %v12901_v41  ;;  %v2347_v52 = vadd.f32 %v2346_v33, %v2345_v36  ;;  %v3099_v13 = vrot.slane %v3091_v46, 2  ;;  %v3102_v63 = vrot.slane %v3092_v48, 2  ;;  %v11031_v38 = vpop.permute.xlu0 %1475  ;;  %v12906_v48 = vld [vmem:[#allocation61_spill] sm:$0xff]  ;;  %vm12911_vm13 = vmmov %vm12902_vm0 }
 0x2d1   : > { %v11023_v6 = vadd.f32 %v4729_v21, %v4728_v58  ;;  %v3406_v53 = vrot.slane %v3399_v40, 2  ;;  %v3405_v0 = vrot.slane %v3397_v55, 2  ;;  %2363 = vrot.lane.b32.xlu0 %v2358_v12, %s12685_s24  ;;  %v2419_v11 = vadd.f32 %v2418_v26, %v10943_v61  ;;  %v11043_v55 = vpop.permute.xlu1 %1522  ;;  %vm12913_vm12 = vmmov %vm12902_vm0  ;;  %v11063_v12 = vld [vmem:[%s9348_s12] sm:$0xfe] }
 0x2d2   : > { %2361 = vrot.lane.b32.xlu1 %v2347_v52, %s12685_s24  ;;  %v12904_v17 = vrot.slane %v10928_v45, 2  ;;  %v3296_v43 = vadd.f32 %v12905_v16, %v3293_v1  ;;  %v3307_v36 = vrot.slane %v3306_v14, 4  ;;  %v11035_v46 = vadd.f32 %v10735_v57, %v2987_v29  ;;  %12907 = vst [vmem:[#allocation47_spill] sm:$0xff] %v11043_v55 }
 0x2d3   : > { %12903 = vst [vmem:[#allocation50_spill] sm:$0xff] %v11023_v6  ;;  %v11038_v40 = vadd.f32 %v12906_v48, %v2997_v49  ;;  %v3059_v61 = vsel %vm12591_vm8, %v3044_v39, 0.0  ;;  %v2420_v21 = vrot.slane %v2419_v11, 1  ;;  %v11049_v1 = vadd.f32 %v10873_v60, %v3049_v25 }
 0x2d4   : > { %v2409_v54 = vadd.f32 %v12904_v17, %v10928_v45  ;;  %v12908_v45 = vld [vmem:[#allocation37_spill] sm:$0xff]  ;;  %v12909_v57 = vrot.slane %v10841_v47, 2  ;;  %v12910_v29 = vrot.slane %v10857_v56, 2  ;;  %v3457_v41 = vmul.f32 %v12912_v15, %v10896_v62  ;;  %v11065_v47 = vpop.permute.xlu0 %1520 }
 0x2d5   : > { %v3459_v26 = vmul.f32 %v12908_v45, %v10596_v5  ;;  %v3407_v39 = vsel %vm12913_vm12, %v3405_v0, %v3406_v53  ;;  %v12914_v5 = vld [vmem:[#allocation45_spill] sm:$0xff]  ;;  %v2421_v60 = vadd.f32 %v2420_v21, %v2419_v11  ;;  %12915 = vst [vmem:[#allocation38_spill] sm:$0xff] %v11065_v47  ;;  %v3297_v25 = vrot.slane %v3296_v43, 4  ;;  %v12917_v45 = vld [vmem:[#allocation58_spill] sm:$0xff] }
 0x2d6   : > { %v2410_v34 = vrot.slane %v2409_v54, 1  ;;  %v3101_v33 = vsel %vm12902_vm0, %v3099_v13, %v12909_v57  ;;  %v3104_v49 = vsel %vm12911_vm13, %v3102_v63, %v12910_v29  ;;  %v4039_v58 = vmul.f32 %v12914_v5, %v11041_v59  ;;  %v11082_v56 = vld [vmem:[%s9348_s12 + $0x20] sm:$0x3f] }
 0x2d7   : > { %v2991_v13 = vrot.slane %v11035_v46, 4  ;;  %v11069_v63 = vadd.f32 %v10878_v32, %v3059_v61  ;;  %v12916_v62 = vmov %v12910_v29  ;;  %v3001_v17 = vrot.slane %v11038_v40, 4  ;;  %2426 = vrot.lane.b32.xlu0 %v2421_v60, %s12685_s24  ;;  %v11092_v29 = vld [vmem:[%s9348_s12 + $0x8] sm:$0xfe] }
 0x2d8   : > { %v2411_v52 = vadd.f32 %v2410_v34, %v2409_v54  ;;  %v3121_v0 = vsel %vm3120_vm3, %v12916_v62, 0.0  ;;  %v3109_v16 = vsel %vm2114_vm7, %v3101_v33, 0.0  ;;  %v3119_v11 = vsel %vm2125_vm5, %v3104_v49, 0.0  ;;  %v11086_v34 = vpop.permute.xlu1 %1600  ;;  %vm12920_vm3 = vmmov %vm12902_vm0 }
 0x2d9   : > { %v3466_v54 = vrot.slane %v3459_v26, 2  ;;  %v3416_v48 = vsel %vm2988_vm6, %v3406_v53, 0.0  ;;  %v3415_v32 = vsel %vm1987_vm1, %v3407_v39, 0.0  ;;  %v3465_v61 = vrot.slane %v3457_v41, 2  ;;  %v11094_v53 = vpop.permute.xlu0 %1598 }
 0x2da   : > { %2424 = vrot.lane.b32.xlu1 %v2411_v52, %s12685_s24  ;;  %v4037_v21 = vmul.f32 %v12917_v45, %v11063_v12  ;;  %v4040_v26 = vmul.f32 %v12914_v5, %v11082_v56  ;;  %v4046_v33 = vrot.slane %v4039_v58, 1  ;;  %v3308_v49 = vadd.f32 %v3307_v36, %v3306_v14 }
 0x2db   : > { %v3063_v15 = vrot.slane %v11069_v63, 4  ;;  %v11098_v41 = vadd.f32 %v10912_v9, %v3109_v16  ;;  %v4038_v39 = vmul.f32 %v12917_v45, %v11092_v29  ;;  %v3298_v60 = vadd.f32 %v3297_v25, %v3296_v43  ;;  %v12922_v43 = vld [vmem:[#allocation29_spill] sm:$0xff] }
 0x2dc   : > { %v11102_v52 = vadd.f32 %v3121_v0, %v3119_v11  ;;  %v11104_v62 = vadd.f32 %v3416_v48, %v3415_v32  ;;  %v11107_v5 = vsel %vm3050_vm11, %v3466_v54, 0.0  ;;  %v3309_v58 = vrot.slane %v3308_v49, 2  ;;  %vm12925_vm11 = vmmov %vm12900_vm9 }
 0x2dd   : > { %12918 = vst [vmem:[#allocation59_spill] sm:$0xff] %v11098_v41  ;;  %v3467_v14 = vsel %vm12920_vm3, %v3465_v61, %v3466_v54  ;;  %v4045_v36 = vrot.slane %v4037_v21, 1  ;;  %v3299_v57 = vrot.slane %v3298_v60, 2  ;;  %v4526_v9 = vmul.f32 %v10863_v50, %v10905_v3  ;;  %v11115_v11 = vpop.permute.xlu0 %1649  ;;  %v11119_v61 = vpop.permute.xlu1 %1647  ;;  %vm12926_vm0 = vmmov %vm12925_vm11 }
 0x2de   : > { %12919 = vst [vmem:[#allocation61_spill] sm:$0xff] %v11102_v52  ;;  %v4049_v16 = vrot.slane %v4040_v26, 1  ;;  %vm12921_vm6 = vcmask 1044608   ;;  %v4465_v25 = vmul.f32 %v12922_v43, %v11082_v56  ;;  %v3310_v0 = vadd.f32 %v3309_v58, %v3308_v49  ;;  %12923 = vst [vmem:[#allocation37_spill] sm:$0xff] %v11119_v61  ;;  %v12924_v26 = vld [vmem:[#allocation60_spill] sm:$0xff] }
 0x2df   : > { %v4056_v27 = vsel %vm12921_vm6, %v4046_v33, 0.0  ;;  %v4048_v48 = vrot.slane %v4038_v39, 1  ;;  %v3300_v32 = vadd.f32 %v3299_v57, %v3298_v60  ;;  %v4535_v45 = vrot.slane %v4526_v9, 1  ;;  %vm12927_vm13 = vmmov %vm12926_vm0 }
 0x2e0   : > { %v4524_v54 = vmul.f32 %v10941_v4, %v10922_v37  ;;  %v4466_v21 = vmul.f32 %v12922_v43, %v10905_v3  ;;  %v4463_v50 = vmul.f32 %v12924_v26, %v11092_v29  ;;  %v3311_v6 = vrot.slane %v3310_v0, 1  ;;  %vm12931_vm3 = vmmov %vm12926_vm0 }
 0x2e1   : > { %v3002_v10 = vadd.f32 %v3001_v17, %v11038_v40  ;;  %v4047_v49 = vsel %vm12925_vm11, %v4045_v36, %v4046_v33  ;;  %vm12590_vm9 = vcmask 258048   ;;  %v3301_v39 = vrot.slane %v3300_v32, 1  ;;  %v11129_v35 = vpop.permute.xlu0 %5507 }
 0x2e2   : > { %v4534_v57 = vrot.slane %v4524_v54, 1  ;;  %v3312_v60 = vadd.f32 %v3311_v6, %v3310_v0  ;;  %v4551_v58 = vsel %vm12590_vm9, %v4535_v45, 0.0  ;;  %v2992_v4 = vadd.f32 %v2991_v13, %v11035_v46 }
 0x2e3   : > { %v3003_v9 = vrot.slane %v3002_v10, 2  ;;  %v4050_v3 = vsel %vm12926_vm0, %v4048_v48, %v4049_v16  ;;  %v4464_v43 = vmul.f32 %v12924_v26, %v10922_v37  ;;  %v3302_v47 = vadd.f32 %v3301_v39, %v3300_v32  ;;  %v11142_v37 = vpop.permute.xlu1 %5509 }
 0x2e4   : > { %v4536_v40 = vsel %vm12927_vm13, %v4534_v57, %v4535_v45  ;;  %v4055_v17 = vsel %vm2337_vm15, %v4047_v49, 0.0  ;;  %3317 = vrot.lane.b32.xlu1 %v3312_v60, %s12694_s1  ;;  %v2993_v36 = vrot.slane %v2992_v4, 2  ;;  %vm12928_vm12 = vcmask 126976  }
 0x2e5   : > { %v4550_v6 = vsel %vm1378_vm14, %v4536_v40, 0.0  ;;  %v3004_v33 = vadd.f32 %v3003_v9, %v3002_v10  ;;  %v4065_v46 = vsel %vm12928_vm12, %v4049_v16, 0.0  ;;  %v4472_v13 = vrot.slane %v4465_v25, 1  ;;  %3315 = vrot.lane.b32.xlu0 %v3302_v47, %s12694_s1  ;;  %v11146_v49 = vpop.permute.xlu0 %5679  ;;  %vm12938_vm13 = vmmov %vm12928_vm12 }
 0x2e6   : > { %v4471_v0 = vrot.slane %v4463_v50, 1  ;;  %v11140_v48 = vadd.f32 %v4551_v58, %v4550_v6  ;;  %v4064_v32 = vsel %vm2348_vm2, %v4050_v3, 0.0  ;;  %v2994_v54 = vadd.f32 %v2993_v36, %v2992_v4  ;;  %v12932_v4 = vld [vmem:[#allocation43_spill] sm:$0xff]  ;;  %v12939_v36 = vld [vmem:[#allocation30_spill] sm:$0xff] }
 0x2e7   : > { %v3005_v45 = vrot.slane %v3004_v33, 1  ;;  %v3064_v26 = vadd.f32 %v3063_v15, %v11069_v63  ;;  %v3475_v10 = vsel %vm2051_vm4, %v3467_v14, 0.0  ;;  %v4057_v39 = vadd.f32 %v4056_v27, %v4055_v17  ;;  %v12934_v63 = vld [vmem:[#allocation42_spill] sm:$0xff] }
 0x2e8   : > { %12929 = vst [vmem:[#allocation28_spill] sm:$0xff] %v11140_v48  ;;  %v4475_v16 = vrot.slane %v4466_v21, 1  ;;  %v4474_v25 = vrot.slane %v4464_v43, 1  ;;  %v2995_v57 = vrot.slane %v2994_v54, 1  ;;  %v12930_v60 = vrot.slane %v11049_v1, 4 }
 0x2e9   : > { %v3006_v50 = vadd.f32 %v3005_v45, %v3004_v33  ;;  %v3065_v47 = vrot.slane %v3064_v26, 2  ;;  %v4066_v9 = vadd.f32 %v4065_v46, %v4064_v32  ;;  %v4473_v3 = vsel %vm12931_vm3, %v4471_v0, %v4472_v13  ;;  %v12941_v0 = vld [vmem:[#allocation46_spill] sm:$0xff] }
 0x2ea   : > { %v3054_v58 = vadd.f32 %v12930_v60, %v11049_v1  ;;  %v12933_v40 = vrot.slane %v12932_v4, 6  ;;  %v12935_v15 = vrot.slane %v12934_v63, 6  ;;  %vm12936_vm6 = vcmask 1041408   ;;  %v11167_v60 = vpop.permute.xlu1 %5681  ;;  %v11169_v4 = vpop.permute.xlu0 %5826 }
 0x2eb   : > { %vm12581_vm11 = vcmask 1043200   ;;  %3011 = vrot.lane.b32.xlu0 %v3006_v50, %s12694_s1  ;;  %v2996_v27 = vadd.f32 %v2995_v57, %v2994_v54  ;;  %v3066_v14 = vadd.f32 %v3065_v47, %v3064_v26  ;;  %vm12937_vm0 = vcmask 1044608  }
 0x2ec   : > { %v672_v6 = vsel %vm12936_vm6, %v12935_v15, %v12933_v40  ;;  %v3055_v21 = vrot.slane %v3054_v58, 2  ;;  %v4482_v17 = vsel %vm12937_vm0, %v4472_v13, 0.0  ;;  %v4491_v1 = vsel %vm12938_vm13, %v4475_v16, 0.0  ;;  %vm12950_vm13 = vmmov %vm12931_vm3 }
 0x2ed   : > { %v679_v43 = vsel %vm12581_vm11, %v672_v6, 0.0  ;;  %v12940_v46 = vrot.slane %v12939_v36, 5  ;;  %v12942_v32 = vrot.slane %v12941_v0, 5  ;;  %vm12943_vm12 = vcmask 1042432   ;;  %3009 = vrot.lane.b32.xlu1 %v2996_v27, %s12694_s1  ;;  %v12944_v0 = vld [vmem:[#allocation24_spill] sm:$0xff]  ;;  %vm12954_vm11 = vmmov %vm12931_vm3 }
 0x2ee   : > { %v680_v33 = vrot.slane %v679_v43, 4  ;;  %v4476_v54 = vsel %vm12931_vm3, %v4474_v25, %v4475_v16  ;;  %v3067_v26 = vrot.slane %v3066_v14, 1  ;;  %v3056_v50 = vadd.f32 %v3055_v21, %v3054_v58  ;;  %v12945_v25 = vld [vmem:[#allocation62_spill] sm:$0xff]  ;;  %v11191_v48 = vpop.permute.xlu0 %5423 }
 0x2ef   : > { %v974_v45 = vsel %vm12943_vm12, %v12942_v32, %v12940_v46  ;;  %vm12580_vm6 = vcmask 1045248   ;;  %v4058_v13 = vrot.slane %v4057_v39, 4  ;;  %v4481_v57 = vsel %vm2337_vm15, %v4473_v3, 0.0  ;;  %v12946_v3 = vld [vmem:[#allocation27_spill] sm:$0xff] }
 0x2f0   : > { %v681_v47 = vadd.f32 %v680_v33, %v679_v43  ;;  %v981_v40 = vsel %vm12580_vm6, %v974_v45, 0.0  ;;  %v4067_v63 = vrot.slane %v4066_v9, 4  ;;  %v3068_v15 = vadd.f32 %v3067_v26, %v3066_v14  ;;  %v11189_v26 = vpop.permute.xlu1 %5828  ;;  %vm12953_vm6 = vmmov %vm12931_vm3 }
 0x2f1   : > { %v3057_v6 = vrot.slane %v3056_v50, 1  ;;  %v982_v36 = vrot.slane %v981_v40, 4  ;;  %v4490_v46 = vsel %vm2348_vm2, %v4476_v54, 0.0  ;;  %v4161_v16 = vmul.f32 %v12944_v0, %v11041_v59 }
 0x2f2   : > { %v4159_v27 = vmul.f32 %v12945_v25, %v11063_v12  ;;  %v682_v58 = vrot.slane %v681_v47, 2  ;;  %v11183_v43 = vmul.f32 %v12946_v3, %v10610_v51  ;;  %3073 = vrot.lane.b32.xlu0 %v3068_v15, %s12694_s1  ;;  %v11187_v32 = vadd.f32 %v11107_v5, %v3475_v10 }
 0x2f3   : > { %v3058_v14 = vadd.f32 %v3057_v6, %v3056_v50  ;;  %v983_v33 = vadd.f32 %v982_v36, %v981_v40  ;;  %v4483_v45 = vadd.f32 %v4482_v17, %v4481_v57  ;;  %vm4178_vm0 = vcmask 1044864   ;;  %v12949_v57 = vld [vmem:[#allocation51_spill] sm:$0xff] }
 0x2f4   : > { %12947 = vst [vmem:[#allocation45_spill] sm:$0xff] %v11183_v43  ;;  %12948 = vst [vmem:[#allocation58_spill] sm:$0xff] %v11187_v32  ;;  %v683_v54 = vadd.f32 %v682_v58, %v681_v47  ;;  %v4492_v55 = vadd.f32 %v4491_v1, %v4490_v46  ;;  %v4162_v21 = vmul.f32 %v12944_v0, %v11082_v56  ;;  %v4168_v50 = vrot.slane %v4161_v16, 1 }
 0x2f5   : > { %3071 = vrot.lane.b32.xlu1 %v3058_v14, %s12694_s1  ;;  %v984_v51 = vrot.slane %v983_v33, 2  ;;  %v4068_v15 = vadd.f32 %v4067_v63, %v4066_v9  ;;  %v4160_v5 = vmul.f32 %v12945_v25, %v11092_v29  ;;  %v4167_v10 = vrot.slane %v4159_v27, 1  ;;  %v11207_v14 = vpop.permute.xlu1 %5425 }
 0x2f6   : > { %v4059_v17 = vadd.f32 %v4058_v13, %v4057_v39  ;;  %v4223_v47 = vmul.f32 %v12949_v57, %v11041_v59  ;;  %v684_v40 = vrot.slane %v683_v54, 1  ;;  %v4224_v1 = vmul.f32 %v12949_v57, %v11082_v56 }
 0x2f7   : > { %v985_v6 = vadd.f32 %v984_v51, %v983_v33  ;;  %v4069_v36 = vrot.slane %v4068_v15, 2  ;;  %v4221_v46 = vmul.f32 %v10793_v42, %v11063_v12  ;;  %v4222_v9 = vmul.f32 %v10793_v42, %v11092_v29  ;;  %v11209_v33 = vpop.permute.xlu0 %5466 }
 0x2f8   : > { %v4060_v63 = vrot.slane %v4059_v17, 2  ;;  %v4484_v0 = vrot.slane %v4483_v45, 4  ;;  %v4493_v16 = vrot.slane %v4492_v55, 4  ;;  %v4171_v13 = vrot.slane %v4162_v21, 1 }
 0x2f9   : > { %v986_v25 = vrot.slane %v985_v6, 1  ;;  %v4070_v39 = vadd.f32 %v4069_v36, %v4068_v15  ;;  %v4169_v59 = vsel %vm12950_vm13, %v4167_v10, %v4168_v50  ;;  %v4170_v27 = vrot.slane %v4160_v5, 1 }
 0x2fa   : > { %v4061_v58 = vadd.f32 %v4060_v63, %v4059_v17  ;;  %v4230_v51 = vrot.slane %v4223_v47, 1  ;;  %v685_v57 = vadd.f32 %v684_v40, %v683_v54  ;;  %v4233_v19 = vrot.slane %v4224_v1, 1  ;;  %v12951_v17 = vld [vmem:[#allocation53_spill] sm:$0xff] }
 0x2fb   : > { %v987_v12 = vadd.f32 %v986_v25, %v985_v6  ;;  %v4071_v41 = vrot.slane %v4070_v39, 1  ;;  %v4229_v42 = vrot.slane %v4221_v46, 1  ;;  %v4232_v44 = vrot.slane %v4222_v9, 1  ;;  %v12952_v47 = vld [vmem:[#allocation25_spill] sm:$0xff] }
 0x2fc   : > { %v4062_v52 = vrot.slane %v4061_v58, 1  ;;  %v4585_v15 = vmul.f32 %v12873_v23, %v11082_v56  ;;  %v4583_v21 = vmul.f32 %v10831_v18, %v11092_v29  ;;  %vm12589_vm12 = vcmask 1045376  }
 0x2fd   : > { %v11215_v5 = vadd.f32 %v987_v12, %v685_v57  ;;  %v4072_v10 = vadd.f32 %v4071_v41, %v4070_v39  ;;  %v4179_v40 = vsel %vm4178_vm0, %v4168_v50, 0.0  ;;  %v4172_v1 = vsel %vm12931_vm3, %v4170_v27, %v4171_v13  ;;  %v11227_v50 = vpop.permute.xlu1 %5468  ;;  %v736_v57 = vld [vmem:[%s8667_s22 + $0x6] sm:$0x7] }
 0x2fe   : > { %v4063_v6 = vadd.f32 %v4062_v52, %v4061_v58  ;;  %v4177_v46 = vsel %vm1987_vm1, %v4169_v59, 0.0  ;;  %v4494_v23 = vadd.f32 %v4493_v16, %v4492_v55  ;;  %v4485_v9 = vadd.f32 %v4484_v0, %v4483_v45  ;;  %v11229_v52 = vpop.permute.xlu0 %5595  ;;  %v12955_v45 = vld [vmem:[#allocation33_spill] sm:$0xff] }
 0x2ff   : > { %4077 = vrot.lane.b32.xlu1 %v4072_v10, %s12694_s1  ;;  %vm4240_vm13 = vcmask 1044992   ;;  %v4231_v41 = vsel %vm12953_vm6, %v4229_v42, %v4230_v51  ;;  %v4234_v63 = vsel %vm12954_vm11, %v4232_v44, %v4233_v19  ;;  %v4592_v25 = vrot.slane %v4585_v15, 1 }
 0x300   : > { %4075 = vrot.lane.b32.xlu0 %v4063_v6, %s12694_s1  ;;  %v4591_v39 = vrot.slane %v4583_v21, 1  ;;  %v4495_v59 = vrot.slane %v4494_v23, 2  ;;  %v4486_v55 = vrot.slane %v4485_v9, 2  ;;  %v12956_v0 = vrot.slane %v12955_v45, 4 }
 0x301   : > { %v4189_v27 = vsel %vm4188_vm10, %v4171_v13, 0.0  ;;  %v11237_v58 = vadd.f32 %v4179_v40, %v4177_v46  ;;  %vm12958_vm11 = vcmask 392192   ;;  %vm12588_vm6 = vcmask 913408   ;;  %v1038_v40 = vld [vmem:[%s8670_s25 + $0xf] sm:$0x1f] }
 0x302   : > { %v11234_v16 = vadd.f32 %v12956_v0, %v12955_v45  ;;  %v4187_v44 = vsel %vm12958_vm11, %v4172_v1, 0.0  ;;  %v4241_v12 = vsel %vm4240_vm13, %v4230_v51, 0.0  ;;  %v4239_v42 = vsel %vm2051_vm4, %v4231_v41, 0.0 }
 0x303   : > { %12957 = vst [vmem:[#allocation29_spill] sm:$0xff] %v11237_v58  ;;  %v4496_v15 = vadd.f32 %v4495_v59, %v4494_v23  ;;  %v4487_v21 = vadd.f32 %v4486_v55, %v4485_v9  ;;  %vm12960_vm3 = vcmask 520192   ;;  %v4249_v45 = vsel %vm12591_vm8, %v4234_v63, 0.0  ;;  %v11258_v63 = vpop.permute.xlu1 %5597 }
 0x304   : > { %v4251_v18 = vsel %vm12960_vm3, %v4233_v19, 0.0  ;;  %v11248_v13 = vmul.f32 %v10723_v7, %v11082_v56  ;;  %vm12961_vm10 = vcmask 1046528   ;;  %v738_v51 = vrot.slane %v736_v57, 2  ;;  %v11260_v7 = vpop.permute.xlu0 %5638 }
 0x305   : > { %v4593_v1 = vsel %vm12961_vm10, %v4591_v39, %v4592_v25  ;;  %v4497_v46 = vrot.slane %v4496_v15, 1  ;;  %v4488_v0 = vrot.slane %v4487_v21, 1  ;;  %v11254_v9 = vadd.f32 %v4189_v27, %v4187_v44 }
 0x306   : > { %v11256_v19 = vadd.f32 %v4241_v12, %v4239_v42  ;;  %v11262_v56 = vadd.f32 %v4251_v18, %v4249_v45  ;;  %v1040_v55 = vrot.slane %v1038_v40, 3  ;;  %v11265_v57 = vsel %vm4178_vm0, %v4592_v25, 0.0  ;;  %v12963_v12 = vld [vmem:[#allocation35_spill] sm:$0xff] }
 0x307   : > { %12962 = vst [vmem:[#allocation60_spill] sm:$0xff] %v11254_v9  ;;  %v4498_v39 = vadd.f32 %v4497_v46, %v4496_v15  ;;  %v4489_v59 = vadd.f32 %v4488_v0, %v4487_v21  ;;  %v11268_v27 = vsel %vm1987_vm1, %v4593_v1, 0.0  ;;  %v1021_v42 = vsel %vm12589_vm12, %v12963_v12, 0.0  ;;  %v12964_v15 = vld [vmem:[#allocation44_spill] sm:$0xff]  ;;  %v12966_v21 = vld [vmem:[#allocation49_spill] sm:$0xff] }
 0x308   : > { %v4643_v18 = vmul.f32 %v10850_v20, %v11092_v29  ;;  %v12965_v45 = vrot.slane %v12964_v15, 5  ;;  %v12967_v40 = vrot.slane %v12966_v21, 5  ;;  %vm12968_vm11 = vcmask 1042432   ;;  %v7822_v1 = vld [vmem:[%s9348_s12 + $0x8] sm:$0xc0]  ;;  %v11300_v21 = vpop.permute.xlu1 %5640  ;;  %v11312_v44 = vpop.permute.xlu0 %5742 }
 0x309   : > { %4503 = vrot.lane.b32.xlu1 %v4498_v39, %s12694_s1  ;;  %4501 = vrot.lane.b32.xlu0 %v4489_v59, %s12694_s1  ;;  %v740_v46 = vmul.f32 %v7822_v1, %v738_v51  ;;  %v11284_v0 = vld [vmem:[%s9348_s12 + $0x18] sm:$0x7f]  ;;  %v11287_v12 = vld [vmem:[%s9348_s12 + $0x20] sm:$0x7f]  ;;  %vm5518_vm0 = vcmask 1046912   ;;  %vm5528_vm3 = vcmask 391168  }
 0x30a   : > { %v1017_v25 = vsel %vm12968_vm11, %v12967_v40, %v12965_v45  ;;  %v7823_v20 = vld [vmem:[%s9348_s12 + $0x20] sm:$0x1]  ;;  %v5515_v15 = vmul.f32 %v11142_v37, %v11284_v0  ;;  %v5516_v39 = vmul.f32 %v11142_v37, %v11287_v12  ;;  %v11298_v59 = vld [vmem:[%s9348_s12 + $0x8] sm:$0xff]  ;;  %v1022_v40 = vrot.slane %v1021_v42, 4  ;;  %12969 = vst [vmem:[#allocation43_spill] sm:$0xff] %v11312_v44 }
 0x30b   : > { %v741_v29 = vmul.f32 %v7823_v20, %v738_v51  ;;  %v11295_v45 = vld [vmem:[%s9348_s12] sm:$0xff]  ;;  %v7824_v1 = vld [vmem:[%s9348_s12 + $0x8] sm:$0xe0]  ;;  %v5514_v51 = vmul.f32 %v11129_v35, %v11298_v59  ;;  %v5688_v54 = vmul.f32 %v11167_v60, %v11287_v12  ;;  %vm12970_vm10 = vcmask 392192  }
 0x30c   : > { %v1042_v23 = vmul.f32 %v7824_v1, %v1040_v55  ;;  %v5513_v6 = vmul.f32 %v11129_v35, %v11295_v45  ;;  %v7825_v20 = vld [vmem:[%s9348_s12 + $0x20] sm:$0x3]  ;;  %v5519_v41 = vsel %vm5518_vm0, %v5515_v15, 0.0  ;;  %v5529_v37 = vsel %vm5528_vm3, %v5516_v39, 0.0  ;;  %v11319_v2 = vpop.permute.xlu1 %5744 }
 0x30d   : > { %v1043_v36 = vmul.f32 %v7825_v20, %v1040_v55  ;;  %v1029_v1 = vsel %vm12588_vm6, %v1017_v25, 0.0  ;;  %v5527_v3 = vsel %vm12970_vm10, %v5514_v51, 0.0  ;;  %v5687_v35 = vmul.f32 %v11167_v60, %v11284_v0  ;;  %12971 = vst [vmem:[#allocation42_spill] sm:$0xff] %v11319_v2  ;;  %v11326_v25 = vld [vmem:[%s9348_s12 + $0x28] sm:$0x7f] }
 0x30e   : > { %v5517_v43 = vsel %vm1987_vm1, %v5513_v6, 0.0  ;;  %v4651_v55 = vrot.slane %v4643_v18, 1  ;;  %v744_v15 = vrot.slane %v740_v46, 6  ;;  %v745_v20 = vrot.slane %v741_v29, 6  ;;  %12972 = vst [vmem:[#allocation30_spill] sm:$0xff] %v11326_v25  ;;  %v11330_v18 = vld [vmem:[%s9348_s12 + $0x10] sm:$0xff]  ;;  %v11343_v29 = vpop.permute.xlu0 %5785 }
 0x30f   : > { %v5530_v39 = vadd.f32 %v5529_v37, %v5527_v3  ;;  %v1023_v58 = vadd.f32 %v1022_v40, %v1021_v42  ;;  %v5520_v10 = vadd.f32 %v5519_v41, %v5517_v43  ;;  %v5685_v44 = vmul.f32 %v11146_v49, %v11295_v45  ;;  %12980 = vst [vmem:[#allocation46_spill] sm:$0xff] %v11343_v29 }
 0x310   : > { %v5686_v6 = vmul.f32 %v11146_v49, %v11298_v59  ;;  %v1030_v51 = vrot.slane %v1029_v1, 4  ;;  %v1046_v32 = vrot.slane %v1042_v23, 5  ;;  %v1047_v61 = vrot.slane %v1043_v36, 5 }
 0x311   : > { %vm12973_vm11 = vcmask 915456   ;;  %vm12974_vm10 = vcmask 1047424   ;;  %vm12975_vm6 = vcmask 1048448   ;;  %vm12976_vm12 = vcmask 916480  }
 0x312   : > { %v5699_v60 = vsel %vm12973_vm11, %v5688_v54, 0.0  ;;  %v5690_v3 = vsel %vm12974_vm10, %v5687_v35, 0.0  ;;  %v5689_v42 = vsel %vm12975_vm6, %v5685_v44, 0.0  ;;  %v5698_v43 = vsel %vm12976_vm12, %v5686_v6, 0.0  ;;  %v11349_v6 = vpop.permute.xlu1 %5787 }
 0x313   : > { %v5834_v41 = vmul.f32 %v11189_v26, %v11287_v12  ;;  %v12977_v49 = vrot.slane %v11248_v13, 1  ;;  %vm12978_vm9 = vcmask 1046528   ;;  %vm12979_vm8 = vcmask 1041408   ;;  %12981 = vst [vmem:[#allocation24_spill] sm:$0xff] %v11349_v6 }
 0x314   : > { %v746_v23 = vsel %vm12979_vm8, %v744_v15, %v745_v20  ;;  %v5531_v36 = vrot.slane %v5530_v39, 4  ;;  %v5835_v54 = vmul.f32 %v11189_v26, %v11326_v25  ;;  %v5521_v40 = vrot.slane %v5520_v10, 4 }
 0x315   : > { %v4653_v46 = vsel %vm12978_vm9, %v4651_v55, %v12977_v49  ;;  %v5700_v37 = vadd.f32 %v5699_v60, %v5698_v43  ;;  %v5832_v44 = vmul.f32 %v11169_v4, %v11298_v59  ;;  %v5833_v35 = vmul.f32 %v11169_v4, %v11330_v18 }
 0x316   : > { %v12982_v55 = vmov %v12977_v49  ;;  %v1031_v20 = vadd.f32 %v1030_v51, %v1029_v1  ;;  %vm12983_vm8 = vcmask 1042432   ;;  %v5691_v26 = vadd.f32 %v5690_v3, %v5689_v42 }
 0x317   : > { %v4662_v15 = vsel %vm4240_vm13, %v12982_v55, 0.0  ;;  %v1048_v49 = vsel %vm12983_vm8, %v1046_v32, %v1047_v61  ;;  %v4661_v29 = vsel %vm2051_vm4, %v4653_v46, 0.0  ;;  %v1024_v25 = vrot.slane %v1023_v58, 2  ;;  %vm12984_vm9 = vmmov %vm12983_vm8 }
 0x318   : > { %v748_v60 = vsel %vm12984_vm9, %v746_v23, 0.0  ;;  %v5837_v43 = vsel %vm5518_vm0, %v5834_v41, 0.0  ;;  %v5532_v2 = vadd.f32 %v5531_v36, %v5530_v39  ;;  %v5846_v4 = vsel %vm5528_vm3, %v5835_v54, 0.0  ;;  %v11367_v39 = vpop.permute.xlu0 %5912 }
 0x319   : > { %v5836_v6 = vsel %vm1987_vm1, %v5832_v44, 0.0  ;;  %vm12985_vm12 = vcmask 392192   ;;  %v11363_v1 = vadd.f32 %v11265_v57, %v11268_v27  ;;  %vm12987_vm13 = vcmask 1044480   ;;  %12988 = vst [vmem:[#allocation51_spill] sm:$0xff] %v11367_v39  ;;  %vm12997_vm1 = vmmov %vm12983_vm8 }
 0x31a   : > { %v5845_v13 = vsel %vm12985_vm12, %v5833_v35, 0.0  ;;  %v1051_v61 = vsel %vm12987_vm13, %v1048_v49, 0.0  ;;  %v5522_v32 = vadd.f32 %v5521_v40, %v5520_v10  ;;  %v5701_v51 = vrot.slane %v5700_v37, 4  ;;  %v11372_v35 = vpop.permute.xlu1 %5914 }
 0x31b   : > { %12986 = vst [vmem:[#allocation62_spill] sm:$0xff] %v11363_v1  ;;  %v1032_v42 = vrot.slane %v1031_v20, 2  ;;  %v749_v46 = vrot.slane %v748_v60, 4  ;;  %v5692_v41 = vrot.slane %v5691_v26, 4  ;;  %v11370_v36 = vadd.f32 %v4662_v15, %v4661_v29  ;;  %12989 = vst [vmem:[#allocation53_spill] sm:$0xff] %v11372_v35 }
 0x31c   : > { %v5838_v54 = vadd.f32 %v5837_v43, %v5836_v6  ;;  %v5847_v44 = vadd.f32 %v5846_v4, %v5845_v13  ;;  %v12990_v57 = vrot.slane %v12952_v47, 2  ;;  %v1025_v27 = vadd.f32 %v1024_v25, %v1023_v58  ;;  %v11384_v3 = vpop.permute.xlu0 %5955 }
 0x31d   : > { %v1052_v40 = vrot.slane %v1051_v61, 4  ;;  %v5533_v55 = vrot.slane %v5532_v2, 2  ;;  %v5523_v39 = vrot.slane %v5522_v32, 2  ;;  %v5702_v9 = vadd.f32 %v5701_v51, %v5700_v37  ;;  %12992 = vst [vmem:[#allocation25_spill] sm:$0xff] %v11384_v3  ;;  %v12993_v51 = vld [vmem:[#allocation22_spill] sm:$0xff] }
 0x31e   : > { %v723_v10 = vadd.f32 %v12990_v57, %v12952_v47  ;;  %v12991_v29 = vrot.slane %v11234_v16, 2  ;;  %v1033_v15 = vadd.f32 %v1032_v42, %v1031_v20  ;;  %v750_v43 = vadd.f32 %v749_v46, %v748_v60  ;;  %v11394_v46 = vpop.permute.xlu1 %5957 }
 0x31f   : > { %v5693_v4 = vadd.f32 %v5692_v41, %v5691_v26  ;;  %v5839_v58 = vrot.slane %v5838_v54, 4  ;;  %v5848_v25 = vrot.slane %v5847_v44, 4  ;;  %v1026_v23 = vrot.slane %v1025_v27, 1  ;;  %12998 = vst [vmem:[#allocation33_spill] sm:$0xff] %v11394_v46 }
 0x320   : > { %v731_v6 = vadd.f32 %v12991_v29, %v11234_v16  ;;  %v724_v57 = vrot.slane %v723_v10, 1  ;;  %v1053_v49 = vadd.f32 %v1052_v40, %v1051_v61  ;;  %v5534_v35 = vadd.f32 %v5533_v55, %v5532_v2  ;;  %v12995_v16 = vld [vmem:[#allocation26_spill] sm:$0xff] }
 0x321   : > { %v12994_v1 = vrot.slane %v12993_v51, 5  ;;  %v12996_v20 = vrot.slane %v12995_v16, 5  ;;  %v5703_v60 = vrot.slane %v5702_v9, 2  ;;  %v5524_v42 = vadd.f32 %v5523_v39, %v5522_v32 }
 0x322   : > { %v732_v41 = vrot.slane %v731_v6, 1  ;;  %v1034_v29 = vrot.slane %v1033_v15, 1  ;;  %v751_v47 = vrot.slane %v750_v43, 2  ;;  %v5694_v61 = vrot.slane %v5693_v4, 2 }
 0x323   : > { %v11392_v26 = vsel %vm12997_vm1, %v12996_v20, %v12994_v1  ;;  %v5840_v2 = vadd.f32 %v5839_v58, %v5838_v54  ;;  %v5849_v40 = vadd.f32 %v5848_v25, %v5847_v44  ;;  %v5535_v55 = vrot.slane %v5534_v35, 1  ;;  %v11403_v58 = vpop.permute.xlu0 %5554 }
 0x324   : > { %v5525_v13 = vrot.slane %v5524_v42, 1  ;;  %v725_v37 = vadd.f32 %v724_v57, %v723_v10  ;;  %v1027_v3 = vadd.f32 %v1026_v23, %v1025_v27  ;;  %v1054_v51 = vrot.slane %v1053_v49, 2 }
 0x325   : > { %v5431_v16 = vmul.f32 %v11207_v14, %v11284_v0  ;;  %v5429_v1 = vmul.f32 %v11191_v48, %v11295_v45  ;;  %v5536_v32 = vadd.f32 %v5535_v55, %v5534_v35  ;;  %v5704_v20 = vadd.f32 %v5703_v60, %v5702_v9  ;;  %v11407_v35 = vpop.permute.xlu1 %5552 }
 0x326   : > { %v5526_v39 = vadd.f32 %v5525_v13, %v5524_v42  ;;  %v733_v46 = vadd.f32 %v732_v41, %v731_v6  ;;  %v1035_v31 = vadd.f32 %v1034_v29, %v1033_v15  ;;  %v1428_v54 = vsel %vm1378_vm14, %v11012_v22, %v10968_v24 }
 0x327   : > { %v5695_v44 = vadd.f32 %v5694_v61, %v5693_v4  ;;  %v752_v23 = vadd.f32 %v751_v47, %v750_v43  ;;  %v5841_v10 = vrot.slane %v5840_v2, 2  ;;  %v5850_v27 = vrot.slane %v5849_v40, 2  ;;  %5541 = vrot.lane.b32.xlu1 %v5536_v32, %s7956_s18 }
 0x328   : > { %5539 = vrot.lane.b32.xlu0 %v5526_v39, %s7956_s18  ;;  %v5705_v25 = vrot.slane %v5704_v20, 1  ;;  %v1055_v9 = vadd.f32 %v1054_v51, %v1053_v49  ;;  %v5432_v6 = vmul.f32 %v11207_v14, %v11287_v12  ;;  %v5430_v24 = vmul.f32 %v11191_v48, %v11298_v59 }
 0x329   : > { %v5696_v15 = vrot.slane %v5695_v44, 1  ;;  %v1036_v4 = vadd.f32 %v1027_v3, %v725_v37  ;;  %vm12999_vm6 = vcmask 1046656   ;;  %v5433_v13 = vsel %vm2337_vm15, %v5429_v1, 0.0 }
 0x32a   : > { %v5434_v43 = vsel %vm12999_vm6, %v5431_v16, 0.0  ;;  %v5706_v47 = vadd.f32 %v5705_v25, %v5704_v20  ;;  %vm940_vm0 = vcmask 1045120   ;;  %v1037_v57 = vadd.f32 %v1035_v31, %v733_v46  ;;  %v11424_v46 = vpop.permute.xlu0 %2013 }
 0x32b   : > { %v5474_v60 = vmul.f32 %v11227_v50, %v11284_v0  ;;  %v5472_v49 = vmul.f32 %v11209_v33, %v11295_v45  ;;  %v5697_v42 = vadd.f32 %v5696_v15, %v5695_v44  ;;  %v1431_v14 = vadd.f32 %v11012_v22, %v1036_v4 }
 0x32c   : > { %v753_v41 = vrot.slane %v752_v23, 1  ;;  %5711 = vrot.lane.b32.xlu1 %v5706_v47, %s12685_s24  ;;  %v5851_v48 = vadd.f32 %v5850_v27, %v5849_v40  ;;  %v5842_v3 = vadd.f32 %v5841_v10, %v5840_v2  ;;  %v1056_v37 = vrot.slane %v1055_v9, 1  ;;  %v11430_v40 = vpop.permute.xlu1 %2011 }
 0x32d   : > { %vm13000_vm3 = vcmask 129024   ;;  %v5435_v61 = vadd.f32 %v5434_v43, %v5433_v13  ;;  %v5442_v31 = vsel %vm2348_vm2, %v5430_v24, 0.0  ;;  %5709 = vrot.lane.b32.xlu0 %v5697_v42, %s12685_s24  ;;  %v5475_v55 = vmul.f32 %v11227_v50, %v11287_v12 }
 0x32e   : > { %v5443_v29 = vsel %vm13000_vm3, %v5432_v6, 0.0  ;;  %v5473_v22 = vmul.f32 %v11209_v33, %v11298_v59  ;;  %v5852_v51 = vrot.slane %v5851_v48, 1  ;;  %v5843_v16 = vrot.slane %v5842_v3, 1  ;;  %v11459_v4 = vpop.permute.xlu0 %2076 }
 0x32f   : > { %vm13001_vm11 = vcmask 1046784   ;;  %vm13002_vm10 = vcmask 1047808   ;;  %v5603_v32 = vmul.f32 %v11258_v63, %v11284_v0  ;;  %v5604_v39 = vmul.f32 %v11258_v63, %v11287_v12 }
 0x330   : > { %v5477_v2 = vsel %vm13001_vm11, %v5474_v60, 0.0  ;;  %v5476_v1 = vsel %vm13002_vm10, %v5472_v49, 0.0  ;;  %v5601_v50 = vmul.f32 %v11229_v52, %v11295_v45  ;;  %v5602_v33 = vmul.f32 %v11229_v52, %v11298_v59  ;;  %v11465_v13 = vpop.permute.xlu1 %2074  ;;  %v5866_v60 = vld [vmem:[%s9176_s21 + $0xbc] sm:$0x7f] }
 0x331   : > { %v5853_v20 = vadd.f32 %v5852_v51, %v5851_v48  ;;  %v5844_v44 = vadd.f32 %v5843_v16, %v5842_v3  ;;  %v11444_v10 = vadd.f32 %v10934_v8, %v11215_v5  ;;  %v1432_v27 = vadd.f32 %v1428_v54, %v1037_v57 }
 0x332   : > { %v1477_v25 = vsel %vm1378_vm14, %v11007_v28, %v11031_v38  ;;  %vm13003_vm8 = vcmask 785408   ;;  %v754_v6 = vadd.f32 %v753_v41, %v752_v23  ;;  %v11453_v24 = vadd.f32 %v11094_v53, %v1431_v14 }
 0x333   : > { %v1602_v63 = vsel %vm13003_vm8, %v11094_v53, %v11086_v34  ;;  %vm13004_vm9 = vcmask 260096   ;;  %v5485_v15 = vsel %vm1378_vm14, %v5473_v22, 0.0  ;;  %5858 = vrot.lane.b32.xlu1 %v5853_v20, %s7956_s18  ;;  %5856 = vrot.lane.b32.xlu0 %v5844_v44, %s7956_s18  ;;  %v1057_v5 = vadd.f32 %v1056_v37, %v1055_v9  ;;  %v5865_v9 = vld [vmem:[%s9176_s21 + $0xb4] sm:$0xff]  ;;  %vm13010_vm1 = vmmov %vm13003_vm8 }
 0x334   : > { %v5486_v52 = vsel %vm13004_vm9, %v5475_v55, 0.0  ;;  %v5436_v28 = vrot.slane %v5435_v61, 4  ;;  %v5444_v38 = vadd.f32 %v5443_v29, %v5442_v31  ;;  %v5478_v54 = vadd.f32 %v5477_v2, %v5476_v1  ;;  %vm13014_vm10 = vmmov %vm13010_vm1 }
 0x335   : > { %vm13005_vm12 = vcmask 1047168   ;;  %vm13006_vm13 = vcmask 653312   ;;  %v5605_v23 = vsel %vm2114_vm7, %v5601_v50, 0.0  ;;  %v5614_v43 = vsel %vm2125_vm5, %v5602_v33, 0.0 }
 0x336   : > { %v5606_v34 = vsel %vm13005_vm12, %v5603_v32, 0.0  ;;  %v5615_v53 = vsel %vm13006_vm13, %v5604_v39, 0.0  ;;  %v5487_v47 = vadd.f32 %v5486_v52, %v5485_v15  ;;  %v5646_v57 = vmul.f32 %v11300_v21, %v11284_v0  ;;  %v11494_v39 = vpop.permute.xlu0 %2263 }
 0x337   : > { %v13007_v49 = vrot.slane %v11104_v62, 4  ;;  %v13008_v14 = vrot.slane %v12951_v17, 4  ;;  %v11479_v48 = vsel %vm940_vm0, %v11392_v26, 0.0  ;;  %v5647_v3 = vmul.f32 %v11300_v21, %v11287_v12  ;;  %5869 = vrot.lane.b32.xlu1 %v5865_v9, %s12694_s1  ;;  %5871 = vrot.lane.b32.xlu0 %v5866_v60, %s12694_s1  ;;  %v13009_v26 = vld [vmem:[#allocation37_spill] sm:$0xff] }
 0x338   : > { %v5644_v37 = vmul.f32 %v11260_v7, %v11295_v45  ;;  %v5645_v29 = vmul.f32 %v11260_v7, %v11298_v59  ;;  %v5616_v31 = vadd.f32 %v5615_v53, %v5614_v43  ;;  %v1058_v22 = vadd.f32 %v1057_v5, %v754_v6  ;;  %v11500_v6 = vpop.permute.xlu1 %2138 }
 0x339   : > { %v3419_v42 = vadd.f32 %v13007_v49, %v11104_v62  ;;  %v3428_v41 = vadd.f32 %v13008_v14, %v12951_v17  ;;  %v5607_v62 = vadd.f32 %v5606_v34, %v5605_v23  ;;  %v1651_v51 = vsel %vm13010_vm1, %v13009_v26, %v11115_v11 }
 0x33a   : > { %v5445_v21 = vrot.slane %v5444_v38, 4  ;;  %v5479_v16 = vrot.slane %v5478_v54, 4  ;;  %v11492_v2 = vadd.f32 %v5436_v28, %v5435_v61  ;;  %v5488_v1 = vrot.slane %v5487_v47, 4 }
 0x33b   : > { %v3420_v17 = vrot.slane %v3419_v42, 2  ;;  %v3429_v55 = vrot.slane %v3428_v41, 2  ;;  %vm13011_vm6 = vcmask 1047296   ;;  %vm13012_vm3 = vcmask 784384  }
 0x33c   : > { %v5649_v50 = vsel %vm13011_vm6, %v5646_v57, 0.0  ;;  %v5658_v33 = vsel %vm13012_vm3, %v5647_v3, 0.0  ;;  %vm13013_vm11 = vcmask 1048320   ;;  %v5657_v44 = vsel %vm13014_vm10, %v5645_v29, 0.0  ;;  %v13017_v3 = vld [vmem:[#allocation55_spill] sm:$0xff] }
 0x33d   : > { %v3421_v32 = vadd.f32 %v3420_v17, %v3419_v42  ;;  %v3430_v7 = vadd.f32 %v3429_v55, %v3428_v41  ;;  %v5648_v20 = vsel %vm13013_vm11, %v5644_v37, 0.0  ;;  %v5608_v11 = vrot.slane %v5607_v62, 4  ;;  %v13015_v42 = vld [vmem:[#allocation58_spill] sm:$0xff]  ;;  %v13020_v55 = vld [vmem:[#allocation43_spill] sm:$0xff] }
 0x33e   : > { %v5617_v52 = vrot.slane %v5616_v31, 4  ;;  %v1479_v5 = vadd.f32 %v1477_v25, %v1058_v22  ;;  %v11502_v28 = vadd.f32 %v1602_v63, %v1432_v27  ;;  %v11504_v34 = vadd.f32 %v5445_v21, %v5444_v38  ;;  %v13019_v37 = vld [vmem:[#allocation42_spill] sm:$0xff] }
 0x33f   : > { %v3422_v15 = vrot.slane %v3421_v32, 1  ;;  %v3431_v61 = vrot.slane %v3430_v7, 1  ;;  %v11506_v53 = vadd.f32 %v5479_v16, %v5478_v54  ;;  %v5650_v23 = vadd.f32 %v5649_v50, %v5648_v20 }
 0x340   : > { %v5659_v43 = vadd.f32 %v5658_v33, %v5657_v44  ;;  %v11508_v60 = vadd.f32 %v1651_v51, %v1479_v5  ;;  %v11510_v49 = vadd.f32 %v5488_v1, %v5487_v47  ;;  %v13016_v14 = vrot.slane %v13015_v42, 4  ;;  %v11527_v47 = vpop.permute.xlu0 %2482  ;;  %v13021_v1 = vld [vmem:[#allocation30_spill] sm:$0xff] }
 0x341   : > { %v3423_v57 = vadd.f32 %v3422_v15, %v3421_v32  ;;  %v3432_v9 = vadd.f32 %v3431_v61, %v3430_v7  ;;  %v13018_v27 = vrot.slane %v13017_v3, 4  ;;  %v5438_v63 = vrot.slane %v11492_v2, 2  ;;  %v13023_v15 = vld [vmem:[#allocation24_spill] sm:$0xff] }
 0x342   : > { %v3479_v41 = vadd.f32 %v13016_v14, %v13015_v42  ;;  %v11519_v38 = vadd.f32 %v5608_v11, %v5607_v62  ;;  %v11521_v54 = vadd.f32 %v5617_v52, %v5616_v31  ;;  %v5750_v29 = vmul.f32 %v13019_v37, %v11287_v12  ;;  %v11532_v62 = vpop.permute.xlu1 %2265  ;;  %v13024_v42 = vld [vmem:[#allocation29_spill] sm:$0xff] }
 0x343   : > { %v3488_v25 = vadd.f32 %v13018_v27, %v13017_v3  ;;  %3435 = vrot.lane.b32.xlu1 %v3423_v57, %s12694_s1  ;;  %3437 = vrot.lane.b32.xlu0 %v3432_v9, %s12694_s1  ;;  %v5447_v17 = vrot.slane %v11504_v34, 2  ;;  %v5748_v22 = vmul.f32 %v13020_v55, %v11298_v59  ;;  %v5651_v21 = vrot.slane %v5650_v23, 4 }
 0x344   : > { %v3480_v26 = vrot.slane %v3479_v41, 2  ;;  %v5660_v16 = vrot.slane %v5659_v43, 4  ;;  %v5751_v32 = vmul.f32 %v13019_v37, %v13021_v1  ;;  %v5749_v50 = vmul.f32 %v13020_v55, %v11330_v18  ;;  %v13027_v37 = vld [vmem:[#allocation60_spill] sm:$0xff] }
 0x345   : > { %v3489_v51 = vrot.slane %v3488_v25, 2  ;;  %vm13022_vm8 = vcmask 1046656   ;;  %v5793_v61 = vmul.f32 %v13023_v15, %v11287_v12  ;;  %v5752_v5 = vsel %vm2337_vm15, %v5748_v22, 0.0 }
 0x346   : > { %v3481_v33 = vadd.f32 %v3480_v26, %v3479_v41  ;;  %v5753_v52 = vsel %vm13022_vm8, %v5750_v29, 0.0  ;;  %v13025_v14 = vrot.slane %v13024_v42, 4  ;;  %v11549_v27 = vadd.f32 %v5651_v21, %v5650_v23  ;;  %v11557_v26 = vpop.permute.xlu0 %2140  ;;  %v11560_v31 = vpop.permute.xlu1 %2484 }
 0x347   : > { %v3490_v20 = vadd.f32 %v3489_v51, %v3488_v25  ;;  %v11551_v41 = vadd.f32 %v5660_v16, %v5659_v43  ;;  %vm13026_vm9 = vcmask 129024   ;;  %v13028_v29 = vrot.slane %v13027_v37, 4 }
 0x348   : > { %v3482_v57 = vrot.slane %v3481_v33, 1  ;;  %v4182_v3 = vadd.f32 %v13025_v14, %v13024_v42  ;;  %v5762_v25 = vsel %vm13026_vm9, %v5751_v32, 0.0  ;;  %v5761_v22 = vsel %vm2348_vm2, %v5749_v50, 0.0  ;;  %v13030_v32 = vld [vmem:[#allocation46_spill] sm:$0xff] }
 0x349   : > { %v3491_v9 = vrot.slane %v3490_v20, 1  ;;  %v4192_v55 = vadd.f32 %v13028_v29, %v13027_v37  ;;  %v5754_v42 = vadd.f32 %v5753_v52, %v5752_v5  ;;  %v5794_v23 = vmul.f32 %v13023_v15, %v13021_v1 }
 0x34a   : > { %v3483_v51 = vadd.f32 %v3482_v57, %v3481_v33  ;;  %v4183_v11 = vrot.slane %v4182_v3, 2  ;;  %v5558_v21 = vmul.f32 %v11407_v35, %v11295_v45  ;;  %vm13029_vm15 = vcmask 1046784   ;;  %v11585_v37 = vpop.permute.xlu0 %2203 }
 0x34b   : > { %v3492_v44 = vadd.f32 %v3491_v9, %v3490_v20  ;;  %v4193_v43 = vrot.slane %v4192_v55, 2  ;;  %v5796_v16 = vsel %vm13029_vm15, %v5793_v61, 0.0  ;;  %v5791_v14 = vmul.f32 %v13030_v32, %v11298_v59 }
 0x34c   : > { %3495 = vrot.lane.b32.xlu1 %v3483_v51, %s12694_s1  ;;  %v4184_v50 = vadd.f32 %v4183_v11, %v4182_v3  ;;  %v5559_v33 = vmul.f32 %v11407_v35, %v11298_v59  ;;  %v5763_v20 = vadd.f32 %v5762_v25, %v5761_v22  ;;  %v5562_v15 = vsel %vm2051_vm4, %v5558_v21, 0.0  ;;  %v11591_v51 = vpop.permute.xlu1 %2201 }
 0x34d   : > { %3497 = vrot.lane.b32.xlu0 %v3492_v44, %s12694_s1  ;;  %v4194_v52 = vadd.f32 %v4193_v43, %v4192_v55  ;;  %v5560_v45 = vmul.f32 %v11403_v58, %v11284_v0  ;;  %v5792_v61 = vmul.f32 %v13030_v32, %v11330_v18  ;;  %vm13031_vm2 = vcmask 523264  }
 0x34e   : > { %v4185_v5 = vrot.slane %v4184_v50, 1  ;;  %v5571_v57 = vsel %vm13031_vm2, %v5559_v33, 0.0  ;;  %v5561_v44 = vmul.f32 %v11403_v58, %v11287_v12  ;;  %v5755_v11 = vrot.slane %v5754_v42, 4 }
 0x34f   : > { %v4195_v9 = vrot.slane %v4194_v52, 1  ;;  %vm13032_vm12 = vcmask 1047040   ;;  %v13033_v3 = vrot.slane %v11256_v19, 4  ;;  %vm13034_vm13 = vcmask 1047808  }
 0x350   : > { %v5563_v35 = vsel %vm13032_vm12, %v5560_v45, 0.0  ;;  %v5795_v0 = vsel %vm13034_vm13, %v5791_v14, 0.0  ;;  %v4186_v29 = vadd.f32 %v4185_v5, %v4184_v50  ;;  %vm13035_vm1 = vcmask 522240   ;;  %v13038_v50 = vld [vmem:[#allocation62_spill] sm:$0xff] }
 0x351   : > { %v4244_v25 = vadd.f32 %v13033_v3, %v11256_v19  ;;  %v11588_v55 = vadd.f32 %v5563_v35, %v5562_v15  ;;  %v5572_v22 = vsel %vm13035_vm1, %v5561_v44, 0.0  ;;  %v4196_v58 = vadd.f32 %v4195_v9, %v4194_v52 }
 0x352   : > { %v11593_v43 = vadd.f32 %v5572_v22, %v5571_v57  ;;  %v13036_v32 = vrot.slane %v11262_v56, 4  ;;  %vm13037_vm6 = vcmask 260096   ;;  %4199 = vrot.lane.b32.xlu1 %v4186_v29, %s12694_s1  ;;  %v13039_v15 = vrot.slane %v13038_v50, 4  ;;  %v13041_v29 = vld [vmem:[#allocation40_spill] sm:$0xff] }
 0x353   : > { %v4245_v21 = vrot.slane %v4244_v25, 2  ;;  %v5805_v14 = vsel %vm13037_vm6, %v5794_v23, 0.0  ;;  %v5764_v52 = vrot.slane %v5763_v20, 4  ;;  %v5804_v57 = vsel %vm1378_vm14, %v5792_v61, 0.0  ;;  %4201 = vrot.lane.b32.xlu0 %v4196_v58, %s12694_s1  ;;  %v11618_v58 = vpop.permute.xlu0 %2363 }
 0x354   : > { %v4254_v33 = vadd.f32 %v13036_v32, %v11262_v56  ;;  %v4605_v5 = vadd.f32 %v13039_v15, %v13038_v50  ;;  %v11607_v56 = vadd.f32 %v5796_v16, %v5795_v0  ;;  %v13040_v3 = vrot.slane %v10956_v30, 4  ;;  %v13042_v50 = vld [vmem:[#allocation53_spill] sm:$0xff] }
 0x355   : > { %v4246_v44 = vadd.f32 %v4245_v21, %v4244_v25  ;;  %v1554_v22 = vadd.f32 %v13041_v29, %v11444_v10  ;;  %v11614_v32 = vadd.f32 %v5755_v11, %v5754_v42  ;;  %v5920_v15 = vmul.f32 %v13042_v50, %v11287_v12 }
 0x356   : > { %v4255_v9 = vrot.slane %v4254_v33, 2  ;;  %v4606_v35 = vrot.slane %v4605_v5, 2  ;;  %v4614_v23 = vadd.f32 %v13040_v3, %v10956_v30  ;;  %v11620_v25 = vadd.f32 %v5805_v14, %v5804_v57  ;;  %v11625_v30 = vpop.permute.xlu1 %2361  ;;  %v13044_v14 = vld [vmem:[#allocation51_spill] sm:$0xff] }
 0x357   : > { %v4247_v61 = vrot.slane %v4246_v44, 1  ;;  %v11623_v21 = vadd.f32 %v11465_v13, %v1554_v22  ;;  %v5921_v10 = vmul.f32 %v13042_v50, %v13021_v1  ;;  %v5918_v57 = vmul.f32 %v13044_v14, %v11298_v59 }
 0x358   : > { %v4256_v19 = vadd.f32 %v4255_v9, %v4254_v33  ;;  %v4607_v16 = vadd.f32 %v4606_v35, %v4605_v5  ;;  %v4615_v0 = vrot.slane %v4614_v23, 2  ;;  %v11632_v33 = vsel %vm1378_vm14, %v11465_v13, %v11459_v4 }
 0x359   : > { %13043 = vst [vmem:[#allocation35_spill] sm:$0xff] %v11623_v21  ;;  %v4248_v42 = vadd.f32 %v4247_v61, %v4246_v44  ;;  %v5919_v5 = vmul.f32 %v13044_v14, %v11330_v18  ;;  %v11638_v3 = vadd.f32 %v5764_v52, %v5763_v20  ;;  %v13045_v44 = vrot.slane %v11370_v36, 4  ;;  %v13046_v61 = vld [vmem:[#allocation72_spill] sm:$0xff] }
 0x35a   : > { %v4257_v11 = vrot.slane %v4256_v19, 1  ;;  %v4608_v9 = vrot.slane %v4607_v16, 1  ;;  %v4616_v35 = vadd.f32 %v4615_v0, %v4614_v23  ;;  %v13047_v4 = vrot.slane %v13046_v61, 4  ;;  %v2427_v0 = vpop.permute.xlu0 %2426 }
 0x35b   : > { %4261 = vrot.lane.b32.xlu1 %v4248_v42, %s12694_s1  ;;  %v4665_v50 = vadd.f32 %v13045_v44, %v11370_v36  ;;  %v5798_v45 = vrot.slane %v11607_v56, 4  ;;  %vm13048_vm3 = vcmask 1047168   ;;  %v2145_v20 = vadd.f32 %v11500_v6, %v11453_v24 }
 0x35c   : > { %v4258_v22 = vadd.f32 %v4257_v11, %v4256_v19  ;;  %v4674_v13 = vadd.f32 %v13047_v4, %v13046_v61  ;;  %v5923_v7 = vsel %vm13048_vm3, %v5920_v15, 0.0  ;;  %v4617_v14 = vrot.slane %v4616_v35, 1  ;;  %v2425_v61 = vpop.permute.xlu1 %2424 }
 0x35d   : > { %v4609_v52 = vadd.f32 %v4608_v9, %v4607_v16  ;;  %v4666_v19 = vrot.slane %v4665_v50, 2  ;;  %v5448_v36 = vadd.f32 %v5447_v17, %v11504_v34  ;;  %v5757_v42 = vrot.slane %v11614_v32, 2  ;;  %v13050_v34 = vld [vmem:[#allocation33_spill] sm:$0xff] }
 0x35e   : > { %4263 = vrot.lane.b32.xlu0 %v4258_v22, %s12694_s1  ;;  %v4675_v23 = vrot.slane %v4674_v13, 2  ;;  %vm13049_vm11 = vcmask 653312   ;;  %v5922_v15 = vsel %vm2114_vm7, %v5918_v57, 0.0  ;;  %v5931_v44 = vsel %vm2125_vm5, %v5919_v5, 0.0  ;;  %v13051_v57 = vld [vmem:[#allocation25_spill] sm:$0xff] }
 0x35f   : > { %v5932_v11 = vsel %vm13049_vm11, %v5921_v10, 0.0  ;;  %4621 = vrot.lane.b32.xlu1 %v4609_v52, %s12694_s1  ;;  %v4618_v24 = vadd.f32 %v4617_v14, %v4616_v35  ;;  %v4667_v16 = vadd.f32 %v4666_v19, %v4665_v50  ;;  %v5439_v22 = vadd.f32 %v5438_v63, %v11492_v2 }
 0x360   : > { %v4676_v9 = vadd.f32 %v4675_v23, %v4674_v13  ;;  %v5963_v17 = vmul.f32 %v13050_v34, %v11287_v12  ;;  %v5964_v10 = vmul.f32 %v13050_v34, %v13021_v1  ;;  %v5961_v4 = vmul.f32 %v13051_v57, %v11298_v59  ;;  %v11682_v34 = vpop.permute.xlu0 %3315 }
 0x361   : > { %v5962_v5 = vmul.f32 %v13051_v57, %v11330_v18  ;;  %v4668_v35 = vrot.slane %v4667_v16, 1  ;;  %v5449_v13 = vrot.slane %v5448_v36, 1  ;;  %v13052_v2 = vrot.slane %v11510_v49, 2 }
 0x362   : > { %4623 = vrot.lane.b32.xlu0 %v4618_v24, %s12694_s1  ;;  %v4677_v50 = vrot.slane %v4676_v9, 1  ;;  %v5807_v12 = vrot.slane %v11620_v25, 4  ;;  %v5924_v14 = vadd.f32 %v5923_v7, %v5922_v15  ;;  %v13053_v1 = vrot.slane %v11506_v53, 2  ;;  %v11690_v15 = vpop.permute.xlu1 %3317 }
 0x363   : > { %v5491_v63 = vadd.f32 %v13052_v2, %v11510_v49  ;;  %v2142_v59 = vsel %vm1378_vm14, %v11500_v6, %v11557_v26  ;;  %v5933_v18 = vadd.f32 %v5932_v11, %v5931_v44  ;;  %v4669_v19 = vadd.f32 %v4668_v35, %v4667_v16 }
 0x364   : > { %v5482_v52 = vadd.f32 %v13053_v1, %v11506_v53  ;;  %v4678_v23 = vadd.f32 %v4677_v50, %v4676_v9  ;;  %v5440_v24 = vrot.slane %v5439_v22, 1  ;;  %vm13054_vm10 = vcmask 1047296  }
 0x365   : > { %v5966_v57 = vsel %vm13054_vm10, %v5963_v17, 0.0  ;;  %vm13055_vm8 = vcmask 784384   ;;  %vm13056_vm9 = vcmask 1048320   ;;  %v2205_v53 = vsel %vm1378_vm14, %v11591_v51, %v11585_v37  ;;  %4681 = vrot.lane.b32.xlu1 %v4669_v19, %s12694_s1 }
 0x366   : > { %v5975_v49 = vsel %vm13055_vm8, %v5964_v10, 0.0  ;;  %v5965_v7 = vsel %vm13056_vm9, %v5961_v4, 0.0  ;;  %vm13057_vm15 = vcmask 785408   ;;  %4683 = vrot.lane.b32.xlu0 %v4678_v23, %s12694_s1  ;;  %v5450_v26 = vadd.f32 %v5449_v13, %v5448_v36  ;;  %v3012_v13 = vpop.permute.xlu0 %3011  ;;  %v3010_v19 = vpop.permute.xlu1 %3009  ;;  %v11722_v23 = vld [vmem:[%s9348_s12 + $0x18] sm:$0x3f] }
 0x367   : > { %v5974_v6 = vsel %vm13057_vm15, %v5962_v5, 0.0  ;;  %v5492_v11 = vrot.slane %v5491_v63, 1  ;;  %v2146_v44 = vadd.f32 %v2142_v59, %v11502_v28  ;;  %v5483_v16 = vrot.slane %v5482_v52, 1  ;;  %vm13059_vm2 = vmmov %vm13057_vm15 }
 0x368   : > { %v13058_v9 = vrot.slane %v11521_v54, 2  ;;  %v2368_v10 = vadd.f32 %v11625_v30, %v2145_v20  ;;  %v2365_v37 = vsel %vm13059_vm2, %v11625_v30, %v11618_v58  ;;  %v5441_v51 = vadd.f32 %v5440_v24, %v5439_v22  ;;  %vm13061_vm12 = vmmov %vm13059_vm2  ;;  %v13064_v24 = vld [vmem:[#allocation31_spill] sm:$0xff] }
 0x369   : > { %v13060_v4 = vrot.slane %v11519_v38, 2  ;;  %v2207_v36 = vadd.f32 %v2205_v53, %v11508_v60  ;;  %v2369_v35 = vadd.f32 %v2365_v37, %v2146_v44  ;;  %v5766_v28 = vrot.slane %v11638_v3, 2  ;;  %v11739_v37 = vld [vmem:[%s9348_s12 + $0x20] sm:$0x3f] }
 0x36a   : > { %v5620_v17 = vadd.f32 %v13058_v9, %v11521_v54  ;;  %v5799_v50 = vadd.f32 %v5798_v45, %v11607_v56  ;;  %v5808_v54 = vadd.f32 %v5807_v12, %v11620_v25  ;;  %v2428_v20 = vsel %vm13061_vm12, %v2425_v61, %v2427_v0  ;;  %5455 = vrot.lane.b32.xlu0 %v5450_v26, %s12685_s24 }
 0x36b   : > { %v5611_v5 = vadd.f32 %v13060_v4, %v11519_v38  ;;  %v5925_v2 = vrot.slane %v5924_v14, 4  ;;  %v5934_v58 = vrot.slane %v5933_v18, 4  ;;  %v5967_v30 = vadd.f32 %v5966_v57, %v5965_v7  ;;  %5453 = vrot.lane.b32.xlu1 %v5441_v51, %s12685_s24  ;;  %v11746_v51 = vld [vmem:[%s9348_s12] sm:$0xfe] }
 0x36c   : > { %v2430_v38 = vadd.f32 %v2428_v20, %v2207_v36  ;;  %v5976_v60 = vadd.f32 %v5975_v49, %v5974_v6  ;;  %v5493_v22 = vadd.f32 %v5492_v11, %v5491_v63  ;;  %v5484_v1 = vadd.f32 %v5483_v16, %v5482_v52  ;;  %v13066_v4 = vld [vmem:[#allocation65_spill] sm:$0xff] }
 0x36d   : > { %v5621_v59 = vrot.slane %v5620_v17, 1  ;;  %v5612_v45 = vrot.slane %v5611_v5, 1  ;;  %v13062_v56 = vrot.slane %v11551_v41, 2  ;;  %v13063_v0 = vrot.slane %v11549_v27, 2 }
 0x36e   : > { %v11719_v12 = vadd.f32 %v3010_v19, %v2368_v10  ;;  %v11726_v57 = vmul.f32 %v11722_v23, %v13064_v24  ;;  %v942_v63 = vrot.slane %v11479_v48, 4  ;;  %v5758_v52 = vadd.f32 %v5757_v42, %v11614_v32  ;;  %5498 = vrot.lane.b32.xlu0 %v5493_v22, %s12685_s24  ;;  %v3074_v32 = vpop.permute.xlu0 %3073 }
 0x36f   : > { %v5663_v25 = vadd.f32 %v13062_v56, %v11551_v41  ;;  %v5654_v61 = vadd.f32 %v13063_v0, %v11549_v27  ;;  %vm13065_vm13 = vcmask 523264   ;;  %v5800_v49 = vrot.slane %v5799_v50, 2  ;;  %5496 = vrot.lane.b32.xlu1 %v5484_v1, %s12685_s24  ;;  %v11762_v56 = vld [vmem:[%s9348_s12 + $0x20] sm:$0x1f] }
 0x370   : > { %v3013_v41 = vsel %vm13065_vm13, %v3010_v19, %v3012_v13  ;;  %v5809_v7 = vrot.slane %v5808_v54, 2  ;;  %v5926_v27 = vadd.f32 %v5925_v2, %v5924_v14  ;;  %v5767_v6 = vadd.f32 %v5766_v28, %v11638_v3  ;;  %v11751_v3 = vld [vmem:[%s9348_s12 + $0x8] sm:$0xfe]  ;;  %vm13067_vm1 = vmmov %vm13065_vm13  ;;  %v11767_v0 = vld [vmem:[%s9348_s12] sm:$0xfc] }
 0x371   : > { %v11735_v53 = vadd.f32 %v3013_v41, %v2369_v35  ;;  %v5935_v26 = vadd.f32 %v5934_v58, %v5933_v18  ;;  %v5968_v11 = vrot.slane %v5967_v30, 4  ;;  %v5977_v44 = vrot.slane %v5976_v60, 4  ;;  %vm13089_vm13 = vmmov %vm13067_vm1 }
 0x372   : > { %v5622_v42 = vadd.f32 %v5621_v59, %v5620_v17  ;;  %v5613_v16 = vadd.f32 %v5612_v45, %v5611_v5  ;;  %v5664_v9 = vrot.slane %v5663_v25, 1  ;;  %v5655_v10 = vrot.slane %v5654_v61, 1  ;;  %v3072_v5 = vpop.permute.xlu1 %3071 }
 0x373   : > { %v11743_v14 = vmul.f32 %v11739_v37, %v13064_v24  ;;  %v4281_v36 = vmul.f32 %v11746_v51, %v13066_v4  ;;  %v4282_v18 = vmul.f32 %v11751_v3, %v13066_v4  ;;  %v943_v17 = vadd.f32 %v942_v63, %v11479_v48  ;;  %v13069_v24 = vld [vmem:[#allocation52_spill] sm:$0xff] }
 0x374   : > { %v5801_v35 = vadd.f32 %v5800_v49, %v5799_v50  ;;  %v5810_v28 = vadd.f32 %v5809_v7, %v5808_v54  ;;  %v5927_v20 = vrot.slane %v5926_v27, 2  ;;  %5627 = vrot.lane.b32.xlu0 %v5622_v42, %s7956_s18  ;;  %5625 = vrot.lane.b32.xlu1 %v5613_v16, %s7956_s18  ;;  %v3075_v13 = vsel %vm13067_vm1, %v3072_v5, %v3074_v32  ;;  %v13068_v50 = vld [vmem:[#allocation27_spill] sm:$0xff] }
 0x375   : > { %v5936_v2 = vrot.slane %v5935_v26, 2  ;;  %v5969_v58 = vadd.f32 %v5968_v11, %v5967_v30  ;;  %v5978_v22 = vadd.f32 %v5977_v44, %v5976_v60  ;;  %v11759_v1 = vadd.f32 %v3075_v13, %v2430_v38 }
 0x376   : > { %v5665_v59 = vadd.f32 %v5664_v9, %v5663_v25  ;;  %v5656_v19 = vadd.f32 %v5655_v10, %v5654_v61  ;;  %v5768_v48 = vrot.slane %v5767_v6, 1  ;;  %v5759_v45 = vrot.slane %v5758_v52, 1  ;;  %v13070_v61 = vld [vmem:[#allocation32_spill] sm:$0xff] }
 0x377   : > { %v2909_v54 = vmul.f32 %v11762_v56, %v13068_v50  ;;  %v2906_v63 = vmul.f32 %v11767_v0, %v13069_v24  ;;  %v4290_v41 = vrot.slane %v11726_v57, 1  ;;  %v4289_v30 = vrot.slane %v4281_v36, 1  ;;  %v11780_v36 = vld [vmem:[%s9348_s12 + $0x8] sm:$0xfc] }
 0x378   : > { %vm2926_vm6 = vcmask 1042688   ;;  %v4293_v38 = vrot.slane %v11743_v14, 1  ;;  %v4292_v60 = vrot.slane %v4282_v18, 1  ;;  %v944_v25 = vrot.slane %v943_v17, 2  ;;  %5670 = vrot.lane.b32.xlu0 %v5665_v59, %s7956_s18  ;;  %5668 = vrot.lane.b32.xlu1 %v5656_v19, %s7956_s18  ;;  %v13072_v14 = vld [vmem:[#allocation45_spill] sm:$0xff] }
 0x379   : > { %v13071_v49 = vrot.slane %v13070_v61, 4  ;;  %vm2936_vm3 = vcmask 256000   ;;  %v5928_v11 = vadd.f32 %v5927_v20, %v5926_v27  ;;  %v5937_v44 = vadd.f32 %v5936_v2, %v5935_v26  ;;  %v13074_v59 = vld [vmem:[#allocation61_spill] sm:$0xff]  ;;  %v13076_v26 = vld [vmem:[#allocation63_spill] sm:$0xff] }
 0x37a   : > { %v5970_v32 = vrot.slane %v5969_v58, 2  ;;  %v5979_v57 = vrot.slane %v5978_v22, 2  ;;  %v5769_v42 = vadd.f32 %v5768_v48, %v5767_v6  ;;  %v5760_v16 = vadd.f32 %v5759_v45, %v5758_v52  ;;  %v13077_v52 = vld [vmem:[#allocation68_spill] sm:$0xff] }
 0x37b   : > { %v951_v7 = vadd.f32 %v13071_v49, %v13070_v61  ;;  %v5811_v9 = vrot.slane %v5810_v28, 1  ;;  %v5802_v10 = vrot.slane %v5801_v35, 1  ;;  %v2916_v4 = vrot.slane %v13072_v14, 2 }
 0x37c   : > { %v2907_v18 = vmul.f32 %v11780_v36, %v13069_v24  ;;  %v2915_v5 = vrot.slane %v2906_v63, 2  ;;  %vm13073_vm11 = vcmask 1046528   ;;  %v3123_v19 = vrot.slane %v13074_v59, 4  ;;  %5774 = vrot.lane.b32.xlu0 %v5769_v42, %s12685_s24  ;;  %5772 = vrot.lane.b32.xlu1 %v5760_v16, %s12685_s24 }
 0x37d   : > { %v4291_v13 = vsel %vm13073_vm11, %v4289_v30, %v4290_v41  ;;  %vm13075_vm10 = vmmov %vm13073_vm11  ;;  %v4703_v6 = vmul.f32 %v11739_v37, %v13076_v26  ;;  %v4701_v20 = vmul.f32 %v11751_v3, %v13077_v52  ;;  %v945_v2 = vadd.f32 %v944_v25, %v943_v17  ;;  %v13080_v17 = vld [vmem:[#allocation59_spill] sm:$0xff] }
 0x37e   : > { %v4294_v27 = vsel %vm13075_vm10, %v4292_v60, %v4293_v38  ;;  %v952_v48 = vrot.slane %v951_v7, 2  ;;  %v5971_v45 = vadd.f32 %v5970_v32, %v5969_v58  ;;  %v5980_v50 = vadd.f32 %v5979_v57, %v5978_v22  ;;  %vm13082_vm2 = vmmov %vm13075_vm10 }
 0x37f   : > { %v5812_v24 = vadd.f32 %v5811_v9, %v5810_v28  ;;  %v5803_v63 = vadd.f32 %v5802_v10, %v5801_v35  ;;  %v5938_v30 = vrot.slane %v5937_v44, 1  ;;  %v5929_v61 = vrot.slane %v5928_v11, 1 }
 0x380   : > { %v2919_v49 = vrot.slane %v2909_v54, 2  ;;  %vm13078_vm8 = vcmask 1045504   ;;  %v2918_v14 = vrot.slane %v2907_v18, 2  ;;  %v4300_v26 = vsel %vm940_vm0, %v4290_v41, 0.0 }
 0x381   : > { %v2917_v60 = vsel %vm13078_vm8, %v2915_v5, %v2916_v4  ;;  %vm13079_vm9 = vcmask 651264   ;;  %v4710_v21 = vrot.slane %v4703_v6, 1  ;;  %v4709_v42 = vrot.slane %v4701_v20, 1  ;;  %5817 = vrot.lane.b32.xlu0 %v5812_v24, %s12685_s24  ;;  %5815 = vrot.lane.b32.xlu1 %v5803_v63, %s12685_s24  ;;  %vm13081_vm15 = vmmov %vm13078_vm8 }
 0x382   : > { %v4309_v52 = vsel %vm13079_vm9, %v4293_v38, 0.0  ;;  %v3113_v58 = vrot.slane %v13080_v17, 4  ;;  %v4299_v35 = vsel %vm2114_vm7, %v4291_v13, 0.0  ;;  %v4308_v28 = vsel %vm2125_vm5, %v4294_v27, 0.0  ;;  %vm13099_vm11 = vmmov %vm13078_vm8 }
 0x383   : > { %v946_v22 = vrot.slane %v945_v2, 1  ;;  %v953_v54 = vadd.f32 %v952_v48, %v951_v7  ;;  %v5939_v25 = vadd.f32 %v5938_v30, %v5937_v44  ;;  %v5930_v32 = vadd.f32 %v5929_v61, %v5928_v11  ;;  %v13084_v48 = vld [vmem:[#allocation23_spill] sm:$0xff]  ;;  %vm13102_vm10 = vmmov %vm13078_vm8 }
 0x384   : > { %v5981_v57 = vrot.slane %v5980_v50, 1  ;;  %v5972_v41 = vrot.slane %v5971_v45, 1  ;;  %v2927_v38 = vsel %vm2926_vm6, %v2916_v4, 0.0  ;;  %v2920_v16 = vsel %vm13081_vm15, %v2918_v14, %v2919_v49  ;;  %v13085_v61 = vld [vmem:[#allocation47_spill] sm:$0xff] }
 0x385   : > { %v2937_v9 = vsel %vm2936_vm3, %v2919_v49, 0.0  ;;  %v4301_v10 = vadd.f32 %v4300_v26, %v4299_v35  ;;  %v4711_v18 = vsel %vm13082_vm2, %v4709_v42, %v4710_v21  ;;  %v3114_v5 = vadd.f32 %v3113_v58, %v13080_v17  ;;  %5944 = vrot.lane.b32.xlu0 %v5939_v25, %s7956_s18  ;;  %5942 = vrot.lane.b32.xlu1 %v5930_v32, %s7956_s18  ;;  %v13086_v49 = vld [vmem:[#allocation38_spill] sm:$0xff]  ;;  %v11831_v58 = vld [vmem:[%s9348_s12 + $0x18] sm:$0x1f] }
 0x386   : > { %vm13083_vm5 = vcmask 1047808   ;;  %v4310_v11 = vadd.f32 %v4309_v52, %v4308_v28  ;;  %v954_v44 = vrot.slane %v953_v54, 1  ;;  %v3124_v13 = vadd.f32 %v3123_v19, %v13074_v59  ;;  %v13087_v59 = vld [vmem:[#allocation70_spill] sm:$0xff]  ;;  %v13088_v19 = vld [vmem:[#allocation39_spill] sm:$0xff]  ;;  %v13090_v35 = vld [vmem:[#allocation41_spill] sm:$0xff] }
 0x387   : > { %v2925_v7 = vsel %vm13083_vm5, %v2917_v60, 0.0  ;;  %v2935_v4 = vsel %vm1378_vm14, %v2920_v16, 0.0  ;;  %v947_v27 = vadd.f32 %v946_v22, %v945_v2  ;;  %v5982_v6 = vadd.f32 %v5981_v57, %v5980_v50  ;;  %v7834_v22 = vld [vmem:[%s9348_s12 + $0x28] sm:$0x1f]  ;;  %vm13103_vm8 = vmmov %vm13083_vm5 }
 0x388   : > { %v5973_v20 = vadd.f32 %v5972_v41, %v5971_v45  ;;  %v11813_v24 = vmul.f32 %v11762_v56, %v13084_v48  ;;  %v4720_v63 = vsel %vm940_vm0, %v4710_v21, 0.0  ;;  %v4719_v30 = vsel %vm2114_vm7, %v4711_v18, 0.0  ;;  %vm13091_vm7 = vmmov %vm13061_vm12 }
 0x389   : > { %v1525_v60 = vsel %vm13061_vm12, %v13086_v49, %v13085_v61  ;;  %v1106_v2 = vsel %vm13089_vm13, %v13088_v19, %v13087_v59  ;;  %v1109_v45 = vadd.f32 %v13088_v19, %v947_v27  ;;  %v3115_v50 = vrot.slane %v3114_v5, 2  ;;  %5987 = vrot.lane.b32.xlu0 %v5982_v6, %s7956_s18  ;;  %v7835_v49 = vld [vmem:[%s9348_s12 + $0x10] sm:$0xfc]  ;;  %v3234_v19 = vld [vmem:[%s8824_s28 + $0x4a] sm:$0x7]  ;;  %vm13107_vm12 = vmmov %vm13067_vm1 }
 0x38a   : > { %5985 = vrot.lane.b32.xlu1 %v5973_v20, %s7956_s18  ;;  %v4302_v14 = vrot.slane %v4301_v10, 4  ;;  %v11826_v21 = vadd.f32 %v2927_v38, %v2925_v7  ;;  %v4311_v26 = vrot.slane %v4310_v11, 4  ;;  %v955_v52 = vadd.f32 %v954_v44, %v953_v54  ;;  %v2272_v20 = vld [vmem:[%s8759_s23 + $0x2d] sm:$0xff] }
 0x38b   : > { %v3125_v42 = vrot.slane %v3124_v13, 2  ;;  %v11828_v17 = vadd.f32 %v2937_v9, %v2935_v4  ;;  %v11835_v28 = vmul.f32 %v11831_v58, %v13090_v35  ;;  %v11839_v25 = vmul.f32 %v7834_v22, %v13084_v48  ;;  %v2273_v48 = vld [vmem:[%s8759_s23 + $0x35] sm:$0x1] }
 0x38c   : > { %v1528_v32 = vadd.f32 %v1525_v60, %v1109_v45  ;;  %v3346_v57 = vrot.slane %v11813_v24, 2  ;;  %v4721_v54 = vadd.f32 %v4720_v63, %v4719_v30  ;;  %v1110_v41 = vadd.f32 %v1106_v2, %v955_v52  ;;  %v13092_v63 = vld [vmem:[#allocation56_spill] sm:$0xff] }
 0x38d   : > { %v2267_v38 = vsel %vm13091_vm7, %v11494_v39, %v11532_v62  ;;  %v2015_v9 = vsel %vm1378_vm14, %v11430_v40, %v11424_v46  ;;  %v3116_v18 = vadd.f32 %v3115_v50, %v3114_v5  ;;  %v4303_v7 = vadd.f32 %v4302_v14, %v4301_v10  ;;  %v13093_v50 = vld [vmem:[#allocation50_spill] sm:$0xff]  ;;  %vm13109_vm7 = vmmov %vm13102_vm10 }
 0x38e   : > { %v2018_v16 = vadd.f32 %v11430_v40, %v1528_v32  ;;  %v1529_v4 = vadd.f32 %v13085_v61, %v1110_v41  ;;  %v3126_v27 = vadd.f32 %v3125_v42, %v3124_v13  ;;  %v4312_v6 = vadd.f32 %v4311_v26, %v4310_v11  ;;  %v3233_v61 = vld [vmem:[%s8824_s28 + $0x42] sm:$0xff] }
 0x38f   : > { %v3349_v39 = vrot.slane %v11839_v25, 2  ;;  %v3337_v30 = vmul.f32 %v11780_v36, %v13092_v63  ;;  %v11858_v46 = vmul.f32 %v7835_v49, %v13092_v63  ;;  %v11863_v10 = vsel %vm2926_vm6, %v3346_v57, 0.0 }
 0x390   : > { %v2270_v40 = vadd.f32 %v2267_v38, %v2018_v16  ;;  %v2019_v5 = vadd.f32 %v2015_v9, %v1529_v4  ;;  %v2486_v11 = vsel %vm1378_vm14, %v11527_v47, %v11560_v31  ;;  %v4722_v13 = vrot.slane %v4721_v54, 4  ;;  %v13094_v38 = vld [vmem:[#allocation64_spill] sm:$0xff] }
 0x391   : > { %v3117_v60 = vrot.slane %v3116_v18, 1  ;;  %v4304_v59 = vrot.slane %v4303_v7, 2  ;;  %v2276_v2 = vrot.slane %v2272_v20, 5  ;;  %v2277_v45 = vrot.slane %v2273_v48, 5 }
 0x392   : > { %v4731_v14 = vrot.slane %v13093_v50, 4  ;;  %v2271_v26 = vadd.f32 %v11532_v62, %v2019_v5  ;;  %v3127_v52 = vrot.slane %v3126_v27, 1  ;;  %v4313_v42 = vrot.slane %v4312_v6, 2 }
 0x393   : > { %v11875_v22 = vsel %vm2936_vm3, %v3349_v39, 0.0  ;;  %v3345_v32 = vrot.slane %v3337_v30, 2  ;;  %v3348_v31 = vrot.slane %v11858_v46, 2  ;;  %v2489_v41 = vadd.f32 %v11527_v47, %v2270_v40  ;;  %v4078_v47 = vpop.permute.xlu1 %4077  ;;  %v4076_v40 = vpop.permute.xlu0 %4075  ;;  %vm13098_vm3 = vmmov %vm13067_vm1 }
 0x394   : > { %v11881_v16 = vmul.f32 %v11722_v23, %v13094_v38  ;;  %v2490_v9 = vadd.f32 %v2486_v11, %v2271_v26  ;;  %v3237_v4 = vrot.slane %v3233_v61, 6  ;;  %v3238_v20 = vrot.slane %v3234_v19, 6  ;;  %v13096_v11 = vld [vmem:[#allocation69_spill] sm:$0xff] }
 0x395   : > { %v3118_v62 = vadd.f32 %v3117_v60, %v3116_v18  ;;  %v4305_v48 = vadd.f32 %v4304_v59, %v4303_v7  ;;  %v4723_v63 = vadd.f32 %v4722_v13, %v4721_v54  ;;  %vm13095_vm0 = vcmask 1042432   ;;  %v7837_v19 = vld [vmem:[%s9348_s12 + $0x20] sm:$0xf] }
 0x396   : > { %v2278_v49 = vsel %vm13095_vm0, %v2276_v2, %v2277_v45  ;;  %v11886_v30 = vmul.f32 %v11739_v37, %v13094_v38  ;;  %v3128_v46 = vadd.f32 %v3127_v52, %v3126_v27  ;;  %v4314_v5 = vadd.f32 %v4313_v42, %v4312_v6  ;;  %v7836_v27 = vld [vmem:[%s9348_s12 + $0x8] sm:$0xf8] }
 0x397   : > { %v4732_v44 = vadd.f32 %v4731_v14, %v13093_v50  ;;  %v4097_v61 = vmul.f32 %v11746_v51, %v13096_v11  ;;  %v4098_v18 = vmul.f32 %v11751_v3, %v13096_v11  ;;  %v3129_v54 = vadd.f32 %v3118_v62, %v2489_v41 }
 0x398   : > { %v3319_v7 = vsel %vm13067_vm1, %v11682_v34, %v11690_v15  ;;  %v3130_v13 = vadd.f32 %v3128_v46, %v2490_v9  ;;  %vm13097_vm6 = vcmask 1041408   ;;  %v2281_v59 = vmul.f32 %v7836_v27, %v2276_v2 }
 0x399   : > { %v3239_v60 = vsel %vm13097_vm6, %v3237_v4, %v3238_v20  ;;  %v2282_v6 = vmul.f32 %v7837_v19, %v2278_v49  ;;  %v3322_v45 = vadd.f32 %v11682_v34, %v3129_v54  ;;  %v4079_v50 = vsel %vm13098_vm3, %v4076_v40, %v4078_v47  ;;  %vm13111_vm6 = vmmov %vm13103_vm8 }
 0x39a   : > { %v4306_v14 = vrot.slane %v4305_v48, 1  ;;  %v4724_v26 = vrot.slane %v4723_v63, 2  ;;  %v3347_v52 = vsel %vm13099_vm11, %v3345_v32, %v3346_v57  ;;  %v3323_v42 = vadd.f32 %v3319_v7, %v3130_v13  ;;  %v13100_v57 = vld [vmem:[#allocation67_spill] sm:$0xff]  ;;  %v13101_v7 = vld [vmem:[#allocation48_spill] sm:$0xff]  ;;  %vm13114_vm11 = vmmov %vm13111_vm6 }
 0x39b   : > { %v4315_v41 = vrot.slane %v4314_v5, 1  ;;  %v4733_v15 = vrot.slane %v4732_v44, 2  ;;  %v4106_v38 = vrot.slane %v11881_v16, 1  ;;  %v4082_v9 = vadd.f32 %v4076_v40, %v3322_v45  ;;  %v4504_v40 = vpop.permute.xlu1 %4503 }
 0x39c   : > { %v3242_v2 = vmul.f32 %v11780_v36, %v3237_v4  ;;  %v3243_v20 = vmul.f32 %v11762_v56, %v3239_v60  ;;  %v4109_v34 = vrot.slane %v11886_v30, 1  ;;  %v4083_v62 = vadd.f32 %v4079_v50, %v3323_v42  ;;  %v4502_v4 = vpop.permute.xlu0 %4501 }
 0x39d   : > { %v2285_v49 = vrot.slane %v2281_v59, 3  ;;  %v2286_v46 = vrot.slane %v2282_v6, 3  ;;  %v4105_v47 = vrot.slane %v4097_v61, 1  ;;  %v4108_v11 = vrot.slane %v4098_v18, 1 }
 0x39e   : > { %v4307_v24 = vadd.f32 %v4306_v14, %v4305_v48  ;;  %v4725_v54 = vadd.f32 %v4724_v26, %v4723_v63  ;;  %v4525_v32 = vmul.f32 %v11739_v37, %v13100_v57  ;;  %v4523_v16 = vmul.f32 %v11751_v3, %v13101_v7 }
 0x39f   : > { %v4316_v13 = vadd.f32 %v4315_v41, %v4314_v5  ;;  %v4734_v27 = vadd.f32 %v4733_v15, %v4732_v44  ;;  %v3350_v30 = vsel %vm13102_vm10, %v3348_v31, %v3349_v39  ;;  %v3246_v59 = vrot.slane %v3242_v2, 2  ;;  %v5542_v2 = vpop.permute.xlu1 %5541 }
 0x3a0   : > { %v4317_v60 = vadd.f32 %v4307_v24, %v4082_v9  ;;  %v3247_v61 = vrot.slane %v3243_v20, 2  ;;  %v3355_v48 = vsel %vm13103_vm8, %v3347_v52, 0.0  ;;  %vm13104_vm9 = vcmask 1044480   ;;  %v5540_v20 = vpop.permute.xlu0 %5539 }
 0x3a1   : > { %v4318_v63 = vadd.f32 %v4316_v13, %v4083_v62  ;;  %v2287_v18 = vsel %vm13104_vm9, %v2285_v49, %v2286_v46  ;;  %vm13105_vm15 = vcmask 1040384   ;;  %vm4116_vm2 = vcmask 1044736  }
 0x3a2   : > { %v2290_v19 = vsel %vm13105_vm15, %v2286_v46, 0.0  ;;  %vm13106_vm5 = vcmask 1046528   ;;  %v4505_v5 = vsel %vm13107_vm12, %v4502_v4, %v4504_v40  ;;  %v4726_v44 = vrot.slane %v4725_v54, 1 }
 0x3a3   : > { %v4107_v6 = vsel %vm13106_vm5, %v4105_v47, %v4106_v38  ;;  %vm13108_vm13 = vmmov %vm13106_vm5  ;;  %v4532_v45 = vrot.slane %v4525_v32, 1  ;;  %v4531_v39 = vrot.slane %v4523_v16, 1  ;;  %v4735_v31 = vrot.slane %v4734_v27, 1 }
 0x3a4   : > { %v4110_v25 = vsel %vm13108_vm13, %v4108_v11, %v4109_v34  ;;  %v4508_v50 = vadd.f32 %v4502_v4, %v4317_v60  ;;  %v3248_v14 = vsel %vm13109_vm7, %v3246_v59, %v3247_v61  ;;  %v3251_v26 = vsel %vm13095_vm0, %v3247_v61, 0.0  ;;  %vm13112_vm3 = vmmov %vm13106_vm5  ;;  %v5710_v59 = vpop.permute.xlu0 %5709 }
 0x3a5   : > { %v2291_v52 = vadd.f32 %v2290_v19, %v2287_v18  ;;  %v3357_v42 = vadd.f32 %v11863_v10, %v3355_v48  ;;  %v3364_v41 = vsel %vm1378_vm14, %v3350_v30, 0.0  ;;  %v4117_v15 = vsel %vm4116_vm2, %v4106_v38, 0.0  ;;  %vm13117_vm8 = vmmov %vm13112_vm3 }
 0x3a6   : > { %v4509_v9 = vadd.f32 %v4505_v5, %v4318_v63  ;;  %vm13110_vm1 = vcmask 258048   ;;  %v4115_v49 = vsel %vm13111_vm6, %v4107_v6, 0.0  ;;  %v4125_v46 = vsel %vm1378_vm14, %v4110_v25, 0.0  ;;  %v5400_v63 = vld [vmem:[%s9176_s21 + $0x8] sm:$0x7f]  ;;  %vm13124_vm13 = vmmov %vm13109_vm7 }
 0x3a7   : > { %v4127_v62 = vsel %vm13110_vm1, %v4109_v34, 0.0  ;;  %v4727_v47 = vadd.f32 %v4726_v44, %v4725_v54  ;;  %v11931_v11 = vmul.f32 %v11762_v56, %v13090_v35  ;;  %v4533_v10 = vsel %vm13112_vm3, %v4531_v39, %v4532_v45  ;;  %v5712_v35 = vpop.permute.xlu1 %5711  ;;  %v3131_v6 = vld [vmem:[%s8824_s28 + $0x2c] sm:$0xff]  ;;  %v3132_v5 = vld [vmem:[%s8824_s28 + $0x34] sm:$0x7]  ;;  %vm13126_vm0 = vmmov %vm13107_vm12 }
 0x3a8   : > { %v4736_v24 = vadd.f32 %v4735_v31, %v4734_v27  ;;  %v3252_v57 = vadd.f32 %v3251_v26, %v3248_v14  ;;  %v5543_v38 = vsel %vm1378_vm14, %v5540_v20, %v5542_v2  ;;  %v2292_v7 = vrot.slane %v2291_v52, 4 }
 0x3a9   : > { %v4737_v32 = vadd.f32 %v4727_v47, %v4508_v50  ;;  %v13113_v34 = vrot.slane %v11826_v21, 4  ;;  %v3366_v40 = vadd.f32 %v11875_v22, %v3364_v41  ;;  %v4118_v54 = vadd.f32 %v4117_v15, %v4115_v49  ;;  %v11955_v41 = vld [vmem:[%s8954_s29 + $0x41] sm:$0xff]  ;;  %v4320_v15 = vld [vmem:[%s8954_s29 + $0x49] sm:$0x1f]  ;;  %v5857_v47 = vpop.permute.xlu0 %5856 }
 0x3aa   : > { %v11939_v13 = vadd.f32 %v4127_v62, %v4125_v46  ;;  %v4738_v56 = vadd.f32 %v4736_v24, %v4509_v9  ;;  %v2939_v4 = vrot.slane %v11828_v17, 4  ;;  %v3358_v27 = vrot.slane %v3357_v42, 4  ;;  %v7838_v62 = vld [vmem:[%s9348_s12 + $0x18] sm:$0x7f] }
 0x3ab   : > { %v2930_v16 = vadd.f32 %v13113_v34, %v11826_v21  ;;  %v4542_v30 = vsel %vm4116_vm2, %v4532_v45, 0.0  ;;  %v5546_v60 = vadd.f32 %v5540_v20, %v4737_v32  ;;  %v4541_v61 = vsel %vm13114_vm11, %v4533_v10, 0.0  ;;  %v13116_v45 = vld [vmem:[#allocation54_spill] sm:$0xff]  ;;  %v5399_v20 = vld [vmem:[%s9176_s21] sm:$0xff]  ;;  %v5859_v46 = vpop.permute.xlu1 %5858  ;;  %vm13120_vm2 = vmmov %vm13112_vm3 }
 0x3ac   : > { %v5547_v21 = vadd.f32 %v5543_v38, %v4738_v56  ;;  %vm13115_vm10 = vcmask 785408   ;;  %v3253_v48 = vrot.slane %v3252_v57, 4  ;;  %v2293_v44 = vadd.f32 %v2292_v7, %v2291_v52 }
 0x3ad   : > { %v5713_v22 = vsel %vm13115_vm10, %v5710_v59, %v5712_v35  ;;  %v2931_v25 = vrot.slane %v2930_v16, 2  ;;  %v11951_v39 = vmul.f32 %v11767_v0, %v13116_v45  ;;  %v3367_v31 = vrot.slane %v3366_v40, 4  ;;  %vm13133_vm10 = vmmov %vm13120_vm2 }
 0x3ae   : > { %v5716_v19 = vadd.f32 %v5713_v22, %v5546_v60  ;;  %v4119_v50 = vrot.slane %v4118_v54, 4  ;;  %v4129_v14 = vrot.slane %v11939_v13, 4  ;;  %v4543_v26 = vadd.f32 %v4542_v30, %v4541_v61  ;;  %v13118_v61 = vld [vmem:[#allocation28_spill] sm:$0xff] }
 0x3af   : > { %v2940_v9 = vadd.f32 %v2939_v4, %v11828_v17  ;;  %v3359_v2 = vadd.f32 %v3358_v27, %v3357_v42  ;;  %v5402_v52 = vmul.f32 %v7838_v62, %v5400_v63  ;;  %v5717_v49 = vadd.f32 %v5712_v35, %v5547_v21  ;;  %v7839_v4 = vld [vmem:[%s9348_s12] sm:$0xff]  ;;  %v5870_v22 = vpop.permute.xlu1 %5869 }
 0x3b0   : > { %v3135_v0 = vrot.slane %v3131_v6, 6  ;;  %v3136_v10 = vrot.slane %v3132_v5, 6  ;;  %v3254_v24 = vadd.f32 %v3253_v48, %v3252_v57  ;;  %v5860_v32 = vsel %vm1378_vm14, %v5857_v47, %v5859_v46  ;;  %v5719_v57 = vld [vmem:[%s9176_s21 + $0x80] sm:$0x7f] }
 0x3b1   : > { %v5863_v38 = vadd.f32 %v5857_v47, %v5716_v19  ;;  %v2294_v7 = vrot.slane %v2293_v44, 2  ;;  %v2932_v34 = vadd.f32 %v2931_v25, %v2930_v16  ;;  %v5864_v56 = vadd.f32 %v5860_v32, %v5717_v49  ;;  %v5872_v16 = vpop.permute.xlu0 %5871  ;;  %v7840_v49 = vld [vmem:[%s9348_s12 + $0x20] sm:$0x7f]  ;;  %v7841_v47 = vld [vmem:[%s9348_s12 + $0x8] sm:$0xff] }
 0x3b2   : > { %v4323_v17 = vrot.slane %v11955_v41, 7  ;;  %v4324_v42 = vrot.slane %v4320_v15, 7  ;;  %v5401_v27 = vmul.f32 %v7839_v4, %v5399_v20  ;;  %v4544_v30 = vrot.slane %v4543_v26, 4 }
 0x3b3   : > { %6005 = vrot.lane.b32.xlu1 %v5863_v38, %s7957_s11  ;;  %v2941_v35 = vrot.slane %v2940_v9, 2  ;;  %v3360_v60 = vrot.slane %v3359_v2, 2  ;;  %v5403_v59 = vsel %vm13117_vm8, %v5402_v52, 0.0  ;;  %v4553_v21 = vrot.slane %v13118_v61, 4  ;;  %6007 = vrot.lane.b32.xlu0 %v5864_v56, %s7957_s11  ;;  %v5718_v52 = vld [vmem:[%s9176_s21 + $0x78] sm:$0xff]  ;;  %vm13134_vm8 = vmmov %vm13120_vm2 }
 0x3b4   : > { %v3255_v48 = vrot.slane %v3254_v24, 2  ;;  %v3368_v63 = vadd.f32 %v3367_v31, %v3366_v40  ;;  %v4120_v19 = vadd.f32 %v4119_v50, %v4118_v54  ;;  %v5565_v6 = vrot.slane %v11588_v55, 4 }
 0x3b5   : > { %v5574_v5 = vrot.slane %v11593_v43, 4  ;;  %v2295_v25 = vadd.f32 %v2294_v7, %v2293_v44  ;;  %v2933_v41 = vrot.slane %v2932_v34, 1  ;;  %vm13119_vm9 = vcmask 1041408  }
 0x3b6   : > { %v3137_v15 = vsel %vm13119_vm9, %v3135_v0, %v3136_v10  ;;  %v4325_v20 = vsel %vm13105_vm15, %v4323_v17, %v4324_v42  ;;  %v5404_v62 = vadd.f32 %v5403_v59, %v5401_v27  ;;  %v5721_v46 = vmul.f32 %v7840_v49, %v5719_v57  ;;  %v7842_v27 = vld [vmem:[%s9348_s12 + $0x10] sm:$0xff]  ;;  %v7843_v57 = vld [vmem:[%s9348_s12 + $0x28] sm:$0x7f] }
 0x3b7   : > { %v5875_v32 = vmul.f32 %v7841_v47, %v5870_v22  ;;  %v5877_v40 = vmul.f32 %v7840_v49, %v5872_v16  ;;  %3138 = vrot.lane.b32.xlu1 %v3135_v0, %s12685_s24  ;;  %v2942_v54 = vadd.f32 %v2941_v35, %v2940_v9  ;;  %v3361_v31 = vadd.f32 %v3360_v60, %v3359_v2 }
 0x3b8   : > { %3140 = vrot.lane.b32.xlu0 %v3137_v15, %s12685_s24  ;;  %v3256_v44 = vadd.f32 %v3255_v48, %v3254_v24  ;;  %v3369_v50 = vrot.slane %v3368_v63, 2  ;;  %v4121_v10 = vrot.slane %v4120_v19, 2  ;;  %v4130_v38 = vadd.f32 %v4129_v14, %v11939_v13 }
 0x3b9   : > { %v2296_v7 = vrot.slane %v2295_v25, 1  ;;  %v2934_v56 = vadd.f32 %v2933_v41, %v2932_v34  ;;  %v4545_v42 = vadd.f32 %v4544_v30, %v4543_v26  ;;  %v5720_v4 = vmul.f32 %v7841_v47, %v5718_v52 }
 0x3ba   : > { %v5876_v59 = vmul.f32 %v7842_v27, %v5870_v22  ;;  %v5878_v18 = vmul.f32 %v7843_v57, %v5872_v16  ;;  %v5405_v49 = vrot.slane %v5404_v62, 4  ;;  %v5722_v0 = vsel %vm13120_vm2, %v5721_v46, 0.0 }
 0x3bb   : > { %v5879_v9 = vsel %vm2051_vm4, %v5875_v32, 0.0  ;;  %vm13121_vm5 = vcmask 1047040   ;;  %4326 = vrot.lane.b32.xlu1 %v4323_v17, %s12685_s24  ;;  %v2943_v24 = vrot.slane %v2942_v54, 1  ;;  %v3362_v35 = vrot.slane %v3361_v31, 1 }
 0x3bc   : > { %v5880_v2 = vsel %vm13121_vm5, %v5877_v40, 0.0  ;;  %4328 = vrot.lane.b32.xlu0 %v4325_v20, %s12685_s24  ;;  %v3257_v13 = vrot.slane %v3256_v44, 1  ;;  %v3370_v14 = vadd.f32 %v3369_v50, %v3368_v63  ;;  %v4122_v26 = vadd.f32 %v4121_v10, %v4120_v19 }
 0x3bd   : > { %v4131_v34 = vrot.slane %v4130_v38, 2  ;;  %v2297_v30 = vadd.f32 %v2296_v7, %v2295_v25  ;;  %v4546_v60 = vrot.slane %v4545_v42, 2  ;;  %v4554_v22 = vadd.f32 %v4553_v21, %v13118_v61  ;;  %v11995_v25 = vpop.permute.xlu1 %3435  ;;  %v11997_v61 = vpop.permute.xlu0 %3437 }
 0x3be   : > { %v5723_v16 = vadd.f32 %v5722_v0, %v5720_v4  ;;  %v5888_v48 = vsel %vm13107_vm12, %v5876_v59, 0.0  ;;  %v5881_v41 = vadd.f32 %v5880_v2, %v5879_v9  ;;  %vm13122_vm4 = vcmask 522240   ;;  %v13125_v2 = vld [vmem:[#allocation66_spill] sm:$0xff]  ;;  %vm13139_vm12 = vmmov %vm13126_vm0 }
 0x3bf   : > { %v5889_v15 = vsel %vm13122_vm4, %v5878_v18, 0.0  ;;  %v5406_v52 = vadd.f32 %v5405_v49, %v5404_v62  ;;  %v3196_v17 = vmul.f32 %v11780_v36, %v13116_v45  ;;  %v3203_v20 = vrot.slane %v11951_v39, 2  ;;  %2299 = vrot.lane.b32.xlu1 %v2297_v30, %s12685_s24  ;;  %vm13140_vm4 = vmmov %vm13126_vm0 }
 0x3c0   : > { %v5566_v63 = vadd.f32 %v5565_v6, %v11588_v55  ;;  %v5575_v19 = vadd.f32 %v5574_v5, %v11593_v43  ;;  %v3258_v21 = vadd.f32 %v3257_v13, %v3256_v44  ;;  %2947 = vrot.lane.b32.xlu0 %v2934_v56, %s12694_s1  ;;  %v2944_v18 = vadd.f32 %v2943_v24, %v2942_v54  ;;  %v13127_v13 = vld [vmem:[#allocation57_spill] sm:$0xff] }
 0x3c1   : > { %v3363_v62 = vadd.f32 %v3362_v35, %v3361_v31  ;;  %v3371_v46 = vrot.slane %v3370_v14, 1  ;;  %v5890_v47 = vadd.f32 %v5889_v15, %v5888_v48  ;;  %v4132_v36 = vadd.f32 %v4131_v34, %v4130_v38  ;;  %v3498_v59 = vpop.permute.xlu0 %3497 }
 0x3c2   : > { %v4555_v45 = vrot.slane %v4554_v22, 2  ;;  %v5724_v39 = vrot.slane %v5723_v16, 4  ;;  %v5882_v32 = vrot.slane %v5881_v41, 4  ;;  %v4123_v55 = vrot.slane %v4122_v26, 1 }
 0x3c3   : > { %v4547_v6 = vadd.f32 %v4546_v60, %v4545_v42  ;;  %v5407_v43 = vrot.slane %v5406_v52, 2  ;;  %v3207_v5 = vrot.slane %v11931_v11, 2  ;;  %v13123_v40 = vrot.slane %v11835_v28, 2  ;;  %2949 = vrot.lane.b32.xlu1 %v2944_v18, %s12694_s1  ;;  %v3496_v11 = vpop.permute.xlu1 %3495 }
 0x3c4   : > { %v3206_v44 = vrot.slane %v3196_v17, 2  ;;  %v5567_v54 = vrot.slane %v5566_v63, 2  ;;  %v5576_v31 = vrot.slane %v5575_v19, 2  ;;  %v3259_v10 = vadd.f32 %v3258_v21, %v11759_v1  ;;  %3375 = vrot.lane.b32.xlu0 %v3363_v62, %s12694_s1 }
 0x3c5   : > { %v3205_v50 = vsel %vm13124_vm13, %v3203_v20, %v13123_v40  ;;  %v3372_v38 = vadd.f32 %v3371_v46, %v3370_v14  ;;  %v5891_v7 = vrot.slane %v5890_v47, 4  ;;  %v4133_v56 = vrot.slane %v4132_v36, 1  ;;  %vm13141_vm13 = vmmov %vm13126_vm0 }
 0x3c6   : > { %v4556_v42 = vadd.f32 %v4555_v45, %v4554_v22  ;;  %v5725_v4 = vadd.f32 %v5724_v39, %v5723_v16  ;;  %v5883_v27 = vadd.f32 %v5882_v32, %v5881_v41  ;;  %v4124_v57 = vadd.f32 %v4123_v55, %v4122_v26 }
 0x3c7   : > { %v4548_v49 = vrot.slane %v4547_v6, 1  ;;  %v5408_v0 = vadd.f32 %v5407_v43, %v5406_v52  ;;  %v3208_v9 = vsel %vm13109_vm7, %v3206_v44, %v3207_v5  ;;  %v4385_v24 = vmul.f32 %v11722_v23, %v13125_v2  ;;  %3377 = vrot.lane.b32.xlu1 %v3372_v38, %s12694_s1  ;;  %vm13142_vm7 = vmmov %vm13126_vm0 }
 0x3c8   : > { %v4386_v1 = vmul.f32 %v11739_v37, %v13125_v2  ;;  %v3499_v35 = vsel %vm13126_vm0, %v3496_v11, %v3498_v59  ;;  %v4383_v14 = vmul.f32 %v11746_v51, %v13127_v13  ;;  %v4384_v26 = vmul.f32 %v11751_v3, %v13127_v13  ;;  %4137 = vrot.lane.b32.xlu0 %v4124_v57, %s12694_s1 }
 0x3c9   : > { %v5568_v34 = vadd.f32 %v5567_v54, %v5566_v63  ;;  %v3501_v30 = vadd.f32 %v3499_v35, %v3259_v10  ;;  %v5892_v60 = vadd.f32 %v5891_v7, %v5890_v47  ;;  %v4134_v22 = vadd.f32 %v4133_v56, %v4132_v36  ;;  %v12027_v36 = vpop.permute.xlu1 %4199 }
 0x3ca   : > { %v4557_v23 = vrot.slane %v4556_v42, 1  ;;  %v5726_v16 = vrot.slane %v5725_v4, 2  ;;  %v5577_v48 = vadd.f32 %v5576_v31, %v5575_v19  ;;  %v5884_v41 = vrot.slane %v5883_v27, 2 }
 0x3cb   : > { %v4549_v15 = vadd.f32 %v4548_v49, %v4547_v6  ;;  %v5409_v52 = vrot.slane %v5408_v0, 1  ;;  %v13128_v17 = vmov %v13123_v40  ;;  %vm13129_vm1 = vcmask 1043328   ;;  %4139 = vrot.lane.b32.xlu1 %v4134_v22, %s12694_s1  ;;  %v12029_v40 = vpop.permute.xlu0 %4201 }
 0x3cc   : > { %v3214_v20 = vsel %vm13129_vm1, %v13128_v17, 0.0  ;;  %vm13130_vm6 = vcmask 911360   ;;  %vm13131_vm3 = vcmask 1048448   ;;  %vm13132_vm11 = vcmask 916480  }
 0x3cd   : > { %v3223_v51 = vsel %vm13130_vm6, %v3207_v5, 0.0  ;;  %v3213_v21 = vsel %vm13131_vm3, %v3205_v50, 0.0  ;;  %v3222_v63 = vsel %vm13132_vm11, %v3208_v9, 0.0  ;;  %v4392_v18 = vrot.slane %v4385_v24, 1  ;;  %4561 = vrot.lane.b32.xlu0 %v4549_v15, %s12694_s1  ;;  %vm13136_vm15 = vmmov %vm13131_vm3  ;;  %v4262_v11 = vpop.permute.xlu1 %4261 }
 0x3ce   : > { %v4395_v62 = vrot.slane %v4386_v1, 1  ;;  %v4391_v46 = vrot.slane %v4383_v14, 1  ;;  %v4394_v47 = vrot.slane %v4384_v26, 1  ;;  %v5893_v19 = vrot.slane %v5892_v60, 2  ;;  %vm13138_vm5 = vmmov %vm13132_vm11 }
 0x3cf   : > { %v4558_v28 = vadd.f32 %v4557_v23, %v4556_v42  ;;  %v5569_v45 = vrot.slane %v5568_v34, 1  ;;  %v5727_v39 = vadd.f32 %v5726_v16, %v5725_v4  ;;  %v3215_v32 = vadd.f32 %v3214_v20, %v3213_v21  ;;  %vm13146_vm3 = vmmov %vm13134_vm8 }
 0x3d0   : > { %v5885_v55 = vadd.f32 %v5884_v41, %v5883_v27  ;;  %v5410_v6 = vadd.f32 %v5409_v52, %v5408_v0  ;;  %v5578_v43 = vrot.slane %v5577_v48, 1  ;;  %v3224_v5 = vadd.f32 %v3223_v51, %v3222_v63  ;;  %v4264_v49 = vpop.permute.xlu0 %4263 }
 0x3d1   : > { %4563 = vrot.lane.b32.xlu1 %v4558_v28, %s12694_s1  ;;  %v4393_v50 = vsel %vm13133_vm10, %v4391_v46, %v4392_v18  ;;  %v4396_v44 = vsel %vm13134_vm8, %v4394_v47, %v4395_v62  ;;  %v5894_v54 = vadd.f32 %v5893_v19, %v5892_v60  ;;  %v5570_v31 = vadd.f32 %v5569_v45, %v5568_v34  ;;  %v4622_v34 = vpop.permute.xlu1 %4621  ;;  %vm13148_vm10 = vmmov %vm13140_vm4 }
 0x3d2   : > { %5412 = vrot.lane.b32.xlu0 %v5410_v6, %s12685_s24  ;;  %v5728_v10 = vrot.slane %v5727_v39, 1  ;;  %v3216_v38 = vrot.slane %v3215_v32, 4  ;;  %v5579_v7 = vadd.f32 %v5578_v43, %v5577_v48  ;;  %v5886_v56 = vrot.slane %v5885_v55, 1 }
 0x3d3   : > { %v3225_v42 = vrot.slane %v3224_v5, 4  ;;  %vm13135_vm9 = vcmask 1045376   ;;  %v4401_v27 = vsel %vm13136_vm15, %v4393_v50, 0.0  ;;  %vm13137_vm2 = vcmask 913408  }
 0x3d4   : > { %v4402_v4 = vsel %vm13135_vm9, %v4392_v18, 0.0  ;;  %v4411_v59 = vsel %vm13137_vm2, %v4395_v62, 0.0  ;;  %v4410_v57 = vsel %vm13138_vm5, %v4396_v44, 0.0  ;;  %v5729_v0 = vadd.f32 %v5728_v10, %v5727_v39  ;;  %v4624_v60 = vpop.permute.xlu0 %4623 }
 0x3d5   : > { %5582 = vrot.lane.b32.xlu1 %v5570_v31, %s7956_s18  ;;  %v5895_v9 = vrot.slane %v5894_v54, 1  ;;  %v4403_v2 = vadd.f32 %v4402_v4, %v4401_v27  ;;  %v3217_v24 = vadd.f32 %v3216_v38, %v3215_v32  ;;  %v4265_v1 = vsel %vm13139_vm12, %v4262_v11, %v4264_v49  ;;  %v4422_v4 = vld [vmem:[%s8954_s29 + $0x63] sm:$0x1f] }
 0x3d6   : > { %5584 = vrot.lane.b32.xlu0 %v5579_v7, %s7956_s18  ;;  %v5887_v35 = vadd.f32 %v5886_v56, %v5885_v55  ;;  %v4412_v13 = vadd.f32 %v4411_v59, %v4410_v57  ;;  %v3226_v14 = vadd.f32 %v3225_v42, %v3224_v5  ;;  %v12042_v26 = vadd.f32 %v4265_v1, %v3501_v30  ;;  %v4421_v42 = vld [vmem:[%s8954_s29 + $0x5b] sm:$0xff] }
 0x3d7   : > { %v5896_v22 = vadd.f32 %v5895_v9, %v5894_v54  ;;  %v3218_v23 = vrot.slane %v3217_v24, 2  ;;  %v4404_v16 = vrot.slane %v4403_v2, 4  ;;  %v12047_v15 = vpop.permute.xlu1 %4681  ;;  %v3439_v43 = vsel %vm13140_vm4, %v11995_v25, %v11997_v61 }
 0x3d8   : > { %v4413_v48 = vrot.slane %v4412_v13, 4  ;;  %v3227_v41 = vrot.slane %v3226_v14, 2  ;;  %v12049_v52 = vpop.permute.xlu0 %4683  ;;  %v4203_v31 = vsel %vm13141_vm13, %v12027_v36, %v12029_v40  ;;  %v4625_v57 = vsel %vm13142_vm7, %v4622_v34, %v4624_v60 }
 0x3d9   : > { %5731 = vrot.lane.b32.xlu1 %v5729_v0, %s12685_s24  ;;  %v3219_v17 = vadd.f32 %v3218_v23, %v3217_v24  ;;  %v4405_v30 = vadd.f32 %v4404_v16, %v4403_v2  ;;  %v4426_v49 = vrot.slane %v4422_v4, 7  ;;  %vm13143_vm0 = vcmask 785408  }
 0x3da   : > { %5899 = vrot.lane.b32.xlu0 %v5887_v35, %s7956_s18  ;;  %v3228_v20 = vadd.f32 %v3227_v41, %v3226_v14  ;;  %v4414_v51 = vadd.f32 %v4413_v48, %v4412_v13  ;;  %vm13144_vm1 = vcmask 1040384   ;;  %vm13145_vm6 = vmmov %vm13143_vm0  ;;  %vm13147_vm11 = vcmask 1044480  }
 0x3db   : > { %v3220_v18 = vrot.slane %v3219_v17, 1  ;;  %v4406_v62 = vrot.slane %v4405_v30, 2  ;;  %vm13149_vm8 = vmmov %vm13143_vm0  ;;  %vm13151_vm15 = vcmask 392192   ;;  %vm13154_vm2 = vcmask 1042432  }
 0x3dc   : > { %v5456_v63 = vpop.permute.xlu0 %5455  ;;  %v3229_v46 = vrot.slane %v3228_v20, 1  ;;  %v4415_v47 = vrot.slane %v4414_v51, 2  ;;  %vm13150_vm9 = vmmov %vm13143_vm0  ;;  %vm988_vm5 = vcmask 782336   ;;  %vm13155_vm12 = vcmask 1041408  }
 0x3dd   : > { %5901 = vrot.lane.b32.xlu1 %v5896_v22, %s7956_s18  ;;  %v5454_v21 = vpop.permute.xlu1 %5453  ;;  %v3221_v45 = vadd.f32 %v3220_v18, %v3219_v17  ;;  %v4407_v39 = vadd.f32 %v4406_v62, %v4405_v30  ;;  %vm686_vm4 = vcmask 780288   ;;  %vm13156_vm13 = vcmask 1045504  }
 0x3de   : > { %v3230_v32 = vadd.f32 %v3229_v46, %v3228_v20  ;;  %v4416_v55 = vadd.f32 %v4415_v47, %v4414_v51  ;;  %v5457_v24 = vsel %vm13143_vm0, %v5454_v21, %v5456_v63  ;;  %vm13157_vm7 = vmmov %vm13156_vm13  ;;  %vm13158_vm0 = vcmask 1048320  }
 0x3df   : > { %v3231_v6 = vadd.f32 %v3221_v45, %v11719_v12  ;;  %v4408_v10 = vrot.slane %v4407_v39, 1 }
 0x3e0   : > { %v12053_v28 = vpop.permute.xlu0 %5498  ;;  %v3232_v5 = vadd.f32 %v3230_v32, %v11735_v53  ;;  %v4417_v7 = vrot.slane %v4416_v55, 1 }
 0x3e1   : > { %v12051_v19 = vpop.permute.xlu1 %5496  ;;  %v3442_v54 = vadd.f32 %v11995_v25, %v3231_v6  ;;  %v4409_v11 = vadd.f32 %v4408_v10, %v4407_v39  ;;  %v4425_v25 = vrot.slane %v4421_v42, 7 }
 0x3e2   : > { %v3443_v38 = vadd.f32 %v3439_v43, %v3232_v5  ;;  %v4418_v53 = vadd.f32 %v4417_v7, %v4416_v55  ;;  %v4685_v5 = vsel %vm13148_vm10, %v12047_v15, %v12049_v52  ;;  %vm13161_vm10 = vmmov %vm13158_vm0 }
 0x3e3   : > { %v4206_v56 = vadd.f32 %v12027_v36, %v3442_v54  ;;  %v4427_v36 = vsel %vm13144_vm1, %v4425_v25, %v4426_v49  ;;  %v4430_v48 = vmul.f32 %v11751_v3, %v4425_v25  ;;  %v13153_v25 = vld [vmem:[#allocation34_spill] sm:$0xff]  ;;  %vm13159_vm1 = vcmask 1043200  }
 0x3e4   : > { %v4207_v12 = vadd.f32 %v4203_v31, %v3443_v38  ;;  %v4431_v41 = vmul.f32 %v11739_v37, %v4427_v36 }
 0x3e5   : > { %v4419_v59 = vadd.f32 %v4409_v11, %v4206_v56  ;;  %v4434_v18 = vrot.slane %v4430_v48, 1 }
 0x3e6   : > { %v5626_v50 = vpop.permute.xlu1 %5625  ;;  %v5628_v44 = vpop.permute.xlu0 %5627  ;;  %v4420_v0 = vadd.f32 %v4418_v53, %v4207_v12  ;;  %v4435_v62 = vrot.slane %v4431_v41, 1  ;;  %v7845_v53 = vld [vmem:[%s9348_s12 + $0x20] sm:$0x3] }
 0x3e7   : > { %v4628_v2 = vadd.f32 %v4622_v34, %v4419_v59  ;;  %v5629_v13 = vsel %vm1378_vm14, %v5626_v50, %v5628_v44  ;;  %v5500_v44 = vsel %vm13149_vm8, %v12051_v19, %v12053_v28  ;;  %vm13162_vm8 = vcmask 1045248  }
 0x3e8   : > { %v4629_v1 = vadd.f32 %v4625_v57, %v4420_v0  ;;  %v4436_v47 = vsel %vm13146_vm3, %v4434_v18, %v4435_v62  ;;  %v4439_v3 = vsel %vm13147_vm11, %v4435_v62, 0.0  ;;  %v7846_v57 = vld [vmem:[%s9348_s12 + $0x8] sm:$0xc0]  ;;  %v7847_v0 = vld [vmem:[%s9348_s12 + $0x20] sm:$0x1]  ;;  %vm13160_vm11 = vmmov %vm13146_vm3 }
 0x3e9   : > { %v5460_v35 = vadd.f32 %v5454_v21, %v4628_v2  ;;  %v4440_v37 = vadd.f32 %v4439_v3, %v4436_v47  ;;  %v662_v49 = vmul.f32 %v7846_v57, %v13153_v25 }
 0x3ea   : > { %v5669_v27 = vpop.permute.xlu1 %5668  ;;  %v5671_v61 = vpop.permute.xlu0 %5670  ;;  %v5461_v14 = vadd.f32 %v5457_v24, %v4629_v1 }
 0x3eb   : > { %v5632_v16 = vadd.f32 %v5626_v50, %v5460_v35  ;;  %v4441_v45 = vrot.slane %v4440_v37, 4  ;;  %v5672_v31 = vsel %vm1378_vm14, %v5669_v27, %v5671_v61  ;;  %v7844_v27 = vld [vmem:[%s9348_s12 + $0x8] sm:$0xe0]  ;;  %v13152_v61 = vld [vmem:[#allocation36_spill] sm:$0xff]  ;;  %v673_v24 = vrot.slane %v662_v49, 6 }
 0x3ec   : > { %v5633_v17 = vadd.f32 %v5629_v13, %v5461_v14  ;;  %v965_v11 = vmul.f32 %v7844_v27, %v13152_v61  ;;  %v967_v59 = vmul.f32 %v7845_v53, %v13152_v61 }
 0x3ed   : > { %v4442_v39 = vadd.f32 %v4441_v45, %v4440_v37 }
 0x3ee   : > { %v5773_v9 = vpop.permute.xlu1 %5772  ;;  %v5775_v40 = vpop.permute.xlu0 %5774  ;;  %v976_v2 = vrot.slane %v967_v59, 5 }
 0x3ef   : > { %v5776_v60 = vsel %vm13145_vm6, %v5773_v9, %v5775_v40  ;;  %v5779_v34 = vadd.f32 %v5773_v9, %v5632_v16  ;;  %v4443_v32 = vrot.slane %v4442_v39, 2  ;;  %v664_v9 = vmul.f32 %v7847_v0, %v13153_v25 }
 0x3f0   : > { %v5780_v30 = vadd.f32 %v5776_v60, %v5633_v17  ;;  %v975_v40 = vrot.slane %v965_v11, 5  ;;  %v7849_v60 = vld [vmem:[%s9348_s12 + $0x8] sm:$0xfc]  ;;  %v7850_v17 = vld [vmem:[%s9348_s12 + $0x20] sm:$0x1f] }
 0x3f1   : > { %v4444_v55 = vadd.f32 %v4443_v32, %v4442_v39  ;;  %v674_v1 = vrot.slane %v664_v9, 6 }
 0x3f2   : > { %v977_v36 = vsel %vm13154_vm2, %v975_v40, %v976_v2 }
 0x3f3   : > { %v5816_v22 = vpop.permute.xlu1 %5815  ;;  %v5818_v23 = vpop.permute.xlu0 %5817  ;;  %v4445_v6 = vrot.slane %v4444_v55, 1  ;;  %v675_v14 = vsel %vm13155_vm12, %v673_v24, %v674_v1 }
 0x3f4   : > { %v5819_v56 = vsel %vm13150_vm9, %v5816_v22, %v5818_v23  ;;  %v989_v22 = vsel %vm988_vm5, %v977_v36, 0.0  ;;  %v7848_v23 = vld [vmem:[%s9348_s12] sm:$0xfc]  ;;  %vm13163_vm9 = vmmov %vm13145_vm6 }
 0x3f5   : > { %v4446_v43 = vadd.f32 %v4445_v6, %v4444_v55 }
 0x3f7   : > { %v5943_v20 = vpop.permute.xlu1 %5942  ;;  %v5945_v51 = vpop.permute.xlu0 %5944  ;;  %v4447_v50 = vadd.f32 %v4446_v43, %v12042_v26 }
 0x3f8   : > { %v5949_v63 = vadd.f32 %v5943_v20, %v5779_v34  ;;  %v5946_v21 = vsel %vm1378_vm14, %v5943_v20, %v5945_v51  ;;  %v990_v20 = vrot.slane %v989_v22, 4 }
 0x3f9   : > { %v5950_v46 = vadd.f32 %v5946_v21, %v5780_v30  ;;  %v4687_v54 = vadd.f32 %v4685_v5, %v4447_v50  ;;  %v687_v30 = vsel %vm686_vm4, %v675_v14, 0.0  ;;  %v7851_v50 = vld [vmem:[%s9348_s12] sm:$0xfe]  ;;  %v13164_v14 = vld [vmem:[#allocation71_spill] sm:$0xff] }
 0x3fa   : > { %5994 = vrot.lane.b32.xlu0 %v5949_v63, %s12682_s0  ;;  %v688_v62 = vrot.slane %v687_v30, 4 }
 0x3fb   : > { %5996 = vrot.lane.b32.xlu1 %v5950_v46, %s12682_s0  ;;  %v5502_v10 = vadd.f32 %v5500_v44, %v4687_v54  ;;  %v5988_v7 = vpop.permute.xlu0 %5987  ;;  %v991_v46 = vadd.f32 %v990_v20, %v989_v22  ;;  %v7852_v54 = vld [vmem:[%s9348_s12 + $0x8] sm:$0xfe]  ;;  %v1379_v22 = vsel %vm1378_vm14, %v10934_v8, %v13164_v14 }
 0x3fc   : > { %v5986_v38 = vpop.permute.xlu1 %5985  ;;  %v689_v37 = vadd.f32 %v688_v62, %v687_v30 }
 0x3fd   : > { %v5674_v12 = vadd.f32 %v5672_v31, %v5502_v10  ;;  %v5989_v15 = vsel %vm1378_vm14, %v5986_v38, %v5988_v7  ;;  %v992_v43 = vrot.slane %v991_v46, 2  ;;  %v7853_v7 = vld [vmem:[%s9348_s12 + $0x18] sm:$0x3f] }
 0x3fe   : > { %v690_v5 = vrot.slane %v689_v37, 2 }
 0x3ff   : > { %v5821_v26 = vadd.f32 %v5819_v56, %v5674_v12  ;;  %v7854_v12 = vld [vmem:[%s9348_s12 + $0x20] sm:$0x3f]  ;;  %s7104_s12 = sshll.u32 %s7935_s17, 1 }
 0x400   : > { %s6066_s26 = sadd.s32 %s7931_s16, %s7104_s12 }
 0x401   : > { %v5991_v42 = vadd.f32 %v5989_v15, %v5821_v26  ;;  %v993_v26 = vadd.f32 %v992_v43, %v991_v46  ;;  %s7105_s0 = sshll.u32 %s6066_s26, 4 }
 0x402   : > { %s12144_s2 = scalar_lea.hbm %s12390_s3, %s7105_s0 }
 0x403   : > { %v994_v11 = vrot.slane %v993_v26, 1 }
 0x405   : > { %v995_v0 = vadd.f32 %v994_v11, %v993_v26 }
 0x425   : > { %v6006_v52 = vpop.permute.xlu1 %6005  ;;  %v6008_v4 = vpop.permute.xlu0 %6007 }
 0x426   : > { %v6009_v19 = vsel %vm13151_vm15, %v6006_v52, %v6008_v4  ;;  %v691_v52 = vadd.f32 %v690_v5, %v689_v37  ;;  %vm13166_vm15 = vcmask 523264  }
 0x427   : > { %v6011_v28 = vadd.f32 %v6009_v19, %v5991_v42  ;;  %vm13167_vm2 = vmmov %vm13166_vm15 }
 0x428   : > { %v692_v53 = vrot.slane %v691_v52, 1  ;;  %vm13169_vm12 = vmmov %vm13167_vm2 }
 0x429   : > { %6013 = vrot.lane.b32.xlu0 %v6011_v28, %s12685_s24  ;;  %v3139_v35 = vpop.permute.xlu1 %3138  ;;  %s465_s24 = scalar_lea.vmem [#allocation3], %s8100_s13 }
 0x42a   : > { %v3141_v13 = vpop.permute.xlu0 %3140  ;;  %v3144_v16 = vmul.f32 %v7848_v23, %v3139_v35  ;;  %v3145_v48 = vmul.f32 %v7849_v60, %v3139_v35  ;;  %v693_v36 = vadd.f32 %v692_v53, %v691_v52  ;;  %s6070_s19 = sshll.u32 %s465_s24, 4  ;;  %s6071_s19 = int_to_ptr.vmem [resolvable:$true] %s6070_s19 }
 0x42b   : > { %v3146_v41 = vmul.f32 %v11831_v58, %v3141_v13  ;;  %v3147_v34 = vmul.f32 %v7850_v17, %v3141_v13  ;;  %s7855_s14 = scalar_lea.vmem %s6071_s19, 16 }
 0x42c   : > { %v3152_v51 = vrot.slane %v3144_v16, 2  ;;  %v3155_v63 = vrot.slane %v3145_v48, 2  ;;  %v997_v23 = vadd.f32 %v995_v0, %v693_v36  ;;  %p7856_p3 = scmp.ne.s32.totalorder %s6071_s19, %s7855_s14 }
 0x42d   : > { %v3153_v21 = vrot.slane %v3146_v41, 2  ;;  %v3156_v18 = vrot.slane %v3147_v34, 2  ;;  %v4327_v58 = vpop.permute.xlu1 %4326 }
 0x42e   : > { %v4329_v6 = vpop.permute.xlu0 %4328  ;;  %v4332_v44 = vmul.f32 %v7851_v50, %v4327_v58  ;;  %v4333_v31 = vmul.f32 %v7852_v54, %v4327_v58  ;;  %v1383_v48 = vadd.f32 %v1379_v22, %v997_v23  ;;  %p7857_p4 = pnand %p7856_p3, %p8074_p8 }
 0x42f   : > { %v3154_v47 = vsel %vm13156_vm13, %v3152_v51, %v3153_v21  ;;  %v3157_v3 = vsel %vm13157_vm7, %v3155_v63, %v3156_v18  ;;  %v3163_v39 = vsel %vm13159_vm1, %v3153_v21, 0.0  ;;  %v3172_v55 = vsel %vm686_vm4, %v3156_v18, 0.0 }
 0x430   : > { %v3162_v45 = vsel %vm13158_vm0, %v3154_v47, 0.0  ;;  %v3171_v32 = vsel %vm13145_vm6, %v3157_v3, 0.0  ;;  %v4334_v56 = vmul.f32 %v7853_v7, %v4329_v6  ;;  %v4335_v15 = vmul.f32 %v7854_v12, %v4329_v6  ;;  %v13165_v3 = vld [vmem:[#allocation35_spill] sm:$0xff]  ;;  %p7858_p5 = pneg %p7857_p4 }
 0x431   : > { %v3164_v10 = vadd.f32 %v3163_v39, %v3162_v45  ;;  %v3173_v38 = vadd.f32 %v3172_v55, %v3171_v32  ;;  %v4340_v42 = vrot.slane %v4332_v44, 1  ;;  %v4343_v4 = vrot.slane %v4333_v31, 1  ;;  %v2300_v9 = vpop.permute.xlu1 %2299 }
 0x432   : > { %v4341_v27 = vrot.slane %v4334_v56, 1  ;;  %v4344_v61 = vrot.slane %v4335_v15, 1  ;;  %v2948_v41 = vpop.permute.xlu0 %2947  ;;  %v1555_v63 = vadd.f32 %v13041_v29, %v1383_v48  ;;  %v2302_v8 = vadd.f32 %v2300_v9, %v13165_v3 }
 0x433   : > { %v3165_v19 = vrot.slane %v3164_v10, 4  ;;  %v3174_v28 = vrot.slane %v3173_v38, 4  ;;  %vm13170_vm4 = vcmask 916480  }
 0x434   : > { %v4342_v25 = vsel %vm13146_vm3, %v4340_v42, %v4341_v27  ;;  %v4345_v49 = vsel %vm13160_vm11, %v4343_v4, %v4344_v61  ;;  %v4351_v2 = vsel %vm13162_vm8, %v4341_v27, 0.0  ;;  %v4360_v1 = vsel %vm988_vm5, %v4344_v61, 0.0  ;;  %vm13168_vm5 = vmmov %vm13167_vm2 }
 0x435   : > { %v3166_v59 = vadd.f32 %v3165_v19, %v3164_v10  ;;  %v3175_v57 = vadd.f32 %v3174_v28, %v3173_v38  ;;  %v4350_v40 = vsel %vm13161_vm10, %v4342_v25, 0.0  ;;  %v4359_v24 = vsel %vm13163_vm9, %v4345_v49, 0.0  ;;  %v2950_v17 = vpop.permute.xlu1 %2949 }
 0x436   : > { %v4352_v16 = vadd.f32 %v4351_v2, %v4350_v40  ;;  %v4361_v60 = vadd.f32 %v4360_v1, %v4359_v24  ;;  %v2082_v62 = vadd.f32 %v11632_v33, %v1555_v63  ;;  %v3376_v37 = vpop.permute.xlu0 %3375  ;;  %v2951_v45 = vsel %vm13166_vm15, %v2948_v41, %v2950_v17 }
 0x437   : > { %v3167_v35 = vrot.slane %v3166_v59, 2  ;;  %v3176_v13 = vrot.slane %v3175_v57, 2  ;;  %v2954_v5 = vadd.f32 %v2948_v41, %v2302_v8 }
 0x438   : > { %v4353_v20 = vrot.slane %v4352_v16, 4  ;;  %v4362_v51 = vrot.slane %v4361_v60, 4  ;;  %v2303_v39 = vadd.f32 %v2300_v9, %v2082_v62 }
 0x439   : > { %v3168_v34 = vadd.f32 %v3167_v35, %v3166_v59  ;;  %v3177_v30 = vadd.f32 %v3176_v13, %v3175_v57  ;;  %v3378_v58 = vpop.permute.xlu1 %3377 }
 0x43a   : > { %v4354_v46 = vadd.f32 %v4353_v20, %v4352_v16  ;;  %v4363_v47 = vadd.f32 %v4362_v51, %v4361_v60  ;;  %v2955_v50 = vadd.f32 %v2951_v45, %v2303_v39  ;;  %v4138_v54 = vpop.permute.xlu0 %4137  ;;  %v3379_v38 = vsel %vm13167_vm2, %v3376_v37, %v3378_v58 }
 0x43b   : > { %v3169_v21 = vrot.slane %v3168_v34, 1  ;;  %v3178_v18 = vrot.slane %v3177_v30, 1 }
 0x43c   : > { %v4355_v6 = vrot.slane %v4354_v46, 2  ;;  %v4364_v43 = vrot.slane %v4363_v47, 2 }
 0x43d   : > { %v3170_v32 = vadd.f32 %v3169_v21, %v3168_v34  ;;  %v3179_v55 = vadd.f32 %v3178_v18, %v3177_v30  ;;  %v4140_v31 = vpop.permute.xlu1 %4139 }
 0x43e   : > { %v4356_v33 = vadd.f32 %v4355_v6, %v4354_v46  ;;  %v4365_v10 = vadd.f32 %v4364_v43, %v4363_v47  ;;  %v4141_v42 = vsel %vm13168_vm5, %v4138_v54, %v4140_v31 }
 0x43f   : > { %v3180_v29 = vadd.f32 %v3170_v32, %v2954_v5  ;;  %v3181_v44 = vadd.f32 %v3179_v55, %v2955_v50  ;;  %v4562_v15 = vpop.permute.xlu0 %4561 }
 0x440   : > { %v4357_v12 = vrot.slane %v4356_v33, 1  ;;  %v4366_v52 = vrot.slane %v4365_v10, 1 }
 0x441   : > { %v3382_v7 = vadd.f32 %v3376_v37, %v3180_v29  ;;  %v3383_v56 = vadd.f32 %v3379_v38, %v3181_v44 }
 0x442   : > { %v4358_v28 = vadd.f32 %v4357_v12, %v4356_v33  ;;  %v4367_v27 = vadd.f32 %v4366_v52, %v4365_v10 }
 0x443   : > { %v4564_v26 = vpop.permute.xlu1 %4563  ;;  %v4144_v4 = vadd.f32 %v4138_v54, %v3382_v7  ;;  %v4145_v19 = vadd.f32 %v4141_v42, %v3383_v56 }
 0x444   : > { %v5413_v53 = vpop.permute.xlu0 %5412  ;;  %v4565_v57 = vsel %vm13169_vm12, %v4562_v15, %v4564_v26 }
 0x445   : > { %v4368_v61 = vadd.f32 %v4358_v28, %v4144_v4  ;;  %v4369_v11 = vadd.f32 %v4367_v27, %v4145_v19 }
 0x447   : > { %v5583_v59 = vpop.permute.xlu1 %5582  ;;  %v4568_v25 = vadd.f32 %v4562_v15, %v4368_v61  ;;  %v4569_v49 = vadd.f32 %v4565_v57, %v4369_v11 }
 0x448   : > { %v5585_v0 = vpop.permute.xlu0 %5584 }
 0x449   : > { %v5415_v40 = vadd.f32 %v5413_v53, %v4568_v25  ;;  %v5416_v2 = vadd.f32 %v5413_v53, %v4569_v49  ;;  %v5586_v24 = vsel %vm1378_vm14, %v5583_v59, %v5585_v0 }
 0x44b   : > { %v5732_v9 = vpop.permute.xlu1 %5731  ;;  %v5589_v1 = vadd.f32 %v5583_v59, %v5415_v40  ;;  %v5590_v36 = vadd.f32 %v5586_v24, %v5416_v2 }
 0x44c   : > { %v5900_v35 = vpop.permute.xlu0 %5899 }
 0x44d   : > { %v5734_v14 = vadd.f32 %v5732_v9, %v5589_v1  ;;  %v5735_v22 = vadd.f32 %v5732_v9, %v5590_v36 }
 0x44f   : > { %v5902_v13 = vpop.permute.xlu1 %5901  ;;  %v5906_v41 = vadd.f32 %v5900_v35, %v5734_v14 }
 0x450   : > { %v5903_v60 = vsel %vm1378_vm14, %v5900_v35, %v5902_v13 }
 0x451   : > { %v5907_v17 = vadd.f32 %v5903_v60, %v5735_v22 }
 0x46c   : > { %v5995_v23 = vpop.permute.xlu0 %5994 }
 0x46d   : > { %v5997_v16 = vpop.permute.xlu1 %5996 }
 0x46e   : > { %v5998_v48 = vsel %vm13170_vm4, %v5995_v23, %v5997_v16  ;;  %v6002_v30 = vadd.f32 %v5997_v16, %v5907_v17 }
 0x46f   : > { %v6001_v34 = vadd.f32 %v5998_v48, %v5906_v41 }
 0x49b   : > { %v6014_v20 = vpop.permute.xlu0 %6013 }
 0x49c   : > { %v6016_v51 = vadd.f32 %v6014_v20, %v6001_v34  ;;  %v6017_v63 = vadd.f32 %v6014_v20, %v6002_v30 }
 0x49e   : > { %6022 = vrot.lane.b32.xlu0 %v6017_v63, %s7956_s18  ;;  %6020 = vrot.lane.b32.xlu1 %v6016_v51, %s7956_s18  ;;  %s7958_s18 = smov [#allocation3]  }
 0x49f   : > { %s7859_s12 = sshll.u32 %s7958_s18, 4  ;;  %s7860_s12 = int_to_ptr.vmem [resolvable:$false] %s7859_s12 }
 0x4a0   : > { %s7861_s26 = scalar_lea.vmem %s7860_s12, 32  ;;  %p7862_p6 = scmp.lt.s32.totalorder %s6071_s19, %s7860_s12 }
 0x4a1   : > { %p7863_p7 = scmp.lt.s32.totalorder %s7861_s26, %s7855_s14 }
 0x4a3   : > { %p7864_p10 = por %p7863_p7, %p7862_p6 }
 0x4a5   : > { %p7865_p11 = pnand %p7864_p10, %p7858_p5 }
 0x510   : > { %v6023_v21 = vpop.permute.xlu0 %6022  ;;  %v6021_v18 = vpop.permute.xlu1 %6020 }
 0x511   : > { %v6024_v62 = vsel %vm1378_vm14, %v6021_v18, %v6023_v21 }
 0x512   : > { %6026 = vst [vmem:[%s465_s24] sm:$0x1] %v6024_v62 }
 0x513   : > { %7868 = shalt.err (!%p7865_p11)
}
 0x514   : > { %s7869_s0 = scalar_lea.hbm %s12144_s2, 16  ;;  %s7873_s1 = scalar_lea.hbm %s12390_s3, 64 }
 0x515   : > { %p7870_p12 = scmp.ne.s32.totalorder %s12144_s2, %s7869_s0  ;;  %p7874_p1 = scmp.lt.s32.totalorder %s12144_s2, %s12390_s3 }
 0x516   : > { %p7875_p2 = scmp.lt.s32.totalorder %s7873_s1, %s7869_s0 }
 0x517   : > { %p7871_p13 = pnand %p7870_p12, %p8074_p8 }
 0x518   : > { %p7876_p3 = por %p7875_p2, %p7874_p1 }
 0x519   : > { %p7872_p0 = pneg %p7871_p13 }
 0x51b   : > { %p7877_p4 = pnand %p7876_p3, %p7872_p0 }
 0x51d   : > { %7880 = shalt.err (!%p7877_p4)
}
 0x51e   : > { %7544 = dma.vmem_to_hbm [thread:$0]  (%p8074_p8), %s6071_s19, 16, %s12144_s2, %s6028_s15   ;;  %v6111_v46 = vld [vmem:[%s8667_s22] sm:$0xff] (%p8074_p8)  ;;  %v6113_v47 = vld [vmem:[%s8667_s22 + $0x8] sm:$0xff] (%p8074_p8) }
 0x51f   : > { %6076 = sbr.rel (!%p8074_p8) target bundleno = 1316 (0x524), region = 78  ;;  %s7106_s14 = sshll.u32 (%p8074_p8), %s7935_s17, 2 }
 0x520   : > { %s6078_s12 = sadd.s32 (%p8074_p8), %s7931_s16, %s7106_s14 }
 0x521   : > { %s7107_s26 = sshll.u32 (%p8074_p8), %s6078_s12, 3 }
 0x522   : > { %s6080_s24 = scalar_lea.vmem (%p8074_p8), %s12391_s4, %s7107_s26 }
 0x523   : > { %6112 = vst [vmem:[%s6080_s24] sm:$0xff] (%p8074_p8), %v6111_v46  ;;  %6114 = vst [vmem:[%s6080_s24 + $0x10] sm:$0xff] (%p8074_p8), %v6113_v47 }
 0x524 PF: > { %6120 = sbr.rel (!%p8074_p8) target bundleno = 1322 (0x52a), region = 116  ;;  %s7108_s2 = sshll.u32 (%p8074_p8), %s7935_s17, 3  ;;  %v6159_v3 = vld [vmem:[%s8670_s25] sm:$0xff] (%p8074_p8)  ;;  %v6161_v8 = vld [vmem:[%s8670_s25 + $0x8] sm:$0xff] (%p8074_p8)  ;;  %v6163_v37 = vld [vmem:[%s8670_s25 + $0x10] sm:$0xff] (%p8074_p8) }
 0x525   : > { %s6122_s15 = sadd.s32 (%p8074_p8), %s7931_s16, %s7108_s2  ;;  %v6165_v58 = vld [vmem:[%s8670_s25 + $0x18] sm:$0xff] (%p8074_p8) }
 0x526   : > { %s7109_s22 = sshll.u32 (%p8074_p8), %s6122_s15, 3 }
 0x527   : > { %s6124_s11 = scalar_lea.vmem (%p8074_p8), %s12392_s5, %s7109_s22 }
 0x528   : > { %6160 = vst [vmem:[%s6124_s11] sm:$0xff] (%p8074_p8), %v6159_v3  ;;  %6162 = vst [vmem:[%s6124_s11 + $0x10] sm:$0xff] (%p8074_p8), %v6161_v8 }
 0x529   : > { %6164 = vst [vmem:[%s6124_s11 + $0x20] sm:$0xff] %v6163_v37  ;;  %6166 = vst [vmem:[%s6124_s11 + $0x30] sm:$0xff] %v6165_v58 }
 0x52a PF: > { %6172 = sbr.rel (!%p8074_p8) target bundleno = 1332 (0x534), region = 154  ;;  %v6217_v45 = vld [vmem:[%s8710_s30] sm:$0xff] (%p8074_p8)  ;;  %v6219_v39 = vld [vmem:[%s8710_s30 + $0x8] sm:$0xff] (%p8074_p8)  ;;  %v6221_v32 = vld [vmem:[%s8710_s30 + $0x10] sm:$0xff] (%p8074_p8) }
 0x52b   : > { %s7540_s25 = smul.u32 (%p8074_p8), 14, %s7935_s17  ;;  %v6223_v55 = vld [vmem:[%s8710_s30 + $0x18] sm:$0xff] (%p8074_p8)  ;;  %v6225_v6 = vld [vmem:[%s8710_s30 + $0x20] sm:$0xff] (%p8074_p8)  ;;  %v6227_v43 = vld [vmem:[%s8710_s30 + $0x28] sm:$0xff] (%p8074_p8) }
 0x52c   : > { %v6229_v5 = vld [vmem:[%s8710_s30 + $0x30] sm:$0xff] (%p8074_p8) }
 0x52d   : > { %s6174_s18 = sadd.s32 (%p8074_p8), %s7931_s16, %s7540_s25 }
 0x52e   : > { %s7110_s14 = sshll.u32 (%p8074_p8), %s6174_s18, 3 }
 0x52f   : > { %s6176_s0 = scalar_lea.vmem %s12393_s6, %s7110_s14 }
 0x530   : > { %6218 = vst [vmem:[%s6176_s0] sm:$0xff] %v6217_v45  ;;  %6220 = vst [vmem:[%s6176_s0 + $0x10] sm:$0xff] %v6219_v39 }
 0x531   : > { %6222 = vst [vmem:[%s6176_s0 + $0x20] sm:$0xff] %v6221_v32  ;;  %6224 = vst [vmem:[%s6176_s0 + $0x30] sm:$0xff] %v6223_v55 }
 0x532   : > { %6226 = vst [vmem:[%s6176_s0 + $0x40] sm:$0xff] %v6225_v6  ;;  %6228 = vst [vmem:[%s6176_s0 + $0x50] sm:$0xff] %v6227_v43 }
 0x533   : > { %6230 = vst [vmem:[%s6176_s0 + $0x60] sm:$0xff] %v6229_v5 }
 0x534 PF: > { %6236 = sbr.rel (!%p8074_p8) target bundleno = 1344 (0x540), region = 192  ;;  %v6289_v50 = vld [vmem:[%s8759_s23] sm:$0xff] (%p8074_p8)  ;;  %v6291_v29 = vld [vmem:[%s8759_s23 + $0x8] sm:$0xff] (%p8074_p8)  ;;  %v6293_v44 = vld [vmem:[%s8759_s23 + $0x10] sm:$0xff] (%p8074_p8) }
 0x535   : > { %s7541_s30 = smul.u32 (%p8074_p8), 22, %s7935_s17  ;;  %v6295_v54 = vld [vmem:[%s8759_s23 + $0x18] sm:$0xff] (%p8074_p8)  ;;  %v6297_v31 = vld [vmem:[%s8759_s23 + $0x20] sm:$0xff] (%p8074_p8)  ;;  %v6299_v33 = vld [vmem:[%s8759_s23 + $0x28] sm:$0xff] (%p8074_p8) }
 0x536   : > { %v6301_v10 = vld [vmem:[%s8759_s23 + $0x30] sm:$0xff] (%p8074_p8)  ;;  %v6303_v38 = vld [vmem:[%s8759_s23 + $0x38] sm:$0xff] (%p8074_p8)  ;;  %v6305_v7 = vld [vmem:[%s8759_s23 + $0x40] sm:$0xff] (%p8074_p8) }
 0x537   : > { %s6238_s13 = sadd.s32 (%p8074_p8), %s7931_s16, %s7541_s30  ;;  %v6307_v56 = vld [vmem:[%s8759_s23 + $0x48] sm:$0xff] (%p8074_p8)  ;;  %v6309_v12 = vld [vmem:[%s8759_s23 + $0x50] sm:$0xff] (%p8074_p8) }
 0x538   : > { %s7111_s24 = sshll.u32 (%p8074_p8), %s6238_s13, 3 }
 0x539   : > { %s6240_s22 = scalar_lea.vmem %s12394_s7, %s7111_s24 }
 0x53a   : > { %6290 = vst [vmem:[%s6240_s22] sm:$0xff] %v6289_v50  ;;  %6292 = vst [vmem:[%s6240_s22 + $0x10] sm:$0xff] %v6291_v29 }
 0x53b   : > { %6294 = vst [vmem:[%s6240_s22 + $0x20] sm:$0xff] %v6293_v44  ;;  %6296 = vst [vmem:[%s6240_s22 + $0x30] sm:$0xff] %v6295_v54 }
 0x53c   : > { %6298 = vst [vmem:[%s6240_s22 + $0x40] sm:$0xff] %v6297_v31  ;;  %6300 = vst [vmem:[%s6240_s22 + $0x50] sm:$0xff] %v6299_v33 }
 0x53d   : > { %6302 = vst [vmem:[%s6240_s22 + $0x60] sm:$0xff] %v6301_v10  ;;  %6304 = vst [vmem:[%s6240_s22 + $0x70] sm:$0xff] %v6303_v38 }
 0x53e   : > { %6306 = vst [vmem:[%s6240_s22 + $0x80] sm:$0xff] %v6305_v7  ;;  %6308 = vst [vmem:[%s6240_s22 + $0x90] sm:$0xff] %v6307_v56 }
 0x53f   : > { %6310 = vst [vmem:[%s6240_s22 + $0xa0] sm:$0xff] %v6309_v12 }
 0x540 PF: > { %6316 = sbr.rel (!%p8074_p8) target bundleno = 1356 (0x54c), region = 230  ;;  %s7112_s23 = sshll.u32 (%p8074_p8), %s7935_s17, 5  ;;  %v6379_v15 = vld [vmem:[%s8824_s28] sm:$0xff] (%p8074_p8)  ;;  %v6381_v26 = vld [vmem:[%s8824_s28 + $0x8] sm:$0xff] (%p8074_p8)  ;;  %v6383_v52 = vld [vmem:[%s8824_s28 + $0x10] sm:$0xff] (%p8074_p8) }
 0x541   : > { %s6318_s19 = sadd.s32 (%p8074_p8), %s7931_s16, %s7112_s23  ;;  %v6385_v42 = vld [vmem:[%s8824_s28 + $0x18] sm:$0xff] (%p8074_p8)  ;;  %v6387_v4 = vld [vmem:[%s8824_s28 + $0x20] sm:$0xff] (%p8074_p8)  ;;  %v6389_v19 = vld [vmem:[%s8824_s28 + $0x28] sm:$0xff] (%p8074_p8) }
 0x542   : > { %s7113_s1 = sshll.u32 (%p8074_p8), %s6318_s19, 3  ;;  %v6391_v28 = vld [vmem:[%s8824_s28 + $0x30] sm:$0xff] (%p8074_p8)  ;;  %v6393_v27 = vld [vmem:[%s8824_s28 + $0x38] sm:$0xff] (%p8074_p8)  ;;  %v6395_v61 = vld [vmem:[%s8824_s28 + $0x40] sm:$0xff] (%p8074_p8) }
 0x543   : > { %s6320_s18 = scalar_lea.vmem (%p8074_p8), %s12395_s8, %s7113_s1  ;;  %v6397_v11 = vld [vmem:[%s8824_s28 + $0x48] sm:$0xff] (%p8074_p8)  ;;  %v6399_v53 = vld [vmem:[%s8824_s28 + $0x50] sm:$0xff] (%p8074_p8)  ;;  %v6401_v59 = vld [vmem:[%s8824_s28 + $0x58] sm:$0xff] (%p8074_p8) }
 0x544   : > { %6380 = vst [vmem:[%s6320_s18] sm:$0xff] (%p8074_p8), %v6379_v15  ;;  %6382 = vst [vmem:[%s6320_s18 + $0x10] sm:$0xff] (%p8074_p8), %v6381_v26  ;;  %v6403_v57 = vld [vmem:[%s8824_s28 + $0x60] sm:$0xff] (%p8074_p8)  ;;  %v6405_v25 = vld [vmem:[%s8824_s28 + $0x68] sm:$0xff] (%p8074_p8) }
 0x545   : > { %6384 = vst [vmem:[%s6320_s18 + $0x20] sm:$0xff] %v6383_v52  ;;  %6386 = vst [vmem:[%s6320_s18 + $0x30] sm:$0xff] %v6385_v42  ;;  %v6407_v49 = vld [vmem:[%s8824_s28 + $0x70] sm:$0xff]  ;;  %v6409_v0 = vld [vmem:[%s8824_s28 + $0x78] sm:$0xff] }
 0x546   : > { %6388 = vst [vmem:[%s6320_s18 + $0x40] sm:$0xff] %v6387_v4  ;;  %6390 = vst [vmem:[%s6320_s18 + $0x50] sm:$0xff] %v6389_v19 }
 0x547   : > { %6392 = vst [vmem:[%s6320_s18 + $0x60] sm:$0xff] %v6391_v28  ;;  %6394 = vst [vmem:[%s6320_s18 + $0x70] sm:$0xff] %v6393_v27 }
 0x548   : > { %6396 = vst [vmem:[%s6320_s18 + $0x80] sm:$0xff] %v6395_v61  ;;  %6398 = vst [vmem:[%s6320_s18 + $0x90] sm:$0xff] %v6397_v11 }
 0x549   : > { %6400 = vst [vmem:[%s6320_s18 + $0xa0] sm:$0xff] %v6399_v53  ;;  %6402 = vst [vmem:[%s6320_s18 + $0xb0] sm:$0xff] %v6401_v59 }
 0x54a   : > { %6404 = vst [vmem:[%s6320_s18 + $0xc0] sm:$0xff] %v6403_v57  ;;  %6406 = vst [vmem:[%s6320_s18 + $0xd0] sm:$0xff] %v6405_v25 }
 0x54b   : > { %6408 = vst [vmem:[%s6320_s18 + $0xe0] sm:$0xff] %v6407_v49  ;;  %6410 = vst [vmem:[%s6320_s18 + $0xf0] sm:$0xff] %v6409_v0 }
 0x54c PF: > { %6416 = sbr.rel (!%p8074_p8) target bundleno = 1373 (0x55d), region = 268  ;;  %v6491_v9 = vld [vmem:[%s8954_s29] sm:$0xff] (%p8074_p8)  ;;  %v6493_v40 = vld [vmem:[%s8954_s29 + $0x8] sm:$0xff] (%p8074_p8)  ;;  %v6495_v2 = vld [vmem:[%s8954_s29 + $0x10] sm:$0xff] (%p8074_p8) }
 0x54d   : > { %s7542_s28 = smul.u32 (%p8074_p8), 44, %s7935_s17  ;;  %v6497_v24 = vld [vmem:[%s8954_s29 + $0x18] sm:$0xff] (%p8074_p8)  ;;  %v6499_v1 = vld [vmem:[%s8954_s29 + $0x20] sm:$0xff] (%p8074_p8)  ;;  %v6501_v36 = vld [vmem:[%s8954_s29 + $0x28] sm:$0xff] (%p8074_p8) }
 0x54e   : > { %v6503_v35 = vld [vmem:[%s8954_s29 + $0x30] sm:$0xff] (%p8074_p8)  ;;  %v6505_v13 = vld [vmem:[%s8954_s29 + $0x38] sm:$0xff] (%p8074_p8)  ;;  %v6507_v14 = vld [vmem:[%s8954_s29 + $0x40] sm:$0xff] (%p8074_p8) }
 0x54f   : > { %s6418_s14 = sadd.s32 (%p8074_p8), %s7931_s16, %s7542_s28  ;;  %v6509_v22 = vld [vmem:[%s8954_s29 + $0x48] sm:$0xff] (%p8074_p8)  ;;  %v6511_v23 = vld [vmem:[%s8954_s29 + $0x50] sm:$0xff] (%p8074_p8)  ;;  %v6513_v16 = vld [vmem:[%s8954_s29 + $0x58] sm:$0xff] (%p8074_p8) }
 0x550   : > { %s7114_s12 = sshll.u32 (%p8074_p8), %s6418_s14, 3  ;;  %v6515_v60 = vld [vmem:[%s8954_s29 + $0x60] sm:$0xff] (%p8074_p8)  ;;  %v6517_v48 = vld [vmem:[%s8954_s29 + $0x68] sm:$0xff] (%p8074_p8)  ;;  %v6519_v41 = vld [vmem:[%s8954_s29 + $0x70] sm:$0xff] (%p8074_p8) }
 0x551   : > { %s12258_s30 = scalar_lea.vmem %s12396_s9, %s7114_s12  ;;  %v6521_v17 = vld [vmem:[%s8954_s29 + $0x78] sm:$0xff]  ;;  %v6523_v34 = vld [vmem:[%s8954_s29 + $0x80] sm:$0xff]  ;;  %v6525_v30 = vld [vmem:[%s8954_s29 + $0x88] sm:$0xff] }
 0x552   : > { %6492 = vst [vmem:[%s12258_s30] sm:$0xff] %v6491_v9  ;;  %6494 = vst [vmem:[%s12258_s30 + $0x10] sm:$0xff] %v6493_v40  ;;  %v6527_v20 = vld [vmem:[%s8954_s29 + $0x90] sm:$0xff]  ;;  %v6529_v51 = vld [vmem:[%s8954_s29 + $0x98] sm:$0xff] }
 0x553   : > { %6496 = vst [vmem:[%s12258_s30 + $0x20] sm:$0xff] %v6495_v2  ;;  %6498 = vst [vmem:[%s12258_s30 + $0x30] sm:$0xff] %v6497_v24  ;;  %v6531_v63 = vld [vmem:[%s8954_s29 + $0xa0] sm:$0xff]  ;;  %v6533_v21 = vld [vmem:[%s8954_s29 + $0xa8] sm:$0xff] }
 0x554   : > { %6500 = vst [vmem:[%s12258_s30 + $0x40] sm:$0xff] %v6499_v1  ;;  %6502 = vst [vmem:[%s12258_s30 + $0x50] sm:$0xff] %v6501_v36 }
 0x555   : > { %6504 = vst [vmem:[%s12258_s30 + $0x60] sm:$0xff] %v6503_v35  ;;  %6506 = vst [vmem:[%s12258_s30 + $0x70] sm:$0xff] %v6505_v13 }
 0x556   : > { %6508 = vst [vmem:[%s12258_s30 + $0x80] sm:$0xff] %v6507_v14  ;;  %6510 = vst [vmem:[%s12258_s30 + $0x90] sm:$0xff] %v6509_v22 }
 0x557   : > { %6512 = vst [vmem:[%s12258_s30 + $0xa0] sm:$0xff] %v6511_v23  ;;  %6514 = vst [vmem:[%s12258_s30 + $0xb0] sm:$0xff] %v6513_v16 }
 0x558   : > { %6516 = vst [vmem:[%s12258_s30 + $0xc0] sm:$0xff] %v6515_v60  ;;  %6518 = vst [vmem:[%s12258_s30 + $0xd0] sm:$0xff] %v6517_v48 }
 0x559   : > { %6520 = vst [vmem:[%s12258_s30 + $0xe0] sm:$0xff] %v6519_v41  ;;  %6522 = vst [vmem:[%s12258_s30 + $0xf0] sm:$0xff] %v6521_v17 }
 0x55a   : > { %6524 = vst [vmem:[%s12258_s30 + $0x100] sm:$0xff] %v6523_v34  ;;  %6526 = vst [vmem:[%s12258_s30 + $0x110] sm:$0xff] %v6525_v30 }
 0x55b   : > { %6528 = vst [vmem:[%s12258_s30 + $0x120] sm:$0xff] %v6527_v20  ;;  %6530 = vst [vmem:[%s12258_s30 + $0x130] sm:$0xff] %v6529_v51 }
 0x55c   : > { %6532 = vst [vmem:[%s12258_s30 + $0x140] sm:$0xff] %v6531_v63  ;;  %6534 = vst [vmem:[%s12258_s30 + $0x150] sm:$0xff] %v6533_v21 }
 0x55d PF: > { %6540 = sbr.rel (!%p8074_p8) target bundleno = 1394 (0x572), region = 306  ;;  %v6629_v18 = vld [vmem:[%s9176_s21] sm:$0xff] (%p8074_p8)  ;;  %v6631_v62 = vld [vmem:[%s9176_s21 + $0x8] sm:$0xff] (%p8074_p8)  ;;  %v6633_v46 = vld [vmem:[%s9176_s21 + $0x10] sm:$0xff] (%p8074_p8) }
 0x55e   : > { %s7543_s29 = smul.u32 (%p8074_p8), 58, %s7935_s17  ;;  %v6635_v47 = vld [vmem:[%s9176_s21 + $0x18] sm:$0xff] (%p8074_p8)  ;;  %v6637_v3 = vld [vmem:[%s9176_s21 + $0x20] sm:$0xff] (%p8074_p8)  ;;  %v6639_v8 = vld [vmem:[%s9176_s21 + $0x28] sm:$0xff] (%p8074_p8) }
 0x55f   : > { %v6641_v37 = vld [vmem:[%s9176_s21 + $0x30] sm:$0xff] (%p8074_p8)  ;;  %v6643_v58 = vld [vmem:[%s9176_s21 + $0x38] sm:$0xff] (%p8074_p8)  ;;  %v6645_v45 = vld [vmem:[%s9176_s21 + $0x40] sm:$0xff] (%p8074_p8) }
 0x560   : > { %s6542_s27 = sadd.s32 (%p8074_p8), %s7931_s16, %s7543_s29  ;;  %v6647_v39 = vld [vmem:[%s9176_s21 + $0x48] sm:$0xff] (%p8074_p8)  ;;  %v6649_v32 = vld [vmem:[%s9176_s21 + $0x50] sm:$0xff] (%p8074_p8)  ;;  %v6651_v55 = vld [vmem:[%s9176_s21 + $0x58] sm:$0xff] (%p8074_p8) }
 0x561   : > { %s7115_s13 = sshll.u32 (%p8074_p8), %s6542_s27, 3  ;;  %v6653_v6 = vld [vmem:[%s9176_s21 + $0x60] sm:$0xff] (%p8074_p8)  ;;  %v6655_v43 = vld [vmem:[%s9176_s21 + $0x68] sm:$0xff] (%p8074_p8)  ;;  %v6657_v5 = vld [vmem:[%s9176_s21 + $0x70] sm:$0xff] (%p8074_p8) }
 0x562   : > { %s12311_s17 = scalar_lea.vmem %s12397_s10, %s7115_s13  ;;  %v6659_v50 = vld [vmem:[%s9176_s21 + $0x78] sm:$0xff]  ;;  %v6661_v29 = vld [vmem:[%s9176_s21 + $0x80] sm:$0xff]  ;;  %v6663_v44 = vld [vmem:[%s9176_s21 + $0x88] sm:$0xff] }
 0x563   : > { %6630 = vst [vmem:[%s12311_s17] sm:$0xff] %v6629_v18  ;;  %6632 = vst [vmem:[%s12311_s17 + $0x10] sm:$0xff] %v6631_v62  ;;  %v6665_v54 = vld [vmem:[%s9176_s21 + $0x90] sm:$0xff]  ;;  %v6667_v31 = vld [vmem:[%s9176_s21 + $0x98] sm:$0xff] }
 0x564   : > { %6634 = vst [vmem:[%s12311_s17 + $0x20] sm:$0xff] %v6633_v46  ;;  %6636 = vst [vmem:[%s12311_s17 + $0x30] sm:$0xff] %v6635_v47  ;;  %v6669_v33 = vld [vmem:[%s9176_s21 + $0xa0] sm:$0xff]  ;;  %v6671_v10 = vld [vmem:[%s9176_s21 + $0xa8] sm:$0xff] }
 0x565   : > { %6638 = vst [vmem:[%s12311_s17 + $0x40] sm:$0xff] %v6637_v3  ;;  %6640 = vst [vmem:[%s12311_s17 + $0x50] sm:$0xff] %v6639_v8  ;;  %v6673_v38 = vld [vmem:[%s9176_s21 + $0xb0] sm:$0xff]  ;;  %v6675_v7 = vld [vmem:[%s9176_s21 + $0xb8] sm:$0xff] }
 0x566   : > { %6642 = vst [vmem:[%s12311_s17 + $0x60] sm:$0xff] %v6641_v37  ;;  %6644 = vst [vmem:[%s12311_s17 + $0x70] sm:$0xff] %v6643_v58  ;;  %v6677_v56 = vld [vmem:[%s9176_s21 + $0xc0] sm:$0xff]  ;;  %v6679_v12 = vld [vmem:[%s9176_s21 + $0xc8] sm:$0xff] }
 0x567   : > { %6646 = vst [vmem:[%s12311_s17 + $0x80] sm:$0xff] %v6645_v45  ;;  %6648 = vst [vmem:[%s12311_s17 + $0x90] sm:$0xff] %v6647_v39  ;;  %v6681_v15 = vld [vmem:[%s9176_s21 + $0xd0] sm:$0xff]  ;;  %v6683_v26 = vld [vmem:[%s9176_s21 + $0xd8] sm:$0xff] }
 0x568   : > { %6650 = vst [vmem:[%s12311_s17 + $0xa0] sm:$0xff] %v6649_v32  ;;  %6652 = vst [vmem:[%s12311_s17 + $0xb0] sm:$0xff] %v6651_v55  ;;  %v6685_v52 = vld [vmem:[%s9176_s21 + $0xe0] sm:$0xff] }
 0x569   : > { %6654 = vst [vmem:[%s12311_s17 + $0xc0] sm:$0xff] %v6653_v6  ;;  %6656 = vst [vmem:[%s12311_s17 + $0xd0] sm:$0xff] %v6655_v43 }
 0x56a   : > { %6658 = vst [vmem:[%s12311_s17 + $0xe0] sm:$0xff] %v6657_v5  ;;  %6660 = vst [vmem:[%s12311_s17 + $0xf0] sm:$0xff] %v6659_v50 }
 0x56b   : > { %6662 = vst [vmem:[%s12311_s17 + $0x100] sm:$0xff] %v6661_v29  ;;  %6664 = vst [vmem:[%s12311_s17 + $0x110] sm:$0xff] %v6663_v44 }
 0x56c   : > { %6666 = vst [vmem:[%s12311_s17 + $0x120] sm:$0xff] %v6665_v54  ;;  %6668 = vst [vmem:[%s12311_s17 + $0x130] sm:$0xff] %v6667_v31 }
 0x56d   : > { %6670 = vst [vmem:[%s12311_s17 + $0x140] sm:$0xff] %v6669_v33  ;;  %6672 = vst [vmem:[%s12311_s17 + $0x150] sm:$0xff] %v6671_v10 }
 0x56e   : > { %6674 = vst [vmem:[%s12311_s17 + $0x160] sm:$0xff] %v6673_v38  ;;  %6676 = vst [vmem:[%s12311_s17 + $0x170] sm:$0xff] %v6675_v7 }
 0x56f   : > { %6678 = vst [vmem:[%s12311_s17 + $0x180] sm:$0xff] %v6677_v56  ;;  %6680 = vst [vmem:[%s12311_s17 + $0x190] sm:$0xff] %v6679_v12 }
 0x570   : > { %6682 = vst [vmem:[%s12311_s17 + $0x1a0] sm:$0xff] %v6681_v15  ;;  %6684 = vst [vmem:[%s12311_s17 + $0x1b0] sm:$0xff] %v6683_v26 }
 0x571   : > { %6686 = vst [vmem:[%s12311_s17 + $0x1c0] sm:$0xff] %v6685_v52 }
 0x572 PF: > { %s13171_s16 = sld [smem:[#allocation13_spill]]  ;;  %p7550_p8 = scmp.ge.s32.totalorder %s7947_s20, 2 }
 0x574   : > { %p7547_p5 = pnand %p7550_p8, %p8078_p9 }
 0x576   : > { %p7548_p6 = pneg %p7547_p5 }
 0x578   : > { %s6698_s22 = sand.u32 1, %s13171_s16  }
 0x579   : > { %s6699_s23 = scalar_lea.sflag [#allocation4], %s6698_s22 }
 0x57a   : > { %7914 = dma.done.wait (%p7548_p6), %s6699_s23, 16  }
 0x57b   : > { %7916 = vsyncadd (%p7548_p6), %s6699_s23, 4294967280  ;;  %s24_s20 = sadd.s32 1, %s7947_s20   ;;  %s13173_s13 = sld [smem:[#allocation14_spill]] }
 0x57c   : > { %p21_p7 = scmp.ge.s32.totalorder %s24_s20, 6   ;;  %s13174_s14 = sld [smem:[#allocation15_spill]] }
 0x57d   : > { %s13175_s15 = sld [smem:[#allocation21_spill]] }
 0x57e   : > { %s13176_s16 = sld [smem:[#allocation16_spill]]  ;;  %23 = sbr.rel (!%p21_p7) target bundleno = 9 (0x9), region = 463 }
 0x57f   : > { %s13177_s17 = sld [smem:[#allocation17_spill]] }
 0x580   : > { %s13178_s18 = sld [smem:[#allocation18_spill]] }
 0x581   : > { %s13179_s19 = sld [smem:[#allocation19_spill]] }
 0x583   :  { %6752 = vsyncpa [#allocation4], 1 }
 0x584   :  { %6754 = vsyncpa [#allocation4 + $0x1], 1 }

</bundles_post_ra>
